<compile_context>
chip_gen: v5e
topology: v5e:2x2
jax: 0.10.0
libtpu: 0.0.40
codegen_flags: <defaults>
</compile_context>

<pallas_src>
import jax
import jax.numpy as jnp
from jax import lax
from jax.experimental import pallas as pl
from jax.experimental.pallas import tpu as pltpu

L = 1454          # feature dim (self.L)
D = 256           # attention hidden dim (self.D)
K = 1454          # attention output dim (self.K) -- == L, required for A*H pooling
L4 = L // 4       # classifier hidden dim (363)
NUM_CLASSES = 2

LP = 1536         # L / K padded to a multiple of 128 (lane-dense matmuls)
TN_MAX = 512      # instance-tile rows; bf16 H tile = 1.5 MiB -> safe on v7x's 64 MiB VMEM
NEG_BIG = -1e30
VMEM_LIMIT = 48 * 1024 * 1024


def _round_up(x, m):
    return (x + m - 1) // m * m


def _choose_tiling(n):
    """Tile = min(round_up(N, 8), TN_MAX); N padded up to a multiple of the tile."""
    tn = min(_round_up(max(n, 1), 8), TN_MAX)
    n_pad = _round_up(max(n, 1), tn)
    return n_pad, tn


def _make_stats_kernel(n_real, n_pad, tn):
    """Pass 1: online softmax over instances -> running (m, l) and pooled acc."""
    masked = n_pad != n_real

    def kernel(h_ref, w1_ref, b1_ref, w2_ref, b2_ref, m_ref, l_ref, acc_ref):
        n = pl.program_id(1)

        @pl.when(n == 0)
        def _init():
            m_ref[0] = jnp.full((1, LP), NEG_BIG, jnp.float32)
            l_ref[0] = jnp.zeros((1, LP), jnp.float32)
            acc_ref[0] = jnp.zeros((1, LP), jnp.float32)

        h = h_ref[0]                                            # (tn, LP) bf16
        z = jnp.tanh(jnp.dot(h, w1_ref[...],
                             preferred_element_type=jnp.float32) + b1_ref[...])
        s = jnp.dot(z.astype(jnp.bfloat16), w2_ref[...],
                    preferred_element_type=jnp.float32) + b2_ref[...]   # (tn, LP) f32
        if masked:
            # (tn, 1) iota broadcast into the select; only compiled when needed.
            rows = lax.broadcasted_iota(jnp.int32, (tn, 1), 0) + n * tn
            s = jnp.where(rows < n_real, s, NEG_BIG)

        # online softmax over the instance axis (per feature column k)
        m_prev = m_ref[0]
        m_new = jnp.maximum(m_prev, jnp.max(s, axis=0, keepdims=True))   # (1, LP)
        alpha = jnp.exp(m_prev - m_new)
        p = jnp.exp(s - m_new)                                           # (tn, LP)
        l_ref[0] = alpha * l_ref[0] + jnp.sum(p, axis=0, keepdims=True)
        acc_ref[0] = alpha * acc_ref[0] + jnp.sum(p * h.astype(jnp.float32),
                                                  axis=0, keepdims=True)
        m_ref[0] = m_new

    return kernel


def _attn_kernel(h_ref, w1_ref, b1_ref, w2_ref, b2_ref, m_ref, il_ref, a_ref):
    """Pass 2: recompute per-tile scores, write normalized A (no divide, no mask)."""
    h = h_ref[0]                                                # (tn, LP) bf16
    z = jnp.tanh(jnp.dot(h, w1_ref[...],
                         preferred_element_type=jnp.float32) + b1_ref[...])
    s = jnp.dot(z.astype(jnp.bfloat16), w2_ref[...],
                preferred_element_type=jnp.float32) + b2_ref[...]
    a = jnp.exp(s - m_ref[0]) * il_ref[0]                       # (tn, LP) f32
    a_ref[0] = a[:, :K]                                         # drop padded lanes


@jax.jit
def attention_mil_forward(H, params):
    """Returns (Y_prob: (B, 2), A: (B, N, K)) exactly like the PyTorch forward."""
    B, N, Lf = H.shape
    assert Lf == L
    n_pad, tn = _choose_tiling(N)
    nt = n_pad // tn
    f32, bf16 = jnp.float32, jnp.bfloat16

    # Cast to bf16 fused with the (row, lane) pad -> one prep pass over H in HBM.
    Hp = jnp.pad(H.astype(bf16), ((0, 0), (0, n_pad - N), (0, LP - L)))
    w1 = jnp.pad(params["w1"], ((0, LP - L), (0, 0))).astype(bf16)     # (LP, D)
    b1 = params["b1"].astype(f32)                                      # (1, D)
    w2 = jnp.pad(params["w2"], ((0, 0), (0, LP - K))).astype(bf16)     # (D, LP)
    b2 = jnp.pad(params["b2"], ((0, 0), (0, LP - K))).astype(f32)      # (1, LP)

    h_spec = pl.BlockSpec((1, tn, LP), lambda b, n: (b, n, 0))

    def resident(shape):   # weights stay in VMEM across all grid steps
        return pl.BlockSpec(shape, lambda b, n: (0, 0))

    stat_spec = pl.BlockSpec((1, 1, LP), lambda b, n: (b, 0, 0))

    # Pass 1: streaming online-softmax stats + weighted-sum pooling.
    m_stat, l_stat, acc = pl.pallas_call(
        _make_stats_kernel(N, n_pad, tn),
        out_shape=(jax.ShapeDtypeStruct((B, 1, LP), f32),
                   jax.ShapeDtypeStruct((B, 1, LP), f32),
                   jax.ShapeDtypeStruct((B, 1, LP), f32)),
        grid=(B, nt),
        in_specs=[h_spec,
                  resident((LP, D)), resident((1, D)),
                  resident((D, LP)), resident((1, LP))],
        out_specs=(stat_spec, stat_spec, stat_spec),
        compiler_params=pltpu.CompilerParams(
            dimension_semantics=("parallel", "arbitrary"),
            vmem_limit_bytes=VMEM_LIMIT),
    )(Hp, w1, b1, w2, b2)

    # Pooled bag feature M and the tiny classifier head: plain JAX (negligible cost).
    inv_l = 1.0 / l_stat                                      # (B, 1, LP)
    M = (acc * inv_l)[:, 0, :L]                               # (B, L)
    h1 = jax.nn.relu(M @ params["wc1"] + params["bc1"])       # Dropout(0.2) = identity
    logits = h1 @ params["wc2"] + params["bc2"]
    Y_prob = jax.nn.softmax(logits, axis=1)

    # Pass 2: normalized attention map, written directly at its final shape.
    A = pl.pallas_call(
        _attn_kernel,
        out_shape=jax.ShapeDtypeStruct((B, N, K), f32),
        grid=(B, nt),
        in_specs=[h_spec,
                  resident((LP, D)), resident((1, D)),
                  resident((D, LP)), resident((1, LP)),
                  stat_spec, stat_spec],
        out_specs=pl.BlockSpec((1, tn, K), lambda b, n: (b, n, 0)),
        compiler_params=pltpu.CompilerParams(
            dimension_semantics=("parallel", "parallel"),
            vmem_limit_bytes=VMEM_LIMIT),
    )(Hp, w1, b1, w2, b2, m_stat, inv_l)

    return Y_prob, A


def init_params(key):
    """Deterministic PyTorch-style Linear init: U(-1/sqrt(fan_in), 1/sqrt(fan_in)).
    Weights are stored (in_features, out_features), i.e. transposed vs. PyTorch."""
    def linear(k, fan_in, fan_out):
        kw, kb = jax.random.split(k)
        bound = 1.0 / float(fan_in) ** 0.5
        w = jax.random.uniform(kw, (fan_in, fan_out), jnp.float32, -bound, bound)
        b = jax.random.uniform(kb, (1, fan_out), jnp.float32, -bound, bound)
        return w, b

    k1, k2, k3, k4 = jax.random.split(key, 4)
    w1, b1 = linear(k1, L, D)
    w2, b2 = linear(k2, D, K)
    wc1, bc1 = linear(k3, L, L4)
    wc2, bc2 = linear(k4, L4, NUM_CLASSES)
    return dict(w1=w1, b1=b1, w2=w2, b2=b2,
                wc1=wc1, bc1=bc1, wc2=wc2, bc2=bc2)


def reference_forward(H, p):
    """Pure-JAX reference mirroring the PyTorch forward (dropout = identity).
    Attention matmuls use the same bf16-operand / f32-accumulate precision."""
    bf16 = jnp.bfloat16
    z = jnp.tanh(jnp.einsum("bnl,ld->bnd", H.astype(bf16), p["w1"].astype(bf16),
                            preferred_element_type=jnp.float32) + p["b1"])
    a_pre = jnp.einsum("bnd,dk->bnk", z.astype(bf16), p["w2"].astype(bf16),
                       preferred_element_type=jnp.float32) + p["b2"]
    A = jax.nn.softmax(a_pre, axis=1)
    M = jnp.sum(A * H, axis=1)
    h1 = jax.nn.relu(M @ p["wc1"] + p["bc1"])
    logits = h1 @ p["wc2"] + p["bc2"]
    return jax.nn.softmax(logits, axis=1), A


if __name__ == "__main__":
    B, N = 2, 8  # small bag size for the test; L, D, K fixed by the module
    key = jax.random.PRNGKey(0)
    kx, kp = jax.random.split(key)
    H = jax.random.normal(kx, (B, N, L), dtype=jnp.float32)
    params = init_params(kp)

    y_prob, A = attention_mil_forward(H, params)
    jax.block_until_ready((y_prob, A))

    y_ref, a_ref = reference_forward(H, params)
    assert y_prob.shape == (B, NUM_CLASSES) and A.shape == (B, N, K)
    assert jnp.allclose(y_prob, y_ref, atol=1e-3, rtol=1e-3), \
        ("Y_prob mismatch", float(jnp.max(jnp.abs(y_prob - y_ref))))
    assert jnp.allclose(A, a_ref, atol=1e-3, rtol=1e-3), \
        ("A mismatch", float(jnp.max(jnp.abs(A - a_ref))))
    print("KERNEL_OK")
</pallas_src>

<mosaic_0001>
module attributes {stable_mosaic.version = 11 : i64} {
  func.func @kernel(%arg0: i32, %arg1: i32, %arg2: memref<1x8x1536xbf16, #tpu.memory_space<vmem>>, %arg3: memref<1536x256xbf16, #tpu.memory_space<vmem>>, %arg4: memref<1x256xf32, #tpu.memory_space<vmem>>, %arg5: memref<256x1536xbf16, #tpu.memory_space<vmem>>, %arg6: memref<1x1536xf32, #tpu.memory_space<vmem>>, %arg7: memref<1x1x1536xf32, #tpu.memory_space<vmem>>, %arg8: memref<1x1x1536xf32, #tpu.memory_space<vmem>>, %arg9: memref<1x1x1536xf32, #tpu.memory_space<vmem>>) attributes {dimension_semantics = [#tpu.dimension_semantics<parallel>, #tpu.dimension_semantics<arbitrary>], iteration_bounds = array<i64: 2, 1>, scalar_prefetch = 0 : i64, scratch_operands = 0 : i64, tpu.core_type = #tpu.core_type<tc>, window_params = [{transform_indices = @transform_0, window_bounds = array<i64: 1, 8, 1536>}, {pipeline_mode = #tpu.pipeline_mode<synchronous>, transform_indices = @transform_1, window_bounds = array<i64: 1536, 256>}, {pipeline_mode = #tpu.pipeline_mode<synchronous>, transform_indices = @transform_2, window_bounds = array<i64: 1, 256>}, {pipeline_mode = #tpu.pipeline_mode<synchronous>, transform_indices = @transform_3, window_bounds = array<i64: 256, 1536>}, {pipeline_mode = #tpu.pipeline_mode<synchronous>, transform_indices = @transform_4, window_bounds = array<i64: 1, 1536>}, {transform_indices = @transform_5, window_bounds = array<i64: 1, 1, 1536>}, {transform_indices = @transform_6, window_bounds = array<i64: 1, 1, 1536>}, {transform_indices = @transform_7, window_bounds = array<i64: 1, 1, 1536>}]} {
    %c0_i32 = arith.constant 0 : i32
    %0 = arith.cmpi eq, %arg1, %c0_i32 : i32
    %1 = arith.extui %0 : i1 to i32
    %c0_i32_0 = arith.constant 0 : i32
    %2 = arith.cmpi ne, %1, %c0_i32_0 : i32
    scf.if %2 {
      %cst_33 = arith.constant -1.000000e+30 : f32
      %50 = vector.broadcast %cst_33 : f32 to vector<1x1536xf32>
      %c0_34 = arith.constant 0 : index
      %c0_35 = arith.constant 0 : index
      %c0_36 = arith.constant 0 : index
      %51 = vector.load %arg7[%c0_34, %c0_35, %c0_36] : memref<1x1x1536xf32, #tpu.memory_space<vmem>>, vector<1x1x1536xf32>
      %52 = vector.shape_cast %51 : vector<1x1x1536xf32> to vector<1x1536xf32>
      %53 = vector.shape_cast %50 : vector<1x1536xf32> to vector<1x1x1536xf32>
      tpu.vector_store %arg7[%c0_34, %c0_35, %c0_36], %53 {strides = array<i32>} : memref<1x1x1536xf32, #tpu.memory_space<vmem>>, vector<1x1x1536xf32>,
      %cst_37 = arith.constant 0.000000e+00 : f32
      %54 = vector.broadcast %cst_37 : f32 to vector<1x1536xf32>
      %c0_38 = arith.constant 0 : index
      %c0_39 = arith.constant 0 : index
      %c0_40 = arith.constant 0 : index
      %55 = vector.load %arg8[%c0_38, %c0_39, %c0_40] : memref<1x1x1536xf32, #tpu.memory_space<vmem>>, vector<1x1x1536xf32>
      %56 = vector.shape_cast %55 : vector<1x1x1536xf32> to vector<1x1536xf32>
      %57 = vector.shape_cast %54 : vector<1x1536xf32> to vector<1x1x1536xf32>
      tpu.vector_store %arg8[%c0_38, %c0_39, %c0_40], %57 {strides = array<i32>} : memref<1x1x1536xf32, #tpu.memory_space<vmem>>, vector<1x1x1536xf32>,
      %cst_41 = arith.constant 0.000000e+00 : f32
      %58 = vector.broadcast %cst_41 : f32 to vector<1x1536xf32>
      %c0_42 = arith.constant 0 : index
      %c0_43 = arith.constant 0 : index
      %c0_44 = arith.constant 0 : index
      %59 = vector.load %arg9[%c0_42, %c0_43, %c0_44] : memref<1x1x1536xf32, #tpu.memory_space<vmem>>, vector<1x1x1536xf32>
      %60 = vector.shape_cast %59 : vector<1x1x1536xf32> to vector<1x1536xf32>
      %61 = vector.shape_cast %58 : vector<1x1536xf32> to vector<1x1x1536xf32>
      tpu.vector_store %arg9[%c0_42, %c0_43, %c0_44], %61 {strides = array<i32>} : memref<1x1x1536xf32, #tpu.memory_space<vmem>>, vector<1x1x1536xf32>,
    } else {
    }
    %c0 = arith.constant 0 : index
    %c0_1 = arith.constant 0 : index
    %c0_2 = arith.constant 0 : index
    %3 = vector.load %arg2[%c0, %c0_1, %c0_2] : memref<1x8x1536xbf16, #tpu.memory_space<vmem>>, vector<1x8x1536xbf16>
    %4 = vector.shape_cast %3 : vector<1x8x1536xbf16> to vector<8x1536xbf16>
    %c0_3 = arith.constant 0 : index
    %c0_4 = arith.constant 0 : index
    %5 = vector.load %arg3[%c0_3, %c0_4] : memref<1536x256xbf16, #tpu.memory_space<vmem>>, vector<1536x256xbf16>
    %cst = arith.constant dense<0.000000e+00> : vector<8x256xf32>
    %6 = tpu.matmul %4, %5, %cst {dimension_numbers = #tpu.dot_dimension_numbers<[1], [0], [0], [1], [0, 0, 1, 1], [], []>} : vector<8x1536xbf16>, vector<1536x256xbf16>, vector<8x256xf32> -> vector<8x256xf32>
    %c0_5 = arith.constant 0 : index
    %c0_6 = arith.constant 0 : index
    %7 = vector.load %arg4[%c0_5, %c0_6] : memref<1x256xf32, #tpu.memory_space<vmem>>, vector<1x256xf32>
    %8 = vector.broadcast %7 : vector<1x256xf32> to vector<8x256xf32>
    %9 = arith.addf %6, %8 : vector<8x256xf32>
    %10 = math.tanh %9 : vector<8x256xf32>
    %11 = arith.truncf %10 : vector<8x256xf32> to vector<8x256xbf16>
    %c0_7 = arith.constant 0 : index
    %c0_8 = arith.constant 0 : index
    %12 = vector.load %arg5[%c0_7, %c0_8] : memref<256x1536xbf16, #tpu.memory_space<vmem>>, vector<256x1536xbf16>
    %cst_9 = arith.constant dense<0.000000e+00> : vector<8x1536xf32>
    %13 = tpu.matmul %11, %12, %cst_9 {dimension_numbers = #tpu.dot_dimension_numbers<[1], [0], [0], [1], [0, 0, 1, 1], [], []>} : vector<8x256xbf16>, vector<256x1536xbf16>, vector<8x1536xf32> -> vector<8x1536xf32>
    %c0_10 = arith.constant 0 : index
    %c0_11 = arith.constant 0 : index
    %14 = vector.load %arg6[%c0_10, %c0_11] : memref<1x1536xf32, #tpu.memory_space<vmem>>, vector<1x1536xf32>
    %15 = vector.broadcast %14 : vector<1x1536xf32> to vector<8x1536xf32>
    %16 = arith.addf %13, %15 : vector<8x1536xf32>
    %c0_12 = arith.constant 0 : index
    %c0_13 = arith.constant 0 : index
    %c0_14 = arith.constant 0 : index
    %17 = vector.load %arg7[%c0_12, %c0_13, %c0_14] : memref<1x1x1536xf32, #tpu.memory_space<vmem>>, vector<1x1x1536xf32>
    %18 = vector.shape_cast %17 : vector<1x1x1536xf32> to vector<1x1536xf32>
    %cst_15 = arith.constant dense<0xFF800000> : vector<1536xf32>
    %19 = vector.multi_reduction <maximumf>, %16, %cst_15 [0] : vector<8x1536xf32> to vector<1536xf32>
    %20 = vector.shape_cast %19 : vector<1536xf32> to vector<1x1536xf32>
    %21 = arith.maximumf %18, %20 : vector<1x1536xf32>
    %22 = arith.subf %18, %21 : vector<1x1536xf32>
    %23 = math.exp %22 : vector<1x1536xf32>
    %24 = vector.broadcast %21 : vector<1x1536xf32> to vector<8x1536xf32>
    %25 = arith.subf %16, %24 : vector<8x1536xf32>
    %26 = math.exp %25 : vector<8x1536xf32>
    %c0_16 = arith.constant 0 : index
    %c0_17 = arith.constant 0 : index
    %c0_18 = arith.constant 0 : index
    %27 = vector.load %arg8[%c0_16, %c0_17, %c0_18] : memref<1x1x1536xf32, #tpu.memory_space<vmem>>, vector<1x1x1536xf32>
    %28 = vector.shape_cast %27 : vector<1x1x1536xf32> to vector<1x1536xf32>
    %29 = arith.mulf %23, %28 : vector<1x1536xf32>
    %cst_19 = arith.constant dense<0.000000e+00> : vector<1536xf32>
    %30 = vector.multi_reduction <add>, %26, %cst_19 [0] : vector<8x1536xf32> to vector<1536xf32>
    %31 = vector.shape_cast %30 : vector<1536xf32> to vector<1x1536xf32>
    %32 = arith.addf %29, %31 : vector<1x1536xf32>
    %c0_20 = arith.constant 0 : index
    %c0_21 = arith.constant 0 : index
    %c0_22 = arith.constant 0 : index
    %33 = vector.load %arg8[%c0_20, %c0_21, %c0_22] : memref<1x1x1536xf32, #tpu.memory_space<vmem>>, vector<1x1x1536xf32>
    %34 = vector.shape_cast %33 : vector<1x1x1536xf32> to vector<1x1536xf32>
    %35 = vector.shape_cast %32 : vector<1x1536xf32> to vector<1x1x1536xf32>
    tpu.vector_store %arg8[%c0_20, %c0_21, %c0_22], %35 {strides = array<i32>} : memref<1x1x1536xf32, #tpu.memory_space<vmem>>, vector<1x1x1536xf32>,
    %c0_23 = arith.constant 0 : index
    %c0_24 = arith.constant 0 : index
    %c0_25 = arith.constant 0 : index
    %36 = vector.load %arg9[%c0_23, %c0_24, %c0_25] : memref<1x1x1536xf32, #tpu.memory_space<vmem>>, vector<1x1x1536xf32>
    %37 = vector.shape_cast %36 : vector<1x1x1536xf32> to vector<1x1536xf32>
    %38 = arith.mulf %23, %37 : vector<1x1536xf32>
    %39 = arith.extf %4 : vector<8x1536xbf16> to vector<8x1536xf32>
    %40 = arith.mulf %26, %39 : vector<8x1536xf32>
    %cst_26 = arith.constant dense<0.000000e+00> : vector<1536xf32>
    %41 = vector.multi_reduction <add>, %40, %cst_26 [0] : vector<8x1536xf32> to vector<1536xf32>
    %42 = vector.shape_cast %41 : vector<1536xf32> to vector<1x1536xf32>
    %43 = arith.addf %38, %42 : vector<1x1536xf32>
    %c0_27 = arith.constant 0 : index
    %c0_28 = arith.constant 0 : index
    %c0_29 = arith.constant 0 : index
    %44 = vector.load %arg9[%c0_27, %c0_28, %c0_29] : memref<1x1x1536xf32, #tpu.memory_space<vmem>>, vector<1x1x1536xf32>
    %45 = vector.shape_cast %44 : vector<1x1x1536xf32> to vector<1x1536xf32>
    %46 = vector.shape_cast %43 : vector<1x1536xf32> to vector<1x1x1536xf32>
    tpu.vector_store %arg9[%c0_27, %c0_28, %c0_29], %46 {strides = array<i32>} : memref<1x1x1536xf32, #tpu.memory_space<vmem>>, vector<1x1x1536xf32>,
    %c0_30 = arith.constant 0 : index
    %c0_31 = arith.constant 0 : index
    %c0_32 = arith.constant 0 : index
    %47 = vector.load %arg7[%c0_30, %c0_31, %c0_32] : memref<1x1x1536xf32, #tpu.memory_space<vmem>>, vector<1x1x1536xf32>
    %48 = vector.shape_cast %47 : vector<1x1x1536xf32> to vector<1x1536xf32>
    %49 = vector.shape_cast %21 : vector<1x1536xf32> to vector<1x1x1536xf32>
    tpu.vector_store %arg7[%c0_30, %c0_31, %c0_32], %49 {strides = array<i32>} : memref<1x1x1536xf32, #tpu.memory_space<vmem>>, vector<1x1x1536xf32>,
    return
  }
  func.func @transform_0(%arg0: i32, %arg1: i32) -> (i32, i32, i32) {
    %c0_i32 = arith.constant 0 : i32
    %c0_i32_0 = arith.constant 0 : i32
    return %arg0, %arg1, %c0_i32 : i32, i32, i32
  }
  func.func @transform_1(%arg0: i32, %arg1: i32) -> (i32, i32) {
    %c0_i32 = arith.constant 0 : i32
    %c0_i32_0 = arith.constant 0 : i32
    %c0_i32_1 = arith.constant 0 : i32
    return %c0_i32, %c0_i32_0 : i32, i32
  }
  func.func @transform_2(%arg0: i32, %arg1: i32) -> (i32, i32) {
    %c0_i32 = arith.constant 0 : i32
    %c0_i32_0 = arith.constant 0 : i32
    %c0_i32_1 = arith.constant 0 : i32
    return %c0_i32, %c0_i32_0 : i32, i32
  }
  func.func @transform_3(%arg0: i32, %arg1: i32) -> (i32, i32) {
    %c0_i32 = arith.constant 0 : i32
    %c0_i32_0 = arith.constant 0 : i32
    %c0_i32_1 = arith.constant 0 : i32
    return %c0_i32, %c0_i32_0 : i32, i32
  }
  func.func @transform_4(%arg0: i32, %arg1: i32) -> (i32, i32) {
    %c0_i32 = arith.constant 0 : i32
    %c0_i32_0 = arith.constant 0 : i32
    %c0_i32_1 = arith.constant 0 : i32
    return %c0_i32, %c0_i32_0 : i32, i32
  }
  func.func @transform_5(%arg0: i32, %arg1: i32) -> (i32, i32, i32) {
    %c0_i32 = arith.constant 0 : i32
    %c0_i32_0 = arith.constant 0 : i32
    %c0_i32_1 = arith.constant 0 : i32
    return %arg0, %c0_i32, %c0_i32_0 : i32, i32, i32
  }
  func.func @transform_6(%arg0: i32, %arg1: i32) -> (i32, i32, i32) {
    %c0_i32 = arith.constant 0 : i32
    %c0_i32_0 = arith.constant 0 : i32
    %c0_i32_1 = arith.constant 0 : i32
    return %arg0, %c0_i32, %c0_i32_0 : i32, i32, i32
  }
  func.func @transform_7(%arg0: i32, %arg1: i32) -> (i32, i32, i32) {
    %c0_i32 = arith.constant 0 : i32
    %c0_i32_0 = arith.constant 0 : i32
    %c0_i32_1 = arith.constant 0 : i32
    return %arg0, %c0_i32, %c0_i32_0 : i32, i32, i32
  }
}

module attributes {stable_mosaic.version = 11 : i64} {
  func.func @_attn_kernel(%arg0: i32, %arg1: i32, %arg2: memref<1x8x1536xbf16, #tpu.memory_space<vmem>>, %arg3: memref<1536x256xbf16, #tpu.memory_space<vmem>>, %arg4: memref<1x256xf32, #tpu.memory_space<vmem>>, %arg5: memref<256x1536xbf16, #tpu.memory_space<vmem>>, %arg6: memref<1x1536xf32, #tpu.memory_space<vmem>>, %arg7: memref<1x1x1536xf32, #tpu.memory_space<vmem>>, %arg8: memref<1x1x1536xf32, #tpu.memory_space<vmem>>, %arg9: memref<1x8x1454xf32, #tpu.memory_space<vmem>>) attributes {dimension_semantics = [#tpu.dimension_semantics<parallel>, #tpu.dimension_semantics<parallel>], iteration_bounds = array<i64: 2, 1>, scalar_prefetch = 0 : i64, scratch_operands = 0 : i64, tpu.core_type = #tpu.core_type<tc>, window_params = [{transform_indices = @transform_0, window_bounds = array<i64: 1, 8, 1536>}, {pipeline_mode = #tpu.pipeline_mode<synchronous>, transform_indices = @transform_1, window_bounds = array<i64: 1536, 256>}, {pipeline_mode = #tpu.pipeline_mode<synchronous>, transform_indices = @transform_2, window_bounds = array<i64: 1, 256>}, {pipeline_mode = #tpu.pipeline_mode<synchronous>, transform_indices = @transform_3, window_bounds = array<i64: 256, 1536>}, {pipeline_mode = #tpu.pipeline_mode<synchronous>, transform_indices = @transform_4, window_bounds = array<i64: 1, 1536>}, {transform_indices = @transform_5, window_bounds = array<i64: 1, 1, 1536>}, {transform_indices = @transform_6, window_bounds = array<i64: 1, 1, 1536>}, {transform_indices = @transform_7, window_bounds = array<i64: 1, 8, 1454>}]} {
    %c0 = arith.constant 0 : index
    %c0_0 = arith.constant 0 : index
    %c0_1 = arith.constant 0 : index
    %0 = vector.load %arg2[%c0, %c0_0, %c0_1] : memref<1x8x1536xbf16, #tpu.memory_space<vmem>>, vector<1x8x1536xbf16>
    %1 = vector.shape_cast %0 : vector<1x8x1536xbf16> to vector<8x1536xbf16>
    %c0_2 = arith.constant 0 : index
    %c0_3 = arith.constant 0 : index
    %2 = vector.load %arg3[%c0_2, %c0_3] : memref<1536x256xbf16, #tpu.memory_space<vmem>>, vector<1536x256xbf16>
    %cst = arith.constant dense<0.000000e+00> : vector<8x256xf32>
    %3 = tpu.matmul %1, %2, %cst {dimension_numbers = #tpu.dot_dimension_numbers<[1], [0], [0], [1], [0, 0, 1, 1], [], []>} : vector<8x1536xbf16>, vector<1536x256xbf16>, vector<8x256xf32> -> vector<8x256xf32>
    %c0_4 = arith.constant 0 : index
    %c0_5 = arith.constant 0 : index
    %4 = vector.load %arg4[%c0_4, %c0_5] : memref<1x256xf32, #tpu.memory_space<vmem>>, vector<1x256xf32>
    %5 = vector.broadcast %4 : vector<1x256xf32> to vector<8x256xf32>
    %6 = arith.addf %3, %5 : vector<8x256xf32>
    %7 = math.tanh %6 : vector<8x256xf32>
    %8 = arith.truncf %7 : vector<8x256xf32> to vector<8x256xbf16>
    %c0_6 = arith.constant 0 : index
    %c0_7 = arith.constant 0 : index
    %9 = vector.load %arg5[%c0_6, %c0_7] : memref<256x1536xbf16, #tpu.memory_space<vmem>>, vector<256x1536xbf16>
    %cst_8 = arith.constant dense<0.000000e+00> : vector<8x1536xf32>
    %10 = tpu.matmul %8, %9, %cst_8 {dimension_numbers = #tpu.dot_dimension_numbers<[1], [0], [0], [1], [0, 0, 1, 1], [], []>} : vector<8x256xbf16>, vector<256x1536xbf16>, vector<8x1536xf32> -> vector<8x1536xf32>
    %c0_9 = arith.constant 0 : index
    %c0_10 = arith.constant 0 : index
    %11 = vector.load %arg6[%c0_9, %c0_10] : memref<1x1536xf32, #tpu.memory_space<vmem>>, vector<1x1536xf32>
    %12 = vector.broadcast %11 : vector<1x1536xf32> to vector<8x1536xf32>
    %13 = arith.addf %10, %12 : vector<8x1536xf32>
    %c0_11 = arith.constant 0 : index
    %c0_12 = arith.constant 0 : index
    %c0_13 = arith.constant 0 : index
    %14 = vector.load %arg7[%c0_11, %c0_12, %c0_13] : memref<1x1x1536xf32, #tpu.memory_space<vmem>>, vector<1x1x1536xf32>
    %15 = vector.shape_cast %14 : vector<1x1x1536xf32> to vector<1x1536xf32>
    %16 = vector.broadcast %15 : vector<1x1536xf32> to vector<8x1536xf32>
    %17 = arith.subf %13, %16 : vector<8x1536xf32>
    %18 = math.exp %17 : vector<8x1536xf32>
    %c0_14 = arith.constant 0 : index
    %c0_15 = arith.constant 0 : index
    %c0_16 = arith.constant 0 : index
    %19 = vector.load %arg8[%c0_14, %c0_15, %c0_16] : memref<1x1x1536xf32, #tpu.memory_space<vmem>>, vector<1x1x1536xf32>
    %20 = vector.shape_cast %19 : vector<1x1x1536xf32> to vector<1x1536xf32>
    %21 = vector.broadcast %20 : vector<1x1536xf32> to vector<8x1536xf32>
    %22 = arith.mulf %18, %21 : vector<8x1536xf32>
    %23 = vector.extract_strided_slice %22 {offsets = [0, 0], sizes = [8, 1454], strides = [1, 1]} : vector<8x1536xf32> to vector<8x1454xf32>
    %c0_17 = arith.constant 0 : index
    %c0_18 = arith.constant 0 : index
    %c0_19 = arith.constant 0 : index
    %24 = vector.load %arg9[%c0_17, %c0_18, %c0_19] : memref<1x8x1454xf32, #tpu.memory_space<vmem>>, vector<1x8x1454xf32>
    %25 = vector.shape_cast %24 : vector<1x8x1454xf32> to vector<8x1454xf32>
    %26 = vector.shape_cast %23 : vector<8x1454xf32> to vector<1x8x1454xf32>
    tpu.vector_store %arg9[%c0_17, %c0_18, %c0_19], %26 {strides = array<i32>} : memref<1x8x1454xf32, #tpu.memory_space<vmem>>, vector<1x8x1454xf32>,
    return
  }
  func.func @transform_0(%arg0: i32, %arg1: i32) -> (i32, i32, i32) {
    %c0_i32 = arith.constant 0 : i32
    %c0_i32_0 = arith.constant 0 : i32
    return %arg0, %arg1, %c0_i32 : i32, i32, i32
  }
  func.func @transform_1(%arg0: i32, %arg1: i32) -> (i32, i32) {
    %c0_i32 = arith.constant 0 : i32
    %c0_i32_0 = arith.constant 0 : i32
    %c0_i32_1 = arith.constant 0 : i32
    return %c0_i32, %c0_i32_0 : i32, i32
  }
  func.func @transform_2(%arg0: i32, %arg1: i32) -> (i32, i32) {
    %c0_i32 = arith.constant 0 : i32
    %c0_i32_0 = arith.constant 0 : i32
    %c0_i32_1 = arith.constant 0 : i32
    return %c0_i32, %c0_i32_0 : i32, i32
  }
  func.func @transform_3(%arg0: i32, %arg1: i32) -> (i32, i32) {
    %c0_i32 = arith.constant 0 : i32
    %c0_i32_0 = arith.constant 0 : i32
    %c0_i32_1 = arith.constant 0 : i32
    return %c0_i32, %c0_i32_0 : i32, i32
  }
  func.func @transform_4(%arg0: i32, %arg1: i32) -> (i32, i32) {
    %c0_i32 = arith.constant 0 : i32
    %c0_i32_0 = arith.constant 0 : i32
    %c0_i32_1 = arith.constant 0 : i32
    return %c0_i32, %c0_i32_0 : i32, i32
  }
  func.func @transform_5(%arg0: i32, %arg1: i32) -> (i32, i32, i32) {
    %c0_i32 = arith.constant 0 : i32
    %c0_i32_0 = arith.constant 0 : i32
    %c0_i32_1 = arith.constant 0 : i32
    return %arg0, %c0_i32, %c0_i32_0 : i32, i32, i32
  }
  func.func @transform_6(%arg0: i32, %arg1: i32) -> (i32, i32, i32) {
    %c0_i32 = arith.constant 0 : i32
    %c0_i32_0 = arith.constant 0 : i32
    %c0_i32_1 = arith.constant 0 : i32
    return %arg0, %c0_i32, %c0_i32_0 : i32, i32, i32
  }
  func.func @transform_7(%arg0: i32, %arg1: i32) -> (i32, i32, i32) {
    %c0_i32 = arith.constant 0 : i32
    %c0_i32_0 = arith.constant 0 : i32
    return %arg0, %arg1, %c0_i32 : i32, i32, i32
  }
}

</mosaic_0001>

<bundles_post_ra>
// kernel: attention_mil_forward.2
= control target key start
LH: loop header
LB: loop body
LE: loop exit
PB: predicated region body
PF: predicated region fallthrough
CT: control target
= control target key end

     0   :  { %s5987_s24 = smov 0   ;;  %s5989_s25 = smov 0   ;;  %s8682_s0 = inlined_call_operand.vmem [shape: bf16[2,8,1536], index: 0, kind: input, shape index: {}]   ;;  %s8683_s1 = inlined_call_operand.vmem [shape: bf16[1536,256], index: 1, kind: input, shape index: {}]   ;;  %s8684_s2 = inlined_call_operand.vmem [shape: f32[1,256], index: 2, kind: input, shape index: {}]   ;;  %s8685_s3 = inlined_call_operand.vmem [shape: bf16[256,1536], index: 3, kind: input, shape index: {}]   ;;  %s8686_s4 = inlined_call_operand.vmem [shape: f32[1,1536], index: 4, kind: input, shape index: {}]   ;;  %s8687_s5 = inlined_call_operand.vmem [shape: f32[2,1,1536], index: 5, kind: output, shape index: {0}]   ;;  %s8688_s6 = inlined_call_operand.vmem [shape: f32[2,1,1536], index: 6, kind: output, shape index: {1}]   ;;  %s8689_s7 = inlined_call_operand.vmem [shape: f32[2,1,1536], index: 7, kind: output, shape index: {2}]  }
   0x1   :  { %s5991_s26 = smov 0  }
   0x2 LB: > { %s30_s27 = sadd.s32 1, %s5939_s25  ;;  %p3931_p0 = scmp.ge.s32.totalorder %s5943_s26, 1  ;;  %s5943_s26 = sphi %s5991_s26, %s18_s26   ;;  %s5939_s25 = sphi %s5989_s25, %s8693_s25   ;;  %s5935_s24 = sphi %s5987_s24, %s8692_s24  }
   0x3   : > { %p32_p1 = scmp.ge.s32.totalorder %s30_s27, 2  ;;  %p260_p2 = scmp.lt.s32.totalorder %s5943_s26, 3 }
   0x5   : > { %s8695_s27 = smov (%p32_p1, %s30_s27), 0  ;;  %p261_p3 = pnand %p3931_p0, %p260_p2 }
   0x6   : > { %p303_p4 = scmp.lt.s32.totalorder (!%p261_p3), %s5935_s24, 1 }
   0x7   : > { %264 = sbr.rel (%p261_p3) target bundleno = 676 (0x2a4), region = 40 }
   0xc   : > { %v3991_v0 = vld [vmem:[%s8683_s1 + $0x70] sm:$0xf]  ;;  %v5486_v1 = vld [vmem:[%s8683_s1 + $0x74] sm:$0xf0]  ;;  %v3983_v11 = vld [vmem:[%s8683_s1 + $0x60] sm:$0xf] }
   0xd   : > { %v4055_v2 = vld [vmem:[%s8683_s1 + $0xf0] sm:$0xf]  ;;  %v3992_v3 = vor.u32 %v5486_v1, %v3991_v0  ;;  %v5502_v4 = vld [vmem:[%s8683_s1 + $0xf4] sm:$0xf0]  ;;  %v5484_v13 = vld [vmem:[%s8683_s1 + $0x64] sm:$0xf0] }
   0xe   : > { %v4119_v5 = vld [vmem:[%s8683_s1 + $0x170] sm:$0xf]  ;;  %v5518_v6 = vld [vmem:[%s8683_s1 + $0x174] sm:$0xf0]  ;;  %v4056_v7 = vor.u32 %v5502_v4, %v4055_v2  ;;  %v4047_v14 = vld [vmem:[%s8683_s1 + $0xe0] sm:$0xf]  ;;  %v3984_v16 = vor.u32 %v5484_v13, %v3983_v11 }
   0xf   : > { %v4120_v8 = vor.u32 %v5518_v6, %v4119_v5  ;;  %v4183_v9 = vld [vmem:[%s8683_s1 + $0x1f0] sm:$0xf]  ;;  %v5534_v10 = vld [vmem:[%s8683_s1 + $0x1f4] sm:$0xf0]  ;;  %1544 = vmatpush.bf16.msra.mxu0 %v3992_v3  ;;  %v5500_v15 = vld [vmem:[%s8683_s1 + $0xe4] sm:$0xf0] }
  0x10   : > { %v4184_v12 = vor.u32 %v5534_v10, %v4183_v9  ;;  %1557 = vmatpush.bf16.msra.mxu1 %v4056_v7  ;;  %v4048_v17 = vor.u32 %v5500_v15, %v4047_v14  ;;  %v4111_v18 = vld [vmem:[%s8683_s1 + $0x160] sm:$0xf]  ;;  %v5516_v19 = vld [vmem:[%s8683_s1 + $0x164] sm:$0xf0]  ;;  %v3975_v23 = vld [vmem:[%s8683_s1 + $0x50] sm:$0xf] }
  0x11   : > { %1570 = vmatpush.bf16.msra.mxu2 %v4120_v8  ;;  %v4175_v20 = vld [vmem:[%s8683_s1 + $0x1e0] sm:$0xf]  ;;  %v4112_v21 = vor.u32 %v5516_v19, %v4111_v18  ;;  %v5532_v22 = vld [vmem:[%s8683_s1 + $0x1e4] sm:$0xf0]  ;;  %v5482_v24 = vld [vmem:[%s8683_s1 + $0x54] sm:$0xf0] }
  0x12   : > { %1583 = vmatpush.bf16.msra.mxu3 %v4184_v12  ;;  %v4176_v25 = vor.u32 %v5532_v22, %v4175_v20  ;;  %v4039_v26 = vld [vmem:[%s8683_s1 + $0xd0] sm:$0xf]  ;;  %v5498_v27 = vld [vmem:[%s8683_s1 + $0xd4] sm:$0xf0]  ;;  %v3976_v29 = vor.u32 %v5482_v24, %v3975_v23  ;;  %v3967_v35 = vld [vmem:[%s8683_s1 + $0x40] sm:$0xf] }
  0x13   : > { %v4103_v28 = vld [vmem:[%s8683_s1 + $0x150] sm:$0xf]  ;;  %1545 = vmatpush.bf16.msra.mxu0 %v3984_v16  ;;  %v5514_v30 = vld [vmem:[%s8683_s1 + $0x154] sm:$0xf0]  ;;  %v4040_v33 = vor.u32 %v5498_v27, %v4039_v26  ;;  %v5480_v36 = vld [vmem:[%s8683_s1 + $0x44] sm:$0xf0] }
  0x14   : > { %v4167_v31 = vld [vmem:[%s8683_s1 + $0x1d0] sm:$0xf]  ;;  %v5530_v32 = vld [vmem:[%s8683_s1 + $0x1d4] sm:$0xf0]  ;;  %1558 = vmatpush.bf16.msra.mxu1 %v4048_v17  ;;  %v4104_v34 = vor.u32 %v5514_v30, %v4103_v28  ;;  %v4031_v37 = vld [vmem:[%s8683_s1 + $0xc0] sm:$0xf]  ;;  %v3968_v44 = vor.u32 %v5480_v36, %v3967_v35 }
  0x15   : > { %1571 = vmatpush.bf16.msra.mxu2 %v4112_v21  ;;  %v4168_v38 = vor.u32 %v5530_v32, %v4167_v31  ;;  %v5496_v39 = vld [vmem:[%s8683_s1 + $0xc4] sm:$0xf0]  ;;  %v4095_v40 = vld [vmem:[%s8683_s1 + $0x140] sm:$0xf]  ;;  %v3959_v47 = vld [vmem:[%s8683_s1 + $0x30] sm:$0xf] }
  0x16   : > { %1584 = vmatpush.bf16.msra.mxu3 %v4176_v25  ;;  %v5512_v41 = vld [vmem:[%s8683_s1 + $0x144] sm:$0xf0]  ;;  %v4159_v42 = vld [vmem:[%s8683_s1 + $0x1c0] sm:$0xf]  ;;  %v4032_v45 = vor.u32 %v5496_v39, %v4031_v37  ;;  %v5478_v48 = vld [vmem:[%s8683_s1 + $0x34] sm:$0xf0] }
  0x17   : > { %v5528_v43 = vld [vmem:[%s8683_s1 + $0x1c4] sm:$0xf0]  ;;  %1546 = vmatpush.bf16.msra.mxu0 %v3976_v29  ;;  %v4096_v46 = vor.u32 %v5512_v41, %v4095_v40  ;;  %v4023_v49 = vld [vmem:[%s8683_s1 + $0xb0] sm:$0xf]  ;;  %v5494_v51 = vld [vmem:[%s8683_s1 + $0xb4] sm:$0xf0]  ;;  %v3960_v56 = vor.u32 %v5478_v48, %v3959_v47 }
  0x18   : > { %1559 = vmatpush.bf16.msra.mxu1 %v4040_v33  ;;  %v4160_v50 = vor.u32 %v5528_v43, %v4159_v42  ;;  %v4087_v52 = vld [vmem:[%s8683_s1 + $0x130] sm:$0xf]  ;;  %v5510_v53 = vld [vmem:[%s8683_s1 + $0x134] sm:$0xf0]  ;;  %v4024_v57 = vor.u32 %v5494_v51, %v4023_v49  ;;  %v3951_v59 = vld [vmem:[%s8683_s1 + $0x20] sm:$0xf] }
  0x19   : > { %1572 = vmatpush.bf16.msra.mxu2 %v4104_v34  ;;  %v4151_v54 = vld [vmem:[%s8683_s1 + $0x1b0] sm:$0xf]  ;;  %v5526_v55 = vld [vmem:[%s8683_s1 + $0x1b4] sm:$0xf0]  ;;  %v4088_v58 = vor.u32 %v5510_v53, %v4087_v52  ;;  %v5476_v60 = vld [vmem:[%s8683_s1 + $0x24] sm:$0xf0] }
  0x1a   : > { %1585 = vmatpush.bf16.msra.mxu3 %v4168_v38  ;;  %v4015_v61 = vld [vmem:[%s8683_s1 + $0xa0] sm:$0xf]  ;;  %v4152_v62 = vor.u32 %v5526_v55, %v4151_v54  ;;  %v5492_v63 = vld [vmem:[%s8683_s1 + $0xa4] sm:$0xf0]  ;;  %v3952_v4 = vor.u32 %v5476_v60, %v3951_v59  ;;  %v3943_v7 = vld [vmem:[%s8683_s1 + $0x10] sm:$0xf] }
  0x1b   : > { %1547 = vmatpush.bf16.msra.mxu0 %v3968_v44  ;;  %v4079_v0 = vld [vmem:[%s8683_s1 + $0x120] sm:$0xf]  ;;  %v5508_v1 = vld [vmem:[%s8683_s1 + $0x124] sm:$0xf0]  ;;  %v4016_v5 = vor.u32 %v5492_v63, %v4015_v61  ;;  %v5474_v8 = vld [vmem:[%s8683_s1 + $0x14] sm:$0xf0] }
  0x1c   : > { %1560 = vmatpush.bf16.msra.mxu1 %v4032_v45  ;;  %v4143_v2 = vld [vmem:[%s8683_s1 + $0x1a0] sm:$0xf]  ;;  %v5524_v3 = vld [vmem:[%s8683_s1 + $0x1a4] sm:$0xf0]  ;;  %v4080_v6 = vor.u32 %v5508_v1, %v4079_v0  ;;  %v4007_v9 = vld [vmem:[%s8683_s1 + $0x90] sm:$0xf]  ;;  %v3944_v16 = vor.u32 %v5474_v8, %v3943_v7 }
  0x1d   : > { %1573 = vmatpush.bf16.msra.mxu2 %v4096_v46  ;;  %v4144_v10 = vor.u32 %v5524_v3, %v4143_v2  ;;  %v5490_v11 = vld [vmem:[%s8683_s1 + $0x94] sm:$0xf0]  ;;  %v4071_v12 = vld [vmem:[%s8683_s1 + $0x110] sm:$0xf]  ;;  %v3935_v17 = vld [vmem:[%s8683_s1] sm:$0xf] }
  0x1e   : > { %1586 = vmatpush.bf16.msra.mxu3 %v4160_v50  ;;  %v5506_v13 = vld [vmem:[%s8683_s1 + $0x114] sm:$0xf0]  ;;  %v4135_v14 = vld [vmem:[%s8683_s1 + $0x190] sm:$0xf]  ;;  %v5472_v18 = vld [vmem:[%s8683_s1 + $0x4] sm:$0xf0]  ;;  %v4008_v19 = vor.u32 %v5490_v11, %v4007_v9 }
  0x1f   : > { %1548 = vmatpush.bf16.msra.mxu0 %v3960_v56  ;;  %v5522_v15 = vld [vmem:[%s8683_s1 + $0x194] sm:$0xf0]  ;;  %v4072_v20 = vor.u32 %v5506_v13, %v4071_v12  ;;  %v3999_v21 = vld [vmem:[%s8683_s1 + $0x80] sm:$0xf]  ;;  %v5488_v22 = vld [vmem:[%s8683_s1 + $0x84] sm:$0xf0]  ;;  %v3936_v31 = vor.u32 %v5472_v18, %v3935_v17  ;;  %v329_v12 = vlaneseq }
  0x20   : > { %1561 = vmatpush.bf16.msra.mxu1 %v4024_v57  ;;  %v4063_v23 = vld [vmem:[%s8683_s1 + $0x100] sm:$0xf]  ;;  %v4136_v24 = vor.u32 %v5522_v15, %v4135_v14  ;;  %v5504_v25 = vld [vmem:[%s8683_s1 + $0x104] sm:$0xf0]  ;;  %v4247_v28 = vld [vmem:[%s8683_s1 + $0x270] sm:$0xf]  ;;  %v4000_v35 = vor.u32 %v5488_v22, %v3999_v21 }
  0x21   : > { %1574 = vmatpush.bf16.msra.mxu2 %v4088_v58  ;;  %v4127_v26 = vld [vmem:[%s8683_s1 + $0x180] sm:$0xf]  ;;  %v5520_v27 = vld [vmem:[%s8683_s1 + $0x184] sm:$0xf0]  ;;  %v5550_v29 = vld [vmem:[%s8683_s1 + $0x274] sm:$0xf0]  ;;  %v4064_v36 = vor.u32 %v5504_v25, %v4063_v23 }
  0x22   : > { %1587 = vmatpush.bf16.msra.mxu3 %v4152_v62  ;;  %v4311_v30 = vld [vmem:[%s8683_s1 + $0x2f0] sm:$0xf]  ;;  %v5566_v32 = vld [vmem:[%s8683_s1 + $0x2f4] sm:$0xf0]  ;;  %v4128_v39 = vor.u32 %v5520_v27, %v4127_v26  ;;  %v4248_v40 = vor.u32 %v5550_v29, %v4247_v28  ;;  %v4239_v43 = vld [vmem:[%s8683_s1 + $0x260] sm:$0xf] }
  0x23   : > { %1549 = vmatpush.bf16.msra.mxu0 %v3952_v4  ;;  %v4375_v33 = vld [vmem:[%s8683_s1 + $0x370] sm:$0xf]  ;;  %v5582_v34 = vld [vmem:[%s8683_s1 + $0x374] sm:$0xf0]  ;;  %v4312_v41 = vor.u32 %v5566_v32, %v4311_v30  ;;  %v5548_v44 = vld [vmem:[%s8683_s1 + $0x264] sm:$0xf0] }
  0x24   : > { %1562 = vmatpush.bf16.msra.mxu1 %v4016_v5  ;;  %v4439_v37 = vld [vmem:[%s8683_s1 + $0x3f0] sm:$0xf]  ;;  %v5598_v38 = vld [vmem:[%s8683_s1 + $0x3f4] sm:$0xf0]  ;;  %v4376_v42 = vor.u32 %v5582_v34, %v4375_v33  ;;  %v4303_v45 = vld [vmem:[%s8683_s1 + $0x2e0] sm:$0xf]  ;;  %v4240_v52 = vor.u32 %v5548_v44, %v4239_v43 }
  0x25   : > { %1575 = vmatpush.bf16.msra.mxu2 %v4080_v6  ;;  %v4440_v46 = vor.u32 %v5598_v38, %v4439_v37  ;;  %v5564_v47 = vld [vmem:[%s8683_s1 + $0x2e4] sm:$0xf0]  ;;  %v4367_v48 = vld [vmem:[%s8683_s1 + $0x360] sm:$0xf]  ;;  %v4231_v55 = vld [vmem:[%s8683_s1 + $0x250] sm:$0xf] }
  0x26   : > { %1588 = vmatpush.bf16.msra.mxu3 %v4144_v10  ;;  %v5580_v49 = vld [vmem:[%s8683_s1 + $0x364] sm:$0xf0]  ;;  %v4431_v50 = vld [vmem:[%s8683_s1 + $0x3e0] sm:$0xf]  ;;  %v4304_v53 = vor.u32 %v5564_v47, %v4303_v45  ;;  %v5546_v56 = vld [vmem:[%s8683_s1 + $0x254] sm:$0xf0] }
  0x27   : > { %1550 = vmatpush.bf16.msra.mxu0 %v3944_v16  ;;  %v5596_v51 = vld [vmem:[%s8683_s1 + $0x3e4] sm:$0xf0]  ;;  %v4368_v54 = vor.u32 %v5580_v49, %v4367_v48  ;;  %v4295_v57 = vld [vmem:[%s8683_s1 + $0x2d0] sm:$0xf]  ;;  %v5562_v59 = vld [vmem:[%s8683_s1 + $0x2d4] sm:$0xf0]  ;;  %v4232_v0 = vor.u32 %v5546_v56, %v4231_v55 }
  0x28   : > { %1563 = vmatpush.bf16.msra.mxu1 %v4008_v19  ;;  %v4432_v58 = vor.u32 %v5596_v51, %v4431_v50  ;;  %v4359_v60 = vld [vmem:[%s8683_s1 + $0x350] sm:$0xf]  ;;  %v5578_v61 = vld [vmem:[%s8683_s1 + $0x354] sm:$0xf0]  ;;  %v4223_v1 = vld [vmem:[%s8683_s1 + $0x240] sm:$0xf]  ;;  %v4296_v2 = vor.u32 %v5562_v59, %v4295_v57 }
  0x29   : > { %1576 = vmatpush.bf16.msra.mxu2 %v4072_v20  ;;  %v4423_v62 = vld [vmem:[%s8683_s1 + $0x3d0] sm:$0xf]  ;;  %v5594_v63 = vld [vmem:[%s8683_s1 + $0x3d4] sm:$0xf0]  ;;  %v4360_v3 = vor.u32 %v5578_v61, %v4359_v60  ;;  %v5544_v4 = vld [vmem:[%s8683_s1 + $0x244] sm:$0xf0] }
  0x2a   : > { %1589 = vmatpush.bf16.msra.mxu3 %v4136_v24  ;;  %v4287_v5 = vld [vmem:[%s8683_s1 + $0x2c0] sm:$0xf]  ;;  %v5560_v6 = vld [vmem:[%s8683_s1 + $0x2c4] sm:$0xf0]  ;;  %v4424_v7 = vor.u32 %v5594_v63, %v4423_v62  ;;  %s8697_s24 = smov (!%p303_p4, %s5935_s24), 1  ;;  %v4224_v13 = vor.u32 %v5544_v4, %v4223_v1  ;;  %vm6334_vm0 = vcmp.lt.s32.totalorder %v329_v12, 512 }
  0x2b   : > { %1551 = vmatpush.bf16.msra.mxu0 %v3936_v31  ;;  %v4351_v8 = vld [vmem:[%s8683_s1 + $0x340] sm:$0xf]  ;;  %v5576_v9 = vld [vmem:[%s8683_s1 + $0x344] sm:$0xf0]  ;;  %v4215_v14 = vld [vmem:[%s8683_s1 + $0x230] sm:$0xf]  ;;  %v4288_v16 = vor.u32 %v5560_v6, %v4287_v5 }
  0x2c   : > { %1564 = vmatpush.bf16.msra.mxu1 %v4000_v35  ;;  %v4415_v10 = vld [vmem:[%s8683_s1 + $0x3c0] sm:$0xf]  ;;  %v5592_v11 = vld [vmem:[%s8683_s1 + $0x3c4] sm:$0xf0]  ;;  %v5542_v15 = vld [vmem:[%s8683_s1 + $0x234] sm:$0xf0]  ;;  %v4352_v17 = vor.u32 %v5576_v9, %v4351_v8 }
  0x2d   : > { %1577 = vmatpush.bf16.msra.mxu2 %v4064_v36  ;;  %s5855_s11 = smul.u32 48, %s8697_s24  ;;  %v4279_v18 = vld [vmem:[%s8683_s1 + $0x2b0] sm:$0xf]  ;;  %v5558_v19 = vld [vmem:[%s8683_s1 + $0x2b4] sm:$0xf0]  ;;  %v4416_v20 = vor.u32 %v5592_v11, %v4415_v10  ;;  %v4216_v28 = vor.u32 %v5542_v15, %v4215_v14  ;;  %v5945_v30 = vmov 0.0  }
  0x2e   : > { %1590 = vmatpush.bf16.msra.mxu3 %v4128_v39  ;;  %s6309_s16 = smul.u32 12, %s8697_s24  ;;  %v4343_v21 = vld [vmem:[%s8683_s1 + $0x330] sm:$0xf]  ;;  %v5574_v22 = vld [vmem:[%s8683_s1 + $0x334] sm:$0xf0]  ;;  %v4280_v33 = vor.u32 %v5558_v19, %v4279_v18  ;;  %vm3448_vm1 = vcmask 1040384  }
  0x2f   : > { %1596 = vmatpush.bf16.msrb.mxu0 %v4248_v40  ;;  %v4407_v23 = vld [vmem:[%s8683_s1 + $0x3b0] sm:$0xf]  ;;  %s6323_s24 = scalar_lea.vmem %s8682_s0, %s5855_s11  ;;  %v5590_v24 = vld [vmem:[%s8683_s1 + $0x3b4] sm:$0xf0]  ;;  %v4207_v29 = vld [vmem:[%s8683_s1 + $0x220] sm:$0xf]  ;;  %v4344_v34 = vor.u32 %v5574_v22, %v4343_v21 }
  0x30   : > { %1609 = vmatpush.bf16.msrb.mxu1 %v4312_v41  ;;  %s6332_s10 = scalar_lea.vmem %s8688_s6, %s6309_s16  ;;  %v339_v26 = vld [vmem:[%s6323_s24 + $0x8] sm:$0xff]  ;;  %v338_v27 = vld [vmem:[%s6323_s24] sm:$0xff]  ;;  %s6347_s15 = scalar_lea.vmem %s8689_s7, %s6309_s16  ;;  %v4408_v39 = vor.u32 %v5590_v24, %v4407_v23  ;;  %v5554_v56 = vld [vmem:[%s8683_s1 + $0x294] sm:$0xf0]  ;;  %vm3450_vm2 = vcmask 1042434   ;;  %vm3452_vm3 = vcmask 1041408  }
  0x31   : > { %1622 = vmatpush.bf16.msrb.mxu2 %v4376_v42  ;;  %335 = vst.msk [vmem:[%s6332_s10 + $0x8] sm:$0xf] %vm6334_vm0, %v5945_v30  ;;  %v550_v31 = vunpack.c.l.b16 %v339_v26  ;;  %v548_v32 = vunpack.c.l.b16 %v338_v27  ;;  %v5540_v35 = vld [vmem:[%s8683_s1 + $0x224] sm:$0xf0]  ;;  %v4271_v36 = vld [vmem:[%s8683_s1 + $0x2a0] sm:$0xf]  ;;  %v551_v37 = vunpack.c.h.b16 %v339_v26  ;;  %v549_v38 = vunpack.c.h.b16 %v338_v27  ;;  %s8531_s21 = scalar_lea.vmem %s8687_s5, %s6309_s16 }
  0x32   : > { %1635 = vmatpush.bf16.msrb.mxu3 %v4440_v46  ;;  %337 = vst.msk [vmem:[%s6347_s15 + $0x8] sm:$0xf] %vm6334_vm0, %v5945_v30  ;;  %v5556_v40 = vld [vmem:[%s8683_s1 + $0x2a4] sm:$0xf0]  ;;  %v4335_v41 = vld [vmem:[%s8683_s1 + $0x320] sm:$0xf]  ;;  %v4208_v49 = vor.u32 %v5540_v35, %v4207_v29 }
  0x33   : > { %1597 = vmatpush.bf16.msrb.mxu0 %v4240_v52  ;;  %v5572_v42 = vld [vmem:[%s8683_s1 + $0x324] sm:$0xf0]  ;;  %v6370_v43 = vpack.c.b16 %v550_v31, %v550_v31  ;;  %v6372_v44 = vpack.c.b16 %v548_v32, %v548_v32  ;;  %v4399_v45 = vld [vmem:[%s8683_s1 + $0x3a0] sm:$0xf]  ;;  %v6380_v47 = vpack.c.b16 %v551_v37, %v551_v37  ;;  %v6382_v48 = vpack.c.b16 %v549_v38, %v549_v38  ;;  %v4199_v52 = vld [vmem:[%s8683_s1 + $0x210] sm:$0xf] }
  0x34   : > { %1610 = vmatpush.bf16.msrb.mxu1 %v4304_v53  ;;  %v5588_v46 = vld [vmem:[%s8683_s1 + $0x3a4] sm:$0xf0]  ;;  %v4272_v50 = vor.u32 %v5556_v40, %v4271_v36  ;;  %v4336_v51 = vor.u32 %v5572_v42, %v4335_v41  ;;  %v5538_v53 = vld [vmem:[%s8683_s1 + $0x214] sm:$0xf0]  ;;  %v4327_v57 = vld [vmem:[%s8683_s1 + $0x310] sm:$0xf] }
  0x35   : > { %1623 = vmatpush.bf16.msrb.mxu2 %v4368_v54  ;;  %v4263_v54 = vld [vmem:[%s8683_s1 + $0x290] sm:$0xf]  ;;  %v4400_v55 = vor.u32 %v5588_v46, %v4399_v45  ;;  %1552 = vmatmul.bf16.vlgmr.msra.gmra.mxu0 %v6372_v44  ;;  %v5586_v60 = vld [vmem:[%s8683_s1 + $0x394] sm:$0xf0]  ;;  %v4200_v61 = vor.u32 %v5538_v53, %v4199_v52  ;;  %v4191_v62 = vld [vmem:[%s8683_s1 + $0x200] sm:$0xf] }
  0x36   : > { %1636 = vmatpush.bf16.msrb.mxu3 %v4432_v58  ;;  %1578 = vmatmul.bf16.vlgmr.msra.gmra.mxu2 %v6370_v43  ;;  %v5570_v58 = vld [vmem:[%s8683_s1 + $0x314] sm:$0xf0]  ;;  %v4391_v59 = vld [vmem:[%s8683_s1 + $0x390] sm:$0xf]  ;;  %v5536_v63 = vld [vmem:[%s8683_s1 + $0x204] sm:$0xf0]  ;;  %v4264_v1 = vor.u32 %v5554_v56, %v4263_v54 }
  0x37   : > { %1598 = vmatpush.bf16.msrb.mxu0 %v4232_v0  ;;  %1591 = vmatmul.bf16.vlgmr.msra.gmra.mxu3 %v6380_v47  ;;  %v4255_v0 = vld [vmem:[%s8683_s1 + $0x280] sm:$0xf]  ;;  %v6428_v5 = vld [vmem:[%s6323_s24 + $0x18] sm:$0xff]  ;;  %v4392_v6 = vor.u32 %v5586_v60, %v4391_v59  ;;  %v5584_v9 = vld [vmem:[%s8683_s1 + $0x384] sm:$0xf0]  ;;  %vm3454_vm4 = vcmask 1044484  }
  0x38   : > { %1611 = vmatpush.bf16.msrb.mxu1 %v4296_v2  ;;  %v4328_v2 = vor.u32 %v5570_v58, %v4327_v57  ;;  %v4319_v4 = vld [vmem:[%s8683_s1 + $0x300] sm:$0xf]  ;;  %v4503_v10 = vld [vmem:[%s8683_s1 + $0x470] sm:$0xf]  ;;  %v5614_v11 = vld [vmem:[%s8683_s1 + $0x474] sm:$0xf0] }
  0x39   : > { %1624 = vmatpush.bf16.msrb.mxu2 %v4360_v3  ;;  %1565 = vmatmul.bf16.vlgmr.msra.gmra.mxu1 %v6382_v48  ;;  %v5552_v3 = vld [vmem:[%s8683_s1 + $0x284] sm:$0xf0]  ;;  %v4383_v8 = vld [vmem:[%s8683_s1 + $0x380] sm:$0xf]  ;;  %v4567_v12 = vld [vmem:[%s8683_s1 + $0x4f0] sm:$0xf]  ;;  %v4504_v24 = vor.u32 %v5614_v11, %v4503_v10 }
  0x3a   : > { %1637 = vmatpush.bf16.msrb.mxu3 %v4424_v7  ;;  %v5568_v7 = vld [vmem:[%s8683_s1 + $0x304] sm:$0xf0]  ;;  %v5630_v14 = vld [vmem:[%s8683_s1 + $0x4f4] sm:$0xf0]  ;;  %v4631_v15 = vld [vmem:[%s8683_s1 + $0x570] sm:$0xf]  ;;  %v4256_v18 = vor.u32 %v5552_v3, %v4255_v0  ;;  %v4384_v23 = vor.u32 %v5584_v9, %v4383_v8 }
  0x3b   : > { %1599 = vmatpush.bf16.msrb.mxu0 %v4224_v13  ;;  %v4192_v13 = vor.u32 %v5536_v63, %v4191_v62  ;;  %v4320_v19 = vor.u32 %v5568_v7, %v4319_v4  ;;  %v5662_v21 = vld [vmem:[%s8683_s1 + $0x5f4] sm:$0xf0]  ;;  %v340_v22 = vld [vmem:[%s6323_s24 + $0x10] sm:$0xff]  ;;  %v4568_v26 = vor.u32 %v5630_v14, %v4567_v12  ;;  %v5612_v29 = vld [vmem:[%s8683_s1 + $0x464] sm:$0xf0]  ;;  %vm3456_vm5 = vcmask 1046534  }
  0x3c   : > { %1612 = vmatpush.bf16.msrb.mxu1 %v4288_v16  ;;  %v5646_v16 = vld [vmem:[%s8683_s1 + $0x574] sm:$0xf0]  ;;  %v4559_v30 = vld [vmem:[%s8683_s1 + $0x4e0] sm:$0xf]  ;;  %v5628_v32 = vld [vmem:[%s8683_s1 + $0x4e4] sm:$0xf0]  ;;  %v552_v36 = vunpack.c.l.b16 %v340_v22  ;;  %v553_v40 = vunpack.c.h.b16 %v340_v22 }
  0x3d   : > { %1625 = vmatpush.bf16.msrb.mxu2 %v4352_v17  ;;  %v554_v17 = vunpack.c.l.b16 %v6428_v5  ;;  %v4632_v27 = vor.u32 %v5646_v16, %v4631_v15  ;;  %v4687_v37 = vld [vmem:[%s8683_s1 + $0x5e0] sm:$0xf]  ;;  %v5660_v38 = vld [vmem:[%s8683_s1 + $0x5e4] sm:$0xf0]  ;;  %v4560_v42 = vor.u32 %v5628_v32, %v4559_v30  ;;  %v4487_v46 = vld [vmem:[%s8683_s1 + $0x450] sm:$0xf] }
  0x3e   : > { %1638 = vmatpush.bf16.msrb.mxu3 %v4416_v20  ;;  %v4695_v20 = vld [vmem:[%s8683_s1 + $0x5f0] sm:$0xf]  ;;  %v5626_v52 = vld [vmem:[%s8683_s1 + $0x4d4] sm:$0xf0]  ;;  %v6521_v59 = vpack.c.b16 %v553_v40, %v553_v40  ;;  %v4479_v63 = vld [vmem:[%s8683_s1 + $0x440] sm:$0xf] }
  0x3f   : > { %1600 = vmatpush.bf16.msrb.mxu0 %v4216_v28  ;;  %v4495_v28 = vld [vmem:[%s8683_s1 + $0x460] sm:$0xf]  ;;  %v4696_v31 = vor.u32 %v5662_v21, %v4695_v20  ;;  %v6483_v35 = vpack.c.b16 %v554_v17, %v554_v17  ;;  %v4615_v53 = vld [vmem:[%s8683_s1 + $0x550] sm:$0xf]  ;;  %v5642_v54 = vld [vmem:[%s8683_s1 + $0x554] sm:$0xf0] }
  0x40   : > { %1613 = vmatpush.bf16.msrb.mxu1 %v4280_v33  ;;  %v4623_v33 = vld [vmem:[%s8683_s1 + $0x560] sm:$0xf]  ;;  %v4496_v41 = vor.u32 %v5612_v29, %v4495_v28  ;;  %v4679_v56 = vld [vmem:[%s8683_s1 + $0x5d0] sm:$0xf]  ;;  %v5658_v57 = vld [vmem:[%s8683_s1 + $0x5d4] sm:$0xf0]  ;;  %v4616_v62 = vor.u32 %v5642_v54, %v4615_v53 }
  0x41   : > { %1626 = vmatpush.bf16.msrb.mxu2 %v4344_v34  ;;  %v5644_v34 = vld [vmem:[%s8683_s1 + $0x564] sm:$0xf0]  ;;  %v4607_v4 = vld [vmem:[%s8683_s1 + $0x540] sm:$0xf]  ;;  %v4471_v11 = vld [vmem:[%s8683_s1 + $0x430] sm:$0xf] }
  0x42   : > { %1639 = vmatpush.bf16.msrb.mxu3 %v4408_v39  ;;  %v555_v39 = vunpack.c.h.b16 %v6428_v5  ;;  %v4624_v45 = vor.u32 %v5644_v34, %v4623_v33  ;;  %v5608_v0 = vld [vmem:[%s8683_s1 + $0x444] sm:$0xf0]  ;;  %v5606_v12 = vld [vmem:[%s8683_s1 + $0x434] sm:$0xf0]  ;;  %v4599_v16 = vld [vmem:[%s8683_s1 + $0x530] sm:$0xf] }
  0x43   : > { %1601 = vmatpush.bf16.msrb.mxu0 %v4208_v49  ;;  %v5610_v49 = vld [vmem:[%s8683_s1 + $0x454] sm:$0xf0]  ;;  %v5624_v3 = vld [vmem:[%s8683_s1 + $0x4c4] sm:$0xf0]  ;;  %v4480_v8 = vor.u32 %v5608_v0, %v4479_v63  ;;  %v4472_v20 = vor.u32 %v5606_v12, %v4471_v11  ;;  %v4591_v29 = vld [vmem:[%s8683_s1 + $0x520] sm:$0xf] }
  0x44   : > { %1614 = vmatpush.bf16.msrb.mxu1 %v4272_v50  ;;  %v4551_v50 = vld [vmem:[%s8683_s1 + $0x4d0] sm:$0xf]  ;;  %v6519_v58 = vpack.c.b16 %v555_v39, %v555_v39  ;;  %v4488_v60 = vor.u32 %v5610_v49, %v4487_v46  ;;  %v5640_v5 = vld [vmem:[%s8683_s1 + $0x544] sm:$0xf0]  ;;  %v5622_v15 = vld [vmem:[%s8683_s1 + $0x4b4] sm:$0xf0] }
  0x45   : > { %1627 = vmatpush.bf16.msrb.mxu2 %v4336_v51  ;;  %v4688_v51 = vor.u32 %v5660_v38, %v4687_v37  ;;  %v5656_v7 = vld [vmem:[%s8683_s1 + $0x5c4] sm:$0xf0]  ;;  %v4608_v10 = vor.u32 %v5640_v5, %v4607_v4  ;;  %v5638_v17 = vld [vmem:[%s8683_s1 + $0x534] sm:$0xf0]  ;;  %v4455_v37 = vld [vmem:[%s8683_s1 + $0x410] sm:$0xf] }
  0x46   : > { %1640 = vmatpush.bf16.msrb.mxu3 %v4400_v55  ;;  %v6511_v55 = vpack.c.b16 %v552_v36, %v552_v36  ;;  %v4600_v22 = vor.u32 %v5638_v17, %v4599_v16  ;;  %v5620_v28 = vld [vmem:[%s8683_s1 + $0x4a4] sm:$0xf0]  ;;  %v5602_v38 = vld [vmem:[%s8683_s1 + $0x414] sm:$0xf0]  ;;  %v4519_v39 = vld [vmem:[%s8683_s1 + $0x490] sm:$0xf] }
  0x47   : > { %1602 = vmatpush.bf16.msrb.mxu0 %v4200_v61  ;;  %v4552_v61 = vor.u32 %v5626_v52, %v4551_v50  ;;  %v5636_v30 = vld [vmem:[%s8683_s1 + $0x524] sm:$0xf0]  ;;  %v4647_v46 = vld [vmem:[%s8683_s1 + $0x590] sm:$0xf]  ;;  %v5650_v49 = vld [vmem:[%s8683_s1 + $0x594] sm:$0xf0] }
  0x48   : > { %1615 = vmatpush.bf16.msrb.mxu1 %v4264_v1  ;;  %v4543_v1 = vld [vmem:[%s8683_s1 + $0x4c0] sm:$0xf]  ;;  %v5652_v32 = vld [vmem:[%s8683_s1 + $0x5a4] sm:$0xf0]  ;;  %v4592_v36 = vor.u32 %v5636_v30, %v4591_v29  ;;  %v4648_v63 = vor.u32 %v5650_v49, %v4647_v46  ;;  %v3993_v4 = vld [vmem:[%s8683_s1 + $0x78] sm:$0xf0] }
  0x49   : > { %1628 = vmatpush.bf16.msrb.mxu2 %v4328_v2  ;;  %v4680_v2 = vor.u32 %v5658_v57, %v4679_v56  ;;  %v4544_v9 = vor.u32 %v5624_v3, %v4543_v1  ;;  %v4447_v50 = vld [vmem:[%s8683_s1 + $0x400] sm:$0xf]  ;;  %v5600_v52 = vld [vmem:[%s8683_s1 + $0x404] sm:$0xf0]  ;;  %v5485_v3 = vld [vmem:[%s8683_s1 + $0x74] sm:$0xf] }
  0x4a   : > { %1641 = vmatpush.bf16.msrb.mxu3 %v4392_v6  ;;  %v4671_v6 = vld [vmem:[%s8683_s1 + $0x5c0] sm:$0xf]  ;;  %v5616_v54 = vld [vmem:[%s8683_s1 + $0x484] sm:$0xf0]  ;;  %v5501_v5 = vld [vmem:[%s8683_s1 + $0xf4] sm:$0xf] }
  0x4b   : > { %1603 = vmatpush.bf16.msrb.mxu0 %v4192_v13  ;;  %v4535_v13 = vld [vmem:[%s8683_s1 + $0x4b0] sm:$0xf]  ;;  %v4672_v14 = vor.u32 %v5656_v7, %v4671_v6  ;;  %v4511_v53 = vld [vmem:[%s8683_s1 + $0x480] sm:$0xf]  ;;  %v5648_v1 = vld [vmem:[%s8683_s1 + $0x584] sm:$0xf0]  ;;  %v4448_v6 = vor.u32 %v5600_v52, %v4447_v50 }
  0x4c   : > { %1616 = vmatpush.bf16.msrb.mxu1 %v4256_v18  ;;  %v4663_v18 = vld [vmem:[%s8683_s1 + $0x5b0] sm:$0xf]  ;;  %v4536_v21 = vor.u32 %v5622_v15, %v4535_v13  ;;  %v4639_v0 = vld [vmem:[%s8683_s1 + $0x580] sm:$0xf]  ;;  %v4057_v7 = vld [vmem:[%s8683_s1 + $0xf8] sm:$0xf0]  ;;  %v4512_v11 = vor.u32 %v5616_v54, %v4511_v53 }
  0x4d   : > { %1629 = vmatpush.bf16.msrb.mxu2 %v4320_v19  ;;  %v5654_v19 = vld [vmem:[%s8683_s1 + $0x5b4] sm:$0xf0]  ;;  %v5533_v13 = vld [vmem:[%s8683_s1 + $0x1f4] sm:$0xf]  ;;  %v4640_v17 = vor.u32 %v5648_v1, %v4639_v0  ;;  %v5515_v29 = vld [vmem:[%s8683_s1 + $0x164] sm:$0xf] }
  0x4e   : > { %1642 = vmatpush.bf16.msrb.mxu3 %v4384_v23  ;;  %1604 = vmatmul.bf16.vlgmr.msrb.gmra.mxu0 %v6511_v55  ;;  %v4463_v23 = vld [vmem:[%s8683_s1 + $0x420] sm:$0xf]  ;;  %v4113_v30 = vld [vmem:[%s8683_s1 + $0x168] sm:$0xf0]  ;;  %v4041_v46 = vld [vmem:[%s8683_s1 + $0xd8] sm:$0xf0] }
  0x4f   : > { %1648 = vmatpush.bf16.msra.mxu0 %v4504_v24  ;;  %1617 = vmatmul.bf16.vlgmr.msrb.gmra.mxu1 %v6521_v59  ;;  %v5604_v24 = vld [vmem:[%s8683_s1 + $0x424] sm:$0xf0]  ;;  %v5513_v49 = vld [vmem:[%s8683_s1 + $0x154] sm:$0xf]  ;;  %v4105_v50 = vld [vmem:[%s8683_s1 + $0x158] sm:$0xf0] }
  0x50   : > { %1661 = vmatpush.bf16.msra.mxu1 %v4568_v26  ;;  %1630 = vmatmul.bf16.vlgmr.msrb.gmra.mxu2 %v6483_v35  ;;  %v4527_v26 = vld [vmem:[%s8683_s1 + $0x4a0] sm:$0xf]  ;;  %v4464_v33 = vor.u32 %v5604_v24, %v4463_v23  ;;  %v3985_v23 = vld [vmem:[%s8683_s1 + $0x68] sm:$0xf0]  ;;  %v5499_v24 = vld [vmem:[%s8683_s1 + $0xe4] sm:$0xf] }
  0x51   : > { %1674 = vmatpush.bf16.msra.mxu2 %v4632_v27  ;;  %1643 = vmatmul.bf16.vlgmr.msrb.gmra.mxu3 %v6519_v58  ;;  %v4664_v27 = vor.u32 %v5654_v19, %v4663_v18  ;;  %v4528_v34 = vor.u32 %v5620_v28, %v4527_v26  ;;  %v3996_v18 = vor.u32 %v5485_v3, %v3993_v4  ;;  %v4049_v28 = vld [vmem:[%s8683_s1 + $0xe8] sm:$0xf0]  ;;  %v4169_v52 = vld [vmem:[%s8683_s1 + $0x1d8] sm:$0xf0]  ;;  %v5511_v0 = vld [vmem:[%s8683_s1 + $0x144] sm:$0xf] }
  0x52   : > { %1687 = vmatpush.bf16.msra.mxu3 %v4696_v31  ;;  %v4655_v31 = vld [vmem:[%s8683_s1 + $0x5a0] sm:$0xf]  ;;  %v4097_v1 = vld [vmem:[%s8683_s1 + $0x148] sm:$0xf0]  ;;  %vm3458_vm6 = vcmask 1045508   ;;  %vm3460_vm7 = vcmask 1043456  }
  0x53   : > { %1649 = vmatpush.bf16.msra.mxu0 %v4496_v41  ;;  %v4656_v40 = vor.u32 %v5652_v32, %v4655_v31  ;;  %v5618_v41 = vld [vmem:[%s8683_s1 + $0x494] sm:$0xf0]  ;;  %v4161_v3 = vld [vmem:[%s8683_s1 + $0x1c8] sm:$0xf0] }
  0x54   : > { %1662 = vmatpush.bf16.msra.mxu1 %v4560_v42  ;;  %v4583_v42 = vld [vmem:[%s8683_s1 + $0x510] sm:$0xf]  ;;  %v4520_v56 = vor.u32 %v5618_v41, %v4519_v39  ;;  %v4116_v39 = vor.u32 %v5515_v29, %v4113_v30  ;;  %v3977_v41 = vld [vmem:[%s8683_s1 + $0x58] sm:$0xf0]  ;;  %v4145_v29 = vld [vmem:[%s8683_s1 + $0x1a8] sm:$0xf0] }
  0x55   : > { %1675 = vmatpush.bf16.msra.mxu2 %v4624_v45  ;;  %v5634_v45 = vld [vmem:[%s8683_s1 + $0x514] sm:$0xf0] }
  0x56   : > { %1688 = vmatpush.bf16.msra.mxu3 %v4688_v51  ;;  %v4456_v51 = vor.u32 %v5602_v38, %v4455_v37  ;;  %v4584_v57 = vor.u32 %v5634_v45, %v4583_v42  ;;  %v4052_v38 = vor.u32 %v5499_v24, %v4049_v28  ;;  %v5497_v42 = vld [vmem:[%s8683_s1 + $0xd4] sm:$0xf]  ;;  %v5507_v24 = vld [vmem:[%s8683_s1 + $0x124] sm:$0xf] }
  0x57   : > { %1650 = vmatpush.bf16.msra.mxu0 %v4488_v60  ;;  %v4575_v60 = vld [vmem:[%s8683_s1 + $0x500] sm:$0xf]  ;;  %v4044_v54 = vor.u32 %v5497_v42, %v4041_v46  ;;  %v5523_v28 = vld [vmem:[%s8683_s1 + $0x1a4] sm:$0xf]  ;;  %v5505_v42 = vld [vmem:[%s8683_s1 + $0x114] sm:$0xf] }
  0x58   : > { %1663 = vmatpush.bf16.msra.mxu1 %v4552_v61  ;;  %v5632_v61 = vld [vmem:[%s8683_s1 + $0x504] sm:$0xf0]  ;;  %v5521_v46 = vld [vmem:[%s8683_s1 + $0x194] sm:$0xf] }
  0x59   : > { %1676 = vmatpush.bf16.msra.mxu2 %v4616_v62  ;;  %v342_v62 = vld [vmem:[%s6323_s24 + $0x20] sm:$0xff]  ;;  %v4576_v12 = vor.u32 %v5632_v61, %v4575_v60  ;;  %v3969_v60 = vld [vmem:[%s8683_s1 + $0x48] sm:$0xf0] }
  0x5a   : > { %1689 = vmatpush.bf16.msra.mxu3 %v4680_v2  ;;  %v343_v2 = vld [vmem:[%s6323_s24 + $0x28] sm:$0xff]  ;;  %v557_v16 = vunpack.c.h.b16 %v342_v62  ;;  %v5495_v61 = vld [vmem:[%s8683_s1 + $0xc4] sm:$0xf] }
  0x5b   : > { %1651 = vmatpush.bf16.msra.mxu0 %v4480_v8  ;;  %v5517_v8 = vld [vmem:[%s8683_s1 + $0x174] sm:$0xf]  ;;  %v558_v15 = vunpack.c.l.b16 %v343_v2  ;;  %v559_v19 = vunpack.c.h.b16 %v343_v2  ;;  %v5527_v2 = vld [vmem:[%s8683_s1 + $0x1c4] sm:$0xf] }
  0x5c   : > { %1664 = vmatpush.bf16.msra.mxu1 %v4544_v9  ;;  %v4121_v9 = vld [vmem:[%s8683_s1 + $0x178] sm:$0xf0]  ;;  %v6694_v32 = vpack.c.b16 %v557_v16, %v557_v16 }
  0x5d   : > { %1677 = vmatpush.bf16.msra.mxu2 %v4608_v10  ;;  %v556_v10 = vunpack.c.l.b16 %v342_v62  ;;  %v6692_v31 = vpack.c.b16 %v558_v15, %v558_v15  ;;  %v4153_v15 = vld [vmem:[%s8683_s1 + $0x1b8] sm:$0xf0] }
  0x5e   : > { %1690 = vmatpush.bf16.msra.mxu3 %v4672_v14  ;;  %v4185_v14 = vld [vmem:[%s8683_s1 + $0x1f8] sm:$0xf0] }
  0x5f   : > { %1652 = vmatpush.bf16.msra.mxu0 %v4472_v20  ;;  %v4060_v20 = vor.u32 %v5501_v5, %v4057_v7  ;;  %v4188_v26 = vor.u32 %v5533_v13, %v4185_v14  ;;  %v5477_v7 = vld [vmem:[%s8683_s1 + $0x34] sm:$0xf]  ;;  %v4089_v13 = vld [vmem:[%s8683_s1 + $0x138] sm:$0xf0] }
  0x60   : > { %1665 = vmatpush.bf16.msra.mxu1 %v4536_v21  ;;  %v4124_v21 = vor.u32 %v5517_v8, %v4121_v9  ;;  %v3961_v8 = vld [vmem:[%s8683_s1 + $0x38] sm:$0xf0]  ;;  %v5493_v9 = vld [vmem:[%s8683_s1 + $0xb4] sm:$0xf] }
  0x61   : > { %1678 = vmatpush.bf16.msra.mxu2 %v4600_v22  ;;  %v5483_v22 = vld [vmem:[%s8683_s1 + $0x64] sm:$0xf]  ;;  %v5525_v14 = vld [vmem:[%s8683_s1 + $0x1b4] sm:$0xf]  ;;  %v3964_v16 = vor.u32 %v5477_v7, %v3961_v8  ;;  %v4377_v7 = vld [vmem:[%s8683_s1 + $0x378] sm:$0xf0] }
  0x62   : > { %1691 = vmatpush.bf16.msra.mxu3 %v4664_v27  ;;  %v6681_v27 = vpack.c.b16 %v556_v10, %v556_v10  ;;  %v3988_v37 = vor.u32 %v5483_v22, %v3985_v23  ;;  %v4164_v10 = vor.u32 %v5527_v2, %v4161_v3  ;;  %v4156_v22 = vor.u32 %v5525_v14, %v4153_v15  ;;  %v4017_v23 = vld [vmem:[%s8683_s1 + $0xa8] sm:$0xf0]  ;;  %v4249_v2 = vld [vmem:[%s8683_s1 + $0x278] sm:$0xf0]  ;;  %v5565_v3 = vld [vmem:[%s8683_s1 + $0x2f4] sm:$0xf] }
  0x63   : > { %1653 = vmatpush.bf16.msra.mxu0 %v4464_v33  ;;  %v5531_v33 = vld [vmem:[%s8683_s1 + $0x1e4] sm:$0xf] }
  0x64   : > { %1666 = vmatpush.bf16.msra.mxu1 %v4528_v34  ;;  %v4177_v34 = vld [vmem:[%s8683_s1 + $0x1e8] sm:$0xf0] }
  0x65   : > { %1679 = vmatpush.bf16.msra.mxu2 %v4592_v36  ;;  %v6702_v36 = vpack.c.b16 %v559_v19, %v559_v19  ;;  %v4180_v45 = vor.u32 %v5531_v33, %v4177_v34  ;;  %v5475_v19 = vld [vmem:[%s8683_s1 + $0x24] sm:$0xf] }
  0x66   : > { %1692 = vmatpush.bf16.msra.mxu3 %v4656_v40  ;;  %v5481_v40 = vld [vmem:[%s8683_s1 + $0x54] sm:$0xf] }
  0x67   : > { %1654 = vmatpush.bf16.msra.mxu0 %v4456_v51  ;;  %v5529_v51 = vld [vmem:[%s8683_s1 + $0x1d4] sm:$0xf]  ;;  %v3980_v53 = vor.u32 %v5481_v40, %v3977_v41  ;;  %v4148_v40 = vor.u32 %v5523_v28, %v4145_v29  ;;  %v4009_v41 = vld [vmem:[%s8683_s1 + $0x98] sm:$0xf0] }
  0x68   : > { %1667 = vmatpush.bf16.msra.mxu1 %v4520_v56  ;;  %v4108_v56 = vor.u32 %v5513_v49, %v4105_v50  ;;  %v4172_v62 = vor.u32 %v5529_v51, %v4169_v52  ;;  %v4137_v49 = vld [vmem:[%s8683_s1 + $0x198] sm:$0xf0]  ;;  %v5471_v51 = vld [vmem:[%s8683_s1 + $0x4] sm:$0xf]  ;;  %v3937_v52 = vld [vmem:[%s8683_s1 + $0x8] sm:$0xf0] }
  0x69   : > { %1680 = vmatpush.bf16.msra.mxu2 %v4584_v57  ;;  %v5479_v57 = vld [vmem:[%s8683_s1 + $0x44] sm:$0xf] }
  0x6a   : > { %1693 = vmatpush.bf16.msra.mxu3 %v4648_v63  ;;  %v4033_v63 = vld [vmem:[%s8683_s1 + $0xc8] sm:$0xf0]  ;;  %v3972_v4 = vor.u32 %v5479_v57, %v3969_v60  ;;  %v5503_v60 = vld [vmem:[%s8683_s1 + $0x104] sm:$0xf] }
  0x6b   : > { %1655 = vmatpush.bf16.msra.mxu0 %v4448_v6  ;;  %v4036_v5 = vor.u32 %v5495_v61, %v4033_v63  ;;  %v4100_v6 = vor.u32 %v5511_v0, %v4097_v1  ;;  %v4001_v57 = vld [vmem:[%s8683_s1 + $0x88] sm:$0xf0]  ;;  %v4140_v61 = vor.u32 %v5521_v46, %v4137_v49  ;;  %v5519_v63 = vld [vmem:[%s8683_s1 + $0x184] sm:$0xf]  ;;  %v5549_v1 = vld [vmem:[%s8683_s1 + $0x274] sm:$0xf] }
  0x6c   : > { %1668 = vmatpush.bf16.msra.mxu1 %v4512_v11  ;;  %v4025_v11 = vld [vmem:[%s8683_s1 + $0xb8] sm:$0xf0]  ;;  %v4129_v0 = vld [vmem:[%s8683_s1 + $0x188] sm:$0xf0]  ;;  %v5543_v49 = vld [vmem:[%s8683_s1 + $0x244] sm:$0xf] }
  0x6d   : > { %1681 = vmatpush.bf16.msra.mxu2 %v4576_v12  ;;  %v5509_v12 = vld [vmem:[%s8683_s1 + $0x134] sm:$0xf] }
  0x6e   : > { %1694 = vmatpush.bf16.msra.mxu3 %v4640_v17  ;;  %1656 = vmatmul.bf16.vlgmr.msra.gmra.mxu0 %v6681_v27  ;;  %v4028_v17 = vor.u32 %v5493_v9, %v4025_v11  ;;  %v4441_v11 = vld [vmem:[%s8683_s1 + $0x3f8] sm:$0xf0] }
  0x6f   : > { %1700 = vmatpush.bf16.msrb.mxu0 %v3996_v18  ;;  %1669 = vmatmul.bf16.vlgmr.msra.gmra.mxu1 %v6694_v32  ;;  %v4092_v18 = vor.u32 %v5509_v12, %v4089_v13  ;;  %v4132_v12 = vor.u32 %v5519_v63, %v4129_v0  ;;  %v4252_v13 = vor.u32 %v5549_v1, %v4249_v2  ;;  %v5557_v63 = vld [vmem:[%s8683_s1 + $0x2b4] sm:$0xf]  ;;  %v4281_v1 = vld [vmem:[%s8683_s1 + $0x2b8] sm:$0xf0] }
  0x70   : > { %1713 = vmatpush.bf16.msrb.mxu1 %v4060_v20  ;;  %1682 = vmatmul.bf16.vlgmr.msra.gmra.mxu2 %v6692_v31  ;;  %v3953_v20 = vld [vmem:[%s8683_s1 + $0x28] sm:$0xf0]  ;;  %v5573_v2 = vld [vmem:[%s8683_s1 + $0x334] sm:$0xf] }
  0x71   : > { %1726 = vmatpush.bf16.msrb.mxu2 %v4124_v21  ;;  %1695 = vmatmul.bf16.vlgmr.msra.gmra.mxu3 %v6702_v36  ;;  %v5491_v21 = vld [vmem:[%s8683_s1 + $0xa4] sm:$0xf]  ;;  %v3956_v30 = vor.u32 %v5475_v19, %v3953_v20  ;;  %v4305_v20 = vld [vmem:[%s8683_s1 + $0x2e8] sm:$0xf0] }
  0x72   : > { %1739 = vmatpush.bf16.msrb.mxu3 %v4188_v26  ;;  %v4081_v26 = vld [vmem:[%s8683_s1 + $0x128] sm:$0xf0]  ;;  %v4020_v33 = vor.u32 %v5491_v21, %v4017_v23  ;;  %v5579_v21 = vld [vmem:[%s8683_s1 + $0x364] sm:$0xf] }
  0x73   : > { %1701 = vmatpush.bf16.msrb.mxu0 %v3988_v37  ;;  %v4084_v34 = vor.u32 %v5507_v24, %v4081_v26  ;;  %v5473_v37 = vld [vmem:[%s8683_s1 + $0x14] sm:$0xf]  ;;  %v5595_v23 = vld [vmem:[%s8683_s1 + $0x3e4] sm:$0xf]  ;;  %v4433_v24 = vld [vmem:[%s8683_s1 + $0x3e8] sm:$0xf0] }
  0x74   : > { %1714 = vmatpush.bf16.msrb.mxu1 %v4052_v38  ;;  %v3945_v38 = vld [vmem:[%s8683_s1 + $0x18] sm:$0xf0] }
  0x75   : > { %1727 = vmatpush.bf16.msrb.mxu2 %v4116_v39  ;;  %v5489_v39 = vld [vmem:[%s8683_s1 + $0x94] sm:$0xf]  ;;  %v3948_v50 = vor.u32 %v5473_v37, %v3945_v38  ;;  %v4436_v37 = vor.u32 %v5595_v23, %v4433_v24  ;;  %v4297_v38 = vld [vmem:[%s8683_s1 + $0x2d8] sm:$0xf0] }
  0x76   : > { %1740 = vmatpush.bf16.msrb.mxu3 %v4180_v45  ;;  %v4073_v45 = vld [vmem:[%s8683_s1 + $0x118] sm:$0xf0]  ;;  %v5553_v23 = vld [vmem:[%s8683_s1 + $0x294] sm:$0xf] }
  0x77   : > { %1702 = vmatpush.bf16.msrb.mxu0 %v3980_v53  ;;  %v4012_v53 = vor.u32 %v5489_v39, %v4009_v41  ;;  %v5577_v39 = vld [vmem:[%s8683_s1 + $0x354] sm:$0xf] }
  0x78   : > { %1715 = vmatpush.bf16.msrb.mxu1 %v4044_v54  ;;  %v4076_v54 = vor.u32 %v5505_v42, %v4073_v45  ;;  %v5593_v41 = vld [vmem:[%s8683_s1 + $0x3d4] sm:$0xf]  ;;  %v4425_v42 = vld [vmem:[%s8683_s1 + $0x3d8] sm:$0xf0] }
  0x79   : > { %1728 = vmatpush.bf16.msrb.mxu2 %v4108_v56  ;;  %v5487_v56 = vld [vmem:[%s8683_s1 + $0x84] sm:$0xf] }
  0x7a   : > { %1741 = vmatpush.bf16.msrb.mxu3 %v4172_v62  ;;  %v4065_v62 = vld [vmem:[%s8683_s1 + $0x108] sm:$0xf0]  ;;  %v4004_v8 = vor.u32 %v5487_v56, %v4001_v57 }
  0x7b   : > { %1703 = vmatpush.bf16.msrb.mxu0 %v3972_v4  ;;  %v3940_v4 = vor.u32 %v5471_v51, %v3937_v52  ;;  %v4068_v9 = vor.u32 %v5503_v60, %v4065_v62  ;;  %v5575_v51 = vld [vmem:[%s8683_s1 + $0x344] sm:$0xf]  ;;  %v4353_v52 = vld [vmem:[%s8683_s1 + $0x348] sm:$0xf0]  ;;  %v4217_v62 = vld [vmem:[%s8683_s1 + $0x238] sm:$0xf0] }
  0x7c   : > { %1716 = vmatpush.bf16.msrb.mxu1 %v4036_v5  ;;  %v4313_v5 = vld [vmem:[%s8683_s1 + $0x2f8] sm:$0xf0]  ;;  %v4356_v60 = vor.u32 %v5575_v51, %v4353_v52 }
  0x7d   : > { %1729 = vmatpush.bf16.msrb.mxu2 %v4100_v6  ;;  %v5581_v6 = vld [vmem:[%s8683_s1 + $0x374] sm:$0xf]  ;;  %v4316_v14 = vor.u32 %v5565_v3, %v4313_v5  ;;  %v4345_v3 = vld [vmem:[%s8683_s1 + $0x338] sm:$0xf0] }
  0x7e   : > { %1742 = vmatpush.bf16.msrb.mxu3 %v4164_v10  ;;  %v5597_v10 = vld [vmem:[%s8683_s1 + $0x3f4] sm:$0xf]  ;;  %v4380_v15 = vor.u32 %v5581_v6, %v4377_v7  ;;  %v4409_v5 = vld [vmem:[%s8683_s1 + $0x3b8] sm:$0xf0]  ;;  %v4284_v7 = vor.u32 %v5557_v63, %v4281_v1 }
  0x7f   : > { %1704 = vmatpush.bf16.msrb.mxu0 %v3964_v16  ;;  %v5547_v16 = vld [vmem:[%s8683_s1 + $0x264] sm:$0xf]  ;;  %v4444_v19 = vor.u32 %v5597_v10, %v4441_v11  ;;  %v4209_v10 = vld [vmem:[%s8683_s1 + $0x228] sm:$0xf0]  ;;  %v4569_v52 = vld [vmem:[%s8683_s1 + $0x4f8] sm:$0xf0] }
  0x80   : > { %1717 = vmatpush.bf16.msrb.mxu1 %v4028_v17  ;;  %v4241_v17 = vld [vmem:[%s8683_s1 + $0x268] sm:$0xf0]  ;;  %v5555_v11 = vld [vmem:[%s8683_s1 + $0x2a4] sm:$0xf] }
  0x81   : > { %1730 = vmatpush.bf16.msrb.mxu2 %v4092_v18  ;;  %v5563_v18 = vld [vmem:[%s8683_s1 + $0x2e4] sm:$0xf]  ;;  %v4244_v26 = vor.u32 %v5547_v16, %v4241_v17  ;;  %v4401_v17 = vld [vmem:[%s8683_s1 + $0x3a8] sm:$0xf0] }
  0x82   : > { %1743 = vmatpush.bf16.msrb.mxu3 %v4156_v22  ;;  %v4369_v22 = vld [vmem:[%s8683_s1 + $0x368] sm:$0xf0]  ;;  %v4308_v28 = vor.u32 %v5563_v18, %v4305_v20  ;;  %v5587_v16 = vld [vmem:[%s8683_s1 + $0x3a4] sm:$0xf] }
  0x83   : > { %1705 = vmatpush.bf16.msrb.mxu0 %v3956_v30  ;;  %v4372_v29 = vor.u32 %v5579_v21, %v4369_v22  ;;  %v5545_v30 = vld [vmem:[%s8683_s1 + $0x254] sm:$0xf]  ;;  %v4201_v22 = vld [vmem:[%s8683_s1 + $0x218] sm:$0xf0]  ;;  %v4404_v24 = vor.u32 %v5587_v16, %v4401_v17 }
  0x84   : > { %1718 = vmatpush.bf16.msrb.mxu1 %v4020_v33  ;;  %v4233_v33 = vld [vmem:[%s8683_s1 + $0x258] sm:$0xf0]  ;;  %v5537_v21 = vld [vmem:[%s8683_s1 + $0x214] sm:$0xf] }
  0x85   : > { %1731 = vmatpush.bf16.msrb.mxu2 %v4084_v34  ;;  %v5561_v34 = vld [vmem:[%s8683_s1 + $0x2d4] sm:$0xf]  ;;  %v4236_v45 = vor.u32 %v5545_v30, %v4233_v33  ;;  %v4393_v33 = vld [vmem:[%s8683_s1 + $0x398] sm:$0xf0] }
  0x86   : > { %1744 = vmatpush.bf16.msrb.mxu3 %v4148_v40  ;;  %v4361_v40 = vld [vmem:[%s8683_s1 + $0x358] sm:$0xf0]  ;;  %v4300_v46 = vor.u32 %v5561_v34, %v4297_v38  ;;  %v5585_v30 = vld [vmem:[%s8683_s1 + $0x394] sm:$0xf]  ;;  %v4204_v34 = vor.u32 %v5537_v21, %v4201_v22  ;;  %v4193_v38 = vld [vmem:[%s8683_s1 + $0x208] sm:$0xf0] }
  0x87   : > { %1706 = vmatpush.bf16.msrb.mxu0 %v3948_v50  ;;  %v4225_v50 = vld [vmem:[%s8683_s1 + $0x248] sm:$0xf0]  ;;  %v5625_v16 = vld [vmem:[%s8683_s1 + $0x4d4] sm:$0xf] }
  0x88   : > { %1719 = vmatpush.bf16.msrb.mxu1 %v4012_v53  ;;  %v5591_v53 = vld [vmem:[%s8683_s1 + $0x3c4] sm:$0xf]  ;;  %v4228_v56 = vor.u32 %v5543_v49, %v4225_v50  ;;  %v4385_v50 = vld [vmem:[%s8683_s1 + $0x388] sm:$0xf0]  ;;  %v5657_v21 = vld [vmem:[%s8683_s1 + $0x5d4] sm:$0xf] }
  0x89   : > { %1732 = vmatpush.bf16.msrb.mxu2 %v4076_v54  ;;  %v4417_v54 = vld [vmem:[%s8683_s1 + $0x3c8] sm:$0xf0]  ;;  %v5583_v49 = vld [vmem:[%s8683_s1 + $0x384] sm:$0xf] }
  0x8a   : > { %1745 = vmatpush.bf16.msrb.mxu3 %v4140_v61  ;;  %v5541_v61 = vld [vmem:[%s8683_s1 + $0x234] sm:$0xf]  ;;  %v4420_v0 = vor.u32 %v5591_v53, %v4417_v54  ;;  %v4633_v54 = vld [vmem:[%s8683_s1 + $0x578] sm:$0xf0] }
  0x8b   : > { %1707 = vmatpush.bf16.msrb.mxu0 %v3940_v4  ;;  %v5589_v4 = vld [vmem:[%s8683_s1 + $0x3b4] sm:$0xf]  ;;  %v4220_v6 = vor.u32 %v5541_v61, %v4217_v62  ;;  %v4697_v61 = vld [vmem:[%s8683_s1 + $0x5f8] sm:$0xf0]  ;;  %v4388_v62 = vor.u32 %v5583_v49, %v4385_v50 }
  0x8c   : > { %1720 = vmatpush.bf16.msrb.mxu1 %v4004_v8  ;;  %v4348_v8 = vor.u32 %v5573_v2, %v4345_v3  ;;  %v5645_v53 = vld [vmem:[%s8683_s1 + $0x574] sm:$0xf]  ;;  %v5611_v2 = vld [vmem:[%s8683_s1 + $0x464] sm:$0xf]  ;;  %v4497_v3 = vld [vmem:[%s8683_s1 + $0x468] sm:$0xf0] }
  0x8d   : > { %1733 = vmatpush.bf16.msrb.mxu2 %v4068_v9  ;;  %v5539_v9 = vld [vmem:[%s8683_s1 + $0x224] sm:$0xf]  ;;  %v4636_v1 = vor.u32 %v5645_v53, %v4633_v54  ;;  %v4601_v49 = vld [vmem:[%s8683_s1 + $0x538] sm:$0xf0]  ;;  %v5653_v50 = vld [vmem:[%s8683_s1 + $0x5b4] sm:$0xf] }
  0x8e   : > { %1746 = vmatpush.bf16.msrb.mxu3 %v4132_v12  ;;  %1708 = vmatmul.bf16.vlgmr.msrb.gmra.mxu0 %v6372_v44  ;;  %v5559_v44 = vld [vmem:[%s8683_s1 + $0x2c4] sm:$0xf]  ;;  %v4412_v12 = vor.u32 %v5589_v4, %v4409_v5  ;;  %v4212_v18 = vor.u32 %v5539_v9, %v4209_v10  ;;  %v4689_v10 = vld [vmem:[%s8683_s1 + $0x5e8] sm:$0xf0] }
  0x8f   : > { %1752 = vmatpush.bf16.msra.mxu0 %v4252_v13  ;;  %1721 = vmatmul.bf16.vlgmr.msrb.gmra.mxu1 %v6382_v48  ;;  %v4289_v48 = vld [vmem:[%s8683_s1 + $0x2c8] sm:$0xf0]  ;;  %v5627_v4 = vld [vmem:[%s8683_s1 + $0x4e4] sm:$0xf] }
  0x90   : > { %1765 = vmatpush.bf16.msra.mxu1 %v4316_v14  ;;  %1734 = vmatmul.bf16.vlgmr.msrb.gmra.mxu2 %v6370_v43  ;;  %v4364_v43 = vor.u32 %v5577_v39, %v4361_v40  ;;  %v4292_v57 = vor.u32 %v5559_v44, %v4289_v48  ;;  %v4273_v13 = vld [vmem:[%s8683_s1 + $0x2a8] sm:$0xf0]  ;;  %v5571_v14 = vld [vmem:[%s8683_s1 + $0x324] sm:$0xf]  ;;  %v5613_v44 = vld [vmem:[%s8683_s1 + $0x474] sm:$0xf] }
  0x91   : > { %1778 = vmatpush.bf16.msra.mxu2 %v4380_v15  ;;  %1747 = vmatmul.bf16.vlgmr.msrb.gmra.mxu3 %v6380_v47  ;;  %v4428_v47 = vor.u32 %v5593_v41, %v4425_v42  ;;  %v4337_v15 = vld [vmem:[%s8683_s1 + $0x328] sm:$0xf0]  ;;  %v5551_v41 = vld [vmem:[%s8683_s1 + $0x284] sm:$0xf]  ;;  %v5629_v48 = vld [vmem:[%s8683_s1 + $0x4f4] sm:$0xf] }
  0x92   : > { %1791 = vmatpush.bf16.msra.mxu3 %v4444_v19  ;;  %v4276_v19 = vor.u32 %v5555_v11, %v4273_v13  ;;  %v4340_v20 = vor.u32 %v5571_v14, %v4337_v15  ;;  %v4257_v42 = vld [vmem:[%s8683_s1 + $0x288] sm:$0xf0]  ;;  %v5659_v9 = vld [vmem:[%s8683_s1 + $0x5e4] sm:$0xf]  ;;  %v4500_v11 = vor.u32 %v5611_v2, %v4497_v3  ;;  %v5609_v14 = vld [vmem:[%s8683_s1 + $0x454] sm:$0xf] }
  0x93   : > { %1753 = vmatpush.bf16.msra.mxu0 %v4244_v26  ;;  %v4265_v26 = vld [vmem:[%s8683_s1 + $0x298] sm:$0xf0]  ;;  %v4692_v17 = vor.u32 %v5659_v9, %v4689_v10  ;;  %v4465_v53 = vld [vmem:[%s8683_s1 + $0x428] sm:$0xf0]  ;;  %v5619_v54 = vld [vmem:[%s8683_s1 + $0x4a4] sm:$0xf] }
  0x94   : > { %1766 = vmatpush.bf16.msra.mxu1 %v4308_v28  ;;  %v5569_v28 = vld [vmem:[%s8683_s1 + $0x314] sm:$0xf]  ;;  %v4268_v39 = vor.u32 %v5553_v23, %v4265_v26  ;;  %v4489_v15 = vld [vmem:[%s8683_s1 + $0x458] sm:$0xf0]  ;;  %v5607_v26 = vld [vmem:[%s8683_s1 + $0x444] sm:$0xf] }
  0x95   : > { %1779 = vmatpush.bf16.msra.mxu2 %v4372_v29  ;;  %v4329_v29 = vld [vmem:[%s8683_s1 + $0x318] sm:$0xf0]  ;;  %v4492_v22 = vor.u32 %v5609_v14, %v4489_v15  ;;  %v5601_v3 = vld [vmem:[%s8683_s1 + $0x414] sm:$0xf] }
  0x96   : > { %1792 = vmatpush.bf16.msra.mxu3 %v4436_v37  ;;  %v5535_v37 = vld [vmem:[%s8683_s1 + $0x204] sm:$0xf]  ;;  %v4332_v40 = vor.u32 %v5569_v28, %v4329_v29  ;;  %v4481_v28 = vld [vmem:[%s8683_s1 + $0x448] sm:$0xf0]  ;;  %v4585_v9 = vld [vmem:[%s8683_s1 + $0x518] sm:$0xf0] }
  0x97   : > { %1754 = vmatpush.bf16.msra.mxu0 %v4236_v45  ;;  %v5567_v45 = vld [vmem:[%s8683_s1 + $0x304] sm:$0xf]  ;;  %v4196_v51 = vor.u32 %v5535_v37, %v4193_v38  ;;  %v4484_v37 = vor.u32 %v5607_v26, %v4481_v28  ;;  %v5649_v10 = vld [vmem:[%s8683_s1 + $0x594] sm:$0xf] }
  0x98   : > { %1767 = vmatpush.bf16.msra.mxu1 %v4300_v46  ;;  %v4396_v46 = vor.u32 %v5585_v30, %v4393_v33  ;;  %v5639_v29 = vld [vmem:[%s8683_s1 + $0x544] sm:$0xf]  ;;  %v4609_v30 = vld [vmem:[%s8683_s1 + $0x548] sm:$0xf0] }
  0x99   : > { %1780 = vmatpush.bf16.msra.mxu2 %v4364_v43  ;;  %v4321_v43 = vld [vmem:[%s8683_s1 + $0x308] sm:$0xf0]  ;;  %v5655_v33 = vld [vmem:[%s8683_s1 + $0x5c4] sm:$0xf] }
  0x9a   : > { %1793 = vmatpush.bf16.msra.mxu3 %v4428_v47  ;;  %v4505_v47 = vld [vmem:[%s8683_s1 + $0x478] sm:$0xf0] }
  0x9b   : > { %1755 = vmatpush.bf16.msra.mxu0 %v4228_v56  ;;  %v4260_v56 = vor.u32 %v5551_v41, %v4257_v42  ;;  %v4508_v63 = vor.u32 %v5613_v44, %v4505_v47  ;;  %v4473_v41 = vld [vmem:[%s8683_s1 + $0x438] sm:$0xf0]  ;;  %v5621_v42 = vld [vmem:[%s8683_s1 + $0x4b4] sm:$0xf] }
  0x9c   : > { %1768 = vmatpush.bf16.msra.mxu1 %v4292_v57  ;;  %v4324_v57 = vor.u32 %v5567_v45, %v4321_v43  ;;  %v5637_v43 = vld [vmem:[%s8683_s1 + $0x534] sm:$0xf]  ;;  %v4665_v44 = vld [vmem:[%s8683_s1 + $0x5b8] sm:$0xf0] }
  0x9d   : > { %1781 = vmatpush.bf16.msra.mxu2 %v4356_v60  ;;  %v5661_v60 = vld [vmem:[%s8683_s1 + $0x5f4] sm:$0xf] }
  0x9e   : > { %1794 = vmatpush.bf16.msra.mxu3 %v4420_v0  ;;  %v4572_v0 = vor.u32 %v5629_v48, %v4569_v52  ;;  %v4700_v5 = vor.u32 %v5661_v60, %v4697_v61  ;;  %v5603_v52 = vld [vmem:[%s8683_s1 + $0x424] sm:$0xf]  ;;  %v4593_v61 = vld [vmem:[%s8683_s1 + $0x528] sm:$0xf0] }
  0x9f   : > { %1756 = vmatpush.bf16.msra.mxu0 %v4220_v6  ;;  %v4561_v6 = vld [vmem:[%s8683_s1 + $0x4e8] sm:$0xf0]  ;;  %v5635_v60 = vld [vmem:[%s8683_s1 + $0x524] sm:$0xf] }
  0xa0   : > { %1769 = vmatpush.bf16.msra.mxu1 %v4284_v7  ;;  %v5643_v7 = vld [vmem:[%s8683_s1 + $0x564] sm:$0xf]  ;;  %v4596_v2 = vor.u32 %v5635_v60, %v4593_v61 }
  0xa1   : > { %1782 = vmatpush.bf16.msra.mxu2 %v4348_v8  ;;  %v4625_v8 = vld [vmem:[%s8683_s1 + $0x568] sm:$0xf0] }
  0xa2   : > { %1795 = vmatpush.bf16.msra.mxu3 %v4412_v12  ;;  %v4564_v12 = vor.u32 %v5627_v4, %v4561_v6  ;;  %v4628_v13 = vor.u32 %v5643_v7, %v4625_v8  ;;  %v4457_v4 = vld [vmem:[%s8683_s1 + $0x418] sm:$0xf0]  ;;  %v5633_v8 = vld [vmem:[%s8683_s1 + $0x514] sm:$0xf] }
  0xa3   : > { %1757 = vmatpush.bf16.msra.mxu0 %v4212_v18  ;;  %v4553_v18 = vld [vmem:[%s8683_s1 + $0x4d8] sm:$0xf0]  ;;  %v4588_v15 = vor.u32 %v5633_v8, %v4585_v9  ;;  %v4799_v9 = vld [vmem:[%s8685_s3 + $0xc0] sm:$0xf] }
  0xa4   : > { %1770 = vmatpush.bf16.msra.mxu1 %v4276_v19  ;;  %v5641_v19 = vld [vmem:[%s8683_s1 + $0x554] sm:$0xf]  ;;  %v4556_v23 = vor.u32 %v5625_v16, %v4553_v18  ;;  %v4521_v7 = vld [vmem:[%s8683_s1 + $0x498] sm:$0xf0]  ;;  %v4449_v16 = vld [vmem:[%s8683_s1 + $0x408] sm:$0xf0] }
  0xa5   : > { %1783 = vmatpush.bf16.msra.mxu2 %v4340_v20  ;;  %v4617_v20 = vld [vmem:[%s8683_s1 + $0x558] sm:$0xf0]  ;;  %v4513_v18 = vld [vmem:[%s8683_s1 + $0x488] sm:$0xf0] }
  0xa6   : > { %1796 = vmatpush.bf16.msra.mxu3 %v4404_v24  ;;  %v4620_v24 = vor.u32 %v5641_v19, %v4617_v20  ;;  %v5631_v20 = vld [vmem:[%s8683_s1 + $0x504] sm:$0xf] }
  0xa7   : > { %1758 = vmatpush.bf16.msra.mxu0 %v4204_v34  ;;  %v4673_v34 = vld [vmem:[%s8683_s1 + $0x5c8] sm:$0xf0] }
  0xa8   : > { %1771 = vmatpush.bf16.msra.mxu1 %v4268_v39  ;;  %v4612_v39 = vor.u32 %v5639_v29, %v4609_v30  ;;  %v4676_v45 = vor.u32 %v5655_v33, %v4673_v34 }
  0xa9   : > { %1784 = vmatpush.bf16.msra.mxu2 %v4332_v40  ;;  %v5605_v40 = vld [vmem:[%s8683_s1 + $0x434] sm:$0xf] }
  0xaa   : > { %1797 = vmatpush.bf16.msra.mxu3 %v4396_v46  ;;  %v4537_v46 = vld [vmem:[%s8683_s1 + $0x4b8] sm:$0xf0]  ;;  %v4476_v47 = vor.u32 %v5605_v40, %v4473_v41  ;;  %v5735_v41 = vld [vmem:[%s8685_s3 + $0x244] sm:$0xf] }
  0xab   : > { %1759 = vmatpush.bf16.msra.mxu0 %v4196_v51  ;;  %v4540_v48 = vor.u32 %v5621_v42, %v4537_v46  ;;  %v4604_v51 = vor.u32 %v5637_v43, %v4601_v49  ;;  %v4993_v42 = vld [vmem:[%s8685_s3 + $0x270] sm:$0xf0]  ;;  %v4943_v49 = vld [vmem:[%s8685_s3 + $0x1e0] sm:$0xf] }
  0xac   : > { %1772 = vmatpush.bf16.msra.mxu1 %v4260_v56  ;;  %v4668_v56 = vor.u32 %v5653_v50, %v4665_v44  ;;  %v4996_v43 = vor.u32 %v5735_v41, %v4993_v42  ;;  %v5729_v50 = vld [vmem:[%s8685_s3 + $0x20c] sm:$0xf0] }
  0xad   : > { %1785 = vmatpush.bf16.msra.mxu2 %v4324_v57  ;;  %v4529_v57 = vld [vmem:[%s8683_s1 + $0x4a8] sm:$0xf0] }
  0xae   : > { %1798 = vmatpush.bf16.msra.mxu3 %v4388_v62  ;;  %1760 = vmatmul.bf16.vlgmr.msra.gmra.mxu0 %v6511_v55  ;;  %v5623_v55 = vld [vmem:[%s8683_s1 + $0x4c4] sm:$0xf] }
  0xaf   : > { %1804 = vmatpush.bf16.msrb.mxu0 %v4508_v63  ;;  %1773 = vmatmul.bf16.vlgmr.msra.gmra.mxu1 %v6521_v59  ;;  %v4545_v59 = vld [vmem:[%s8683_s1 + $0x4c8] sm:$0xf0]  ;;  %v5651_v62 = vld [vmem:[%s8683_s1 + $0x5a4] sm:$0xf] }
  0xb0   : > { %1817 = vmatpush.bf16.msrb.mxu1 %v4572_v0  ;;  %1786 = vmatmul.bf16.vlgmr.msra.gmra.mxu2 %v6483_v35  ;;  %v4681_v35 = vld [vmem:[%s8683_s1 + $0x5d8] sm:$0xf0]  ;;  %v4548_v38 = vor.u32 %v5623_v55, %v4545_v59  ;;  %v4657_v63 = vld [vmem:[%s8683_s1 + $0x5a8] sm:$0xf0]  ;;  %v4468_v0 = vor.u32 %v5603_v52, %v4465_v53  ;;  %v5747_v55 = vld [vmem:[%s8685_s3 + $0x2a4] sm:$0xf] }
  0xb1   : > { %1830 = vmatpush.bf16.msrb.mxu2 %v4636_v1  ;;  %1799 = vmatmul.bf16.vlgmr.msra.gmra.mxu3 %v6519_v58  ;;  %v4684_v58 = vor.u32 %v5657_v21, %v4681_v35  ;;  %v4532_v1 = vor.u32 %v5619_v54, %v4529_v57  ;;  %v4660_v6 = vor.u32 %v5651_v62, %v4657_v63  ;;  %v4577_v21 = vld [vmem:[%s8683_s1 + $0x508] sm:$0xf0]  ;;  %v5647_v35 = vld [vmem:[%s8683_s1 + $0x584] sm:$0xf]  ;;  %v4895_v53 = vld [vmem:[%s8685_s3 + $0x180] sm:$0xf] }
  0xb2   : > { %1843 = vmatpush.bf16.msrb.mxu3 %v4700_v5  ;;  %v5617_v5 = vld [vmem:[%s8683_s1 + $0x494] sm:$0xf]  ;;  %v1553_v26 = vpop.f32.mrf.mxu0  ;;  %v4580_v30 = vor.u32 %v5631_v20, %v4577_v21  ;;  %v5717_v54 = vld [vmem:[%s8685_s3 + $0x1ac] sm:$0xf0]  ;;  %v5711_v57 = vld [vmem:[%s8685_s3 + $0x184] sm:$0xf] }
  0xb3   : > { %1805 = vmatpush.bf16.msrb.mxu0 %v4500_v11  ;;  %v4649_v11 = vld [vmem:[%s8683_s1 + $0x598] sm:$0xf0]  ;;  %v4524_v14 = vor.u32 %v5617_v5, %v4521_v7  ;;  %v4896_v60 = vor.u32 %v5717_v54, %v4895_v53  ;;  %v5675_v20 = vld [vmem:[%s8685_s3 + $0x64] sm:$0xf]  ;;  %v4753_v21 = vld [vmem:[%s8685_s3 + $0x90] sm:$0xf0] }
  0xb4   : > { %1818 = vmatpush.bf16.msrb.mxu1 %v4564_v12  ;;  %v4460_v12 = vor.u32 %v5601_v3, %v4457_v4  ;;  %v4652_v19 = vor.u32 %v5649_v10, %v4649_v11  ;;  %v4849_v3 = vld [vmem:[%s8685_s3 + $0x150] sm:$0xf0]  ;;  %v5693_v10 = vld [vmem:[%s8685_s3 + $0xec] sm:$0xf0] }
  0xb5   : > { %1831 = vmatpush.bf16.msrb.mxu2 %v4628_v13  ;;  %v5599_v13 = vld [vmem:[%s8683_s1 + $0x404] sm:$0xf] }
  0xb6   : > { %1844 = vmatpush.bf16.msrb.mxu3 %v4692_v17  ;;  %v5615_v17 = vld [vmem:[%s8683_s1 + $0x484] sm:$0xf]  ;;  %v4452_v28 = vor.u32 %v5599_v13, %v4449_v16  ;;  %v1566_v59 = vpop.f32.mrf.mxu1  ;;  %v4801_v13 = vld [vmem:[%s8685_s3 + $0xf0] sm:$0xf0] }
  0xb7   : > { %1806 = vmatpush.bf16.msrb.mxu0 %v4492_v22  ;;  %v4641_v22 = vld [vmem:[%s8683_s1 + $0x588] sm:$0xf0]  ;;  %v4516_v29 = vor.u32 %v5615_v17, %v4513_v18  ;;  %v4751_v17 = vld [vmem:[%s8685_s3 + $0x60] sm:$0xf]  ;;  %v5681_v18 = vld [vmem:[%s8685_s3 + $0x8c] sm:$0xf0] }
  0xb8   : > { %1819 = vmatpush.bf16.msrb.mxu1 %v4556_v23  ;;  %v5039_v23 = vld [vmem:[%s8685_s3 + $0x2a0] sm:$0xf]  ;;  %v4644_v33 = vor.u32 %v5647_v35, %v4641_v22  ;;  %v4752_v22 = vor.u32 %v5681_v18, %v4751_v17 }
  0xb9   : > { %1832 = vmatpush.bf16.msrb.mxu2 %v4620_v24  ;;  %v5753_v24 = vld [vmem:[%s8685_s3 + $0x2cc] sm:$0xf0]  ;;  %v1579_v40 = vpop.f32.mrf.mxu2 }
  0xba   : > { %1845 = vmatpush.bf16.msrb.mxu3 %v4684_v58  ;;  %v5041_v58 = vld [vmem:[%s8685_s3 + $0x2d0] sm:$0xf0]  ;;  %v5040_v34 = vor.u32 %v5753_v24, %v5039_v23  ;;  %v1592_v46 = vpop.f32.mrf.mxu3  ;;  %v1555_v44 = vpop.f32.mrf.mxu0 }
  0xbb   : > { %1807 = vmatpush.bf16.msrb.mxu0 %v4484_v37  ;;  %v5044_v37 = vor.u32 %v5747_v55, %v5041_v58  ;;  %v5669_v55 = vld [vmem:[%s8685_s3 + $0x2c] sm:$0xf0]  ;;  %v5663_v58 = vld [vmem:[%s8685_s3 + $0x4] sm:$0xf] }
  0xbc   : > { %1820 = vmatpush.bf16.msrb.mxu1 %v4548_v38  ;;  %v4991_v38 = vld [vmem:[%s8685_s3 + $0x240] sm:$0xf] }
  0xbd   : > { %1833 = vmatpush.bf16.msrb.mxu2 %v4612_v39  ;;  %v5741_v39 = vld [vmem:[%s8685_s3 + $0x26c] sm:$0xf0] }
  0xbe   : > { %1846 = vmatpush.bf16.msrb.mxu3 %v4676_v45  ;;  %v4992_v45 = vor.u32 %v5741_v39, %v4991_v38 }
  0xbf   : > { %1808 = vmatpush.bf16.msrb.mxu0 %v4476_v47  ;;  %v7280_v47 = vld [vmem:[%s8684_s2] sm:$0x3] }
  0xc0   : > { %1821 = vmatpush.bf16.msrb.mxu1 %v4540_v48  ;;  %v4945_v48 = vld [vmem:[%s8685_s3 + $0x210] sm:$0xf0] }
  0xc1   : > { %1834 = vmatpush.bf16.msrb.mxu2 %v4604_v51  ;;  %v1568_v51 = vpop.f32.mrf.mxu1 }
  0xc2   : > { %1847 = vmatpush.bf16.msrb.mxu3 %v4668_v56  ;;  %v1581_v56 = vpop.f32.mrf.mxu2  ;;  %v1594_v61 = vpop.f32.mrf.mxu3  ;;  %v4951_v51 = vld [vmem:[%s8685_s3 + $0x1e8] sm:$0xf] }
  0xc3   : > { %1809 = vmatpush.bf16.msrb.mxu0 %v4468_v0  ;;  %v4847_v0 = vld [vmem:[%s8685_s3 + $0x120] sm:$0xf]  ;;  %v4905_v61 = vld [vmem:[%s8685_s3 + $0x1b8] sm:$0xf0] }
  0xc4   : > { %1822 = vmatpush.bf16.msrb.mxu1 %v4532_v1  ;;  %v5705_v1 = vld [vmem:[%s8685_s3 + $0x14c] sm:$0xf0] }
  0xc5   : > { %1835 = vmatpush.bf16.msrb.mxu2 %v4596_v2  ;;  %v5699_v2 = vld [vmem:[%s8685_s3 + $0x124] sm:$0xf]  ;;  %v4848_v5 = vor.u32 %v5705_v1, %v4847_v0 }
  0xc6   : > { %1848 = vmatpush.bf16.msrb.mxu3 %v4660_v6  ;;  %v4852_v8 = vor.u32 %v5699_v2, %v4849_v3  ;;  %v4855_v3 = vld [vmem:[%s8685_s3 + $0x128] sm:$0xf] }
  0xc7   : > { %1810 = vmatpush.bf16.msrb.mxu0 %v4460_v12  ;;  %v5687_v12 = vld [vmem:[%s8685_s3 + $0xc4] sm:$0xf] }
  0xc8   : > { %1823 = vmatpush.bf16.msrb.mxu1 %v4524_v14  ;;  %v4800_v14 = vor.u32 %v5693_v10, %v4799_v9  ;;  %v4804_v16 = vor.u32 %v5687_v12, %v4801_v13  ;;  %v4807_v10 = vld [vmem:[%s8685_s3 + $0xc8] sm:$0xf]  ;;  %v5688_v13 = vld [vmem:[%s8685_s3 + $0xcc] sm:$0xf] }
  0xc9   : > { %1836 = vmatpush.bf16.msrb.mxu2 %v4588_v15 }
  0xca   : > { %1849 = vmatpush.bf16.msrb.mxu3 %v4652_v19 }
  0xcb   : > { %1811 = vmatpush.bf16.msrb.mxu0 %v4452_v28  ;;  %v1605_v4 = vpop.f32.mrf.mxu0  ;;  %v4703_v28 = vld [vmem:[%s8685_s3] sm:$0xf] }
  0xcc   : > { %1824 = vmatpush.bf16.msrb.mxu1 %v4516_v29  ;;  %v1618_v6 = vpop.f32.mrf.mxu1  ;;  %v4705_v29 = vld [vmem:[%s8685_s3 + $0x30] sm:$0xf0]  ;;  %v4704_v38 = vor.u32 %v5669_v55, %v4703_v28 }
  0xcd   : > { %1837 = vmatpush.bf16.msrb.mxu2 %v4580_v30  ;;  %v5047_v30 = vld [vmem:[%s8685_s3 + $0x2a8] sm:$0xf] }
  0xce   : > { %1850 = vmatpush.bf16.msrb.mxu3 %v4644_v33  ;;  %1812 = vmatmul.bf16.vlgmr.msrb.gmra.mxu0 %v6681_v27  ;;  %v5723_v27 = vld [vmem:[%s8685_s3 + $0x1e4] sm:$0xf]  ;;  %v5754_v33 = vld [vmem:[%s8685_s3 + $0x2d4] sm:$0xf0] }
  0xcf   : > { %3040 = vmatpush.bf16.msra.mxu0 %v5040_v34  ;;  %1825 = vmatmul.bf16.vlgmr.msrb.gmra.mxu1 %v6694_v32  ;;  %v4944_v32 = vor.u32 %v5729_v50, %v4943_v49  ;;  %v4948_v52 = vor.u32 %v5723_v27, %v4945_v48  ;;  %v5748_v34 = vld [vmem:[%s8685_s3 + $0x2ac] sm:$0xf]  ;;  %v5048_v41 = vor.u32 %v5754_v33, %v5047_v30  ;;  %v5001_v50 = vld [vmem:[%s8685_s3 + $0x278] sm:$0xf0]  ;;  %v5055_v33 = vld [vmem:[%s8685_s3 + $0x2b0] sm:$0xf] }
  0xd0   : > { %1838 = vmatmul.bf16.vlgmr.msrb.gmra.mxu2 %v6692_v31  ;;  %v538_v31 = vperm.slane %v7280_v47, 0  ;;  %v5736_v49 = vld [vmem:[%s8685_s3 + $0x24c] sm:$0xf]  ;;  %v4713_v30 = vld [vmem:[%s8685_s3 + $0x38] sm:$0xf0] }
  0xd1   : > { %3066 = vmatpush.bf16.msra.mxu2 %v5044_v37  ;;  %1851 = vmatmul.bf16.vlgmr.msrb.gmra.mxu3 %v6702_v36  ;;  %v4897_v36 = vld [vmem:[%s8685_s3 + $0x1b0] sm:$0xf0]  ;;  %v5049_v37 = vld [vmem:[%s8685_s3 + $0x2d8] sm:$0xf0]  ;;  %v5004_v48 = vor.u32 %v5736_v49, %v5001_v50  ;;  %v5849_v49 = vld [vmem:[%s8685_s3 + $0x5cc] sm:$0xf0] }
  0xd2   : > { %v1554_v62 = vadd.f32 %v1553_v26, %v538_v31  ;;  %v4900_v63 = vor.u32 %v5711_v57, %v4897_v36  ;;  %v4756_v26 = vor.u32 %v5675_v20, %v4753_v21  ;;  %v5052_v42 = vor.u32 %v5748_v34, %v5049_v37  ;;  %v5724_v31 = vld [vmem:[%s8685_s3 + $0x1ec] sm:$0xf]  ;;  %v4903_v57 = vld [vmem:[%s8685_s3 + $0x188] sm:$0xf]  ;;  %v5718_v36 = vld [vmem:[%s8685_s3 + $0x1b4] sm:$0xf0] }
  0xd3   : > { %3041 = vmatpush.bf16.msra.mxu0 %v4992_v45  ;;  %v1631_v11 = vpop.f32.mrf.mxu2  ;;  %v1607_v35 = vpop.f32.mrf.mxu0  ;;  %v4999_v45 = vld [vmem:[%s8685_s3 + $0x248] sm:$0xf]  ;;  %v4904_v0 = vor.u32 %v5718_v36, %v4903_v57  ;;  %v5755_v34 = vld [vmem:[%s8685_s3 + $0x2dc] sm:$0xf0]  ;;  %v5843_v50 = vld [vmem:[%s8685_s3 + $0x5a4] sm:$0xf] }
  0xd4   : > { %v1567_v7 = vadd.f32 %v1566_v59, %v1554_v62  ;;  %v1644_v19 = vpop.f32.mrf.mxu3  ;;  %v1620_v23 = vpop.f32.mrf.mxu1  ;;  %v4759_v21 = vld [vmem:[%s8685_s3 + $0x68] sm:$0xf]  ;;  %v5682_v35 = vld [vmem:[%s8685_s3 + $0x94] sm:$0xf0]  ;;  %v5375_v57 = vld [vmem:[%s8685_s3 + $0x540] sm:$0xf] }
  0xd5   : > { %3067 = vmatpush.bf16.msra.mxu2 %v4996_v43  ;;  %v4760_v28 = vor.u32 %v5682_v35, %v4759_v21  ;;  %v5837_v36 = vld [vmem:[%s8685_s3 + $0x56c] sm:$0xf0] }
  0xd6   : > { %v1580_v15 = vadd.f32 %v1579_v40, %v1567_v7  ;;  %v4708_v40 = vor.u32 %v5663_v58, %v4705_v29  ;;  %v4857_v7 = vld [vmem:[%s8685_s3 + $0x158] sm:$0xf0]  ;;  %v4711_v58 = vld [vmem:[%s8685_s3 + $0x8] sm:$0xf]  ;;  %v5664_v29 = vld [vmem:[%s8685_s3 + $0xc] sm:$0xf] }
  0xd7   : > { %3042 = vmatpush.bf16.msra.mxu0 %v4944_v32  ;;  %v5730_v32 = vld [vmem:[%s8685_s3 + $0x214] sm:$0xf0] }
  0xd8   : > { %v1593_v24 = vadd.f32 %v1592_v46, %v1580_v15  ;;  %v5742_v46 = vld [vmem:[%s8685_s3 + $0x274] sm:$0xf0]  ;;  %v4952_v54 = vor.u32 %v5730_v32, %v4951_v51  ;;  %v5743_v51 = vld [vmem:[%s8685_s3 + $0x27c] sm:$0xf0] }
  0xd9   : > { %3068 = vmatpush.bf16.msra.mxu2 %v4948_v52  ;;  %v5000_v27 = vor.u32 %v5742_v46, %v4999_v45  ;;  %v4953_v52 = vld [vmem:[%s8685_s3 + $0x218] sm:$0xf0]  ;;  %v5056_v46 = vor.u32 %v5755_v34, %v5055_v33  ;;  %v5795_v33 = vld [vmem:[%s8685_s3 + $0x424] sm:$0xf]  ;;  %v5233_v34 = vld [vmem:[%s8685_s3 + $0x450] sm:$0xf0] }
  0xda   : > { %v1606_v39 = vadd.f32 %v1605_v4, %v1593_v24  ;;  %v4956_v56 = vor.u32 %v5724_v31, %v4953_v52  ;;  %v5706_v4 = vld [vmem:[%s8685_s3 + $0x154] sm:$0xf0]  ;;  %v5676_v24 = vld [vmem:[%s8685_s3 + $0x6c] sm:$0xf]  ;;  %v5425_v31 = vld [vmem:[%s8685_s3 + $0x5d0] sm:$0xf0] }
  0xdb   : > { %3043 = vmatpush.bf16.msra.mxu0 %v4896_v60  ;;  %v1633_v59 = vpop.f32.mrf.mxu2  ;;  %v5712_v60 = vld [vmem:[%s8685_s3 + $0x18c] sm:$0xf]  ;;  %v5737_v52 = vld [vmem:[%s8685_s3 + $0x254] sm:$0xf] }
  0xdc   : > { %v1646_v43 = vpop.f32.mrf.mxu3  ;;  %v1619_v44 = vadd.f32 %v1618_v6, %v1606_v39  ;;  %v4908_v2 = vor.u32 %v5712_v60, %v4905_v61  ;;  %v5700_v6 = vld [vmem:[%s8685_s3 + $0x12c] sm:$0xf]  ;;  %v5670_v59 = vld [vmem:[%s8685_s3 + $0x34] sm:$0xf0]  ;;  %v5749_v39 = vld [vmem:[%s8685_s3 + $0x2b4] sm:$0xf] }
  0xdd   : > { %3069 = vmatpush.bf16.msra.mxu2 %v4900_v63  ;;  %v4860_v9 = vor.u32 %v5700_v6, %v4857_v7  ;;  %v5423_v43 = vld [vmem:[%s8685_s3 + $0x5a0] sm:$0xf]  ;;  %v5831_v60 = vld [vmem:[%s8685_s3 + $0x544] sm:$0xf]  ;;  %v5825_v6 = vld [vmem:[%s8685_s3 + $0x50c] sm:$0xf0] }
  0xde   : > { %v1632_v53 = vadd.f32 %v1631_v11, %v1619_v44  ;;  %v5694_v11 = vld [vmem:[%s8685_s3 + $0xf4] sm:$0xf0]  ;;  %v5424_v32 = vor.u32 %v5849_v49, %v5423_v43  ;;  %v5819_v7 = vld [vmem:[%s8685_s3 + $0x4e4] sm:$0xf]  ;;  %v5236_v43 = vor.u32 %v5795_v33, %v5233_v34  ;;  %v5183_v49 = vld [vmem:[%s8685_s3 + $0x3c0] sm:$0xf] }
  0xdf   : > { %3044 = vmatpush.bf16.msra.mxu0 %v4848_v5  ;;  %v4808_v18 = vor.u32 %v5694_v11, %v4807_v10  ;;  %v4911_v11 = vld [vmem:[%s8685_s3 + $0x190] sm:$0xf]  ;;  %v5738_v33 = vld [vmem:[%s8685_s3 + $0x25c] sm:$0xf]  ;;  %v5017_v34 = vld [vmem:[%s8685_s3 + $0x288] sm:$0xf0] }
  0xe0   : > { %v1645_v62 = vadd.f32 %v1644_v19, %v1632_v53  ;;  %v5009_v53 = vld [vmem:[%s8685_s3 + $0x280] sm:$0xf0]  ;;  %3053 = vmatpush.bf16.msra.mxu1 %v5424_v32 }
  0xe1   : > { %3070 = vmatpush.bf16.msra.mxu2 %v4852_v8  ;;  %v4856_v8 = vor.u32 %v5706_v4, %v4855_v3  ;;  %v5012_v61 = vor.u32 %v5737_v52, %v5009_v53  ;;  %v4961_v3 = vld [vmem:[%s8685_s3 + $0x220] sm:$0xf0]  ;;  %v4767_v52 = vld [vmem:[%s8685_s3 + $0x70] sm:$0xf]  ;;  %v5683_v53 = vld [vmem:[%s8685_s3 + $0x9c] sm:$0xf0] }
  0xe3   : > { %3045 = vmatpush.bf16.msra.mxu0 %v4800_v14  ;;  %v4809_v14 = vld [vmem:[%s8685_s3 + $0xf8] sm:$0xf0] }
  0xe4   : > { %v4812_v20 = vor.u32 %v5688_v13, %v4809_v14  ;;  %v5713_v13 = vld [vmem:[%s8685_s3 + $0x194] sm:$0xf] }
  0xe5   : > { %3071 = vmatpush.bf16.msra.mxu2 %v4804_v16 }
  0xe7   : > { %3046 = vmatpush.bf16.msra.mxu0 %v4752_v22 }
  0xe9   : > { %3072 = vmatpush.bf16.msra.mxu2 %v4756_v26  ;;  %v4761_v26 = vld [vmem:[%s8685_s3 + $0x98] sm:$0xf0] }
  0xea   : > { %v4764_v55 = vor.u32 %v5676_v24, %v4761_v26  ;;  %v5701_v24 = vld [vmem:[%s8685_s3 + $0x134] sm:$0xf] }
  0xeb   : > { %3047 = vmatpush.bf16.msra.mxu0 %v4704_v38  ;;  %v1657_v63 = vpop.f32.mrf.mxu0  ;;  %v4712_v38 = vor.u32 %v5670_v59, %v4711_v58 }
  0xec   : > { %v1670_v1 = vpop.f32.mrf.mxu1  ;;  %v1658_v5 = vadd.f32 %v1657_v63, %v1645_v62  ;;  %v4959_v62 = vld [vmem:[%s8685_s3 + $0x1f0] sm:$0xf]  ;;  %v5731_v63 = vld [vmem:[%s8685_s3 + $0x21c] sm:$0xf0] }
  0xed   : > { %3073 = vmatpush.bf16.msra.mxu2 %v4708_v40  ;;  %v5057_v40 = vld [vmem:[%s8685_s3 + $0x2e0] sm:$0xf0] }
  0xee   : > { %v1671_v12 = vadd.f32 %v1670_v1, %v1658_v5  ;;  %v5377_v1 = vld [vmem:[%s8685_s3 + $0x570] sm:$0xf0]  ;;  %v5327_v5 = vld [vmem:[%s8685_s3 + $0x4e0] sm:$0xf] }
  0xef   : > { %3092 = vmatpush.bf16.msrb.mxu0 %v5048_v41  ;;  %v5380_v4 = vor.u32 %v5831_v60, %v5377_v1  ;;  %v5328_v14 = vor.u32 %v5825_v6, %v5327_v5  ;;  %v5137_v1 = vld [vmem:[%s8685_s3 + $0x390] sm:$0xf0]  ;;  %v5671_v5 = vld [vmem:[%s8685_s3 + $0x3c] sm:$0xf0] }
  0xf0   : > { %v5665_v6 = vld [vmem:[%s8685_s3 + $0x14] sm:$0xf] }
  0xf1   : > { %3118 = vmatpush.bf16.msrb.mxu2 %v5052_v42  ;;  %v4716_v42 = vor.u32 %v5664_v29, %v4713_v30  ;;  %v5231_v29 = vld [vmem:[%s8685_s3 + $0x420] sm:$0xf]  ;;  %v5801_v30 = vld [vmem:[%s8685_s3 + $0x44c] sm:$0xf0] }
  0xf3   : > { %3093 = vmatpush.bf16.msrb.mxu0 %v5000_v27  ;;  %v1683_v15 = vpop.f32.mrf.mxu2  ;;  %v1659_v19 = vpop.f32.mrf.mxu0  ;;  %v5060_v27 = vor.u32 %v5749_v39, %v5057_v40  ;;  %v4815_v39 = vld [vmem:[%s8685_s3 + $0xd0] sm:$0xf]  ;;  %v5695_v40 = vld [vmem:[%s8685_s3 + $0xfc] sm:$0xf0] }
  0xf4   : > { %v1684_v16 = vadd.f32 %v1683_v15, %v1671_v12  ;;  %v1696_v17 = vpop.f32.mrf.mxu3  ;;  %v1672_v22 = vpop.f32.mrf.mxu1  ;;  %v5719_v12 = vld [vmem:[%s8685_s3 + $0x1bc] sm:$0xf0]  ;;  %v4913_v15 = vld [vmem:[%s8685_s3 + $0x1c0] sm:$0xf0]  ;;  %v4816_v32 = vor.u32 %v5695_v40, %v4815_v39  ;;  %v4967_v40 = vld [vmem:[%s8685_s3 + $0x1f8] sm:$0xf] }
  0xf5   : > { %3119 = vmatpush.bf16.msrb.mxu2 %v5004_v48  ;;  %v5007_v48 = vld [vmem:[%s8685_s3 + $0x250] sm:$0xf]  ;;  %v5807_v19 = vld [vmem:[%s8685_s3 + $0x484] sm:$0xf]  ;;  %v4912_v21 = vor.u32 %v5719_v12, %v4911_v11  ;;  %v4916_v35 = vor.u32 %v5713_v13, %v4913_v15  ;;  %v5750_v11 = vld [vmem:[%s8685_s3 + $0x2bc] sm:$0xf] }
  0xf6   : > { %v1697_v23 = vadd.f32 %v1696_v17, %v1684_v16  ;;  %v5279_v17 = vld [vmem:[%s8685_s3 + $0x480] sm:$0xf]  ;;  %v4863_v22 = vld [vmem:[%s8685_s3 + $0x130] sm:$0xf] }
  0xf7   : > { %3094 = vmatpush.bf16.msrb.mxu0 %v4952_v54  ;;  %v5428_v54 = vor.u32 %v5843_v50, %v5425_v31  ;;  %v5789_v50 = vld [vmem:[%s8685_s3 + $0x3ec] sm:$0xf0] }
  0xf8   : > { %5883 = vtanh.f32 %v1697_v23  ;;  %v5707_v23 = vld [vmem:[%s8685_s3 + $0x15c] sm:$0xf0] }
  0xf9   : > { %3120 = vmatpush.bf16.msrb.mxu2 %v4956_v56  ;;  %v5008_v56 = vor.u32 %v5743_v51, %v5007_v48  ;;  %3079 = vmatpush.bf16.msra.mxu3 %v5428_v54  ;;  %v5783_v48 = vld [vmem:[%s8685_s3 + $0x3c4] sm:$0xf]  ;;  %v5185_v51 = vld [vmem:[%s8685_s3 + $0x3f0] sm:$0xf0] }
  0xfa   : > { %v5677_v54 = vld [vmem:[%s8685_s3 + $0x74] sm:$0xf] }
  0xfb   : > { %3095 = vmatpush.bf16.msrb.mxu0 %v4904_v0  ;;  %v1685_v37 = vpop.f32.mrf.mxu2  ;;  %v5376_v0 = vor.u32 %v5837_v36, %v5375_v57  ;;  %v5184_v57 = vor.u32 %v5789_v50, %v5183_v49  ;;  %v4769_v36 = vld [vmem:[%s8685_s3 + $0xa0] sm:$0xf0]  ;;  %v5732_v49 = vld [vmem:[%s8685_s3 + $0x224] sm:$0xf0]  ;;  %v5832_v50 = vld [vmem:[%s8685_s3 + $0x54c] sm:$0xf] }
  0xfc   : > { %v1698_v41 = vpop.f32.mrf.mxu3  ;;  %v4864_v37 = vor.u32 %v5707_v23, %v4863_v22  ;;  %v5015_v22 = vld [vmem:[%s8685_s3 + $0x258] sm:$0xf]  ;;  %v5431_v23 = vld [vmem:[%s8685_s3 + $0x5a8] sm:$0xf] }
  0xfd   : > { %3121 = vmatpush.bf16.msrb.mxu2 %v4908_v2  ;;  %v5725_v2 = vld [vmem:[%s8685_s3 + $0x1f4] sm:$0xf]  ;;  %3054 = vmatpush.bf16.msra.mxu1 %v5376_v0  ;;  %v5771_v0 = vld [vmem:[%s8685_s3 + $0x364] sm:$0xf] }
  0xfe   : > { %v5884_v45 = vpop.eup %5883  ;;  %v4964_v10 = vor.u32 %v5725_v2, %v4961_v3  ;;  %3080 = vmatpush.bf16.msra.mxu3 %v5380_v4  ;;  %v5689_v41 = vld [vmem:[%s8685_s3 + $0xd4] sm:$0xf]  ;;  %v4768_v2 = vor.u32 %v5683_v53, %v4767_v52  ;;  %v4719_v3 = vld [vmem:[%s8685_s3 + $0x10] sm:$0xf]  ;;  %v4772_v4 = vor.u32 %v5677_v54, %v4769_v36  ;;  %v5140_v13 = vor.u32 %v5771_v0, %v5137_v1  ;;  %v4919_v53 = vld [vmem:[%s8685_s3 + $0x198] sm:$0xf] }
  0xff   : > { %3096 = vmatpush.bf16.msrb.mxu0 %v4856_v8  ;;  %v7467_v44 = vpack.c.bf16 %v5884_v45, %v5884_v45  ;;  %v5329_v8 = vld [vmem:[%s8685_s3 + $0x510] sm:$0xf0]  ;;  %v4817_v45 = vld [vmem:[%s8685_s3 + $0x100] sm:$0xf0]  ;;  %v4968_v52 = vor.u32 %v5732_v49, %v4967_v40  ;;  %v5714_v0 = vld [vmem:[%s8685_s3 + $0x19c] sm:$0xf] }
 0x100   : > { %v5332_v16 = vor.u32 %v5819_v7, %v5329_v8  ;;  %v4820_v31 = vor.u32 %v5689_v41, %v4817_v45  ;;  %v4721_v7 = vld [vmem:[%s8685_s3 + $0x40] sm:$0xf0]  ;;  %v5838_v45 = vld [vmem:[%s8685_s3 + $0x574] sm:$0xf0]  ;;  %v4921_v1 = vld [vmem:[%s8685_s3 + $0x1c8] sm:$0xf0] }
 0x101   : > { %3122 = vmatpush.bf16.msrb.mxu2 %v4860_v9  ;;  %3048 = vmatmul.bf16.vlgmr.msra.gmra.mxu0 %v7467_v44  ;;  %v4960_v9 = vor.u32 %v5731_v63, %v4959_v62  ;;  %v5135_v62 = vld [vmem:[%s8685_s3 + $0x360] sm:$0xf]  ;;  %v5777_v63 = vld [vmem:[%s8685_s3 + $0x38c] sm:$0xf0]  ;;  %v5684_v40 = vld [vmem:[%s8685_s3 + $0xa4] sm:$0xf0] }
 0x102   : > { %3074 = vmatmul.bf16.vlgmr.msra.gmra.mxu2 %v7467_v44  ;;  %3055 = vmatpush.bf16.msra.mxu1 %v5328_v14  ;;  %v5136_v8 = vor.u32 %v5777_v63, %v5135_v62  ;;  %v5065_v14 = vld [vmem:[%s8685_s3 + $0x2e8] sm:$0xf0]  ;;  %v5337_v62 = vld [vmem:[%s8685_s3 + $0x518] sm:$0xf0]  ;;  %v539_v63 = vperm.slane %v7280_v47, 1 }
 0x103   : > { %3097 = vmatpush.bf16.msrb.mxu0 %v4808_v18  ;;  %v5813_v18 = vld [vmem:[%s8685_s3 + $0x4ac] sm:$0xf0]  ;;  %3081 = vmatpush.bf16.msra.mxu3 %v5332_v16  ;;  %v5087_v16 = vld [vmem:[%s8685_s3 + $0x300] sm:$0xf]  ;;  %v5287_v47 = vld [vmem:[%s8685_s3 + $0x488] sm:$0xf] }
 0x104   : > { %v5678_v49 = vld [vmem:[%s8685_s3 + $0x7c] sm:$0xf] }
 0x105   : > { %3123 = vmatpush.bf16.msrb.mxu2 %v4812_v20  ;;  %v5281_v20 = vld [vmem:[%s8685_s3 + $0x4b0] sm:$0xf0] }
 0x106   : > { %v5284_v59 = vor.u32 %v5807_v19, %v5281_v20  ;;  %v5759_v19 = vld [vmem:[%s8685_s3 + $0x304] sm:$0xf]  ;;  %v5089_v20 = vld [vmem:[%s8685_s3 + $0x330] sm:$0xf0] }
 0x107   : > { %3098 = vmatpush.bf16.msrb.mxu0 %v4760_v28  ;;  %v5280_v28 = vor.u32 %v5813_v18, %v5279_v17  ;;  %v5765_v17 = vld [vmem:[%s8685_s3 + $0x32c] sm:$0xf0]  ;;  %v4720_v18 = vor.u32 %v5671_v5, %v4719_v3 }
 0x108   : > { %3082 = vmatpush.bf16.msra.mxu3 %v5284_v59  ;;  %v5088_v59 = vor.u32 %v5765_v17, %v5087_v16 }
 0x109   : > { %3124 = vmatpush.bf16.msrb.mxu2 %v4764_v55  ;;  %v4865_v55 = vld [vmem:[%s8685_s3 + $0x160] sm:$0xf0]  ;;  %3056 = vmatpush.bf16.msra.mxu1 %v5280_v28  ;;  %v5068_v28 = vor.u32 %v5750_v11, %v5065_v14  ;;  %v4873_v14 = vld [vmem:[%s8685_s3 + $0x168] sm:$0xf0] }
 0x10b   : > { %3099 = vmatpush.bf16.msrb.mxu0 %v4712_v38  ;;  %v7555_v26 = vpop.f32.mrf.mxu0  ;;  %v4868_v38 = vor.u32 %v5701_v24, %v4865_v55  ;;  %v5850_v24 = vld [vmem:[%s8685_s3 + $0x5d4] sm:$0xf0]  ;;  %v5744_v55 = vld [vmem:[%s8685_s3 + $0x284] sm:$0xf0] }
 0x10c   : > { %v7560_v58 = vpop.f32.mrf.mxu1  ;;  %3083 = vmatpush.bf16.msra.mxu3 %v5236_v43  ;;  %v5016_v39 = vor.u32 %v5744_v55, %v5015_v22  ;;  %v5020_v43 = vor.u32 %v5738_v33, %v5017_v34  ;;  %v1710_v11 = vadd.f32 %v7555_v26, %v539_v63  ;;  %v4823_v26 = vld [vmem:[%s8685_s3 + $0xd8] sm:$0xf]  ;;  %v5796_v22 = vld [vmem:[%s8685_s3 + $0x42c] sm:$0xf]  ;;  %v5071_v63 = vld [vmem:[%s8685_s3 + $0x2c0] sm:$0xf] }
 0x10d   : > { %3125 = vmatpush.bf16.msrb.mxu2 %v4716_v42  ;;  %v5232_v42 = vor.u32 %v5801_v30, %v5231_v29  ;;  %v5844_v29 = vld [vmem:[%s8685_s3 + $0x5ac] sm:$0xf]  ;;  %v5433_v30 = vld [vmem:[%s8685_s3 + $0x5d8] sm:$0xf0] }
 0x10e   : > { %v5436_v41 = vor.u32 %v5844_v29, %v5433_v30  ;;  %v4825_v55 = vld [vmem:[%s8685_s3 + $0x108] sm:$0xf0] }
 0x10f   : > { %3144 = vmatpush.bf16.msra.mxu0 %v5056_v46  ;;  %3057 = vmatpush.bf16.msra.mxu1 %v5232_v42  ;;  %v5383_v42 = vld [vmem:[%s8685_s3 + $0x548] sm:$0xf] }
 0x111   : > { %3170 = vmatpush.bf16.msra.mxu2 %v5060_v27  ;;  %3100 = vmatmul.bf16.vlgmr.msrb.gmra.mxu0 %v7467_v44 }
 0x112   : > { %3126 = vmatmul.bf16.vlgmr.msrb.gmra.mxu2 %v7467_v44 }
 0x113   : > { %3145 = vmatpush.bf16.msra.mxu0 %v5008_v56  ;;  %v7586_v46 = vpop.f32.mrf.mxu2  ;;  %v1711_v56 = vpop.f32.mrf.mxu0  ;;  %3058 = vmatpush.bf16.msra.mxu1 %v5184_v57  ;;  %v5826_v57 = vld [vmem:[%s8685_s3 + $0x514] sm:$0xf0] }
 0x114   : > { %v7595_v27 = vpop.f32.mrf.mxu3  ;;  %v1724_v60 = vpop.f32.mrf.mxu1  ;;  %v5335_v56 = vld [vmem:[%s8685_s3 + $0x4e8] sm:$0xf] }
 0x115   : > { %3171 = vmatpush.bf16.msra.mxu2 %v5012_v61  ;;  %v5188_v61 = vor.u32 %v5783_v48, %v5185_v51  ;;  %v5385_v48 = vld [vmem:[%s8685_s3 + $0x578] sm:$0xf0]  ;;  %v5720_v60 = vld [vmem:[%s8685_s3 + $0x1c4] sm:$0xf0] }
 0x116   : > { %v5726_v51 = vld [vmem:[%s8685_s3 + $0x1fc] sm:$0xf]  ;;  %v5388_v54 = vor.u32 %v5832_v50, %v5385_v48  ;;  %v4920_v3 = vor.u32 %v5720_v60, %v4919_v53  ;;  %v4777_v50 = vld [vmem:[%s8685_s3 + $0xa8] sm:$0xf0]  ;;  %v5143_v53 = vld [vmem:[%s8685_s3 + $0x368] sm:$0xf] }
 0x117   : > { %3146 = vmatpush.bf16.msra.mxu0 %v4960_v9  ;;  %v5063_v9 = vld [vmem:[%s8685_s3 + $0x2b8] sm:$0xf]  ;;  %3084 = vmatpush.bf16.msra.mxu3 %v5188_v61  ;;  %v5820_v61 = vld [vmem:[%s8685_s3 + $0x4ec] sm:$0xf]  ;;  %v5145_v60 = vld [vmem:[%s8685_s3 + $0x398] sm:$0xf0] }
 0x118   : > { %3059 = vmatpush.bf16.msra.mxu1 %v5136_v8  ;;  %v5340_v5 = vor.u32 %v5820_v61, %v5337_v62  ;;  %v5708_v8 = vld [vmem:[%s8685_s3 + $0x164] sm:$0xf0]  ;;  %v4729_v62 = vld [vmem:[%s8685_s3 + $0x48] sm:$0xf0] }
 0x119   : > { %3172 = vmatpush.bf16.msra.mxu2 %v4964_v10  ;;  %v5756_v10 = vld [vmem:[%s8685_s3 + $0x2e4] sm:$0xf0] }
 0x11b   : > { %3147 = vmatpush.bf16.msra.mxu0 %v4912_v21  ;;  %v1737_v12 = vpop.f32.mrf.mxu2  ;;  %v4724_v21 = vor.u32 %v5665_v6, %v4721_v7  ;;  %3085 = vmatpush.bf16.msra.mxu3 %v5140_v13  ;;  %v5814_v6 = vld [vmem:[%s8685_s3 + $0x4b4] sm:$0xf0]  ;;  %v4924_v7 = vor.u32 %v5714_v0, %v4921_v1  ;;  %v5702_v13 = vld [vmem:[%s8685_s3 + $0x13c] sm:$0xf]  ;;  %v5757_v0 = vld [vmem:[%s8685_s3 + $0x2ec] sm:$0xf0] }
 0x11c   : > { %v1750_v15 = vpop.f32.mrf.mxu3  ;;  %3060 = vmatpush.bf16.msra.mxu1 %v5088_v59  ;;  %v5288_v16 = vor.u32 %v5814_v6, %v5287_v47  ;;  %v5095_v6 = vld [vmem:[%s8685_s3 + $0x308] sm:$0xf] }
 0x11d   : > { %3173 = vmatpush.bf16.msra.mxu2 %v4916_v35  ;;  %v5064_v35 = vor.u32 %v5756_v10, %v5063_v9  ;;  %v5808_v9 = vld [vmem:[%s8685_s3 + $0x48c] sm:$0xf]  ;;  %v5289_v10 = vld [vmem:[%s8685_s3 + $0x4b8] sm:$0xf0] }
 0x11f   : > { %3148 = vmatpush.bf16.msra.mxu0 %v4864_v37  ;;  %v5092_v37 = vor.u32 %v5759_v19, %v5089_v20  ;;  %v5239_v19 = vld [vmem:[%s8685_s3 + $0x428] sm:$0xf]  ;;  %v5802_v20 = vld [vmem:[%s8685_s3 + $0x454] sm:$0xf0] }
 0x120   : > { %v5240_v29 = vor.u32 %v5802_v20, %v5239_v19 }
 0x121   : > { %3174 = vmatpush.bf16.msra.mxu2 %v4868_v38  ;;  %v5432_v38 = vor.u32 %v5850_v24, %v5431_v23  ;;  %3086 = vmatpush.bf16.msra.mxu3 %v5092_v37  ;;  %v5241_v23 = vld [vmem:[%s8685_s3 + $0x458] sm:$0xf0]  ;;  %v1723_v24 = vadd.f32 %v7560_v58, %v1710_v11  ;;  %v4775_v58 = vld [vmem:[%s8685_s3 + $0x78] sm:$0xf]  ;;  %v5191_v37 = vld [vmem:[%s8685_s3 + $0x3c8] sm:$0xf] }
 0x122   : > { %v5244_v34 = vor.u32 %v5796_v22, %v5241_v23  ;;  %v5097_v11 = vld [vmem:[%s8685_s3 + $0x338] sm:$0xf0]  ;;  %v4975_v22 = vld [vmem:[%s8685_s3 + $0x200] sm:$0xf]  ;;  %v5733_v23 = vld [vmem:[%s8685_s3 + $0x22c] sm:$0xf0] }
 0x123   : > { %3149 = vmatpush.bf16.msra.mxu0 %v4816_v32  ;;  %v4969_v32 = vld [vmem:[%s8685_s3 + $0x228] sm:$0xf0]  ;;  %3105 = vmatpush.bf16.msrb.mxu1 %v5432_v38  ;;  %v5790_v38 = vld [vmem:[%s8685_s3 + $0x3f4] sm:$0xf0] }
 0x124   : > { %v4972_v36 = vor.u32 %v5726_v51, %v4969_v32  ;;  %v4727_v51 = vld [vmem:[%s8685_s3 + $0x18] sm:$0xf]  ;;  %v5192_v32 = vor.u32 %v5790_v38, %v5191_v37  ;;  %v4929_v37 = vld [vmem:[%s8685_s3 + $0x1d0] sm:$0xf0] }
 0x125   : > { %3175 = vmatpush.bf16.msra.mxu2 %v4820_v31  ;;  %v5384_v31 = vor.u32 %v5838_v45, %v5383_v42  ;;  %3131 = vmatpush.bf16.msrb.mxu3 %v5436_v41  ;;  %v5784_v41 = vld [vmem:[%s8685_s3 + $0x3cc] sm:$0xf]  ;;  %v5193_v42 = vld [vmem:[%s8685_s3 + $0x3f8] sm:$0xf0]  ;;  %v1736_v45 = vadd.f32 %v7586_v46, %v1723_v24  ;;  %v5672_v46 = vld [vmem:[%s8685_s3 + $0x44] sm:$0xf0] }
 0x126   : > { %v5727_v24 = vld [vmem:[%s8685_s3 + $0x204] sm:$0xf] }
 0x127   : > { %3150 = vmatpush.bf16.msra.mxu0 %v4768_v2  ;;  %3106 = vmatpush.bf16.msrb.mxu1 %v5384_v31  ;;  %v5336_v2 = vor.u32 %v5826_v57, %v5335_v56  ;;  %v4776_v31 = vor.u32 %v5684_v40, %v4775_v58  ;;  %v4780_v56 = vor.u32 %v5678_v49, %v4777_v50  ;;  %v5666_v57 = vld [vmem:[%s8685_s3 + $0x1c] sm:$0xf]  ;;  %v5721_v58 = vld [vmem:[%s8685_s3 + $0x1cc] sm:$0xf0] }
 0x128   : > { %v1749_v61 = vadd.f32 %v7595_v27, %v1736_v45  ;;  %v5073_v27 = vld [vmem:[%s8685_s3 + $0x2f0] sm:$0xf0] }
 0x129   : > { %3176 = vmatpush.bf16.msra.mxu2 %v4772_v4  ;;  %v4871_v4 = vld [vmem:[%s8685_s3 + $0x138] sm:$0xf]  ;;  %3132 = vmatpush.bf16.msrb.mxu3 %v5388_v54 }
 0x12a   : > { %v4872_v17 = vor.u32 %v5708_v8, %v4871_v4  ;;  %v5778_v54 = vld [vmem:[%s8685_s3 + $0x394] sm:$0xf0]  ;;  %v4728_v4 = vor.u32 %v5672_v46, %v4727_v51  ;;  %v4732_v8 = vor.u32 %v5666_v57, %v4729_v62  ;;  %v4831_v51 = vld [vmem:[%s8685_s3 + $0xe0] sm:$0xf]  ;;  %v4833_v46 = vld [vmem:[%s8685_s3 + $0x110] sm:$0xf0] }
 0x12b   : > { %3151 = vmatpush.bf16.msra.mxu0 %v4720_v18  ;;  %v7758_v12 = vpop.f32.mrf.mxu0  ;;  %3107 = vmatpush.bf16.msrb.mxu1 %v5336_v2  ;;  %v5292_v18 = vor.u32 %v5808_v9, %v5289_v10  ;;  %v5751_v2 = vld [vmem:[%s8685_s3 + $0x2c4] sm:$0xf]  ;;  %v5072_v9 = vor.u32 %v5757_v0, %v5071_v63  ;;  %v5760_v10 = vld [vmem:[%s8685_s3 + $0x30c] sm:$0xf]  ;;  %v5685_v62 = vld [vmem:[%s8685_s3 + $0xac] sm:$0xf0] }
 0x12c   : > { %v7766_v15 = vpop.f32.mrf.mxu1  ;;  %v5679_v0 = vld [vmem:[%s8685_s3 + $0x84] sm:$0xf] }
 0x12d   : > { %3177 = vmatpush.bf16.msra.mxu2 %v4724_v21  ;;  %3133 = vmatpush.bf16.msrb.mxu3 %v5340_v5  ;;  %v4876_v21 = vor.u32 %v5702_v13, %v4873_v14  ;;  %v1762_v13 = vadd.f32 %v7758_v12, %v1749_v61  ;;  %v5076_v14 = vor.u32 %v5751_v2, %v5073_v27  ;;  %v4783_v61 = vld [vmem:[%s8685_s3 + $0x80] sm:$0xf] }
 0x12e   : > { %3152 = vmatmul.bf16.vlgmr.msra.gmra.mxu0 %v7467_v44  ;;  %v5100_v12 = vor.u32 %v5760_v10, %v5097_v11  ;;  %v4784_v27 = vor.u32 %v5685_v62, %v4783_v61  ;;  %v4937_v61 = vld [vmem:[%s8685_s3 + $0x1d8] sm:$0xf0]  ;;  %v4887_v62 = vld [vmem:[%s8685_s3 + $0x148] sm:$0xf] }
 0x12f   : > { %3196 = vmatpush.bf16.msrb.mxu0 %v5064_v35  ;;  %v5696_v35 = vld [vmem:[%s8685_s3 + $0x104] sm:$0xf0]  ;;  %3108 = vmatpush.bf16.msrb.mxu1 %v5288_v16  ;;  %v5023_v16 = vld [vmem:[%s8685_s3 + $0x260] sm:$0xf] }
 0x130   : > { %3178 = vmatmul.bf16.vlgmr.msra.gmra.mxu2 %v7467_v44  ;;  %v4824_v30 = vor.u32 %v5696_v35, %v4823_v26  ;;  %v5739_v26 = vld [vmem:[%s8685_s3 + $0x264] sm:$0xf] }
 0x131   : > { %3222 = vmatpush.bf16.msrb.mxu2 %v5068_v28  ;;  %v5690_v28 = vld [vmem:[%s8685_s3 + $0xdc] sm:$0xf]  ;;  %3134 = vmatpush.bf16.msrb.mxu3 %v5292_v18  ;;  %v5025_v18 = vld [vmem:[%s8685_s3 + $0x290] sm:$0xf0] }
 0x132   : > { %v5028_v35 = vor.u32 %v5739_v26, %v5025_v18 }
 0x133   : > { %3197 = vmatpush.bf16.msrb.mxu0 %v5016_v39  ;;  %v7793_v59 = vpop.f32.mrf.mxu2  ;;  %v4828_v39 = vor.u32 %v5690_v28, %v4825_v55  ;;  %3109 = vmatpush.bf16.msrb.mxu1 %v5240_v29  ;;  %v4976_v28 = vor.u32 %v5733_v23, %v4975_v22 }
 0x134   : > { %v7795_v33 = vpop.f32.mrf.mxu3  ;;  %v1776_v48 = vpop.f32.mrf.mxu1 }
 0x135   : > { %3223 = vmatpush.bf16.msrb.mxu2 %v5020_v43  ;;  %v1763_v43 = vpop.f32.mrf.mxu0  ;;  %3135 = vmatpush.bf16.msrb.mxu3 %v5244_v34  ;;  %v5715_v34 = vld [vmem:[%s8685_s3 + $0x1a4] sm:$0xf] }
 0x136   : > { %v4932_v40 = vor.u32 %v5715_v34, %v4929_v37  ;;  %v5703_v43 = vld [vmem:[%s8685_s3 + $0x144] sm:$0xf]  ;;  %v5740_v34 = vld [vmem:[%s8685_s3 + $0x26c] sm:$0xf]  ;;  %v5033_v37 = vld [vmem:[%s8685_s3 + $0x298] sm:$0xf0] }
 0x137   : > { %3198 = vmatpush.bf16.msrb.mxu0 %v4968_v52  ;;  %v5196_v52 = vor.u32 %v5784_v41, %v5193_v42  ;;  %3110 = vmatpush.bf16.msrb.mxu1 %v5192_v32  ;;  %v4879_v41 = vld [vmem:[%s8685_s3 + $0x140] sm:$0xf]  ;;  %v5709_v42 = vld [vmem:[%s8685_s3 + $0x16c] sm:$0xf0] }
 0x138   : > { %v4880_v50 = vor.u32 %v5709_v42, %v4879_v41  ;;  %v5697_v32 = vld [vmem:[%s8685_s3 + $0x10c] sm:$0xf0]  ;;  %v5036_v42 = vor.u32 %v5740_v34, %v5033_v37  ;;  %v4793_v34 = vld [vmem:[%s8685_s3 + $0xb8] sm:$0xf0]  ;;  %v4743_v37 = vld [vmem:[%s8685_s3 + $0x28] sm:$0xf] }
 0x139   : > { %3224 = vmatpush.bf16.msrb.mxu2 %v4972_v36  ;;  %v5772_v36 = vld [vmem:[%s8685_s3 + $0x36c] sm:$0xf]  ;;  %3136 = vmatpush.bf16.msrb.mxu3 %v5196_v52  ;;  %v5343_v41 = vld [vmem:[%s8685_s3 + $0x4f0] sm:$0xf] }
 0x13a   : > { %v5148_v47 = vor.u32 %v5772_v36, %v5145_v60 }
 0x13b   : > { %3199 = vmatpush.bf16.msrb.mxu0 %v4920_v3  ;;  %v1789_v1 = vpop.f32.mrf.mxu2  ;;  %v5144_v3 = vor.u32 %v5778_v54, %v5143_v53  ;;  %v4832_v54 = vor.u32 %v5697_v32, %v4831_v51  ;;  %v4935_v51 = vld [vmem:[%s8685_s3 + $0x1a8] sm:$0xf]  ;;  %v5722_v32 = vld [vmem:[%s8685_s3 + $0x1d4] sm:$0xf0] }
 0x13c   : > { %v1802_v5 = vpop.f32.mrf.mxu3  ;;  %v4785_v1 = vld [vmem:[%s8685_s3 + $0xb0] sm:$0xf0] }
 0x13d   : > { %3225 = vmatpush.bf16.msrb.mxu2 %v4924_v7  ;;  %v5766_v7 = vld [vmem:[%s8685_s3 + $0x334] sm:$0xf0]  ;;  %3111 = vmatpush.bf16.msrb.mxu1 %v5144_v3  ;;  %v4788_v3 = vor.u32 %v5679_v0, %v4785_v1  ;;  %v5673_v5 = vld [vmem:[%s8685_s3 + $0x4c] sm:$0xf0] }
 0x13e   : > { %v5096_v19 = vor.u32 %v5766_v7, %v5095_v6  ;;  %3137 = vmatpush.bf16.msrb.mxu3 %v5148_v47  ;;  %v5667_v47 = vld [vmem:[%s8685_s3 + $0x24] sm:$0xf]  ;;  %v4737_v6 = vld [vmem:[%s8685_s3 + $0x50] sm:$0xf0]  ;;  %v5079_v7 = vld [vmem:[%s8685_s3 + $0x2c8] sm:$0xf] }
 0x13f   : > { %3200 = vmatpush.bf16.msrb.mxu0 %v4872_v17  ;;  %v5745_v17 = vld [vmem:[%s8685_s3 + $0x28c] sm:$0xf0]  ;;  %v4740_v26 = vor.u32 %v5667_v47, %v4737_v6  ;;  %v5704_v6 = vld [vmem:[%s8685_s3 + $0x14c] sm:$0xf] }
 0x140   : > { %v5024_v20 = vor.u32 %v5745_v17, %v5023_v16  ;;  %v5441_v16 = vld [vmem:[%s8685_s3 + $0x5e0] sm:$0xf0] }
 0x141   : > { %3226 = vmatpush.bf16.msrb.mxu2 %v4876_v21  ;;  %v1775_v21 = vadd.f32 %v7766_v15, %v1762_v13  ;;  %v4977_v15 = vld [vmem:[%s8685_s3 + $0x230] sm:$0xf0]  ;;  %3112 = vmatpush.bf16.msrb.mxu1 %v5096_v19  ;;  %v5851_v13 = vld [vmem:[%s8685_s3 + $0x5dc] sm:$0xf0]  ;;  %v5752_v19 = vld [vmem:[%s8685_s3 + $0x2cc] sm:$0xf] }
 0x142   : > { %3138 = vmatpush.bf16.msrb.mxu3 %v5100_v12  ;;  %v4980_v29 = vor.u32 %v5727_v24, %v4977_v15  ;;  %v5081_v12 = vld [vmem:[%s8685_s3 + $0x2f8] sm:$0xf0]  ;;  %v5391_v24 = vld [vmem:[%s8685_s3 + $0x550] sm:$0xf] }
 0x143   : > { %3201 = vmatpush.bf16.msrb.mxu0 %v4824_v30  ;;  %v1788_v55 = vadd.f32 %v7793_v59, %v1775_v21  ;;  %v4927_v30 = vld [vmem:[%s8685_s3 + $0x1a0] sm:$0xf]  ;;  %v5746_v21 = vld [vmem:[%s8685_s3 + $0x294] sm:$0xf0] }
 0x144   : > { %v4928_v59 = vor.u32 %v5721_v58, %v4927_v30  ;;  %v5393_v30 = vld [vmem:[%s8685_s3 + $0x580] sm:$0xf0] }
 0x145   : > { %3227 = vmatpush.bf16.msrb.mxu2 %v4828_v39  ;;  %v1801_v38 = vadd.f32 %v7795_v33, %v1788_v55  ;;  %v4881_v33 = vld [vmem:[%s8685_s3 + $0x170] sm:$0xf0]  ;;  %v5839_v55 = vld [vmem:[%s8685_s3 + $0x57c] sm:$0xf0] }
 0x146   : > { %v4884_v48 = vor.u32 %v5703_v43, %v4881_v33  ;;  %v5821_v43 = vld [vmem:[%s8685_s3 + $0x4f4] sm:$0xf]  ;;  %v5345_v33 = vld [vmem:[%s8685_s3 + $0x520] sm:$0xf0] }
 0x147   : > { %3202 = vmatpush.bf16.msrb.mxu0 %v4776_v31  ;;  %v5691_v31 = vld [vmem:[%s8685_s3 + $0xe4] sm:$0xf] }
 0x148   : > { %v4836_v60 = vor.u32 %v5691_v31, %v4833_v46  ;;  %v5348_v46 = vor.u32 %v5821_v43, %v5345_v33  ;;  %v5105_v43 = vld [vmem:[%s8685_s3 + $0x340] sm:$0xf0]  ;;  %v5668_v33 = vld [vmem:[%s8685_s3 + $0x2c] sm:$0xf] }
 0x149   : > { %3228 = vmatpush.bf16.msrb.mxu2 %v4780_v56 }
 0x14b   : > { %3203 = vmatpush.bf16.msrb.mxu0 %v4728_v4  ;;  %v1813_v39 = vpop.f32.mrf.mxu0  ;;  %v4735_v4 = vld [vmem:[%s8685_s3 + $0x20] sm:$0xf] }
 0x14c   : > { %v1826_v45 = vpop.f32.mrf.mxu1  ;;  %v1814_v49 = vadd.f32 %v1813_v39, %v1801_v38  ;;  %v4736_v11 = vor.u32 %v5673_v5, %v4735_v4  ;;  %v5734_v38 = vld [vmem:[%s8685_s3 + $0x234] sm:$0xf0]  ;;  %v5392_v39 = vor.u32 %v5839_v55, %v5391_v24  ;;  %v5797_v4 = vld [vmem:[%s8685_s3 + $0x434] sm:$0xf]  ;;  %v5249_v5 = vld [vmem:[%s8685_s3 + $0x460] sm:$0xf0] }
 0x14d   : > { %3229 = vmatpush.bf16.msrb.mxu2 %v4732_v8  ;;  %v5758_v8 = vld [vmem:[%s8685_s3 + $0x2f4] sm:$0xf0]  ;;  %v5773_v55 = vld [vmem:[%s8685_s3 + $0x374] sm:$0xf] }
 0x14e   : > { %3204 = vmatmul.bf16.vlgmr.msrb.gmra.mxu0 %v7467_v44  ;;  %v1827_v52 = vadd.f32 %v1826_v45, %v1814_v49  ;;  %v5080_v18 = vor.u32 %v5758_v8, %v5079_v7  ;;  %v5827_v45 = vld [vmem:[%s8685_s3 + $0x51c] sm:$0xf0]  ;;  %v4889_v7 = vld [vmem:[%s8685_s3 + $0x178] sm:$0xf0]  ;;  %v4839_v8 = vld [vmem:[%s8685_s3 + $0xe8] sm:$0xf] }
 0x14f   : > { %3248 = vmatpush.bf16.msra.mxu0 %v5072_v9  ;;  %v5439_v9 = vld [vmem:[%s8685_s3 + $0x5b0] sm:$0xf]  ;;  %v5344_v31 = vor.u32 %v5827_v45, %v5343_v41  ;;  %v5767_v41 = vld [vmem:[%s8685_s3 + $0x33c] sm:$0xf0]  ;;  %v5761_v45 = vld [vmem:[%s8685_s3 + $0x314] sm:$0xf] }
 0x150   : > { %3230 = vmatmul.bf16.vlgmr.msrb.gmra.mxu2 %v7467_v44  ;;  %v5440_v22 = vor.u32 %v5851_v13, %v5439_v9  ;;  %v5698_v9 = vld [vmem:[%s8685_s3 + $0x114] sm:$0xf0]  ;;  %v5199_v13 = vld [vmem:[%s8685_s3 + $0x3d0] sm:$0xf] }
 0x151   : > { %3274 = vmatpush.bf16.msra.mxu2 %v5076_v14  ;;  %v5845_v14 = vld [vmem:[%s8685_s3 + $0x5b4] sm:$0xf] }
 0x152   : > { %v5444_v23 = vor.u32 %v5845_v14, %v5441_v16  ;;  %v4892_v14 = vor.u32 %v5704_v6, %v4889_v7  ;;  %v5791_v16 = vld [vmem:[%s8685_s3 + $0x3fc] sm:$0xf0]  ;;  %v5810_v7 = vld [vmem:[%s8685_s3 + $0x49c] sm:$0xf] }
 0x153   : > { %3249 = vmatpush.bf16.msra.mxu0 %v5024_v20  ;;  %v1839_v53 = vpop.f32.mrf.mxu2  ;;  %v1815_v36 = vpop.f32.mrf.mxu0  ;;  %v5031_v20 = vld [vmem:[%s8685_s3 + $0x268] sm:$0xf] }
 0x154   : > { %v1840_v56 = vadd.f32 %v1839_v53, %v1827_v52  ;;  %v1852_v57 = vpop.f32.mrf.mxu3  ;;  %v1828_v63 = vpop.f32.mrf.mxu1  ;;  %v5032_v58 = vor.u32 %v5746_v21, %v5031_v20  ;;  %v5295_v52 = vld [vmem:[%s8685_s3 + $0x490] sm:$0xf]  ;;  %v4936_v36 = vor.u32 %v5722_v32, %v4935_v51  ;;  %v4791_v20 = vld [vmem:[%s8685_s3 + $0x88] sm:$0xf]  ;;  %v5686_v21 = vld [vmem:[%s8685_s3 + $0xb4] sm:$0xf0] }
 0x155   : > { %3275 = vmatpush.bf16.msra.mxu2 %v5028_v35  ;;  %v5710_v63 = vld [vmem:[%s8685_s3 + $0x174] sm:$0xf0]  ;;  %v5852_v51 = vld [vmem:[%s8685_s3 + $0x5e4] sm:$0xf0]  ;;  %v5846_v32 = vld [vmem:[%s8685_s3 + $0x5bc] sm:$0xf] }
 0x156   : > { %v1853_v2 = vadd.f32 %v1852_v57, %v1840_v56  ;;  %v5809_v56 = vld [vmem:[%s8685_s3 + $0x494] sm:$0xf]  ;;  %v5297_v57 = vld [vmem:[%s8685_s3 + $0x4c0] sm:$0xf0]  ;;  %v4888_v47 = vor.u32 %v5710_v63, %v4887_v62 }
 0x157   : > { %3250 = vmatpush.bf16.msra.mxu0 %v4976_v28  ;;  %v5084_v28 = vor.u32 %v5752_v19, %v5081_v12  ;;  %v5300_v1 = vor.u32 %v5809_v56, %v5297_v57  ;;  %v5692_v19 = vld [vmem:[%s8685_s3 + $0xec] sm:$0xf]  ;;  %v4841_v12 = vld [vmem:[%s8685_s3 + $0x118] sm:$0xf0]  ;;  %v5399_v57 = vld [vmem:[%s8685_s3 + $0x558] sm:$0xf] }
 0x158   : > { %5885 = vtanh.f32 %v1853_v2  ;;  %v5247_v2 = vld [vmem:[%s8685_s3 + $0x430] sm:$0xf]  ;;  %v4844_v24 = vor.u32 %v5692_v19, %v4841_v12  ;;  %v5792_v19 = vld [vmem:[%s8685_s3 + $0x404] sm:$0xf0] }
 0x159   : > { %3276 = vmatpush.bf16.msra.mxu2 %v4980_v29  ;;  %v5833_v29 = vld [vmem:[%s8685_s3 + $0x554] sm:$0xf] }
 0x15b   : > { %3251 = vmatpush.bf16.msra.mxu0 %v4928_v59  ;;  %v1841_v10 = vpop.f32.mrf.mxu2  ;;  %v4983_v59 = vld [vmem:[%s8685_s3 + $0x208] sm:$0xf] }
 0x15c   : > { %v1854_v17 = vpop.f32.mrf.mxu3  ;;  %v4984_v49 = vor.u32 %v5734_v38, %v4983_v59  ;;  %v5674_v59 = vld [vmem:[%s8685_s3 + $0x54] sm:$0xf0] }
 0x15d   : > { %3277 = vmatpush.bf16.msra.mxu2 %v4932_v40  ;;  %v5396_v40 = vor.u32 %v5833_v29, %v5393_v30  ;;  %v5785_v17 = vld [vmem:[%s8685_s3 + $0x3d4] sm:$0xf]  ;;  %v5153_v29 = vld [vmem:[%s8685_s3 + $0x3a0] sm:$0xf0]  ;;  %v4792_v30 = vor.u32 %v5686_v21, %v4791_v20  ;;  %v5786_v20 = vld [vmem:[%s8685_s3 + $0x3dc] sm:$0xf] }
 0x15e   : > { %v5886_v35 = vpop.eup %5885  ;;  %v5209_v21 = vld [vmem:[%s8685_s3 + $0x408] sm:$0xf0] }
 0x15f   : > { %3252 = vmatpush.bf16.msra.mxu0 %v4880_v50  ;;  %v7994_v15 = vpack.c.bf16 %v5886_v35, %v5886_v35  ;;  %v5728_v50 = vld [vmem:[%s8685_s3 + $0x20c] sm:$0xf]  ;;  %v5200_v35 = vor.u32 %v5791_v16, %v5199_v13  ;;  %v5798_v13 = vld [vmem:[%s8685_s3 + $0x43c] sm:$0xf] }
 0x161   : > { %3278 = vmatpush.bf16.msra.mxu2 %v4884_v48  ;;  %3061 = vmatmul.bf16.vlgmr.msra.gmra.mxu1 %v7994_v15  ;;  %v4985_v48 = vld [vmem:[%s8685_s3 + $0x238] sm:$0xf0] }
 0x162   : > { %3087 = vmatmul.bf16.vlgmr.msra.gmra.mxu3 %v7994_v15  ;;  %3157 = vmatpush.bf16.msra.mxu1 %v5440_v22  ;;  %v4988_v53 = vor.u32 %v5728_v50, %v4985_v48  ;;  %v4745_v50 = vld [vmem:[%s8685_s3 + $0x58] sm:$0xf0]  ;;  %v5447_v48 = vld [vmem:[%s8685_s3 + $0x5b8] sm:$0xf] }
 0x163   : > { %3253 = vmatpush.bf16.msra.mxu0 %v4832_v54  ;;  %3183 = vmatpush.bf16.msra.mxu3 %v5444_v23  ;;  %v5815_v54 = vld [vmem:[%s8685_s3 + $0x4bc] sm:$0xf0]  ;;  %v5151_v23 = vld [vmem:[%s8685_s3 + $0x370] sm:$0xf] }
 0x164   : > { %v5296_v0 = vor.u32 %v5815_v54, %v5295_v52  ;;  %v5108_v52 = vor.u32 %v5761_v45, %v5105_v43  ;;  %v5448_v54 = vor.u32 %v5852_v51, %v5447_v48  ;;  %v5457_v45 = vld [vmem:[%s8685_s3 + $0x5f0] sm:$0xf0]  ;;  %v5407_v48 = vld [vmem:[%s8685_s3 + $0x560] sm:$0xf]  ;;  %v5841_v51 = vld [vmem:[%s8685_s3 + $0x58c] sm:$0xf0] }
 0x165   : > { %3279 = vmatpush.bf16.msra.mxu2 %v4836_v60  ;;  %v5716_v60 = vld [vmem:[%s8685_s3 + $0x1ac] sm:$0xf] }
 0x166   : > { %3158 = vmatpush.bf16.msra.mxu1 %v5392_v39  ;;  %v5156_v39 = vor.u32 %v5773_v55, %v5153_v29  ;;  %v5161_v55 = vld [vmem:[%s8685_s3 + $0x3a8] sm:$0xf0] }
 0x167   : > { %3254 = vmatpush.bf16.msra.mxu0 %v4784_v27  ;;  %3184 = vmatpush.bf16.msra.mxu3 %v5396_v40  ;;  %v4940_v27 = vor.u32 %v5716_v60, %v4937_v61  ;;  %v5103_v40 = vld [vmem:[%s8685_s3 + $0x310] sm:$0xf]  ;;  %v5834_v60 = vld [vmem:[%s8685_s3 + $0x55c] sm:$0xf]  ;;  %v5401_v61 = vld [vmem:[%s8685_s3 + $0x588] sm:$0xf0] }
 0x168   : > { %v5404_v63 = vor.u32 %v5834_v60, %v5401_v61  ;;  %v5361_v60 = vld [vmem:[%s8685_s3 + $0x530] sm:$0xf0] }
 0x169   : > { %3280 = vmatpush.bf16.msra.mxu2 %v4788_v3  ;;  %v5803_v3 = vld [vmem:[%s8685_s3 + $0x45c] sm:$0xf0] }
 0x16a   : > { %3159 = vmatpush.bf16.msra.mxu1 %v5344_v31  ;;  %v5248_v10 = vor.u32 %v5803_v3, %v5247_v2  ;;  %v5449_v31 = vld [vmem:[%s8685_s3 + $0x5e8] sm:$0xf0]  ;;  %v5822_v2 = vld [vmem:[%s8685_s3 + $0x4fc] sm:$0xf] }
 0x16b   : > { %3255 = vmatpush.bf16.msra.mxu0 %v4736_v11  ;;  %3185 = vmatpush.bf16.msra.mxu3 %v5348_v46  ;;  %v5252_v11 = vor.u32 %v5797_v4, %v5249_v5  ;;  %v5104_v46 = vor.u32 %v5767_v41, %v5103_v40  ;;  %v5452_v56 = vor.u32 %v5846_v32, %v5449_v31  ;;  %v5303_v5 = vld [vmem:[%s8685_s3 + $0x498] sm:$0xf]  ;;  %v5455_v40 = vld [vmem:[%s8685_s3 + $0x5c0] sm:$0xf]  ;;  %v5853_v41 = vld [vmem:[%s8685_s3 + $0x5ec] sm:$0xf0] }
 0x16c   : > { %v5835_v32 = vld [vmem:[%s8685_s3 + $0x564] sm:$0xf]  ;;  %v5409_v31 = vld [vmem:[%s8685_s3 + $0x590] sm:$0xf0] }
 0x16d   : > { %3281 = vmatpush.bf16.msra.mxu2 %v4740_v26  ;;  %v5201_v26 = vld [vmem:[%s8685_s3 + $0x400] sm:$0xf0] }
 0x16e   : > { %3256 = vmatmul.bf16.vlgmr.msra.gmra.mxu0 %v7467_v44  ;;  %3160 = vmatpush.bf16.msra.mxu1 %v5296_v0  ;;  %v5204_v22 = vor.u32 %v5785_v17, %v5201_v26  ;;  %v5351_v0 = vld [vmem:[%s8685_s3 + $0x4f8] sm:$0xf] }
 0x16f   : > { %3300 = vmatpush.bf16.msrb.mxu0 %v5080_v18  ;;  %3186 = vmatpush.bf16.msra.mxu3 %v5300_v1  ;;  %v4840_v18 = vor.u32 %v5698_v9, %v4839_v8  ;;  %v5828_v1 = vld [vmem:[%s8685_s3 + $0x524] sm:$0xf0] }
 0x170   : > { %3282 = vmatmul.bf16.vlgmr.msra.gmra.mxu2 %v7467_v44  ;;  %v5352_v3 = vor.u32 %v5828_v1, %v5351_v0  ;;  %v5817_v0 = vld [vmem:[%s8685_s3 + $0x4cc] sm:$0xf0]  ;;  %v5811_v1 = vld [vmem:[%s8685_s3 + $0x4a4] sm:$0xf] }
 0x171   : > { %3326 = vmatpush.bf16.msrb.mxu2 %v5084_v28  ;;  %3113 = vmatmul.bf16.vlgmr.msrb.gmra.mxu1 %v7994_v15  ;;  %v5779_v28 = vld [vmem:[%s8685_s3 + $0x39c] sm:$0xf0] }
 0x172   : > { %3139 = vmatmul.bf16.vlgmr.msrb.gmra.mxu3 %v7994_v15  ;;  %3161 = vmatpush.bf16.msra.mxu1 %v5248_v10  ;;  %v5152_v38 = vor.u32 %v5779_v28, %v5151_v23  ;;  %v5255_v10 = vld [vmem:[%s8685_s3 + $0x438] sm:$0xf]  ;;  %v5774_v28 = vld [vmem:[%s8685_s3 + $0x37c] sm:$0xf] }
 0x173   : > { %3301 = vmatpush.bf16.msrb.mxu0 %v5032_v58  ;;  %3187 = vmatpush.bf16.msra.mxu3 %v5252_v11  ;;  %v5680_v58 = vld [vmem:[%s8685_s3 + $0x8c] sm:$0xf]  ;;  %v5804_v11 = vld [vmem:[%s8685_s3 + $0x464] sm:$0xf0]  ;;  %v5159_v23 = vld [vmem:[%s8685_s3 + $0x378] sm:$0xf] }
 0x174   : > { %v5256_v16 = vor.u32 %v5804_v11, %v5255_v10  ;;  %v5215_v11 = vld [vmem:[%s8685_s3 + $0x3e0] sm:$0xf] }
 0x175   : > { %3327 = vmatpush.bf16.msrb.mxu2 %v5036_v42  ;;  %v4796_v42 = vor.u32 %v5680_v58, %v4793_v34  ;;  %v5164_v58 = vor.u32 %v5774_v28, %v5161_v55  ;;  %v5111_v34 = vld [vmem:[%s8685_s3 + $0x318] sm:$0xf]  ;;  %v5119_v28 = vld [vmem:[%s8685_s3 + $0x320] sm:$0xf]  ;;  %v5769_v55 = vld [vmem:[%s8685_s3 + $0x34c] sm:$0xf0] }
 0x176   : > { %3162 = vmatpush.bf16.msra.mxu1 %v5200_v35 }
 0x177   : > { %3302 = vmatpush.bf16.msrb.mxu0 %v4984_v49  ;;  %3188 = vmatpush.bf16.msra.mxu3 %v5204_v22  ;;  %v4744_v49 = vor.u32 %v5674_v59, %v4743_v37  ;;  %v5212_v22 = vor.u32 %v5786_v20, %v5209_v21  ;;  %v5768_v37 = vld [vmem:[%s8685_s3 + $0x344] sm:$0xf0]  ;;  %v5762_v59 = vld [vmem:[%s8685_s3 + $0x31c] sm:$0xf]  ;;  %v5167_v20 = vld [vmem:[%s8685_s3 + $0x380] sm:$0xf] }
 0x178   : > { %v5112_v43 = vor.u32 %v5768_v37, %v5111_v34  ;;  %v5781_v21 = vld [vmem:[%s8685_s3 + $0x3ac] sm:$0xf0]  ;;  %v5854_v34 = vld [vmem:[%s8685_s3 + $0x5f4] sm:$0xf0]  ;;  %v5848_v37 = vld [vmem:[%s8685_s3 + $0x5cc] sm:$0xf] }
 0x179   : > { %3328 = vmatpush.bf16.msrb.mxu2 %v4988_v53  ;;  %v4748_v53 = vor.u32 %v5668_v33, %v4745_v50 }
 0x17a   : > { %3163 = vmatpush.bf16.msra.mxu1 %v5152_v38 }
 0x17b   : > { %3303 = vmatpush.bf16.msrb.mxu0 %v4936_v36  ;;  %3189 = vmatpush.bf16.msra.mxu3 %v5156_v39  ;;  %v5840_v36 = vld [vmem:[%s8685_s3 + $0x584] sm:$0xf0]  ;;  %v5113_v39 = vld [vmem:[%s8685_s3 + $0x348] sm:$0xf0] }
 0x17c   : > { %v5400_v62 = vor.u32 %v5840_v36, %v5399_v57  ;;  %v5116_v33 = vor.u32 %v5762_v59, %v5113_v39  ;;  %v5829_v57 = vld [vmem:[%s8685_s3 + $0x52c] sm:$0xf0]  ;;  %v5823_v36 = vld [vmem:[%s8685_s3 + $0x504] sm:$0xf]  ;;  %v5465_v59 = vld [vmem:[%s8685_s3 + $0x5f8] sm:$0xf0] }
 0x17d   : > { %3329 = vmatpush.bf16.msrb.mxu2 %v4940_v27  ;;  %v5353_v27 = vld [vmem:[%s8685_s3 + $0x528] sm:$0xf0] }
 0x17e   : > { %3164 = vmatpush.bf16.msra.mxu1 %v5104_v46  ;;  %v5356_v4 = vor.u32 %v5822_v2, %v5353_v27  ;;  %v8207_v6 = vpop.f32.mrf.mxu0  ;;  %v5313_v2 = vld [vmem:[%s8685_s3 + $0x4d0] sm:$0xf0] }
 0x17f   : > { %3304 = vmatpush.bf16.msrb.mxu0 %v4888_v47  ;;  %3190 = vmatpush.bf16.msra.mxu3 %v5108_v52  ;;  %v5816_v47 = vld [vmem:[%s8685_s3 + $0x4c4] sm:$0xf0]  ;;  %v5408_v52 = vor.u32 %v5841_v51, %v5407_v48 }
 0x180   : > { %v5304_v8 = vor.u32 %v5816_v47, %v5303_v5  ;;  %v5316_v5 = vor.u32 %v5811_v1, %v5313_v2  ;;  %v5263_v47 = vld [vmem:[%s8685_s3 + $0x440] sm:$0xf]  ;;  %v5271_v1 = vld [vmem:[%s8685_s3 + $0x448] sm:$0xf]  ;;  %v5806_v2 = vld [vmem:[%s8685_s3 + $0x474] sm:$0xf0] }
 0x181   : > { %3330 = vmatpush.bf16.msrb.mxu2 %v4892_v14  ;;  %3165 = vmatmul.bf16.vlgmr.msra.gmra.mxu1 %v7994_v15  ;;  %v5257_v14 = vld [vmem:[%s8685_s3 + $0x468] sm:$0xf0] }
 0x182   : > { %3209 = vmatpush.bf16.msrb.mxu1 %v5448_v54  ;;  %3191 = vmatmul.bf16.vlgmr.msra.gmra.mxu3 %v7994_v15  ;;  %v5260_v26 = vor.u32 %v5798_v13, %v5257_v14  ;;  %v5412_v54 = vor.u32 %v5835_v32, %v5409_v31  ;;  %v5793_v13 = vld [vmem:[%s8685_s3 + $0x40c] sm:$0xf0]  ;;  %v5787_v14 = vld [vmem:[%s8685_s3 + $0x3e4] sm:$0xf]  ;;  %v5367_v32 = vld [vmem:[%s8685_s3 + $0x508] sm:$0xf] }
 0x183   : > { %3305 = vmatpush.bf16.msrb.mxu0 %v4840_v18  ;;  %3235 = vmatpush.bf16.msrb.mxu3 %v5452_v56  ;;  %v5207_v18 = vld [vmem:[%s8685_s3 + $0x3d8] sm:$0xf]  ;;  %v5359_v56 = vld [vmem:[%s8685_s3 + $0x500] sm:$0xf] }
 0x184   : > { %v5208_v35 = vor.u32 %v5792_v19, %v5207_v18  ;;  %v5360_v61 = vor.u32 %v5829_v57, %v5359_v56  ;;  %v5216_v18 = vor.u32 %v5793_v13, %v5215_v11  ;;  %v5830_v31 = vld [vmem:[%s8685_s3 + $0x534] sm:$0xf0]  ;;  %v5319_v57 = vld [vmem:[%s8685_s3 + $0x4a8] sm:$0xf] }
 0x185   : > { %3331 = vmatpush.bf16.msrb.mxu2 %v4844_v24  ;;  %v8227_v17 = vpop.f32.mrf.mxu2  ;;  %v5780_v24 = vld [vmem:[%s8685_s3 + $0x3a4] sm:$0xf0] }
 0x186   : > { %3210 = vmatpush.bf16.msrb.mxu1 %v5400_v62  ;;  %v3051_v12 = vpop.f32.mrf.mxu0  ;;  %v5160_v29 = vor.u32 %v5780_v24, %v5159_v23  ;;  %v5364_v62 = vor.u32 %v5823_v36, %v5361_v60  ;;  %v5168_v23 = vor.u32 %v5781_v21, %v5167_v20  ;;  %v5818_v36 = vld [vmem:[%s8685_s3 + $0x4d4] sm:$0xf0]  ;;  %v5812_v60 = vld [vmem:[%s8685_s3 + $0x4ac] sm:$0xf] }
 0x187   : > { %3306 = vmatpush.bf16.msrb.mxu0 %v4792_v30  ;;  %3236 = vmatpush.bf16.msrb.mxu3 %v5404_v63  ;;  %v5311_v63 = vld [vmem:[%s8685_s3 + $0x4a0] sm:$0xf] }
 0x189   : > { %3332 = vmatpush.bf16.msrb.mxu2 %v4796_v42  ;;  %v5847_v42 = vld [vmem:[%s8685_s3 + $0x5c4] sm:$0xf] }
 0x18a   : > { %3211 = vmatpush.bf16.msrb.mxu1 %v5352_v3  ;;  %v5460_v50 = vor.u32 %v5847_v42, %v5457_v45  ;;  %v5312_v3 = vor.u32 %v5817_v0, %v5311_v63  ;;  %v5468_v45 = vor.u32 %v5848_v37, %v5465_v59 }
 0x18b   : > { %3307 = vmatpush.bf16.msrb.mxu0 %v4744_v49  ;;  %3237 = vmatpush.bf16.msrb.mxu3 %v5356_v4  ;;  %v5456_v49 = vor.u32 %v5853_v41, %v5455_v40  ;;  %v5120_v40 = vor.u32 %v5769_v55, %v5119_v28 }
 0x18d   : > { %3333 = vmatpush.bf16.msrb.mxu2 %v4748_v53  ;;  %v3077_v30 = vpop.f32.mrf.mxu2 }
 0x18e   : > { %3308 = vmatmul.bf16.vlgmr.msrb.gmra.mxu0 %v7467_v44  ;;  %3212 = vmatpush.bf16.msrb.mxu1 %v5304_v8  ;;  %v8262_v38 = vpop.f32.mrf.mxu0  ;;  %v5265_v8 = vld [vmem:[%s8685_s3 + $0x470] sm:$0xf0] }
 0x18f   : > { %v5121_v30 = vld [vmem:[%s8685_s3 + $0x350] sm:$0xf0] }
 0x190   : > { %3334 = vmatmul.bf16.vlgmr.msrb.gmra.mxu2 %v7467_v44  ;;  %v5305_v44 = vld [vmem:[%s8685_s3 + $0x4c8] sm:$0xf0] }
 0x191   : > { %v5308_v9 = vor.u32 %v5810_v7, %v5305_v44  ;;  %v5805_v7 = vld [vmem:[%s8685_s3 + $0x46c] sm:$0xf0]  ;;  %v5799_v44 = vld [vmem:[%s8685_s3 + $0x444] sm:$0xf] }
 0x192   : > { %3213 = vmatpush.bf16.msrb.mxu1 %v5256_v16  ;;  %v5268_v10 = vor.u32 %v5799_v44, %v5265_v8  ;;  %v5217_v16 = vld [vmem:[%s8685_s3 + $0x410] sm:$0xf0]  ;;  %v5794_v44 = vld [vmem:[%s8685_s3 + $0x414] sm:$0xf0]  ;;  %v5788_v8 = vld [vmem:[%s8685_s3 + $0x3ec] sm:$0xf] }
 0x193   : > { %3238 = vmatpush.bf16.msrb.mxu3 %v5308_v9  ;;  %v5264_v9 = vor.u32 %v5805_v7, %v5263_v47  ;;  %v5220_v12 = vor.u32 %v5787_v14, %v5217_v16  ;;  %v5223_v7 = vld [vmem:[%s8685_s3 + $0x3e8] sm:$0xf] }
 0x194   : > { %v5224_v11 = vor.u32 %v5794_v44, %v5223_v7  ;;  %v5175_v16 = vld [vmem:[%s8685_s3 + $0x388] sm:$0xf] }
 0x195   : > { %v8291_v46 = vpop.f32.mrf.mxu2 }
 0x196   : > { %3214 = vmatpush.bf16.msrb.mxu1 %v5208_v35  ;;  %v3103_v53 = vpop.f32.mrf.mxu0  ;;  %v5775_v35 = vld [vmem:[%s8685_s3 + $0x384] sm:$0xf] }
 0x197   : > { %3239 = vmatpush.bf16.msrb.mxu3 %v5260_v26  ;;  %v5369_v53 = vld [vmem:[%s8685_s3 + $0x538] sm:$0xf0] }
 0x19a   : > { %3215 = vmatpush.bf16.msrb.mxu1 %v5160_v29  ;;  %v5763_v29 = vld [vmem:[%s8685_s3 + $0x324] sm:$0xf] }
 0x19b   : > { %3240 = vmatpush.bf16.msrb.mxu3 %v5212_v22  ;;  %v5169_v22 = vld [vmem:[%s8685_s3 + $0x3b0] sm:$0xf0]  ;;  %v5124_v41 = vor.u32 %v5763_v29, %v5121_v30  ;;  %v8476_v30 = vld [vmem:[%s8686_s4] sm:$0xff] }
 0x19c   : > { %v5172_v24 = vor.u32 %v5775_v35, %v5169_v22  ;;  %v5127_v35 = vld [vmem:[%s8685_s3 + $0x328] sm:$0xf]  ;;  %v5770_v22 = vld [vmem:[%s8685_s3 + $0x354] sm:$0xf0]  ;;  %v2057_v59 = vperm.slane %v8476_v30, 1 }
 0x19d   : > { %v3129_v27 = vpop.f32.mrf.mxu2  ;;  %v5128_v55 = vor.u32 %v5770_v22, %v5127_v35 }
 0x19e   : > { %3216 = vmatpush.bf16.msrb.mxu1 %v5112_v43  ;;  %v5415_v43 = vld [vmem:[%s8685_s3 + $0x568] sm:$0xf]  ;;  %v5800_v27 = vld [vmem:[%s8685_s3 + $0x44c] sm:$0xf] }
 0x19f   : > { %3241 = vmatpush.bf16.msrb.mxu3 %v5164_v58  ;;  %v5463_v58 = vld [vmem:[%s8685_s3 + $0x5c8] sm:$0xf] }
 0x1a0   : > { %v5464_v42 = vor.u32 %v5854_v34, %v5463_v58  ;;  %v2056_v58 = vperm.slane %v8476_v30, 0 }
 0x1a1   : > { %3217 = vmatmul.bf16.vlgmr.msrb.gmra.mxu1 %v7994_v15 }
 0x1a2   : > { %3261 = vmatpush.bf16.msra.mxu1 %v5456_v49  ;;  %v5836_v49 = vld [vmem:[%s8685_s3 + $0x56c] sm:$0xf]  ;;  %v3050_v34 = vadd.f32 %v8207_v6, %v2056_v58 }
 0x1a3   : > { %3242 = vmatpush.bf16.msrb.mxu3 %v5116_v33  ;;  %v5842_v33 = vld [vmem:[%s8685_s3 + $0x594] sm:$0xf0] }
 0x1a4   : > { %v5416_v48 = vor.u32 %v5842_v33, %v5415_v43 }
 0x1a6   : > { %3243 = vmatmul.bf16.vlgmr.msrb.gmra.mxu3 %v7994_v15  ;;  %3262 = vmatpush.bf16.msra.mxu1 %v5408_v52  ;;  %v5824_v52 = vld [vmem:[%s8685_s3 + $0x50c] sm:$0xf] }
 0x1a7   : > { %3287 = vmatpush.bf16.msra.mxu3 %v5460_v50  ;;  %v5417_v50 = vld [vmem:[%s8685_s3 + $0x598] sm:$0xf0]  ;;  %v5372_v56 = vor.u32 %v5824_v52, %v5369_v53 }
 0x1a8   : > { %v5420_v51 = vor.u32 %v5836_v49, %v5417_v50 }
 0x1aa   : > { %3263 = vmatpush.bf16.msra.mxu1 %v5360_v61  ;;  %v5321_v61 = vld [vmem:[%s8685_s3 + $0x4d8] sm:$0xf0] }
 0x1ab   : > { %3288 = vmatpush.bf16.msra.mxu3 %v5412_v54  ;;  %v8319_v4 = vpop.f32.mrf.mxu0  ;;  %v5368_v54 = vor.u32 %v5830_v31, %v5367_v32  ;;  %v5324_v0 = vor.u32 %v5812_v60, %v5321_v61 }
 0x1ae   : > { %3264 = vmatpush.bf16.msra.mxu1 %v5312_v3  ;;  %v5273_v3 = vld [vmem:[%s8685_s3 + $0x478] sm:$0xf0] }
 0x1af   : > { %3289 = vmatpush.bf16.msra.mxu3 %v5364_v62  ;;  %v5320_v62 = vor.u32 %v5818_v36, %v5319_v57  ;;  %v5276_v47 = vor.u32 %v5800_v27, %v5273_v3  ;;  %v2059_v57 = vperm.slane %v8476_v30, 3 }
 0x1b2   : > { %3265 = vmatpush.bf16.msra.mxu1 %v5264_v9  ;;  %v5225_v9 = vld [vmem:[%s8685_s3 + $0x418] sm:$0xf0] }
 0x1b3   : > { %3290 = vmatpush.bf16.msra.mxu3 %v5316_v5  ;;  %v8345_v26 = vpop.f32.mrf.mxu2  ;;  %v3155_v19 = vpop.f32.mrf.mxu0  ;;  %v5272_v5 = vor.u32 %v5806_v2, %v5271_v1  ;;  %v5228_v14 = vor.u32 %v5788_v8, %v5225_v9  ;;  %v3128_v2 = vadd.f32 %v8291_v46, %v2059_v57 }
 0x1b4   : > { %v5776_v19 = vld [vmem:[%s8685_s3 + $0x38c] sm:$0xf] }
 0x1b6   : > { %3266 = vmatpush.bf16.msra.mxu1 %v5216_v18  ;;  %v5782_v18 = vld [vmem:[%s8685_s3 + $0x3b4] sm:$0xf0] }
 0x1b7   : > { %3291 = vmatpush.bf16.msra.mxu3 %v5268_v10  ;;  %v5176_v20 = vor.u32 %v5782_v18, %v5175_v16 }
 0x1ba   : > { %3267 = vmatpush.bf16.msra.mxu1 %v5168_v23  ;;  %v5764_v23 = vld [vmem:[%s8685_s3 + $0x32c] sm:$0xf] }
 0x1bb   : > { %3292 = vmatpush.bf16.msra.mxu3 %v5220_v12  ;;  %v3181_v39 = vpop.f32.mrf.mxu2  ;;  %v5177_v12 = vld [vmem:[%s8685_s3 + $0x3b8] sm:$0xf0] }
 0x1bc   : > { %v5180_v21 = vor.u32 %v5776_v19, %v5177_v12 }
 0x1be   : > { %3268 = vmatpush.bf16.msra.mxu1 %v5120_v40 }
 0x1bf   : > { %3293 = vmatpush.bf16.msra.mxu3 %v5172_v24  ;;  %v5129_v24 = vld [vmem:[%s8685_s3 + $0x358] sm:$0xf0] }
 0x1c0   : > { %v5132_v29 = vor.u32 %v5764_v23, %v5129_v24 }
 0x1c1   : > { %3269 = vmatmul.bf16.vlgmr.msra.gmra.mxu1 %v7994_v15 }
 0x1c2   : > { %3313 = vmatpush.bf16.msrb.mxu1 %v5464_v42  ;;  %v3076_v42 = vadd.f32 %v8227_v17, %v2057_v59 }
 0x1c3   : > { %3294 = vmatpush.bf16.msra.mxu3 %v5124_v41 }
 0x1c6   : > { %3295 = vmatmul.bf16.vlgmr.msra.gmra.mxu3 %v7994_v15  ;;  %3314 = vmatpush.bf16.msrb.mxu1 %v5416_v48 }
 0x1c7   : > { %3339 = vmatpush.bf16.msrb.mxu3 %v5468_v45 }
 0x1ca   : > { %3315 = vmatpush.bf16.msrb.mxu1 %v5368_v54 }
 0x1cb   : > { %3340 = vmatpush.bf16.msrb.mxu3 %v5420_v51  ;;  %v8421_v63 = vpop.f32.mrf.mxu0  ;;  %v2058_v51 = vperm.slane %v8476_v30, 2 }
 0x1cd   : > { %v3102_v17 = vadd.f32 %v8262_v38, %v2058_v51 }
 0x1ce   : > { %3316 = vmatpush.bf16.msrb.mxu1 %v5320_v62 }
 0x1cf   : > { %3341 = vmatpush.bf16.msrb.mxu3 %v5372_v56 }
 0x1d2   : > { %3317 = vmatpush.bf16.msrb.mxu1 %v5272_v5 }
 0x1d3   : > { %3342 = vmatpush.bf16.msrb.mxu3 %v5324_v0  ;;  %v8447_v10 = vpop.f32.mrf.mxu2  ;;  %v3207_v13 = vpop.f32.mrf.mxu0 }
 0x1d4   : > { %v2060_v13 = vperm.slane %v8476_v30, 4 }
 0x1d6   : > { %3318 = vmatpush.bf16.msrb.mxu1 %v5224_v11  ;;  %v3154_v19 = vadd.f32 %v8319_v4, %v2060_v13 }
 0x1d7   : > { %3343 = vmatpush.bf16.msrb.mxu3 %v5276_v47 }
 0x1da   : > { %3319 = vmatpush.bf16.msrb.mxu1 %v5176_v20 }
 0x1db   : > { %3344 = vmatpush.bf16.msrb.mxu3 %v5228_v14  ;;  %v3233_v28 = vpop.f32.mrf.mxu2 }
 0x1de   : > { %3320 = vmatpush.bf16.msrb.mxu1 %v5128_v55  ;;  %v3062_v37 = vpop.f32.mrf.mxu1 }
 0x1df   : > { %3345 = vmatpush.bf16.msrb.mxu3 %v5180_v21  ;;  %v8483_v39 = vadd.f32 %v3062_v37, %v3050_v34  ;;  %v2061_v21 = vperm.slane %v8476_v30, 5 }
 0x1e1   : > { %3321 = vmatmul.bf16.vlgmr.msrb.gmra.mxu1 %v7994_v15  ;;  %v3354_v41 = vrot.slane %v8483_v39, 4 }
 0x1e3   : > { %3346 = vmatpush.bf16.msrb.mxu3 %v5132_v29  ;;  %v3355_v45 = vmax.f32 %v8483_v39, %v3354_v41  ;;  %v3180_v29 = vadd.f32 %v8345_v26, %v2061_v21 }
 0x1e5   : > { %v3088_v43 = vpop.f32.mrf.mxu3 }
 0x1e6   : > { %3347 = vmatmul.bf16.vlgmr.msrb.gmra.mxu3 %v7994_v15  ;;  %v8490_v33 = vadd.f32 %v3088_v43, %v3076_v42  ;;  %v3064_v49 = vpop.f32.mrf.mxu1  ;;  %v3356_v15 = vrot.slane %v3355_v45, 2 }
 0x1e8   : > { %v3360_v6 = vrot.slane %v8490_v33, 4  ;;  %v3357_v31 = vmax.f32 %v3355_v45, %v3356_v15 }
 0x1ea   : > { %v3361_v32 = vmax.f32 %v8490_v33, %v3360_v6  ;;  %v3358_v36 = vrot.slane %v3357_v31, 1 }
 0x1eb   : > { %v8485_v40 = vpop.f32.mrf.mxu0 }
 0x1ec   : > { %v3362_v52 = vrot.slane %v3361_v32, 2  ;;  %v3359_v27 = vmax.f32 %v3357_v31, %v3358_v36  ;;  %v5946_v31 = vmov -1e+30  }
 0x1ed   : > { %v3090_v53 = vpop.f32.mrf.mxu3  ;;  %333 = vst.msk [vmem:[%s8531_s21 + $0x8] sm:$0xf] %vm6334_vm0, %v5946_v31 }
 0x1ee   : > { %v3363_v54 = vmax.f32 %v3361_v32, %v3362_v52  ;;  %v3114_v56 = vpop.f32.mrf.mxu1 }
 0x1ef   : > { %v8499_v61 = vadd.f32 %v3114_v56, %v3102_v17 }
 0x1f0   : > { %v3364_v60 = vrot.slane %v3363_v54, 1 }
 0x1f1   : > { %v3366_v1 = vrot.slane %v8499_v61, 4 }
 0x1f2   : > { %v3365_v0 = vmax.f32 %v3363_v54, %v3364_v60 }
 0x1f3   : > { %v8493_v50 = vpop.f32.mrf.mxu2  ;;  %v3259_v48 = vpop.f32.mrf.mxu0  ;;  %v3367_v5 = vmax.f32 %v8499_v61, %v3366_v1 }
 0x1f4   : > { %v3438_v3 = vrot.slane %v3365_v0, 7  ;;  %v2062_v0 = vperm.slane %v8476_v30, 6 }
 0x1f5   : > { %v3140_v38 = vpop.f32.mrf.mxu3  ;;  %v3368_v7 = vrot.slane %v3367_v5, 2 }
 0x1f6   : > { %v3449_v47 = vsel %vm3448_vm1, %v3359_v27, %v3438_v3  ;;  %v8505_v44 = vadd.f32 %v3140_v38, %v3128_v2  ;;  %v3116_v8 = vpop.f32.mrf.mxu1  ;;  %v3206_v1 = vadd.f32 %v8421_v63, %v2062_v0  ;;  %v2063_v3 = vperm.slane %v8476_v30, 7  ;;  %v8544_v30 = vld [vmem:[%s8686_s4 + $0x8] sm:$0xf] }
 0x1f7   : > { %v3369_v9 = vmax.f32 %v3367_v5, %v3368_v7 }
 0x1f8   : > { %v3372_v11 = vrot.slane %v8505_v44, 4 }
 0x1f9   : > { %v3370_v16 = vrot.slane %v3369_v9, 1 }
 0x1fa   : > { %v3373_v14 = vmax.f32 %v8505_v44, %v3372_v11 }
 0x1fb   : > { %v3285_v62 = vpop.f32.mrf.mxu2  ;;  %v3371_v22 = vmax.f32 %v3369_v9, %v3370_v16 }
 0x1fc   : > { %v3374_v46 = vrot.slane %v3373_v14, 2 }
 0x1fd   : > { %v3142_v18 = vpop.f32.mrf.mxu3  ;;  %v3439_v58 = vrot.slane %v3371_v22, 6 }
 0x1fe   : > { %v3375_v12 = vmax.f32 %v3373_v14, %v3374_v46  ;;  %v3166_v35 = vpop.f32.mrf.mxu1 }
 0x1ff   : > { %v8514_v24 = vadd.f32 %v3166_v35, %v3154_v19 }
 0x200   : > { %v3376_v23 = vrot.slane %v3375_v12, 1 }
 0x201   : > { %v3378_v55 = vrot.slane %v8514_v24, 4 }
 0x202   : > { %v3377_v28 = vmax.f32 %v3375_v12, %v3376_v23  ;;  %v2064_v23 = vperm.slane %v8544_v30, 0 }
 0x203   : > { %v3379_v4 = vmax.f32 %v8514_v24, %v3378_v55 }
 0x204   : > { %v3440_v34 = vrot.slane %v3377_v28, 5 }
 0x205   : > { %v3192_v37 = vpop.f32.mrf.mxu3  ;;  %v3380_v41 = vrot.slane %v3379_v4, 2 }
 0x206   : > { %v3451_v59 = vsel %vm3450_vm2, %v3439_v58, %v3440_v34  ;;  %v8522_v45 = vadd.f32 %v3192_v37, %v3180_v29  ;;  %v3168_v15 = vpop.f32.mrf.mxu1  ;;  %v8551_v34 = vld [vmem:[%s6323_s24 + $0x8] sm:$0xff]  ;;  %v3258_v37 = vadd.f32 %v8485_v40, %v2064_v23 }
 0x207   : > { %v3453_v49 = vsel %vm3452_vm3, %v3449_v47, %v3451_v59  ;;  %v3381_v26 = vmax.f32 %v3379_v4, %v3380_v41  ;;  %v3232_v47 = vadd.f32 %v8447_v10, %v2063_v3  ;;  %v3661_v4 = vunpack.c.l.bf16 %v8551_v34 }
 0x208   : > { %v3384_v6 = vrot.slane %v8522_v45, 4  ;;  %v2065_v59 = vperm.slane %v8544_v30, 1 }
 0x209   : > { %v3382_v51 = vrot.slane %v3381_v26, 1 }
 0x20a   : > { %v3385_v48 = vmax.f32 %v8522_v45, %v3384_v6 }
 0x20b   : > { %v8511_v20 = vpop.f32.mrf.mxu0  ;;  %v3383_v54 = vmax.f32 %v3381_v26, %v3382_v51 }
 0x20c   : > { %v3386_v32 = vrot.slane %v3385_v48, 2 }
 0x20d   : > { %v3194_v52 = vpop.f32.mrf.mxu3  ;;  %v3441_v36 = vrot.slane %v3383_v54, 4 }
 0x20e   : > { %v3387_v53 = vmax.f32 %v3385_v48, %v3386_v32 }
 0x210   : > { %v3388_v56 = vrot.slane %v3387_v53, 1 }
 0x212   : > { %v3389_v57 = vmax.f32 %v3387_v53, %v3388_v56 }
 0x213   : > { %v8520_v42 = vpop.f32.mrf.mxu2  ;;  %v3311_v43 = vpop.f32.mrf.mxu0 }
 0x214   : > { %v3442_v60 = vrot.slane %v3389_v57, 3 }
 0x216   : > { %v3455_v62 = vsel %vm3454_vm4, %v3441_v36, %v3442_v60 }
 0x21b   : > { %v3337_v17 = vpop.f32.mrf.mxu2 }
 0x21e   : > { %v3218_v2 = vpop.f32.mrf.mxu1 }
 0x21f   : > { %v3219_v27 = vadd.f32 %v3218_v2, %v3206_v1 }
 0x221   : > { %v3390_v5 = vrot.slane %v3219_v27, 4 }
 0x223   : > { %v3391_v38 = vmax.f32 %v3219_v27, %v3390_v5  ;;  %v2067_v5 = vperm.slane %v8544_v30, 3 }
 0x225   : > { %v3392_v7 = vrot.slane %v3391_v38, 2 }
 0x226   : > { %v3220_v11 = vpop.f32.mrf.mxu1 }
 0x227   : > { %v3393_v13 = vmax.f32 %v3391_v38, %v3392_v7 }
 0x229   : > { %v3244_v8 = vpop.f32.mrf.mxu3  ;;  %v3394_v46 = vrot.slane %v3393_v13, 1 }
 0x22a   : > { %v3245_v9 = vadd.f32 %v3244_v8, %v3232_v47  ;;  %v5916_v8 = vld [vmem:[%s6323_s24] sm:$0xff] }
 0x22b   : > { %v3395_v12 = vmax.f32 %v3393_v13, %v3394_v46 }
 0x22c   : > { %v3396_v14 = vrot.slane %v3245_v9, 4 }
 0x22d   : > { %v3443_v10 = vrot.slane %v3395_v12, 2 }
 0x22e   : > { %v3397_v16 = vmax.f32 %v3245_v9, %v3396_v14  ;;  %v3660_v14 = vunpack.c.h.bf16 %v5916_v8 }
 0x230   : > { %v3398_v18 = vrot.slane %v3397_v16, 2 }
 0x231   : > { %v3246_v19 = vpop.f32.mrf.mxu3 }
 0x232   : > { %v3399_v63 = vmax.f32 %v3397_v16, %v3398_v18  ;;  %v8575_v16 = vld [vmem:[%s6323_s24 + $0x18] sm:$0xff] }
 0x233   : > { %v3665_v46 = vunpack.c.l.bf16 %v8575_v16  ;;  %v3666_v19 = vunpack.c.h.bf16 %v8575_v16 }
 0x234   : > { %v3400_v21 = vrot.slane %v3399_v63, 1 }
 0x236   : > { %v3401_v35 = vmax.f32 %v3399_v63, %v3400_v21  ;;  %v5918_v63 = vld [vmem:[%s6323_s24 + $0x10] sm:$0xff] }
 0x237   : > { %v3663_v12 = vunpack.c.l.bf16 %v5918_v63 }
 0x238   : > { %v3444_v22 = vrot.slane %v3401_v35, 1 }
 0x23a   : > { %v3457_v28 = vsel %vm3456_vm5, %v3443_v10, %v3444_v22  ;;  %v8585_v22 = vadd.f32 %v8520_v42, %v2067_v5 }
 0x23b   : > { %v3459_v55 = vsel %vm3458_vm6, %v3455_v62, %v3457_v28 }
 0x23c   : > { %v3461_v29 = vsel %vm3460_vm7, %v3453_v49, %v3459_v55 }
 0x23d   : > { %v3467_v58 = vmax.f32 %v3461_v29, -1e+30 }
 0x23e   : > { %v3270_v6 = vpop.f32.mrf.mxu1 }
 0x23f   : > { %v3469_v41 = vsub.f32 -1e+30, %v3467_v58  ;;  %v3477_v43 = vperm.slane %v3467_v58, 0  ;;  %v3478_v15 = vperm.slane %v3467_v58, 1  ;;  %v3479_v26 = vperm.slane %v3467_v58, 2  ;;  %3793 = vst [vmem:[%s8531_s21] sm:$0xff] %v3467_v58 }
 0x240   : > { %v3480_v48 = vperm.slane %v3467_v58, 3  ;;  %v3481_v51 = vperm.slane %v3467_v58, 4  ;;  %v3482_v32 = vperm.slane %v3467_v58, 5  ;;  %v3483_v31 = vperm.slane %v3467_v58, 6 }
 0x241   : > { %v3471_v49 = vmul.f32 1.442695, %v3469_v41  ;;  %v3484_v52 = vperm.slane %v3467_v58, 7  ;;  %v3501_v53 = vsub.f32 %v8483_v39, %v3477_v43  ;;  %v3502_v17 = vsub.f32 %v8490_v33, %v3478_v15 }
 0x242   : > { %v3503_v40 = vsub.f32 %v8499_v61, %v3479_v26  ;;  %v3504_v54 = vsub.f32 %v8505_v44, %v3480_v48  ;;  %v3505_v56 = vsub.f32 %v8514_v24, %v3481_v51  ;;  %v3506_v57 = vsub.f32 %v8522_v45, %v3482_v32 }
 0x243   : > { %5887 = vpow2.f32 %v3471_v49  ;;  %v3507_v36 = vsub.f32 %v3219_v27, %v3483_v31  ;;  %v3508_v60 = vsub.f32 %v3245_v9, %v3484_v52  ;;  %v3513_v62 = vmul.f32 1.442695, %v3501_v53 }
 0x244   : > { %v3515_v0 = vmul.f32 1.442695, %v3502_v17  ;;  %v3517_v1 = vmul.f32 1.442695, %v3503_v40  ;;  %v3519_v2 = vmul.f32 1.442695, %v3504_v54  ;;  %v8563_v3 = vadd.f32 %v3270_v6, %v3258_v37 }
 0x245   : > { %v3662_v39 = vunpack.c.h.bf16 %v8551_v34  ;;  %v3284_v33 = vadd.f32 %v8493_v50, %v2065_v59  ;;  %5889 = vpow2.f32 %v3513_v62  ;;  %v3521_v61 = vmul.f32 1.442695, %v3505_v56 }
 0x246   : > { %v2066_v44 = vperm.slane %v8544_v30, 2  ;;  %5891 = vpow2.f32 %v3515_v0  ;;  %v3523_v24 = vmul.f32 1.442695, %v3506_v57  ;;  %v3402_v45 = vrot.slane %v8563_v3, 4  ;;  %v3272_v7 = vpop.f32.mrf.mxu1 }
 0x247   : > { %5893 = vpow2.f32 %v3517_v1  ;;  %v3525_v38 = vmul.f32 1.442695, %v3507_v36  ;;  %v3659_v50 = vunpack.c.l.bf16 %v5916_v8  ;;  %v3527_v9 = vmul.f32 1.442695, %v3508_v60 }
 0x248   : > { %5895 = vpow2.f32 %v3519_v2  ;;  %v3403_v11 = vmax.f32 %v8563_v3, %v3402_v45  ;;  %v3664_v30 = vunpack.c.h.bf16 %v5918_v63  ;;  %v8582_v10 = vadd.f32 %v8511_v20, %v2066_v44 }
 0x249   : > { %v3296_v27 = vpop.f32.mrf.mxu3  ;;  %v5888_v13 = vpop.eup %5887  ;;  %5897 = vpow2.f32 %v3521_v61 }
 0x24a   : > { %v8570_v47 = vadd.f32 %v3296_v27, %v3284_v33  ;;  %5899 = vpow2.f32 %v3523_v24  ;;  %v3404_v21 = vrot.slane %v3403_v11, 2  ;;  %v8587_v28 = vmul.f32 0.0, %v5888_v13 }
 0x24b   : > { %v5890_v35 = vpop.eup %5889  ;;  %5901 = vpow2.f32 %v3525_v38 }
 0x24c   : > { %v3408_v18 = vrot.slane %v8570_v47, 4  ;;  %v5892_v23 = vpop.eup %5891  ;;  %5903 = vpow2.f32 %v3527_v9  ;;  %v3541_v55 = vrot.slane %v5890_v35, 4  ;;  %v8589_v29 = vmul.f32 %v5890_v35, %v3659_v50 }
 0x24d   : > { %v5894_v58 = vpop.eup %5893  ;;  %v3547_v37 = vrot.slane %v5892_v23, 4  ;;  %v8591_v59 = vmul.f32 %v5892_v23, %v3660_v14  ;;  %v8593_v41 = vmax.f32 %v3403_v11, %v3404_v21 }
 0x24e   : > { %v8596_v20 = vmax.f32 %v8570_v47, %v3408_v18  ;;  %v5896_v43 = vpop.eup %5895  ;;  %v3542_v42 = vadd.f32 %v5890_v35, %v3541_v55  ;;  %v3553_v15 = vrot.slane %v5894_v58, 4  ;;  %v8600_v26 = vmul.f32 %v5894_v58, %v3661_v4 }
 0x24f   : > { %v3683_v6 = vrot.slane %v8589_v29, 4  ;;  %v5898_v51 = vpop.eup %5897  ;;  %v3548_v32 = vadd.f32 %v5892_v23, %v3547_v37  ;;  %v3559_v31 = vrot.slane %v5896_v43, 4  ;;  %v8603_v49 = vmul.f32 %v5896_v43, %v3662_v39 }
 0x250   : > { %v3689_v52 = vrot.slane %v8591_v59, 4  ;;  %v5900_v53 = vpop.eup %5899  ;;  %v3543_v17 = vrot.slane %v3542_v42, 2  ;;  %v3554_v40 = vadd.f32 %v5894_v58, %v3553_v15  ;;  %v3565_v54 = vrot.slane %v5898_v51, 4 }
 0x251   : > { %v3298_v48 = vpop.f32.mrf.mxu3  ;;  %v8606_v56 = vmul.f32 %v5898_v51, %v3663_v12  ;;  %v5902_v57 = vpop.eup %5901  ;;  %v3549_v34 = vrot.slane %v3548_v32, 2  ;;  %v3560_v4 = vadd.f32 %v5896_v43, %v3559_v31  ;;  %v3571_v36 = vrot.slane %v5900_v53, 4 }
 0x252   : > { %v8608_v60 = vmul.f32 %v5900_v53, %v3664_v30  ;;  %v5904_v62 = vpop.eup %5903  ;;  %v3544_v0 = vadd.f32 %v3543_v17, %v3542_v42  ;;  %v3555_v1 = vrot.slane %v3554_v40, 2  ;;  %v3566_v2 = vadd.f32 %v5898_v51, %v3565_v54 }
 0x253   : > { %v3577_v39 = vrot.slane %v5902_v57, 4  ;;  %v3550_v33 = vadd.f32 %v3549_v34, %v3548_v32  ;;  %v3561_v61 = vrot.slane %v3560_v4, 2  ;;  %v3572_v44 = vadd.f32 %v5900_v53, %v3571_v36 }
 0x254   : > { %v3583_v24 = vrot.slane %v5904_v62, 4  ;;  %v3545_v45 = vrot.slane %v3544_v0, 1  ;;  %v3556_v27 = vadd.f32 %v3555_v1, %v3554_v40  ;;  %v3567_v5 = vrot.slane %v3566_v2, 2 }
 0x255   : > { %v3578_v38 = vadd.f32 %v5902_v57, %v3577_v39  ;;  %v3551_v7 = vrot.slane %v3550_v33, 1  ;;  %v3562_v8 = vadd.f32 %v3561_v61, %v3560_v4  ;;  %v3573_v50 = vrot.slane %v3572_v44, 2 }
 0x256   : > { %v3584_v9 = vadd.f32 %v5904_v62, %v3583_v24  ;;  %v3546_v11 = vadd.f32 %v3545_v45, %v3544_v0  ;;  %v3557_v13 = vrot.slane %v3556_v27, 1  ;;  %v3568_v14 = vadd.f32 %v3567_v5, %v3566_v2 }
 0x257   : > { %v3579_v18 = vrot.slane %v3578_v38, 2  ;;  %v3552_v63 = vadd.f32 %v3551_v7, %v3550_v33  ;;  %v3563_v12 = vrot.slane %v3562_v8, 1  ;;  %v3574_v21 = vadd.f32 %v3573_v50, %v3572_v44 }
 0x258   : > { %v3585_v35 = vrot.slane %v3584_v9, 2  ;;  %v3558_v30 = vadd.f32 %v3557_v13, %v3556_v27  ;;  %v3569_v23 = vrot.slane %v3568_v14, 1  ;;  %v3677_v58 = vmul.f32 %v5902_v57, %v3665_v46 }
 0x259   : > { %v3580_v55 = vadd.f32 %v3579_v18, %v3578_v38  ;;  %v3564_v37 = vadd.f32 %v3563_v12, %v3562_v8  ;;  %v3575_v43 = vrot.slane %v3574_v21, 1  ;;  %v3625_v15 = vrot.slane %v3552_v63, 7 }
 0x25a   : > { %v3586_v42 = vadd.f32 %v3585_v35, %v3584_v9  ;;  %v3570_v48 = vadd.f32 %v3569_v23, %v3568_v14  ;;  %v3626_v32 = vrot.slane %v3558_v30, 6  ;;  %v3678_v31 = vmul.f32 %v5904_v62, %v3666_v19 }
 0x25b   : > { %v3581_v51 = vrot.slane %v3580_v55, 1  ;;  %v3576_v53 = vadd.f32 %v3575_v43, %v3574_v21  ;;  %v3627_v40 = vrot.slane %v3564_v37, 5  ;;  %v3635_v54 = vsel %vm3448_vm1, %v3546_v11, %v3625_v15 }
 0x25c   : > { %v3587_v17 = vrot.slane %v3586_v42, 1  ;;  %v3628_v4 = vrot.slane %v3570_v48, 4  ;;  %v3684_v36 = vadd.f32 %v3683_v6, %v8589_v29  ;;  %v3690_v46 = vadd.f32 %v3689_v52, %v8591_v59 }
 0x25d   : > { %v3582_v34 = vadd.f32 %v3581_v51, %v3580_v55  ;;  %v3629_v1 = vrot.slane %v3576_v53, 3  ;;  %v3636_v2 = vsel %vm3450_vm2, %v3626_v32, %v3627_v40  ;;  %v3695_v39 = vrot.slane %v8600_v26, 4 }
 0x25e   : > { %v3322_v57 = vpop.f32.mrf.mxu1  ;;  %v3588_v0 = vadd.f32 %v3587_v17, %v3586_v42  ;;  %v3637_v19 = vsel %vm3452_vm3, %v3635_v54, %v3636_v2  ;;  %v3685_v62 = vrot.slane %v3684_v36, 2  ;;  %v3691_v33 = vrot.slane %v3690_v46, 2 }
 0x25f   : > { %v3630_v16 = vrot.slane %v3582_v34, 2  ;;  %v3638_v44 = vsel %vm3454_vm4, %v3628_v4, %v3629_v1  ;;  %v3696_v24 = vadd.f32 %v3695_v39, %v8600_v26  ;;  %v3701_v29 = vrot.slane %v8603_v49, 4 }
 0x260   : > { %v3631_v61 = vrot.slane %v3588_v0, 1  ;;  %v3686_v59 = vadd.f32 %v3685_v62, %v3684_v36  ;;  %v3692_v6 = vadd.f32 %v3691_v33, %v3690_v46  ;;  %v3707_v52 = vrot.slane %v8606_v56, 4 }
 0x261   : > { %v3713_v45 = vrot.slane %v8608_v60, 4  ;;  %v3697_v5 = vrot.slane %v3696_v24, 2  ;;  %v3702_v38 = vadd.f32 %v3701_v29, %v8603_v49  ;;  %v3719_v7 = vrot.slane %v3677_v58, 4 }
 0x262   : > { %v3639_v27 = vsel %vm3456_vm5, %v3630_v16, %v3631_v61  ;;  %v3687_v50 = vrot.slane %v3686_v59, 1  ;;  %v3693_v9 = vrot.slane %v3692_v6, 1  ;;  %v3708_v26 = vadd.f32 %v3707_v52, %v8606_v56 }
 0x263   : > { %v3640_v8 = vsel %vm3458_vm6, %v3638_v44, %v3639_v27  ;;  %v3698_v13 = vadd.f32 %v3697_v5, %v3696_v24  ;;  %v3703_v14 = vrot.slane %v3702_v38, 2  ;;  %v3714_v18 = vadd.f32 %v3713_v45, %v8608_v60 }
 0x264   : > { %v3641_v11 = vsel %vm3460_vm7, %v3637_v19, %v3640_v8  ;;  %v3694_v21 = vadd.f32 %v3693_v9, %v3692_v6  ;;  %v3709_v35 = vrot.slane %v3708_v26, 2  ;;  %v3410_v49 = vrot.slane %v8596_v20, 2 }
 0x265   : > { %v3647_v12 = vadd.f32 %v3641_v11, %v8587_v28  ;;  %v3699_v23 = vrot.slane %v3698_v13, 1  ;;  %v3704_v55 = vadd.f32 %v3703_v14, %v3702_v38  ;;  %v3715_v37 = vrot.slane %v3714_v18, 2 }
 0x266   : > { %v3324_v30 = vpop.f32.mrf.mxu1  ;;  %v3720_v43 = vadd.f32 %v3719_v7, %v3677_v58  ;;  %v3688_v56 = vadd.f32 %v3687_v50, %v3686_v59  ;;  %v3710_v42 = vadd.f32 %v3709_v35, %v3708_v26  ;;  %v3725_v15 = vrot.slane %v3678_v31, 4 }
 0x267   : > { %3649 = vst [vmem:[%s6332_s10] sm:$0xff] %v3647_v12  ;;  %v3767_v48 = vrot.slane %v3694_v21, 7  ;;  %v3700_v51 = vadd.f32 %v3699_v23, %v3698_v13  ;;  %v3705_v32 = vrot.slane %v3704_v55, 1  ;;  %v3716_v60 = vadd.f32 %v3715_v37, %v3714_v18 }
 0x268   : > { %v3721_v53 = vrot.slane %v3720_v43, 2  ;;  %v3711_v17 = vrot.slane %v3710_v42, 1  ;;  %v3726_v40 = vadd.f32 %v3725_v15, %v3678_v31  ;;  %v3406_v34 = vrot.slane %v8593_v41, 1 }
 0x269   : > { %v3348_v63 = vpop.f32.mrf.mxu3  ;;  %v3777_v54 = vsel %vm3448_vm1, %v3688_v56, %v3767_v48  ;;  %v3706_v4 = vadd.f32 %v3705_v32, %v3704_v55  ;;  %v3717_v36 = vrot.slane %v3716_v60, 1  ;;  %v3768_v0 = vrot.slane %v3700_v51, 6 }
 0x26a   : > { %v3722_v46 = vadd.f32 %v3721_v53, %v3720_v43  ;;  %v3712_v58 = vadd.f32 %v3711_v17, %v3710_v42  ;;  %v3727_v1 = vrot.slane %v3726_v40, 2  ;;  %v3411_v2 = vmax.f32 %v8596_v20, %v3410_v49  ;;  %v3353_v43 = vld [vmem:[%s8531_s21 + $0x8] sm:$0xf] }
 0x26b   : > { %v3323_v39 = vadd.f32 %v3322_v57, %v8582_v10  ;;  %v3718_v16 = vadd.f32 %v3717_v36, %v3716_v60  ;;  %v3769_v62 = vrot.slane %v3706_v4, 5  ;;  %v3349_v33 = vadd.f32 %v3348_v63, %v8585_v22 }
 0x26c   : > { %v3723_v19 = vrot.slane %v3722_v46, 1  ;;  %v3728_v61 = vadd.f32 %v3727_v1, %v3726_v40  ;;  %v3770_v44 = vrot.slane %v3712_v58, 4  ;;  %v3412_v24 = vrot.slane %v3411_v2, 1 }
 0x26d   : > { %v3414_v29 = vrot.slane %v3323_v39, 4  ;;  %v3771_v6 = vrot.slane %v3718_v16, 3  ;;  %v3778_v52 = vsel %vm3450_vm2, %v3768_v0, %v3769_v62  ;;  %v3420_v45 = vrot.slane %v3349_v33, 4  ;;  %v5919_v0 = vld [vmem:[%s6323_s24 + $0x20] sm:$0xff]  ;;  %v5920_v16 = vld [vmem:[%s6323_s24 + $0x28] sm:$0xff] }
 0x26e   : > { %v3724_v59 = vadd.f32 %v3723_v19, %v3722_v46  ;;  %v3729_v27 = vrot.slane %v3728_v61, 1  ;;  %v3779_v20 = vsel %vm3452_vm3, %v3777_v54, %v3778_v52  ;;  %v3413_v5 = vmax.f32 %v3411_v2, %v3412_v24 }
 0x26f   : > { %v3415_v10 = vmax.f32 %v3323_v39, %v3414_v29  ;;  %v3780_v57 = vsel %vm3454_vm4, %v3770_v44, %v3771_v6  ;;  %v3407_v38 = vmax.f32 %v8593_v41, %v3406_v34  ;;  %v3421_v22 = vmax.f32 %v3349_v33, %v3420_v45 }
 0x270   : > { %v3730_v7 = vadd.f32 %v3729_v27, %v3728_v61  ;;  %v3772_v8 = vrot.slane %v3724_v59, 2  ;;  %v3445_v50 = vrot.slane %v3413_v5, 7  ;;  %v3667_v58 = vunpack.c.l.bf16 %v5919_v0 }
 0x271   : > { %v3350_v31 = vpop.f32.mrf.mxu3  ;;  %v3416_v9 = vrot.slane %v3415_v10, 2  ;;  %v3422_v26 = vrot.slane %v3421_v22, 2  ;;  %v3668_v1 = vunpack.c.h.bf16 %v5919_v0 }
 0x272   : > { %v3773_v11 = vrot.slane %v3730_v7, 1  ;;  %v3462_v13 = vsel %vm3448_vm1, %v3407_v38, %v3445_v50 }
 0x273   : > { %v3417_v14 = vmax.f32 %v3415_v10, %v3416_v9  ;;  %v3423_v18 = vmax.f32 %v3421_v22, %v3422_v26 }
 0x274   : > { %v3781_v63 = vsel %vm3456_vm5, %v3772_v8, %v3773_v11 }
 0x275   : > { %v3418_v12 = vrot.slane %v3417_v14, 1  ;;  %v3782_v21 = vsel %vm3458_vm6, %v3780_v57, %v3781_v63  ;;  %v3424_v41 = vrot.slane %v3423_v18, 1 }
 0x276   : > { %v3783_v35 = vsel %vm3460_vm7, %v3779_v20, %v3782_v21 }
 0x277   : > { %v3419_v49 = vmax.f32 %v3417_v14, %v3418_v12  ;;  %v3789_v30 = vadd.f32 %v3783_v35, %v8587_v28  ;;  %v3425_v23 = vmax.f32 %v3423_v18, %v3424_v41 }
 0x279   : > { %3791 = vst [vmem:[%s6347_s15] sm:$0xff] %v3789_v30  ;;  %v3446_v55 = vrot.slane %v3419_v49, 6  ;;  %v3447_v37 = vrot.slane %v3425_v23, 5 }
 0x27b   : > { %v3463_v56 = vsel %vm3450_vm2, %v3446_v55, %v3447_v37 }
 0x27c   : > { %v3464_v42 = vsel %vm3452_vm3, %v3462_v13, %v3463_v56 }
 0x27d   : > { %v3468_v15 = vmax.f32 %v3353_v43, %v3464_v42 }
 0x27f   : > { %v3485_v48 = vperm.slane %v3468_v15, 0  ;;  %v3486_v51 = vperm.slane %v3468_v15, 1  ;;  %v3487_v32 = vperm.slane %v3468_v15, 2  ;;  %3794 = vst.msk [vmem:[%s8531_s21 + $0x8] sm:$0xf] %vm6334_vm0, %v3468_v15  ;;  %v3488_v60 = vperm.slane %v3468_v15, 3 }
 0x280   : > { %v3470_v46 = vsub.f32 %v3353_v43, %v3468_v15 }
 0x281   : > { %v3509_v28 = vsub.f32 %v8563_v3, %v3485_v48  ;;  %v3510_v53 = vsub.f32 %v8570_v47, %v3486_v51  ;;  %v3511_v17 = vsub.f32 %v3323_v39, %v3487_v32  ;;  %v3512_v40 = vsub.f32 %v3349_v33, %v3488_v60 }
 0x282   : > { %v3473_v2 = vmul.f32 1.442695, %v3470_v46  ;;  %v3669_v3 = vunpack.c.l.bf16 %v5920_v16  ;;  %v3670_v47 = vunpack.c.h.bf16 %v5920_v16  ;;  %v3538_v46 = vld [vmem:[%s6332_s10 + $0x8] sm:$0xf] }
 0x283   : > { %v3529_v54 = vmul.f32 1.442695, %v3509_v28  ;;  %v3531_v34 = vmul.f32 1.442695, %v3510_v53  ;;  %v3533_v4 = vmul.f32 1.442695, %v3511_v17 }
 0x284   : > { %v3535_v36 = vmul.f32 1.442695, %v3512_v40 }
 0x285   : > { %5905 = vpow2.f32 %v3529_v54 }
 0x286   : > { %5907 = vpow2.f32 %v3531_v34 }
 0x287   : > { %5909 = vpow2.f32 %v3533_v4 }
 0x288   : > { %5911 = vpow2.f32 %v3535_v36 }
 0x289   : > { %5913 = vpow2.f32 %v3473_v2 }
 0x28b   : > { %v5906_v19 = vpop.eup %5905 }
 0x28c   : > { %v5908_v62 = vpop.eup %5907  ;;  %v3589_v39 = vrot.slane %v5906_v19, 4  ;;  %v3679_v33 = vmul.f32 %v5906_v19, %v3667_v58 }
 0x28d   : > { %v5910_v31 = vpop.eup %5909  ;;  %v3595_v61 = vrot.slane %v5908_v62, 4  ;;  %v3680_v44 = vmul.f32 %v5908_v62, %v3668_v1 }
 0x28e   : > { %v5912_v24 = vpop.eup %5911  ;;  %v3590_v29 = vadd.f32 %v5906_v19, %v3589_v39  ;;  %v3601_v59 = vrot.slane %v5910_v31, 4  ;;  %v3681_v6 = vmul.f32 %v5910_v31, %v3669_v3  ;;  %v3731_v52 = vrot.slane %v3679_v33, 4 }
 0x28f   : > { %v3596_v45 = vadd.f32 %v5908_v62, %v3595_v61  ;;  %v3607_v27 = vrot.slane %v5912_v24, 4  ;;  %v3682_v20 = vmul.f32 %v5912_v24, %v3670_v47  ;;  %v3737_v5 = vrot.slane %v3680_v44, 4  ;;  %v5914_v18 = vpop.eup %5913  ;;  %v3656_v47 = vld [vmem:[%s6347_s15 + $0x8] sm:$0xf] }
 0x290   : > { %v3591_v10 = vrot.slane %v3590_v29, 2  ;;  %v3602_v57 = vadd.f32 %v5910_v31, %v3601_v59  ;;  %v3732_v38 = vadd.f32 %v3731_v52, %v3679_v33  ;;  %v3743_v22 = vrot.slane %v3681_v6, 4 }
 0x291   : > { %v3597_v7 = vrot.slane %v3596_v45, 2  ;;  %v3608_v8 = vadd.f32 %v5912_v24, %v3607_v27  ;;  %v3738_v50 = vadd.f32 %v3737_v5, %v3680_v44  ;;  %v3749_v9 = vrot.slane %v3682_v20, 4 }
 0x292   : > { %v3592_v26 = vadd.f32 %v3591_v10, %v3590_v29  ;;  %v3603_v11 = vrot.slane %v3602_v57, 2  ;;  %v3733_v13 = vrot.slane %v3732_v38, 2  ;;  %v3744_v14 = vadd.f32 %v3743_v22, %v3681_v6 }
 0x293   : > { %v3598_v63 = vadd.f32 %v3597_v7, %v3596_v45  ;;  %v3609_v12 = vrot.slane %v3608_v8, 2  ;;  %v3739_v21 = vrot.slane %v3738_v50, 2  ;;  %v3750_v41 = vadd.f32 %v3749_v9, %v3682_v20 }
 0x294   : > { %v3593_v35 = vrot.slane %v3592_v26, 1  ;;  %v3604_v49 = vadd.f32 %v3603_v11, %v3602_v57  ;;  %v3734_v30 = vadd.f32 %v3733_v13, %v3732_v38  ;;  %v3745_v23 = vrot.slane %v3744_v14, 2 }
 0x295   : > { %v3599_v55 = vrot.slane %v3598_v63, 1  ;;  %v3610_v37 = vadd.f32 %v3609_v12, %v3608_v8  ;;  %v3740_v43 = vadd.f32 %v3739_v21, %v3738_v50  ;;  %v3751_v56 = vrot.slane %v3750_v41, 2 }
 0x296   : > { %v3605_v42 = vrot.slane %v3604_v49, 1  ;;  %v3735_v15 = vrot.slane %v3734_v30, 1  ;;  %v3746_v48 = vadd.f32 %v3745_v23, %v3744_v14  ;;  %v3594_v53 = vadd.f32 %v3593_v35, %v3592_v26 }
 0x297   : > { %v3600_v51 = vadd.f32 %v3599_v55, %v3598_v63  ;;  %v3611_v32 = vrot.slane %v3610_v37, 1  ;;  %v3741_v60 = vrot.slane %v3740_v43, 1  ;;  %v3752_v28 = vadd.f32 %v3751_v56, %v3750_v41 }
 0x298   : > { %v3606_v17 = vadd.f32 %v3605_v42, %v3604_v49  ;;  %v3747_v40 = vrot.slane %v3746_v48, 1  ;;  %v3736_v58 = vadd.f32 %v3735_v15, %v3734_v30  ;;  %v3540_v39 = vmul.f32 %v5914_v18, %v3538_v46 }
 0x299   : > { %v3612_v54 = vadd.f32 %v3611_v32, %v3610_v37  ;;  %v3632_v34 = vrot.slane %v3600_v51, 7  ;;  %v3742_v4 = vadd.f32 %v3741_v60, %v3740_v43  ;;  %v3753_v36 = vrot.slane %v3752_v28, 1 }
 0x29a   : > { %v3633_v0 = vrot.slane %v3606_v17, 6  ;;  %v3748_v1 = vadd.f32 %v3747_v40, %v3746_v48  ;;  %v3658_v29 = vmul.f32 %v5914_v18, %v3656_v47 }
 0x29b   : > { %v3634_v2 = vrot.slane %v3612_v54, 5  ;;  %v3642_v16 = vsel %vm3448_vm1, %v3594_v53, %v3632_v34  ;;  %v3754_v3 = vadd.f32 %v3753_v36, %v3752_v28  ;;  %v3774_v19 = vrot.slane %v3742_v4, 7 }
 0x29c   : > { %v3775_v62 = vrot.slane %v3748_v1, 6 }
 0x29d   : > { %v3643_v33 = vsel %vm3450_vm2, %v3633_v0, %v3634_v2  ;;  %v3776_v31 = vrot.slane %v3754_v3, 5  ;;  %v3784_v61 = vsel %vm3448_vm1, %v3736_v58, %v3774_v19 }
 0x29e   : > { %v3644_v44 = vsel %vm3452_vm3, %v3642_v16, %v3643_v33 }
 0x29f   : > { %v3648_v24 = vadd.f32 %v3644_v44, %v3540_v39  ;;  %v3785_v59 = vsel %vm3450_vm2, %v3775_v62, %v3776_v31 }
 0x2a0   : > { %v3786_v6 = vsel %vm3452_vm3, %v3784_v61, %v3785_v59 }
 0x2a1   : > { %3654 = vst.msk [vmem:[%s6332_s10 + $0x8] sm:$0xf] %vm6334_vm0, %v3648_v24  ;;  %v3790_v52 = vadd.f32 %v3786_v6, %v3658_v29 }
 0x2a3   : > { %3792 = vst.msk [vmem:[%s6347_s15 + $0x8] sm:$0xf] %vm6334_vm0, %v3790_v52 }
 0x2a4 PF: > { %s18_s26 = sadd.s32 1, %s5943_s26   ;;  %s8692_s24 = smov %s5939_s25 }
 0x2a5   : > { %p15_p5 = scmp.ge.s32.totalorder %s18_s26, 4   ;;  %s8693_s25 = smov %s8695_s27 }
 0x2a7   :  { %17 = sbr.rel (!%p15_p5) target bundleno = 2 (0x2), region = 98 }

// kernel: attention_mil_forward.3
= control target key start
LH: loop header
LB: loop body
LE: loop exit
PB: predicated region body
PF: predicated region fallthrough
CT: control target
= control target key end

     0   :  { %12 = vsyncpa [#allocation3], 0  ;;  %s8357_s0 = inlined_call_operand.vmem [shape: bf16[2,8,1536], index: 0, kind: input, shape index: {}]   ;;  %s8358_s1 = inlined_call_operand.vmem [shape: bf16[1536,256], index: 1, kind: input, shape index: {}]   ;;  %s8359_s2 = inlined_call_operand.vmem [shape: f32[1,256], index: 2, kind: input, shape index: {}]   ;;  %s8360_s3 = inlined_call_operand.vmem [shape: bf16[256,1536], index: 3, kind: input, shape index: {}]   ;;  %s8361_s4 = inlined_call_operand.vmem [shape: f32[1,1536], index: 4, kind: input, shape index: {}]   ;;  %s8362_s5 = inlined_call_operand.vmem [shape: f32[2,1,1536], index: 5, kind: input, shape index: {}]   ;;  %s8363_s6 = inlined_call_operand.vmem [shape: f32[2,1,1536], index: 6, kind: input, shape index: {}]   ;;  %s8364_s7 = inlined_call_operand.hbm [shape: f32[2,8,1454], index: 7, kind: output, shape index: {}]  }
   0x1   :  { %14 = vsyncpa [#allocation3 + $0x1], 0  ;;  %s5728_s24 = smov 0   ;;  %s5730_s25 = smov 0  }
   0x2   :  { %s5732_s26 = smov 0   ;;  %s5734_s27 = smov 0  }
   0x3   :  { %s5736_s28 = smov 0   ;;  %s5738_s29 = smov 0  }
   0x4 LB: > { %s3592_s30 = sadd.s32 4294967295, %s5686_s29   ;;  %s3593_s8 = sadd.s32 4294967294, %s5686_s29   ;;  %s5686_s29 = sphi %s5738_s29, %s20_s29   ;;  %s5682_s28 = sphi %s5736_s28, %s8371_s28   ;;  %s5678_s27 = sphi %s5734_s27, %s8370_s27   ;;  %s5674_s26 = sphi %s5732_s26, %s8369_s26   ;;  %s5670_s25 = sphi %s5730_s25, %s8368_s25   ;;  %s5666_s24 = sphi %s5728_s24, %s8367_s24  }
   0x5   : > { %s32_s9 = sadd.s32 1, %s5682_s28  ;;  %s205_s10 = sadd.s32 1, %s5674_s26 }
   0x6   : > { %p34_p0 = scmp.ge.s32.totalorder %s32_s9, 2  ;;  %p215_p1 = scmp.ne.s32.totalorder %s5674_s26, %s5670_s25 }
   0x7   : > { %p216_p2 = scmp.eq.s32.totalorder %s3592_s30, 1  ;;  %p221_p3 = scmp.ne.s32.totalorder %s5670_s25, %s5666_s24 }
   0x8   : > { %s8373_s9 = smov (%p34_p0, %s32_s9), 0  ;;  %p222_p5 = scmp.eq.s32.totalorder %s3593_s8, 1 }
   0x9   : > { %p5768_p4 = por %p216_p2, %p215_p1  ;;  %s200_s12 = ssub.s32 %s5682_s28, %s8373_s9 }
   0xa   : > { %p3596_p6 = scmp.ge.s32.totalorder %s5686_s29, 1  ;;  %p203_p7 = scmp.eq.s32.totalorder %s200_s12, 0 }
   0xb   : > { %p5775_p8 = por %p222_p5, %p221_p3  ;;  %p278_p9 = scmp.lt.s32.totalorder %s5686_s29, 3 }
   0xc   : > { %s5781_s14 = scalar_select %p203_p7, %s5674_s26, %s205_s10  }
   0xd   : > { %p279_p10 = pnand %p3596_p6, %p278_p9 }
   0xe   : > { %p322_p11 = scmp.lt.s32.totalorder (!%p279_p10), %s5678_s27, 1  ;;  %s319_s20 = sand.u32 (!%p279_p10), 1, %s5670_s25  }
   0xf   : > { %282 = sbr.rel (%p279_p10) target bundleno = 644 (0x284), region = 48 }
  0x10   : > { %s5521_s22 = smul.u32 (!%p279_p10), 96, %s319_s20 }
  0x11   : > { %s5524_s8 = smul.u32 (!%p279_p10), 96, %s5678_s27 }
  0x13   : > { %s3484_s15 = scalar_lea.hbm (!%p279_p10), %s8364_s7, %s5524_s8 }
  0x14   : > { %v3656_v0 = vld [vmem:[%s8358_s1 + $0x70] sm:$0xf]  ;;  %v5152_v1 = vld [vmem:[%s8358_s1 + $0x74] sm:$0xf0]  ;;  %v3648_v11 = vld [vmem:[%s8358_s1 + $0x60] sm:$0xf] }
  0x15   : > { %v3720_v2 = vld [vmem:[%s8358_s1 + $0xf0] sm:$0xf]  ;;  %v3657_v3 = vor.u32 %v5152_v1, %v3656_v0  ;;  %v5168_v4 = vld [vmem:[%s8358_s1 + $0xf4] sm:$0xf0]  ;;  %v5150_v13 = vld [vmem:[%s8358_s1 + $0x64] sm:$0xf0] }
  0x16   : > { %v3784_v5 = vld [vmem:[%s8358_s1 + $0x170] sm:$0xf]  ;;  %v5184_v6 = vld [vmem:[%s8358_s1 + $0x174] sm:$0xf0]  ;;  %v3721_v7 = vor.u32 %v5168_v4, %v3720_v2  ;;  %v3712_v14 = vld [vmem:[%s8358_s1 + $0xe0] sm:$0xf]  ;;  %v3649_v16 = vor.u32 %v5150_v13, %v3648_v11 }
  0x17   : > { %v3785_v8 = vor.u32 %v5184_v6, %v3784_v5  ;;  %v3848_v9 = vld [vmem:[%s8358_s1 + $0x1f0] sm:$0xf]  ;;  %v5200_v10 = vld [vmem:[%s8358_s1 + $0x1f4] sm:$0xf0]  ;;  %1545 = vmatpush.bf16.msra.mxu0 %v3657_v3  ;;  %v5166_v15 = vld [vmem:[%s8358_s1 + $0xe4] sm:$0xf0] }
  0x18   : > { %v3849_v12 = vor.u32 %v5200_v10, %v3848_v9  ;;  %1558 = vmatpush.bf16.msra.mxu1 %v3721_v7  ;;  %v3713_v17 = vor.u32 %v5166_v15, %v3712_v14  ;;  %v3776_v18 = vld [vmem:[%s8358_s1 + $0x160] sm:$0xf]  ;;  %v5182_v19 = vld [vmem:[%s8358_s1 + $0x164] sm:$0xf0]  ;;  %v3640_v23 = vld [vmem:[%s8358_s1 + $0x50] sm:$0xf] }
  0x19   : > { %1571 = vmatpush.bf16.msra.mxu2 %v3785_v8  ;;  %v3840_v20 = vld [vmem:[%s8358_s1 + $0x1e0] sm:$0xf]  ;;  %v3777_v21 = vor.u32 %v5182_v19, %v3776_v18  ;;  %v5198_v22 = vld [vmem:[%s8358_s1 + $0x1e4] sm:$0xf0]  ;;  %v5148_v24 = vld [vmem:[%s8358_s1 + $0x54] sm:$0xf0] }
  0x1a   : > { %1584 = vmatpush.bf16.msra.mxu3 %v3849_v12  ;;  %v3841_v25 = vor.u32 %v5198_v22, %v3840_v20  ;;  %v3704_v26 = vld [vmem:[%s8358_s1 + $0xd0] sm:$0xf]  ;;  %v5164_v27 = vld [vmem:[%s8358_s1 + $0xd4] sm:$0xf0]  ;;  %v3641_v29 = vor.u32 %v5148_v24, %v3640_v23  ;;  %v3632_v35 = vld [vmem:[%s8358_s1 + $0x40] sm:$0xf] }
  0x1b   : > { %v3768_v28 = vld [vmem:[%s8358_s1 + $0x150] sm:$0xf]  ;;  %1546 = vmatpush.bf16.msra.mxu0 %v3649_v16  ;;  %v5180_v30 = vld [vmem:[%s8358_s1 + $0x154] sm:$0xf0]  ;;  %v3705_v33 = vor.u32 %v5164_v27, %v3704_v26  ;;  %v5146_v36 = vld [vmem:[%s8358_s1 + $0x44] sm:$0xf0] }
  0x1c   : > { %v3832_v31 = vld [vmem:[%s8358_s1 + $0x1d0] sm:$0xf]  ;;  %v5196_v32 = vld [vmem:[%s8358_s1 + $0x1d4] sm:$0xf0]  ;;  %1559 = vmatpush.bf16.msra.mxu1 %v3713_v17  ;;  %v3769_v34 = vor.u32 %v5180_v30, %v3768_v28  ;;  %v3696_v37 = vld [vmem:[%s8358_s1 + $0xc0] sm:$0xf]  ;;  %v3633_v44 = vor.u32 %v5146_v36, %v3632_v35 }
  0x1d   : > { %1572 = vmatpush.bf16.msra.mxu2 %v3777_v21  ;;  %v3833_v38 = vor.u32 %v5196_v32, %v3832_v31  ;;  %v5162_v39 = vld [vmem:[%s8358_s1 + $0xc4] sm:$0xf0]  ;;  %v3760_v40 = vld [vmem:[%s8358_s1 + $0x140] sm:$0xf]  ;;  %v3624_v47 = vld [vmem:[%s8358_s1 + $0x30] sm:$0xf] }
  0x1e   : > { %1585 = vmatpush.bf16.msra.mxu3 %v3841_v25  ;;  %v5178_v41 = vld [vmem:[%s8358_s1 + $0x144] sm:$0xf0]  ;;  %v3824_v42 = vld [vmem:[%s8358_s1 + $0x1c0] sm:$0xf]  ;;  %v3697_v45 = vor.u32 %v5162_v39, %v3696_v37  ;;  %v5144_v48 = vld [vmem:[%s8358_s1 + $0x34] sm:$0xf0] }
  0x1f   : > { %v5194_v43 = vld [vmem:[%s8358_s1 + $0x1c4] sm:$0xf0]  ;;  %1547 = vmatpush.bf16.msra.mxu0 %v3641_v29  ;;  %v3761_v46 = vor.u32 %v5178_v41, %v3760_v40  ;;  %v3688_v49 = vld [vmem:[%s8358_s1 + $0xb0] sm:$0xf]  ;;  %v5160_v51 = vld [vmem:[%s8358_s1 + $0xb4] sm:$0xf0]  ;;  %v3625_v56 = vor.u32 %v5144_v48, %v3624_v47 }
  0x20   : > { %1560 = vmatpush.bf16.msra.mxu1 %v3705_v33  ;;  %v3825_v50 = vor.u32 %v5194_v43, %v3824_v42  ;;  %v3752_v52 = vld [vmem:[%s8358_s1 + $0x130] sm:$0xf]  ;;  %v5176_v53 = vld [vmem:[%s8358_s1 + $0x134] sm:$0xf0]  ;;  %v3689_v57 = vor.u32 %v5160_v51, %v3688_v49  ;;  %v3616_v59 = vld [vmem:[%s8358_s1 + $0x20] sm:$0xf] }
  0x21   : > { %1573 = vmatpush.bf16.msra.mxu2 %v3769_v34  ;;  %v3816_v54 = vld [vmem:[%s8358_s1 + $0x1b0] sm:$0xf]  ;;  %v5192_v55 = vld [vmem:[%s8358_s1 + $0x1b4] sm:$0xf0]  ;;  %v3753_v58 = vor.u32 %v5176_v53, %v3752_v52  ;;  %v5142_v60 = vld [vmem:[%s8358_s1 + $0x24] sm:$0xf0] }
  0x22   : > { %1586 = vmatpush.bf16.msra.mxu3 %v3833_v38  ;;  %v3680_v61 = vld [vmem:[%s8358_s1 + $0xa0] sm:$0xf]  ;;  %v3817_v62 = vor.u32 %v5192_v55, %v3816_v54  ;;  %v5158_v63 = vld [vmem:[%s8358_s1 + $0xa4] sm:$0xf0]  ;;  %v3617_v4 = vor.u32 %v5142_v60, %v3616_v59  ;;  %v3608_v7 = vld [vmem:[%s8358_s1 + $0x10] sm:$0xf] }
  0x23   : > { %1548 = vmatpush.bf16.msra.mxu0 %v3633_v44  ;;  %v3744_v0 = vld [vmem:[%s8358_s1 + $0x120] sm:$0xf]  ;;  %v5174_v1 = vld [vmem:[%s8358_s1 + $0x124] sm:$0xf0]  ;;  %v3681_v5 = vor.u32 %v5158_v63, %v3680_v61  ;;  %v5140_v8 = vld [vmem:[%s8358_s1 + $0x14] sm:$0xf0] }
  0x24   : > { %1561 = vmatpush.bf16.msra.mxu1 %v3697_v45  ;;  %v3808_v2 = vld [vmem:[%s8358_s1 + $0x1a0] sm:$0xf]  ;;  %v5190_v3 = vld [vmem:[%s8358_s1 + $0x1a4] sm:$0xf0]  ;;  %v3745_v6 = vor.u32 %v5174_v1, %v3744_v0  ;;  %v3672_v9 = vld [vmem:[%s8358_s1 + $0x90] sm:$0xf]  ;;  %v3609_v16 = vor.u32 %v5140_v8, %v3608_v7 }
  0x25   : > { %1574 = vmatpush.bf16.msra.mxu2 %v3761_v46  ;;  %v3809_v10 = vor.u32 %v5190_v3, %v3808_v2  ;;  %v5156_v11 = vld [vmem:[%s8358_s1 + $0x94] sm:$0xf0]  ;;  %v3736_v12 = vld [vmem:[%s8358_s1 + $0x110] sm:$0xf]  ;;  %v3600_v17 = vld [vmem:[%s8358_s1] sm:$0xf] }
  0x26   : > { %1587 = vmatpush.bf16.msra.mxu3 %v3825_v50  ;;  %v5172_v13 = vld [vmem:[%s8358_s1 + $0x114] sm:$0xf0]  ;;  %v3800_v14 = vld [vmem:[%s8358_s1 + $0x190] sm:$0xf]  ;;  %v5138_v18 = vld [vmem:[%s8358_s1 + $0x4] sm:$0xf0]  ;;  %v3673_v19 = vor.u32 %v5156_v11, %v3672_v9 }
  0x27   : > { %1549 = vmatpush.bf16.msra.mxu0 %v3625_v56  ;;  %v5188_v15 = vld [vmem:[%s8358_s1 + $0x194] sm:$0xf0]  ;;  %v3737_v20 = vor.u32 %v5172_v13, %v3736_v12  ;;  %v3664_v21 = vld [vmem:[%s8358_s1 + $0x80] sm:$0xf]  ;;  %v5154_v22 = vld [vmem:[%s8358_s1 + $0x84] sm:$0xf0]  ;;  %v3601_v31 = vor.u32 %v5138_v18, %v3600_v17 }
  0x28   : > { %1562 = vmatpush.bf16.msra.mxu1 %v3689_v57  ;;  %v3728_v23 = vld [vmem:[%s8358_s1 + $0x100] sm:$0xf]  ;;  %v3801_v24 = vor.u32 %v5188_v15, %v3800_v14  ;;  %v5170_v25 = vld [vmem:[%s8358_s1 + $0x104] sm:$0xf0]  ;;  %v3912_v28 = vld [vmem:[%s8358_s1 + $0x270] sm:$0xf]  ;;  %v3665_v35 = vor.u32 %v5154_v22, %v3664_v21 }
  0x29   : > { %1575 = vmatpush.bf16.msra.mxu2 %v3753_v58  ;;  %v3792_v26 = vld [vmem:[%s8358_s1 + $0x180] sm:$0xf]  ;;  %v5186_v27 = vld [vmem:[%s8358_s1 + $0x184] sm:$0xf0]  ;;  %v5216_v29 = vld [vmem:[%s8358_s1 + $0x274] sm:$0xf0]  ;;  %v3729_v36 = vor.u32 %v5170_v25, %v3728_v23 }
  0x2a   : > { %1588 = vmatpush.bf16.msra.mxu3 %v3817_v62  ;;  %v3976_v30 = vld [vmem:[%s8358_s1 + $0x2f0] sm:$0xf]  ;;  %v5232_v32 = vld [vmem:[%s8358_s1 + $0x2f4] sm:$0xf0]  ;;  %v3793_v39 = vor.u32 %v5186_v27, %v3792_v26  ;;  %v3913_v40 = vor.u32 %v5216_v29, %v3912_v28  ;;  %v3904_v43 = vld [vmem:[%s8358_s1 + $0x260] sm:$0xf] }
  0x2b   : > { %1550 = vmatpush.bf16.msra.mxu0 %v3617_v4  ;;  %v4040_v33 = vld [vmem:[%s8358_s1 + $0x370] sm:$0xf]  ;;  %v5248_v34 = vld [vmem:[%s8358_s1 + $0x374] sm:$0xf0]  ;;  %v3977_v41 = vor.u32 %v5232_v32, %v3976_v30  ;;  %v5214_v44 = vld [vmem:[%s8358_s1 + $0x264] sm:$0xf0] }
  0x2c   : > { %1563 = vmatpush.bf16.msra.mxu1 %v3681_v5  ;;  %v4104_v37 = vld [vmem:[%s8358_s1 + $0x3f0] sm:$0xf]  ;;  %v5264_v38 = vld [vmem:[%s8358_s1 + $0x3f4] sm:$0xf0]  ;;  %v4041_v42 = vor.u32 %v5248_v34, %v4040_v33  ;;  %v3968_v45 = vld [vmem:[%s8358_s1 + $0x2e0] sm:$0xf]  ;;  %v3905_v52 = vor.u32 %v5214_v44, %v3904_v43 }
  0x2d   : > { %1576 = vmatpush.bf16.msra.mxu2 %v3745_v6  ;;  %v4105_v46 = vor.u32 %v5264_v38, %v4104_v37  ;;  %v5230_v47 = vld [vmem:[%s8358_s1 + $0x2e4] sm:$0xf0]  ;;  %v4032_v48 = vld [vmem:[%s8358_s1 + $0x360] sm:$0xf]  ;;  %v3896_v55 = vld [vmem:[%s8358_s1 + $0x250] sm:$0xf] }
  0x2e   : > { %1589 = vmatpush.bf16.msra.mxu3 %v3809_v10  ;;  %v5246_v49 = vld [vmem:[%s8358_s1 + $0x364] sm:$0xf0]  ;;  %v4096_v50 = vld [vmem:[%s8358_s1 + $0x3e0] sm:$0xf]  ;;  %v3969_v53 = vor.u32 %v5230_v47, %v3968_v45  ;;  %v5212_v56 = vld [vmem:[%s8358_s1 + $0x254] sm:$0xf0] }
  0x2f   : > { %1551 = vmatpush.bf16.msra.mxu0 %v3609_v16  ;;  %v5262_v51 = vld [vmem:[%s8358_s1 + $0x3e4] sm:$0xf0]  ;;  %v4033_v54 = vor.u32 %v5246_v49, %v4032_v48  ;;  %v3960_v57 = vld [vmem:[%s8358_s1 + $0x2d0] sm:$0xf]  ;;  %v5228_v59 = vld [vmem:[%s8358_s1 + $0x2d4] sm:$0xf0]  ;;  %v3897_v0 = vor.u32 %v5212_v56, %v3896_v55 }
  0x30   : > { %1564 = vmatpush.bf16.msra.mxu1 %v3673_v19  ;;  %v4097_v58 = vor.u32 %v5262_v51, %v4096_v50  ;;  %v4024_v60 = vld [vmem:[%s8358_s1 + $0x350] sm:$0xf]  ;;  %v5244_v61 = vld [vmem:[%s8358_s1 + $0x354] sm:$0xf0]  ;;  %v3888_v1 = vld [vmem:[%s8358_s1 + $0x240] sm:$0xf]  ;;  %v3961_v2 = vor.u32 %v5228_v59, %v3960_v57 }
  0x31   : > { %1577 = vmatpush.bf16.msra.mxu2 %v3737_v20  ;;  %v4088_v62 = vld [vmem:[%s8358_s1 + $0x3d0] sm:$0xf]  ;;  %v5260_v63 = vld [vmem:[%s8358_s1 + $0x3d4] sm:$0xf0]  ;;  %v4025_v3 = vor.u32 %v5244_v61, %v4024_v60  ;;  %v5210_v4 = vld [vmem:[%s8358_s1 + $0x244] sm:$0xf0] }
  0x32   : > { %1590 = vmatpush.bf16.msra.mxu3 %v3801_v24  ;;  %v3952_v5 = vld [vmem:[%s8358_s1 + $0x2c0] sm:$0xf]  ;;  %v5226_v6 = vld [vmem:[%s8358_s1 + $0x2c4] sm:$0xf0]  ;;  %v4089_v7 = vor.u32 %v5260_v63, %v4088_v62  ;;  %s6067_s21 = scalar_select %p322_p11, %s5678_s27, 1  ;;  %v3889_v12 = vor.u32 %v5210_v4, %v3888_v1  ;;  %vm3468_vm0 = vcmask 375808  }
  0x33   : > { %1552 = vmatpush.bf16.msra.mxu0 %v3601_v31  ;;  %v4016_v8 = vld [vmem:[%s8358_s1 + $0x340] sm:$0xf]  ;;  %v5242_v9 = vld [vmem:[%s8358_s1 + $0x344] sm:$0xf0]  ;;  %v3880_v13 = vld [vmem:[%s8358_s1 + $0x230] sm:$0xf]  ;;  %v3953_v15 = vor.u32 %v5226_v6, %v3952_v5 }
  0x34   : > { %1565 = vmatpush.bf16.msra.mxu1 %v3665_v35  ;;  %v4080_v10 = vld [vmem:[%s8358_s1 + $0x3c0] sm:$0xf]  ;;  %v5258_v11 = vld [vmem:[%s8358_s1 + $0x3c4] sm:$0xf0]  ;;  %v5208_v14 = vld [vmem:[%s8358_s1 + $0x234] sm:$0xf0]  ;;  %v4017_v16 = vor.u32 %v5242_v9, %v4016_v8 }
  0x35   : > { %1578 = vmatpush.bf16.msra.mxu2 %v3729_v36  ;;  %s5522_s17 = smul.u32 48, %s6067_s21  ;;  %v3944_v17 = vld [vmem:[%s8358_s1 + $0x2b0] sm:$0xf]  ;;  %v5224_v18 = vld [vmem:[%s8358_s1 + $0x2b4] sm:$0xf0]  ;;  %v4081_v19 = vor.u32 %v5258_v11, %v4080_v10  ;;  %v3881_v23 = vor.u32 %v5208_v14, %v3880_v13  ;;  %s3471_s27 = scalar_lea.sflag [#allocation3], %s319_s20 }
  0x36   : > { %1591 = vmatpush.bf16.msra.mxu3 %v3793_v39  ;;  %v4008_v20 = vld [vmem:[%s8358_s1 + $0x330] sm:$0xf]  ;;  %v5240_v21 = vld [vmem:[%s8358_s1 + $0x334] sm:$0xf0]  ;;  %v3945_v31 = vor.u32 %v5224_v18, %v3944_v17  ;;  %v3872_v33 = vld [vmem:[%s8358_s1 + $0x220] sm:$0xf] }
  0x37   : > { %1597 = vmatpush.bf16.msrb.mxu0 %v3913_v40  ;;  %v4072_v22 = vld [vmem:[%s8358_s1 + $0x3b0] sm:$0xf]  ;;  %s6100_s19 = scalar_lea.vmem %s8357_s0, %s5522_s17  ;;  %v5256_v24 = vld [vmem:[%s8358_s1 + $0x3b4] sm:$0xf0]  ;;  %v4009_v32 = vor.u32 %v5240_v21, %v4008_v20  ;;  %v5206_v34 = vld [vmem:[%s8358_s1 + $0x224] sm:$0xf0] }
  0x38   : > { %1610 = vmatpush.bf16.msrb.mxu1 %v3977_v41  ;;  %v340_v25 = vld [vmem:[%s6100_s19 + $0x8] sm:$0xff]  ;;  %v339_v26 = vld [vmem:[%s6100_s19] sm:$0xff]  ;;  %v4073_v36 = vor.u32 %v5256_v24, %v4072_v22  ;;  %v3864_v49 = vld [vmem:[%s8358_s1 + $0x210] sm:$0xf]  ;;  %s5523_s30 = smul.u32 12, %s6067_s21  ;;  %s8269_s17 = scalar_lea.vmem [#allocation2], %s5521_s22 }
  0x39   : > { %1623 = vmatpush.bf16.msrb.mxu2 %v4041_v42  ;;  %v551_v27 = vunpack.c.l.b16 %v340_v25  ;;  %v549_v28 = vunpack.c.l.b16 %v339_v26  ;;  %v552_v29 = vunpack.c.h.b16 %v340_v25  ;;  %v550_v30 = vunpack.c.h.b16 %v339_v26  ;;  %v3936_v35 = vld [vmem:[%s8358_s1 + $0x2a0] sm:$0xf]  ;;  %v5222_v37 = vld [vmem:[%s8358_s1 + $0x2a4] sm:$0xf0]  ;;  %v5204_v50 = vld [vmem:[%s8358_s1 + $0x214] sm:$0xf0] }
  0x3a   : > { %1636 = vmatpush.bf16.msrb.mxu3 %v4105_v46  ;;  %v4000_v38 = vld [vmem:[%s8358_s1 + $0x320] sm:$0xf]  ;;  %v5238_v39 = vld [vmem:[%s8358_s1 + $0x324] sm:$0xf0]  ;;  %v3873_v46 = vor.u32 %v5206_v34, %v3872_v33  ;;  %v3937_v47 = vor.u32 %v5222_v37, %v3936_v35  ;;  %v3928_v51 = vld [vmem:[%s8358_s1 + $0x290] sm:$0xf]  ;;  %s8237_s16 = scalar_lea.vmem %s8362_s5, %s5523_s30 }
  0x3b   : > { %1598 = vmatpush.bf16.msrb.mxu0 %v3905_v52  ;;  %v6125_v40 = vpack.c.b16 %v551_v27, %v551_v27  ;;  %v6127_v41 = vpack.c.b16 %v549_v28, %v549_v28  ;;  %v4064_v42 = vld [vmem:[%s8358_s1 + $0x3a0] sm:$0xf]  ;;  %v5254_v43 = vld [vmem:[%s8358_s1 + $0x3a4] sm:$0xf0]  ;;  %v6135_v44 = vpack.c.b16 %v552_v29, %v552_v29  ;;  %v6137_v45 = vpack.c.b16 %v550_v30, %v550_v30  ;;  %v5236_v55 = vld [vmem:[%s8358_s1 + $0x314] sm:$0xf0] }
  0x3c   : > { %1611 = vmatpush.bf16.msrb.mxu1 %v3969_v53  ;;  %v4001_v48 = vor.u32 %v5238_v39, %v4000_v38  ;;  %v4065_v52 = vor.u32 %v5254_v43, %v4064_v42  ;;  %v5220_v53 = vld [vmem:[%s8358_s1 + $0x294] sm:$0xf0]  ;;  %v4056_v56 = vld [vmem:[%s8358_s1 + $0x390] sm:$0xf]  ;;  %v3856_v59 = vld [vmem:[%s8358_s1 + $0x200] sm:$0xf] }
  0x3d   : > { %1624 = vmatpush.bf16.msrb.mxu2 %v4033_v54  ;;  %1553 = vmatmul.bf16.vlgmr.msra.gmra.mxu0 %v6127_v41  ;;  %v3992_v54 = vld [vmem:[%s8358_s1 + $0x310] sm:$0xf]  ;;  %v5252_v57 = vld [vmem:[%s8358_s1 + $0x394] sm:$0xf0]  ;;  %v5202_v60 = vld [vmem:[%s8358_s1 + $0x204] sm:$0xf0]  ;;  %v3929_v62 = vor.u32 %v5220_v53, %v3928_v51 }
  0x3e   : > { %1637 = vmatpush.bf16.msrb.mxu3 %v4097_v58  ;;  %1579 = vmatmul.bf16.vlgmr.msra.gmra.mxu2 %v6125_v40  ;;  %v3865_v58 = vor.u32 %v5204_v50, %v3864_v49  ;;  %v3920_v61 = vld [vmem:[%s8358_s1 + $0x280] sm:$0xf]  ;;  %v3993_v63 = vor.u32 %v5236_v55, %v3992_v54  ;;  %v5234_v4 = vld [vmem:[%s8358_s1 + $0x304] sm:$0xf0]  ;;  %v5280_v8 = vld [vmem:[%s8358_s1 + $0x474] sm:$0xf0]  ;;  %v3857_v10 = vor.u32 %v5202_v60, %v3856_v59 }
  0x3f   : > { %1599 = vmatpush.bf16.msrb.mxu0 %v3897_v0  ;;  %1592 = vmatmul.bf16.vlgmr.msra.gmra.mxu3 %v6135_v44  ;;  %v5218_v0 = vld [vmem:[%s8358_s1 + $0x284] sm:$0xf0]  ;;  %v3984_v1 = vld [vmem:[%s8358_s1 + $0x300] sm:$0xf]  ;;  %v4232_v9 = vld [vmem:[%s8358_s1 + $0x4f0] sm:$0xf] }
  0x40   : > { %1612 = vmatpush.bf16.msrb.mxu1 %v3961_v2  ;;  %v6183_v2 = vld [vmem:[%s6100_s19 + $0x18] sm:$0xff]  ;;  %v4048_v5 = vld [vmem:[%s8358_s1 + $0x380] sm:$0xf]  ;;  %v5250_v6 = vld [vmem:[%s8358_s1 + $0x384] sm:$0xf0]  ;;  %s3488_s21 = sshll.u32 %s3484_s15, 4  ;;  %s3489_s21 = int_to_ptr.hbm [resolvable:$true] %s3488_s21 }
  0x41   : > { %1625 = vmatpush.bf16.msrb.mxu2 %v4025_v3  ;;  %1566 = vmatmul.bf16.vlgmr.msra.gmra.mxu1 %v6137_v45  ;;  %v4057_v3 = vor.u32 %v5252_v57, %v4056_v56  ;;  %v5296_v11 = vld [vmem:[%s8358_s1 + $0x4f4] sm:$0xf0]  ;;  %v555_v14 = vunpack.c.l.b16 %v6183_v2  ;;  %v4360_v17 = vld [vmem:[%s8358_s1 + $0x5f0] sm:$0xf]  ;;  %v4049_v20 = vor.u32 %v5250_v6, %v4048_v5  ;;  %v4160_v24 = vld [vmem:[%s8358_s1 + $0x460] sm:$0xf]  ;;  %v556_v35 = vunpack.c.h.b16 %v6183_v2 }
  0x42   : > { %1638 = vmatpush.bf16.msrb.mxu3 %v4089_v7  ;;  %v4168_v7 = vld [vmem:[%s8358_s1 + $0x470] sm:$0xf]  ;;  %v5312_v13 = vld [vmem:[%s8358_s1 + $0x574] sm:$0xf0]  ;;  %v4233_v22 = vor.u32 %v5296_v11, %v4232_v9  ;;  %v5278_v25 = vld [vmem:[%s8358_s1 + $0x464] sm:$0xf0] }
  0x43   : > { %1600 = vmatpush.bf16.msrb.mxu0 %v3889_v12  ;;  %v4296_v12 = vld [vmem:[%s8358_s1 + $0x570] sm:$0xf]  ;;  %v5328_v18 = vld [vmem:[%s8358_s1 + $0x5f4] sm:$0xf0]  ;;  %v4169_v21 = vor.u32 %v5280_v8, %v4168_v7  ;;  %v4224_v26 = vld [vmem:[%s8358_s1 + $0x4e0] sm:$0xf]  ;;  %v4161_v37 = vor.u32 %v5278_v25, %v4160_v24  ;;  %v6274_v54 = vpack.c.b16 %v556_v35, %v556_v35 }
  0x44   : > { %1613 = vmatpush.bf16.msrb.mxu1 %v3953_v15  ;;  %v3921_v15 = vor.u32 %v5218_v0, %v3920_v61  ;;  %v4361_v27 = vor.u32 %v5328_v18, %v4360_v17  ;;  %v5294_v28 = vld [vmem:[%s8358_s1 + $0x4e4] sm:$0xf0]  ;;  %v4288_v29 = vld [vmem:[%s8358_s1 + $0x560] sm:$0xf]  ;;  %v4152_v42 = vld [vmem:[%s8358_s1 + $0x450] sm:$0xf] }
  0x45   : > { %1626 = vmatpush.bf16.msrb.mxu2 %v4017_v16  ;;  %v3985_v16 = vor.u32 %v5234_v4, %v3984_v1  ;;  %v5310_v30 = vld [vmem:[%s8358_s1 + $0x564] sm:$0xf0]  ;;  %v4352_v33 = vld [vmem:[%s8358_s1 + $0x5e0] sm:$0xf]  ;;  %v4225_v38 = vor.u32 %v5294_v28, %v4224_v26  ;;  %v5276_v43 = vld [vmem:[%s8358_s1 + $0x454] sm:$0xf0] }
  0x46   : > { %1639 = vmatpush.bf16.msrb.mxu3 %v4081_v19  ;;  %v341_v19 = vld [vmem:[%s6100_s19 + $0x10] sm:$0xff]  ;;  %v5326_v34 = vld [vmem:[%s8358_s1 + $0x5e4] sm:$0xf0]  ;;  %v4289_v39 = vor.u32 %v5310_v30, %v4288_v29  ;;  %v5308_v50 = vld [vmem:[%s8358_s1 + $0x554] sm:$0xf0]  ;;  %v4153_v56 = vor.u32 %v5276_v43, %v4152_v42  ;;  %s5622_s18 = sshra.s32 %s3489_s21, 4  ;;  %s5623_s18 = int_to_ptr.hbm [resolvable:$true] %s5622_s18 }
  0x47   : > { %1601 = vmatpush.bf16.msrb.mxu0 %v3881_v23  ;;  %v4297_v23 = vor.u32 %v5312_v13, %v4296_v12  ;;  %v4280_v49 = vld [vmem:[%s8358_s1 + $0x550] sm:$0xf]  ;;  %v5324_v53 = vld [vmem:[%s8358_s1 + $0x5d4] sm:$0xf0]  ;;  %v4144_v59 = vld [vmem:[%s8358_s1 + $0x440] sm:$0xf]  ;;  %p5629_p1 = scmp.lt.s32.totalorder %s5623_s18, %s8364_s7 }
  0x48   : > { %1614 = vmatpush.bf16.msrb.mxu1 %v3945_v31  ;;  %v6238_v31 = vpack.c.b16 %v555_v14, %v555_v14  ;;  %v5274_v60 = vld [vmem:[%s8358_s1 + $0x444] sm:$0xf0]  ;;  %v4208_v61 = vld [vmem:[%s8358_s1 + $0x4c0] sm:$0xf]  ;;  %v4136_v7 = vld [vmem:[%s8358_s1 + $0x430] sm:$0xf] }
  0x49   : > { %1627 = vmatpush.bf16.msrb.mxu2 %v4009_v32  ;;  %v553_v32 = vunpack.c.l.b16 %v341_v19  ;;  %v4272_v0 = vld [vmem:[%s8358_s1 + $0x540] sm:$0xf]  ;;  %v5306_v1 = vld [vmem:[%s8358_s1 + $0x544] sm:$0xf0]  ;;  %v4145_v4 = vor.u32 %v5274_v60, %v4144_v59  ;;  %v5272_v8 = vld [vmem:[%s8358_s1 + $0x434] sm:$0xf0] }
  0x4a   : > { %1640 = vmatpush.bf16.msrb.mxu3 %v4073_v36  ;;  %v554_v36 = vunpack.c.h.b16 %v341_v19  ;;  %v4336_v2 = vld [vmem:[%s8358_s1 + $0x5c0] sm:$0xf]  ;;  %v4273_v6 = vor.u32 %v5306_v1, %v4272_v0  ;;  %v4200_v9 = vld [vmem:[%s8358_s1 + $0x4b0] sm:$0xf]  ;;  %v5288_v11 = vld [vmem:[%s8358_s1 + $0x4b4] sm:$0xf0] }
  0x4b   : > { %1602 = vmatpush.bf16.msrb.mxu0 %v3873_v46  ;;  %v4216_v46 = vld [vmem:[%s8358_s1 + $0x4d0] sm:$0xf]  ;;  %v6266_v51 = vpack.c.b16 %v553_v32, %v553_v32  ;;  %v5304_v13 = vld [vmem:[%s8358_s1 + $0x534] sm:$0xf0]  ;;  %v4201_v17 = vor.u32 %v5288_v11, %v4200_v9  ;;  %v4128_v19 = vld [vmem:[%s8358_s1 + $0x420] sm:$0xf] }
  0x4c   : > { %1615 = vmatpush.bf16.msrb.mxu1 %v3937_v47  ;;  %v4353_v47 = vor.u32 %v5326_v34, %v4352_v33  ;;  %v6276_v55 = vpack.c.b16 %v554_v36, %v554_v36  ;;  %v4264_v12 = vld [vmem:[%s8358_s1 + $0x530] sm:$0xf]  ;;  %v4256_v24 = vld [vmem:[%s8358_s1 + $0x520] sm:$0xf]  ;;  %v5302_v25 = vld [vmem:[%s8358_s1 + $0x524] sm:$0xf0] }
  0x4d   : > { %1628 = vmatpush.bf16.msrb.mxu2 %v4001_v48  ;;  %v5292_v48 = vld [vmem:[%s8358_s1 + $0x4d4] sm:$0xf0]  ;;  %v4328_v14 = vld [vmem:[%s8358_s1 + $0x5b0] sm:$0xf]  ;;  %v4265_v18 = vor.u32 %v5304_v13, %v4264_v12  ;;  %v4320_v26 = vld [vmem:[%s8358_s1 + $0x5a0] sm:$0xf]  ;;  %v4257_v30 = vor.u32 %v5302_v25, %v4256_v24 }
  0x4e   : > { %1641 = vmatpush.bf16.msrb.mxu3 %v4065_v52  ;;  %v4344_v52 = vld [vmem:[%s8358_s1 + $0x5d0] sm:$0xf]  ;;  %v4217_v57 = vor.u32 %v5292_v48, %v4216_v46  ;;  %v5268_v33 = vld [vmem:[%s8358_s1 + $0x414] sm:$0xf0]  ;;  %v4112_v43 = vld [vmem:[%s8358_s1 + $0x400] sm:$0xf] }
  0x4f   : > { %1603 = vmatpush.bf16.msrb.mxu0 %v3865_v58  ;;  %v4281_v58 = vor.u32 %v5308_v50, %v4280_v49  ;;  %v4120_v32 = vld [vmem:[%s8358_s1 + $0x410] sm:$0xf]  ;;  %v5284_v36 = vld [vmem:[%s8358_s1 + $0x494] sm:$0xf0]  ;;  %v4176_v48 = vld [vmem:[%s8358_s1 + $0x480] sm:$0xf] }
  0x50   : > { %1616 = vmatpush.bf16.msrb.mxu1 %v3929_v62  ;;  %v4345_v62 = vor.u32 %v5324_v53, %v4344_v52  ;;  %v4184_v34 = vld [vmem:[%s8358_s1 + $0x490] sm:$0xf]  ;;  %v5316_v42 = vld [vmem:[%s8358_s1 + $0x594] sm:$0xf0]  ;;  %v4121_v46 = vor.u32 %v5268_v33, %v4120_v32  ;;  %v5282_v49 = vld [vmem:[%s8358_s1 + $0x484] sm:$0xf0] }
  0x51   : > { %1629 = vmatpush.bf16.msrb.mxu2 %v3993_v63  ;;  %v5290_v63 = vld [vmem:[%s8358_s1 + $0x4c4] sm:$0xf0]  ;;  %v4185_v50 = vor.u32 %v5284_v36, %v4184_v34  ;;  %v4240_v53 = vld [vmem:[%s8358_s1 + $0x500] sm:$0xf]  ;;  %v5167_v0 = vld [vmem:[%s8358_s1 + $0xf4] sm:$0xf] }
  0x52   : > { %1642 = vmatpush.bf16.msrb.mxu3 %v4057_v3  ;;  %v5322_v3 = vld [vmem:[%s8358_s1 + $0x5c4] sm:$0xf0]  ;;  %v4209_v5 = vor.u32 %v5290_v63, %v4208_v61  ;;  %v4304_v59 = vld [vmem:[%s8358_s1 + $0x580] sm:$0xf]  ;;  %v3658_v63 = vld [vmem:[%s8358_s1 + $0x78] sm:$0xf0] }
  0x53   : > { %1604 = vmatpush.bf16.msrb.mxu0 %v3857_v10  ;;  %v4337_v10 = vor.u32 %v5322_v3, %v4336_v2  ;;  %v5314_v60 = vld [vmem:[%s8358_s1 + $0x584] sm:$0xf0]  ;;  %v3722_v2 = vld [vmem:[%s8358_s1 + $0xf8] sm:$0xf0]  ;;  %v5183_v3 = vld [vmem:[%s8358_s1 + $0x174] sm:$0xf] }
  0x54   : > { %1617 = vmatpush.bf16.msrb.mxu1 %v3921_v15  ;;  %v5320_v15 = vld [vmem:[%s8358_s1 + $0x5b4] sm:$0xf0]  ;;  %v344_v61 = vld [vmem:[%s6100_s19 + $0x28] sm:$0xff]  ;;  %v3850_v9 = vld [vmem:[%s8358_s1 + $0x1f8] sm:$0xf0]  ;;  %v4305_v12 = vor.u32 %v5314_v60, %v4304_v59 }
  0x55   : > { %1630 = vmatpush.bf16.msrb.mxu2 %v3985_v16  ;;  %v4137_v16 = vor.u32 %v5272_v8, %v4136_v7  ;;  %v5199_v8 = vld [vmem:[%s8358_s1 + $0x1f4] sm:$0xf]  ;;  %v3778_v24 = vld [vmem:[%s8358_s1 + $0x168] sm:$0xf0]  ;;  %v5193_v60 = vld [vmem:[%s8358_s1 + $0x1c4] sm:$0xf] }
  0x56   : > { %1643 = vmatpush.bf16.msrb.mxu3 %v4049_v20  ;;  %1605 = vmatmul.bf16.vlgmr.msrb.gmra.mxu0 %v6266_v51  ;;  %v5270_v20 = vld [vmem:[%s8358_s1 + $0x424] sm:$0xf0]  ;;  %v5147_v34 = vld [vmem:[%s8358_s1 + $0x54] sm:$0xf]  ;;  %v3762_v59 = vld [vmem:[%s8358_s1 + $0x148] sm:$0xf0] }
  0x57   : > { %1649 = vmatpush.bf16.msra.mxu0 %v4169_v21  ;;  %1618 = vmatmul.bf16.vlgmr.msrb.gmra.mxu1 %v6276_v55  ;;  %v4192_v21 = vld [vmem:[%s8358_s1 + $0x4a0] sm:$0xf]  ;;  %v4129_v28 = vor.u32 %v5270_v20, %v4128_v19  ;;  %v5165_v19 = vld [vmem:[%s8358_s1 + $0xe4] sm:$0xf]  ;;  %v3853_v20 = vor.u32 %v5199_v8, %v3850_v9  ;;  %v5163_v36 = vld [vmem:[%s8358_s1 + $0xd4] sm:$0xf] }
  0x58   : > { %1662 = vmatpush.bf16.msra.mxu1 %v4233_v22  ;;  %1631 = vmatmul.bf16.vlgmr.msrb.gmra.mxu2 %v6238_v31  ;;  %v4329_v22 = vor.u32 %v5320_v15, %v4328_v14  ;;  %v560_v14 = vunpack.c.h.b16 %v344_v61  ;;  %v3725_v15 = vor.u32 %v5167_v0, %v3722_v2  ;;  %v3626_v2 = vld [vmem:[%s8358_s1 + $0x38] sm:$0xf0]  ;;  %v5191_v8 = vld [vmem:[%s8358_s1 + $0x1b4] sm:$0xf] }
  0x59   : > { %1675 = vmatpush.bf16.msra.mxu2 %v4297_v23  ;;  %1644 = vmatmul.bf16.vlgmr.msrb.gmra.mxu3 %v6274_v54  ;;  %v5286_v23 = vld [vmem:[%s8358_s1 + $0x4a4] sm:$0xf0]  ;;  %v3818_v9 = vld [vmem:[%s8358_s1 + $0x1b8] sm:$0xf0] }
  0x5a   : > { %1688 = vmatpush.bf16.msra.mxu3 %v4361_v27  ;;  %v5318_v27 = vld [vmem:[%s8358_s1 + $0x5a4] sm:$0xf0]  ;;  %v4193_v29 = vor.u32 %v5286_v23, %v4192_v21  ;;  %v5181_v23 = vld [vmem:[%s8358_s1 + $0x164] sm:$0xf] }
  0x5b   : > { %1650 = vmatpush.bf16.msra.mxu0 %v4161_v37  ;;  %v4321_v35 = vor.u32 %v5318_v27, %v4320_v26  ;;  %v4248_v37 = vld [vmem:[%s8358_s1 + $0x510] sm:$0xf]  ;;  %v5197_v27 = vld [vmem:[%s8358_s1 + $0x1e4] sm:$0xf]  ;;  %v3781_v33 = vor.u32 %v5181_v23, %v3778_v24 }
  0x5c   : > { %1663 = vmatpush.bf16.msra.mxu1 %v4225_v38  ;;  %v5300_v38 = vld [vmem:[%s8358_s1 + $0x514] sm:$0xf0] }
  0x5d   : > { %1676 = vmatpush.bf16.msra.mxu2 %v4289_v39  ;;  %v4312_v39 = vld [vmem:[%s8358_s1 + $0x590] sm:$0xf]  ;;  %v4249_v52 = vor.u32 %v5300_v38, %v4248_v37  ;;  %v3706_v38 = vld [vmem:[%s8358_s1 + $0xd8] sm:$0xf0] }
  0x5e   : > { %1689 = vmatpush.bf16.msra.mxu3 %v4353_v47  ;;  %v5266_v47 = vld [vmem:[%s8358_s1 + $0x404] sm:$0xf0] }
  0x5f   : > { %1651 = vmatpush.bf16.msra.mxu0 %v4153_v56  ;;  %v5298_v56 = vld [vmem:[%s8358_s1 + $0x504] sm:$0xf0]  ;;  %v4113_v1 = vor.u32 %v5266_v47, %v4112_v43  ;;  %v5195_v43 = vld [vmem:[%s8358_s1 + $0x1d4] sm:$0xf] }
  0x60   : > { %1664 = vmatpush.bf16.msra.mxu1 %v4217_v57  ;;  %v343_v57 = vld [vmem:[%s6100_s19 + $0x20] sm:$0xff]  ;;  %v4241_v7 = vor.u32 %v5298_v56, %v4240_v53  ;;  %s8253_s19 = scalar_lea.vmem %s8363_s6, %s5523_s30  ;;  %s5628_s30 = scalar_lea.hbm %s8364_s7, 192 }
  0x61   : > { %1677 = vmatpush.bf16.msra.mxu2 %v4281_v58  ;;  %v4313_v58 = vor.u32 %v5316_v42, %v4312_v39  ;;  %v558_v11 = vunpack.c.h.b16 %v343_v57  ;;  %v5179_v39 = vld [vmem:[%s8358_s1 + $0x154] sm:$0xf]  ;;  %v3770_v42 = vld [vmem:[%s8358_s1 + $0x158] sm:$0xf0]  ;;  %v5161_v53 = vld [vmem:[%s8358_s1 + $0xc4] sm:$0xf] }
  0x62   : > { %1690 = vmatpush.bf16.msra.mxu3 %v4345_v62  ;;  %v5151_v62 = vld [vmem:[%s8358_s1 + $0x74] sm:$0xf] }
  0x63   : > { %1652 = vmatpush.bf16.msra.mxu0 %v4145_v4  ;;  %v3786_v4 = vld [vmem:[%s8358_s1 + $0x178] sm:$0xf0]  ;;  %v3661_v13 = vor.u32 %v5151_v62, %v3658_v63  ;;  %v6449_v26 = vpack.c.b16 %v558_v11, %v558_v11 }
  0x64   : > { %1665 = vmatpush.bf16.msra.mxu1 %v4209_v5  ;;  %v557_v5 = vunpack.c.l.b16 %v343_v57  ;;  %v3698_v57 = vld [vmem:[%s8358_s1 + $0xc8] sm:$0xf0] }
  0x65   : > { %1678 = vmatpush.bf16.msra.mxu2 %v4273_v6  ;;  %v4177_v6 = vor.u32 %v5282_v49, %v4176_v48  ;;  %v3709_v48 = vor.u32 %v5163_v36, %v3706_v38  ;;  %v3773_v49 = vor.u32 %v5179_v39, %v3770_v42  ;;  %v3701_v63 = vor.u32 %v5161_v53, %v3698_v57  ;;  %v3738_v36 = vld [vmem:[%s8358_s1 + $0x118] sm:$0xf0]  ;;  %v5137_v42 = vld [vmem:[%s8358_s1 + $0x4] sm:$0xf]  ;;  %v3730_v53 = vld [vmem:[%s8358_s1 + $0x108] sm:$0xf0] }
  0x66   : > { %1691 = vmatpush.bf16.msra.mxu3 %v4337_v10  ;;  %v559_v10 = vunpack.c.l.b16 %v344_v61  ;;  %v6436_v21 = vpack.c.b16 %v557_v5, %v557_v5  ;;  %v3826_v61 = vld [vmem:[%s8358_s1 + $0x1c8] sm:$0xf0]  ;;  %v3690_v5 = vld [vmem:[%s8358_s1 + $0xb8] sm:$0xf0] }
  0x67   : > { %1653 = vmatpush.bf16.msra.mxu0 %v4137_v16  ;;  %v3789_v16 = vor.u32 %v5183_v3, %v3786_v4  ;;  %v5159_v3 = vld [vmem:[%s8358_s1 + $0xb4] sm:$0xf]  ;;  %v3829_v4 = vor.u32 %v5193_v60, %v3826_v61  ;;  %v3802_v38 = vld [vmem:[%s8358_s1 + $0x198] sm:$0xf0]  ;;  %v3794_v57 = vld [vmem:[%s8358_s1 + $0x188] sm:$0xf0] }
  0x68   : > { %1666 = vmatpush.bf16.msra.mxu1 %v4201_v17  ;;  %v5149_v17 = vld [vmem:[%s8358_s1 + $0x64] sm:$0xf]  ;;  %v6447_v25 = vpack.c.b16 %v559_v10, %v559_v10  ;;  %v3693_v11 = vor.u32 %v5159_v3, %v3690_v5  ;;  %v5231_v60 = vld [vmem:[%s8358_s1 + $0x2f4] sm:$0xf] }
  0x69   : > { %1679 = vmatpush.bf16.msra.mxu2 %v4265_v18  ;;  %v3650_v18 = vld [vmem:[%s8358_s1 + $0x68] sm:$0xf0]  ;;  %v5263_v3 = vld [vmem:[%s8358_s1 + $0x3f4] sm:$0xf] }
  0x6a   : > { %1692 = vmatpush.bf16.msra.mxu3 %v4329_v22  ;;  %v3714_v22 = vld [vmem:[%s8358_s1 + $0xe8] sm:$0xf0] }
  0x6b   : > { %1654 = vmatpush.bf16.msra.mxu0 %v4129_v28  ;;  %v3842_v28 = vld [vmem:[%s8358_s1 + $0x1e8] sm:$0xf0]  ;;  %v3717_v32 = vor.u32 %v5165_v19, %v3714_v22 }
  0x6c   : > { %1667 = vmatpush.bf16.msra.mxu1 %v4193_v29  ;;  %v6457_v29 = vpack.c.b16 %v560_v14, %v560_v14  ;;  %v3845_v37 = vor.u32 %v5197_v27, %v3842_v28  ;;  %v3618_v14 = vld [vmem:[%s8358_s1 + $0x28] sm:$0xf0]  ;;  %v5139_v28 = vld [vmem:[%s8358_s1 + $0x14] sm:$0xf] }
  0x6d   : > { %1680 = vmatpush.bf16.msra.mxu2 %v4257_v30  ;;  %v3653_v30 = vor.u32 %v5149_v17, %v3650_v18  ;;  %v3682_v17 = vld [vmem:[%s8358_s1 + $0xa8] sm:$0xf0]  ;;  %v5173_v18 = vld [vmem:[%s8358_s1 + $0x124] sm:$0xf] }
  0x6e   : > { %1693 = vmatpush.bf16.msra.mxu3 %v4321_v35  ;;  %v3642_v35 = vld [vmem:[%s8358_s1 + $0x58] sm:$0xf0]  ;;  %v3746_v19 = vld [vmem:[%s8358_s1 + $0x128] sm:$0xf0] }
  0x6f   : > { %1655 = vmatpush.bf16.msra.mxu0 %v4121_v46  ;;  %v3834_v46 = vld [vmem:[%s8358_s1 + $0x1d8] sm:$0xf0]  ;;  %v3645_v47 = vor.u32 %v5147_v34, %v3642_v35  ;;  %v3810_v22 = vld [vmem:[%s8358_s1 + $0x1a8] sm:$0xf0]  ;;  %v3749_v27 = vor.u32 %v5173_v18, %v3746_v19  ;;  %v5171_v35 = vld [vmem:[%s8358_s1 + $0x114] sm:$0xf] }
  0x70   : > { %1668 = vmatpush.bf16.msra.mxu1 %v4185_v50  ;;  %v5145_v50 = vld [vmem:[%s8358_s1 + $0x44] sm:$0xf]  ;;  %v3837_v56 = vor.u32 %v5195_v43, %v3834_v46  ;;  %v3674_v34 = vld [vmem:[%s8358_s1 + $0x98] sm:$0xf0]  ;;  %v3602_v43 = vld [vmem:[%s8358_s1 + $0x8] sm:$0xf0] }
  0x71   : > { %1681 = vmatpush.bf16.msra.mxu2 %v4249_v52  ;;  %v3634_v52 = vld [vmem:[%s8358_s1 + $0x48] sm:$0xf0]  ;;  %v3605_v61 = vor.u32 %v5137_v42, %v3602_v43  ;;  %v5257_v43 = vld [vmem:[%s8358_s1 + $0x3c4] sm:$0xf] }
  0x72   : > { %1694 = vmatpush.bf16.msra.mxu3 %v4313_v58  ;;  %v5177_v58 = vld [vmem:[%s8358_s1 + $0x144] sm:$0xf]  ;;  %v3637_v62 = vor.u32 %v5145_v50, %v3634_v52  ;;  %v4018_v42 = vld [vmem:[%s8358_s1 + $0x348] sm:$0xf0] }
  0x73   : > { %1656 = vmatpush.bf16.msra.mxu0 %v4113_v1  ;;  %v3765_v0 = vor.u32 %v5177_v58, %v3762_v59  ;;  %v5143_v1 = vld [vmem:[%s8358_s1 + $0x34] sm:$0xf]  ;;  %v5169_v50 = vld [vmem:[%s8358_s1 + $0x104] sm:$0xf]  ;;  %v3914_v59 = vld [vmem:[%s8358_s1 + $0x278] sm:$0xf0] }
  0x74   : > { %1669 = vmatpush.bf16.msra.mxu1 %v4177_v6  ;;  %v5175_v6 = vld [vmem:[%s8358_s1 + $0x134] sm:$0xf]  ;;  %v3629_v10 = vor.u32 %v5143_v1, %v3626_v2  ;;  %v3733_v2 = vor.u32 %v5169_v50, %v3730_v53 }
  0x75   : > { %1682 = vmatpush.bf16.msra.mxu2 %v4241_v7  ;;  %v3754_v7 = vld [vmem:[%s8358_s1 + $0x138] sm:$0xf0]  ;;  %v5215_v58 = vld [vmem:[%s8358_s1 + $0x274] sm:$0xf] }
  0x76   : > { %1695 = vmatpush.bf16.msra.mxu3 %v4305_v12  ;;  %1657 = vmatmul.bf16.vlgmr.msra.gmra.mxu0 %v6436_v21  ;;  %v3757_v12 = vor.u32 %v5175_v6, %v3754_v7  ;;  %v3917_v6 = vor.u32 %v5215_v58, %v3914_v59  ;;  %v5207_v50 = vld [vmem:[%s8358_s1 + $0x234] sm:$0xf]  ;;  %v4010_v59 = vld [vmem:[%s8358_s1 + $0x338] sm:$0xf0] }
  0x77   : > { %1701 = vmatpush.bf16.msrb.mxu0 %v3661_v13  ;;  %1670 = vmatmul.bf16.vlgmr.msra.gmra.mxu1 %v6449_v26  ;;  %v5141_v13 = vld [vmem:[%s8358_s1 + $0x24] sm:$0xf]  ;;  %v5223_v53 = vld [vmem:[%s8358_s1 + $0x2b4] sm:$0xf] }
  0x78   : > { %1714 = vmatpush.bf16.msrb.mxu1 %v3725_v15  ;;  %1683 = vmatmul.bf16.vlgmr.msra.gmra.mxu2 %v6447_v25  ;;  %v5157_v15 = vld [vmem:[%s8358_s1 + $0xa4] sm:$0xf]  ;;  %v3621_v23 = vor.u32 %v5141_v13, %v3618_v14  ;;  %v3970_v13 = vld [vmem:[%s8358_s1 + $0x2e8] sm:$0xf0]  ;;  %v5239_v58 = vld [vmem:[%s8358_s1 + $0x334] sm:$0xf] }
  0x79   : > { %1727 = vmatpush.bf16.msrb.mxu2 %v3789_v16  ;;  %1696 = vmatmul.bf16.vlgmr.msra.gmra.mxu3 %v6457_v29  ;;  %v3821_v16 = vor.u32 %v5191_v8, %v3818_v9  ;;  %v3685_v24 = vor.u32 %v5157_v15, %v3682_v17  ;;  %v5213_v9 = vld [vmem:[%s8358_s1 + $0x264] sm:$0xf]  ;;  %v4034_v15 = vld [vmem:[%s8358_s1 + $0x368] sm:$0xf0] }
  0x7a   : > { %1740 = vmatpush.bf16.msrb.mxu3 %v3853_v20  ;;  %v5189_v20 = vld [vmem:[%s8358_s1 + $0x1a4] sm:$0xf]  ;;  %v4098_v17 = vld [vmem:[%s8358_s1 + $0x3e8] sm:$0xf0] }
  0x7b   : > { %1702 = vmatpush.bf16.msrb.mxu0 %v3653_v30  ;;  %v3610_v30 = vld [vmem:[%s8358_s1 + $0x18] sm:$0xf0]  ;;  %v5245_v14 = vld [vmem:[%s8358_s1 + $0x364] sm:$0xf] }
  0x7c   : > { %1715 = vmatpush.bf16.msrb.mxu1 %v3717_v32  ;;  %v5155_v32 = vld [vmem:[%s8358_s1 + $0x94] sm:$0xf]  ;;  %v3613_v39 = vor.u32 %v5139_v28, %v3610_v30  ;;  %v3962_v28 = vld [vmem:[%s8358_s1 + $0x2d8] sm:$0xf0] }
  0x7d   : > { %1728 = vmatpush.bf16.msrb.mxu2 %v3781_v33  ;;  %v3813_v33 = vor.u32 %v5189_v20, %v3810_v22  ;;  %v3677_v46 = vor.u32 %v5155_v32, %v3674_v34  ;;  %v4037_v20 = vor.u32 %v5245_v14, %v4034_v15  ;;  %v5211_v22 = vld [vmem:[%s8358_s1 + $0x254] sm:$0xf]  ;;  %v4026_v32 = vld [vmem:[%s8358_s1 + $0x358] sm:$0xf0] }
  0x7e   : > { %1741 = vmatpush.bf16.msrb.mxu3 %v3845_v37  ;;  %v5187_v37 = vld [vmem:[%s8358_s1 + $0x194] sm:$0xf]  ;;  %v4090_v34 = vld [vmem:[%s8358_s1 + $0x3d8] sm:$0xf0] }
  0x7f   : > { %1703 = vmatpush.bf16.msrb.mxu0 %v3645_v47  ;;  %v3741_v47 = vor.u32 %v5171_v35, %v3738_v36  ;;  %v3805_v52 = vor.u32 %v5187_v37, %v3802_v38  ;;  %v5243_v30 = vld [vmem:[%s8358_s1 + $0x354] sm:$0xf]  ;;  %v5209_v37 = vld [vmem:[%s8358_s1 + $0x244] sm:$0xf]  ;;  %v3890_v38 = vld [vmem:[%s8358_s1 + $0x248] sm:$0xf0] }
  0x80   : > { %1716 = vmatpush.bf16.msrb.mxu1 %v3709_v48  ;;  %v5153_v48 = vld [vmem:[%s8358_s1 + $0x84] sm:$0xf]  ;;  %v3866_v14 = vld [vmem:[%s8358_s1 + $0x218] sm:$0xf0]  ;;  %v5219_v15 = vld [vmem:[%s8358_s1 + $0x294] sm:$0xf] }
  0x81   : > { %1729 = vmatpush.bf16.msrb.mxu2 %v3773_v49  ;;  %v3666_v49 = vld [vmem:[%s8358_s1 + $0x88] sm:$0xf0] }
  0x82   : > { %1742 = vmatpush.bf16.msrb.mxu3 %v3837_v56  ;;  %v5185_v56 = vld [vmem:[%s8358_s1 + $0x184] sm:$0xf]  ;;  %v3669_v1 = vor.u32 %v5153_v48, %v3666_v49 }
  0x83   : > { %1704 = vmatpush.bf16.msrb.mxu0 %v3637_v62  ;;  %v3978_v62 = vld [vmem:[%s8358_s1 + $0x2f8] sm:$0xf0]  ;;  %v3797_v5 = vor.u32 %v5185_v56, %v3794_v57 }
  0x84   : > { %1717 = vmatpush.bf16.msrb.mxu1 %v3701_v63  ;;  %v5247_v63 = vld [vmem:[%s8358_s1 + $0x374] sm:$0xf]  ;;  %v3981_v7 = vor.u32 %v5231_v60, %v3978_v62  ;;  %v3946_v57 = vld [vmem:[%s8358_s1 + $0x2b8] sm:$0xf0] }
  0x85   : > { %1730 = vmatpush.bf16.msrb.mxu2 %v3765_v0  ;;  %v4042_v0 = vld [vmem:[%s8358_s1 + $0x378] sm:$0xf0]  ;;  %v5255_v60 = vld [vmem:[%s8358_s1 + $0x3b4] sm:$0xf] }
  0x86   : > { %1743 = vmatpush.bf16.msrb.mxu3 %v3829_v4  ;;  %v4106_v4 = vld [vmem:[%s8358_s1 + $0x3f8] sm:$0xf0]  ;;  %v4045_v8 = vor.u32 %v5247_v63, %v4042_v0  ;;  %v3949_v63 = vor.u32 %v5223_v53, %v3946_v57  ;;  %v4013_v0 = vor.u32 %v5239_v58, %v4010_v59  ;;  %v5277_v57 = vld [vmem:[%s8358_s1 + $0x464] sm:$0xf]  ;;  %v4162_v58 = vld [vmem:[%s8358_s1 + $0x468] sm:$0xf0] }
  0x87   : > { %1705 = vmatpush.bf16.msrb.mxu0 %v3629_v10  ;;  %v3906_v10 = vld [vmem:[%s8358_s1 + $0x268] sm:$0xf0]  ;;  %v5293_v59 = vld [vmem:[%s8358_s1 + $0x4e4] sm:$0xf] }
  0x88   : > { %1718 = vmatpush.bf16.msrb.mxu1 %v3693_v11  ;;  %v5229_v11 = vld [vmem:[%s8358_s1 + $0x2e4] sm:$0xf]  ;;  %v3909_v18 = vor.u32 %v5213_v9, %v3906_v10  ;;  %v4066_v9 = vld [vmem:[%s8358_s1 + $0x3a8] sm:$0xf0] }
  0x89   : > { %1731 = vmatpush.bf16.msrb.mxu2 %v3757_v12  ;;  %v4109_v12 = vor.u32 %v5263_v3, %v4106_v4  ;;  %v3973_v19 = vor.u32 %v5229_v11, %v3970_v13  ;;  %v5221_v3 = vld [vmem:[%s8358_s1 + $0x2a4] sm:$0xf]  ;;  %v5203_v13 = vld [vmem:[%s8358_s1 + $0x214] sm:$0xf] }
  0x8a   : > { %1744 = vmatpush.bf16.msrb.mxu3 %v3821_v16  ;;  %v5261_v16 = vld [vmem:[%s8358_s1 + $0x3e4] sm:$0xf] }
  0x8b   : > { %1706 = vmatpush.bf16.msrb.mxu0 %v3621_v23  ;;  %v3898_v23 = vld [vmem:[%s8358_s1 + $0x258] sm:$0xf0] }
  0x8c   : > { %1719 = vmatpush.bf16.msrb.mxu1 %v3685_v24  ;;  %v5227_v24 = vld [vmem:[%s8358_s1 + $0x2d4] sm:$0xf]  ;;  %v3901_v35 = vor.u32 %v5211_v22, %v3898_v23  ;;  %v4058_v22 = vld [vmem:[%s8358_s1 + $0x398] sm:$0xf0]  ;;  %v3869_v23 = vor.u32 %v5203_v13, %v3866_v14 }
  0x8d   : > { %1732 = vmatpush.bf16.msrb.mxu2 %v3749_v27  ;;  %v4101_v27 = vor.u32 %v5261_v16, %v4098_v17  ;;  %v3965_v36 = vor.u32 %v5227_v24, %v3962_v28  ;;  %v3930_v17 = vld [vmem:[%s8358_s1 + $0x298] sm:$0xf0]  ;;  %v5201_v24 = vld [vmem:[%s8358_s1 + $0x204] sm:$0xf] }
  0x8e   : > { %1745 = vmatpush.bf16.msrb.mxu3 %v3813_v33  ;;  %v5259_v33 = vld [vmem:[%s8358_s1 + $0x3d4] sm:$0xf]  ;;  %v3933_v28 = vor.u32 %v5219_v15, %v3930_v17  ;;  %v4146_v17 = vld [vmem:[%s8358_s1 + $0x448] sm:$0xf0] }
  0x8f   : > { %1707 = vmatpush.bf16.msrb.mxu0 %v3613_v39  ;;  %v5241_v39 = vld [vmem:[%s8358_s1 + $0x344] sm:$0xf] }
  0x90   : > { %1720 = vmatpush.bf16.msrb.mxu1 %v3677_v46  ;;  %v4082_v46 = vld [vmem:[%s8358_s1 + $0x3c8] sm:$0xf0]  ;;  %v4021_v49 = vor.u32 %v5241_v39, %v4018_v42  ;;  %v4234_v39 = vld [vmem:[%s8358_s1 + $0x4f8] sm:$0xf0]  ;;  %v5311_v42 = vld [vmem:[%s8358_s1 + $0x574] sm:$0xf] }
  0x91   : > { %1733 = vmatpush.bf16.msrb.mxu2 %v3741_v47  ;;  %v3893_v47 = vor.u32 %v5209_v37, %v3890_v38  ;;  %v4085_v56 = vor.u32 %v5257_v43, %v4082_v46  ;;  %v4050_v37 = vld [vmem:[%s8358_s1 + $0x388] sm:$0xf0]  ;;  %v5279_v38 = vld [vmem:[%s8358_s1 + $0x474] sm:$0xf]  ;;  %v4298_v43 = vld [vmem:[%s8358_s1 + $0x578] sm:$0xf0] }
  0x92   : > { %1746 = vmatpush.bf16.msrb.mxu3 %v3805_v52  ;;  %v3882_v52 = vld [vmem:[%s8358_s1 + $0x238] sm:$0xf0] }
  0x93   : > { %1708 = vmatpush.bf16.msrb.mxu0 %v3605_v61  ;;  %v4074_v61 = vld [vmem:[%s8358_s1 + $0x3b8] sm:$0xf0]  ;;  %v3885_v62 = vor.u32 %v5207_v50, %v3882_v52 }
  0x94   : > { %1721 = vmatpush.bf16.msrb.mxu1 %v3669_v1  ;;  %v5205_v1 = vld [vmem:[%s8358_s1 + $0x224] sm:$0xf]  ;;  %v4077_v4 = vor.u32 %v5255_v60, %v4074_v61  ;;  %v4226_v61 = vld [vmem:[%s8358_s1 + $0x4e8] sm:$0xf0] }
  0x95   : > { %1734 = vmatpush.bf16.msrb.mxu2 %v3733_v2  ;;  %v3874_v2 = vld [vmem:[%s8358_s1 + $0x228] sm:$0xf0] }
  0x96   : > { %1747 = vmatpush.bf16.msrb.mxu3 %v3797_v5  ;;  %1709 = vmatmul.bf16.vlgmr.msrb.gmra.mxu0 %v6127_v41  ;;  %v5225_v41 = vld [vmem:[%s8358_s1 + $0x2c4] sm:$0xf]  ;;  %v3938_v5 = vld [vmem:[%s8358_s1 + $0x2a8] sm:$0xf0]  ;;  %v3877_v10 = vor.u32 %v5205_v1, %v3874_v2  ;;  %v4165_v2 = vor.u32 %v5277_v57, %v4162_v58  ;;  %v5267_v57 = vld [vmem:[%s8358_s1 + $0x414] sm:$0xf] }
  0x97   : > { %1753 = vmatpush.bf16.msra.mxu0 %v3917_v6  ;;  %1722 = vmatmul.bf16.vlgmr.msrb.gmra.mxu1 %v6137_v45  ;;  %v3954_v45 = vld [vmem:[%s8358_s1 + $0x2c8] sm:$0xf0]  ;;  %v5237_v6 = vld [vmem:[%s8358_s1 + $0x324] sm:$0xf]  ;;  %v3941_v11 = vor.u32 %v5221_v3, %v3938_v5  ;;  %v4229_v3 = vor.u32 %v5293_v59, %v4226_v61  ;;  %v5275_v5 = vld [vmem:[%s8358_s1 + $0x454] sm:$0xf] }
  0x98   : > { %1766 = vmatpush.bf16.msra.mxu1 %v3981_v7  ;;  %1735 = vmatmul.bf16.vlgmr.msrb.gmra.mxu2 %v6125_v40  ;;  %v4029_v40 = vor.u32 %v5243_v30, %v4026_v32  ;;  %v3957_v48 = vor.u32 %v5225_v41, %v3954_v45  ;;  %v4002_v7 = vld [vmem:[%s8358_s1 + $0x328] sm:$0xf0]  ;;  %v5217_v32 = vld [vmem:[%s8358_s1 + $0x284] sm:$0xf]  ;;  %v4170_v41 = vld [vmem:[%s8358_s1 + $0x478] sm:$0xf0] }
  0x99   : > { %1779 = vmatpush.bf16.msra.mxu2 %v4045_v8  ;;  %1748 = vmatmul.bf16.vlgmr.msrb.gmra.mxu3 %v6135_v44  ;;  %v4093_v44 = vor.u32 %v5259_v33, %v4090_v34  ;;  %v5253_v8 = vld [vmem:[%s8358_s1 + $0x3a4] sm:$0xf]  ;;  %v3922_v33 = vld [vmem:[%s8358_s1 + $0x288] sm:$0xf0]  ;;  %v4173_v52 = vor.u32 %v5279_v38, %v4170_v41  ;;  %v4122_v58 = vld [vmem:[%s8358_s1 + $0x418] sm:$0xf0] }
  0x9a   : > { %1792 = vmatpush.bf16.msra.mxu3 %v4109_v12  ;;  %v4005_v12 = vor.u32 %v5237_v6, %v4002_v7  ;;  %v4069_v16 = vor.u32 %v5253_v8, %v4066_v9  ;;  %v5233_v34 = vld [vmem:[%s8358_s1 + $0x304] sm:$0xf]  ;;  %v3925_v46 = vor.u32 %v5217_v32, %v3922_v33  ;;  %v4354_v1 = vld [vmem:[%s8358_s1 + $0x5e8] sm:$0xf0]  ;;  %v4154_v6 = vld [vmem:[%s8358_s1 + $0x458] sm:$0xf0] }
  0x9b   : > { %1754 = vmatpush.bf16.msra.mxu0 %v3909_v18  ;;  %v5235_v18 = vld [vmem:[%s8358_s1 + $0x314] sm:$0xf]  ;;  %v4218_v9 = vld [vmem:[%s8358_s1 + $0x4d8] sm:$0xf0]  ;;  %v4157_v13 = vor.u32 %v5275_v5, %v4154_v6  ;;  %v4114_v6 = vld [vmem:[%s8358_s1 + $0x408] sm:$0xf0] }
  0x9c   : > { %1767 = vmatpush.bf16.msra.mxu1 %v3973_v19  ;;  %v3994_v19 = vld [vmem:[%s8358_s1 + $0x318] sm:$0xf0]  ;;  %v5291_v7 = vld [vmem:[%s8358_s1 + $0x4d4] sm:$0xf] }
  0x9d   : > { %1780 = vmatpush.bf16.msra.mxu2 %v4037_v20  ;;  %v5251_v20 = vld [vmem:[%s8358_s1 + $0x394] sm:$0xf]  ;;  %v3997_v30 = vor.u32 %v5235_v18, %v3994_v19  ;;  %v4221_v14 = vor.u32 %v5291_v7, %v4218_v9  ;;  %v5305_v18 = vld [vmem:[%s8358_s1 + $0x544] sm:$0xf]  ;;  %v4274_v19 = vld [vmem:[%s8358_s1 + $0x548] sm:$0xf0] }
  0x9e   : > { %1793 = vmatpush.bf16.msra.mxu3 %v4101_v27  ;;  %v3858_v27 = vld [vmem:[%s8358_s1 + $0x208] sm:$0xf0]  ;;  %v5287_v32 = vld [vmem:[%s8358_s1 + $0x4b4] sm:$0xf]  ;;  %v4186_v61 = vld [vmem:[%s8358_s1 + $0x498] sm:$0xf0] }
  0x9f   : > { %1755 = vmatpush.bf16.msra.mxu0 %v3901_v35  ;;  %v4061_v35 = vor.u32 %v5251_v20, %v4058_v22  ;;  %v3861_v45 = vor.u32 %v5201_v24, %v3858_v27  ;;  %v5321_v20 = vld [vmem:[%s8358_s1 + $0x5c4] sm:$0xf]  ;;  %v4338_v22 = vld [vmem:[%s8358_s1 + $0x5c8] sm:$0xf0]  ;;  %v4277_v27 = vor.u32 %v5305_v18, %v4274_v19  ;;  %v5283_v59 = vld [vmem:[%s8358_s1 + $0x494] sm:$0xf] }
  0xa0   : > { %1768 = vmatpush.bf16.msra.mxu1 %v3965_v36  ;;  %v3986_v36 = vld [vmem:[%s8358_s1 + $0x308] sm:$0xf0]  ;;  %v4341_v33 = vor.u32 %v5321_v20, %v4338_v22  ;;  %v5281_v7 = vld [vmem:[%s8358_s1 + $0x484] sm:$0xf] }
  0xa1   : > { %1781 = vmatpush.bf16.msra.mxu2 %v4029_v40  ;;  %v5249_v40 = vld [vmem:[%s8358_s1 + $0x384] sm:$0xf] }
  0xa2   : > { %1794 = vmatpush.bf16.msra.mxu3 %v4093_v44  ;;  %v5295_v44 = vld [vmem:[%s8358_s1 + $0x4f4] sm:$0xf]  ;;  %v4053_v50 = vor.u32 %v5249_v40, %v4050_v37  ;;  %v4330_v37 = vld [vmem:[%s8358_s1 + $0x5b8] sm:$0xf0] }
  0xa3   : > { %1756 = vmatpush.bf16.msra.mxu0 %v3893_v47  ;;  %v3989_v47 = vor.u32 %v5233_v34, %v3986_v36  ;;  %v4237_v53 = vor.u32 %v5295_v44, %v4234_v39  ;;  %v4202_v34 = vld [vmem:[%s8358_s1 + $0x4b8] sm:$0xf0]  ;;  %v5319_v40 = vld [vmem:[%s8358_s1 + $0x5b4] sm:$0xf]  ;;  %v4130_v39 = vld [vmem:[%s8358_s1 + $0x428] sm:$0xf0] }
  0xa4   : > { %1769 = vmatpush.bf16.msra.mxu1 %v3957_v48  ;;  %v5327_v48 = vld [vmem:[%s8358_s1 + $0x5f4] sm:$0xf]  ;;  %v4266_v36 = vld [vmem:[%s8358_s1 + $0x538] sm:$0xf0]  ;;  %v4205_v41 = vor.u32 %v5287_v32, %v4202_v34 }
  0xa5   : > { %1782 = vmatpush.bf16.msra.mxu2 %v4021_v49  ;;  %v4362_v49 = vld [vmem:[%s8358_s1 + $0x5f8] sm:$0xf0] }
  0xa6   : > { %1795 = vmatpush.bf16.msra.mxu3 %v4085_v56  ;;  %v4301_v56 = vor.u32 %v5311_v42, %v4298_v43  ;;  %v4365_v60 = vor.u32 %v5327_v48, %v4362_v49  ;;  %v5285_v42 = vld [vmem:[%s8358_s1 + $0x4a4] sm:$0xf]  ;;  %v4333_v43 = vor.u32 %v5319_v40, %v4330_v37  ;;  %v4258_v48 = vld [vmem:[%s8358_s1 + $0x528] sm:$0xf0]  ;;  %v7035_v37 = vld [vmem:[%s8359_s2] sm:$0x3] }
  0xa7   : > { %1757 = vmatpush.bf16.msra.mxu0 %v3885_v62  ;;  %v5309_v62 = vld [vmem:[%s8358_s1 + $0x564] sm:$0xf] }
  0xa8   : > { %1770 = vmatpush.bf16.msra.mxu1 %v3949_v63  ;;  %v4290_v63 = vld [vmem:[%s8358_s1 + $0x568] sm:$0xf0]  ;;  %v5317_v49 = vld [vmem:[%s8358_s1 + $0x5a4] sm:$0xf] }
  0xa9   : > { %1783 = vmatpush.bf16.msra.mxu2 %v4013_v0  ;;  %v5325_v0 = vld [vmem:[%s8358_s1 + $0x5e4] sm:$0xf] }
  0xaa   : > { %1796 = vmatpush.bf16.msra.mxu3 %v4077_v4  ;;  %v4293_v4 = vor.u32 %v5309_v62, %v4290_v63  ;;  %v4357_v8 = vor.u32 %v5325_v0, %v4354_v1  ;;  %v5299_v62 = vld [vmem:[%s8358_s1 + $0x514] sm:$0xf]  ;;  %v4250_v63 = vld [vmem:[%s8358_s1 + $0x518] sm:$0xf0] }
  0xab   : > { %1758 = vmatpush.bf16.msra.mxu0 %v3877_v10  ;;  %v5307_v10 = vld [vmem:[%s8358_s1 + $0x554] sm:$0xf]  ;;  %v4314_v1 = vld [vmem:[%s8358_s1 + $0x598] sm:$0xf0]  ;;  %v4253_v5 = vor.u32 %v5299_v62, %v4250_v63  ;;  %v4464_v62 = vld [vmem:[%s8360_s3 + $0xc0] sm:$0xf] }
  0xac   : > { %1771 = vmatpush.bf16.msra.mxu1 %v3941_v11  ;;  %v4282_v11 = vld [vmem:[%s8358_s1 + $0x558] sm:$0xf0]  ;;  %v5315_v0 = vld [vmem:[%s8358_s1 + $0x594] sm:$0xf]  ;;  %v5359_v63 = vld [vmem:[%s8360_s3 + $0xec] sm:$0xf0] }
  0xad   : > { %1784 = vmatpush.bf16.msra.mxu2 %v4005_v12  ;;  %v5323_v12 = vld [vmem:[%s8358_s1 + $0x5d4] sm:$0xf]  ;;  %v4285_v15 = vor.u32 %v5307_v10, %v4282_v11  ;;  %v4317_v9 = vor.u32 %v5315_v0, %v4314_v1  ;;  %v5297_v10 = vld [vmem:[%s8358_s1 + $0x504] sm:$0xf]  ;;  %v4242_v11 = vld [vmem:[%s8358_s1 + $0x508] sm:$0xf0] }
  0xae   : > { %1797 = vmatpush.bf16.msra.mxu3 %v4069_v16  ;;  %v5273_v16 = vld [vmem:[%s8358_s1 + $0x444] sm:$0xf]  ;;  %v4245_v18 = vor.u32 %v5297_v10, %v4242_v11  ;;  %v4418_v10 = vld [vmem:[%s8360_s3 + $0x90] sm:$0xf0] }
  0xaf   : > { %1759 = vmatpush.bf16.msra.mxu0 %v3869_v23  ;;  %v4149_v23 = vor.u32 %v5273_v16, %v4146_v17  ;;  %v5413_v17 = vld [vmem:[%s8360_s3 + $0x2a4] sm:$0xf] }
  0xb0   : > { %1772 = vmatpush.bf16.msra.mxu1 %v3933_v28  ;;  %v5271_v28 = vld [vmem:[%s8358_s1 + $0x434] sm:$0xf]  ;;  %v5353_v1 = vld [vmem:[%s8360_s3 + $0xc4] sm:$0xf] }
  0xb1   : > { %1785 = vmatpush.bf16.msra.mxu2 %v3997_v30  ;;  %v4138_v30 = vld [vmem:[%s8358_s1 + $0x438] sm:$0xf0] }
  0xb2   : > { %1798 = vmatpush.bf16.msra.mxu3 %v4061_v35  ;;  %v5303_v35 = vld [vmem:[%s8358_s1 + $0x534] sm:$0xf]  ;;  %v4141_v38 = vor.u32 %v5271_v28, %v4138_v30  ;;  %v5401_v28 = vld [vmem:[%s8360_s3 + $0x244] sm:$0xf] }
  0xb3   : > { %1760 = vmatpush.bf16.msra.mxu0 %v3861_v45  ;;  %v4269_v44 = vor.u32 %v5303_v35, %v4266_v36  ;;  %v5269_v45 = vld [vmem:[%s8358_s1 + $0x424] sm:$0xf]  ;;  %v4658_v30 = vld [vmem:[%s8360_s3 + $0x270] sm:$0xf0]  ;;  %v4608_v35 = vld [vmem:[%s8360_s3 + $0x1e0] sm:$0xf] }
  0xb4   : > { %1773 = vmatpush.bf16.msra.mxu1 %v3925_v46  ;;  %v4194_v46 = vld [vmem:[%s8358_s1 + $0x4a8] sm:$0xf0]  ;;  %v4661_v34 = vor.u32 %v5401_v28, %v4658_v30  ;;  %v5395_v36 = vld [vmem:[%s8360_s3 + $0x20c] sm:$0xf0]  ;;  %v4664_v30 = vld [vmem:[%s8360_s3 + $0x248] sm:$0xf] }
  0xb5   : > { %1786 = vmatpush.bf16.msra.mxu2 %v3989_v47  ;;  %v5301_v47 = vld [vmem:[%s8358_s1 + $0x524] sm:$0xf] }
  0xb6   : > { %1799 = vmatpush.bf16.msra.mxu3 %v4053_v50  ;;  %1761 = vmatmul.bf16.vlgmr.msra.gmra.mxu0 %v6266_v51  ;;  %v5289_v51 = vld [vmem:[%s8358_s1 + $0x4c4] sm:$0xf]  ;;  %v4322_v50 = vld [vmem:[%s8358_s1 + $0x5a8] sm:$0xf0] }
  0xb7   : > { %1805 = vmatpush.bf16.msrb.mxu0 %v4173_v52  ;;  %1774 = vmatmul.bf16.vlgmr.msra.gmra.mxu1 %v6276_v55  ;;  %v4210_v55 = vld [vmem:[%s8358_s1 + $0x4c8] sm:$0xf0]  ;;  %v4133_v52 = vor.u32 %v5269_v45, %v4130_v39  ;;  %v4560_v45 = vld [vmem:[%s8360_s3 + $0x180] sm:$0xf]  ;;  %v5383_v39 = vld [vmem:[%s8360_s3 + $0x1ac] sm:$0xf0] }
  0xb8   : > { %1818 = vmatpush.bf16.msrb.mxu1 %v4237_v53  ;;  %1787 = vmatmul.bf16.vlgmr.msra.gmra.mxu2 %v6238_v31  ;;  %v4346_v31 = vld [vmem:[%s8358_s1 + $0x5d8] sm:$0xf0]  ;;  %v4213_v24 = vor.u32 %v5289_v51, %v4210_v55  ;;  %v4197_v53 = vor.u32 %v5285_v42, %v4194_v46  ;;  %v4706_v51 = vld [vmem:[%s8360_s3 + $0x2d0] sm:$0xf0]  ;;  %v4561_v46 = vor.u32 %v5383_v39, %v4560_v45 }
  0xb9   : > { %1831 = vmatpush.bf16.msrb.mxu2 %v4301_v56  ;;  %1800 = vmatmul.bf16.vlgmr.msra.gmra.mxu3 %v6274_v54  ;;  %v4349_v54 = vor.u32 %v5323_v12, %v4346_v31  ;;  %v4261_v56 = vor.u32 %v5301_v47, %v4258_v48  ;;  %v5313_v12 = vld [vmem:[%s8358_s1 + $0x584] sm:$0xf]  ;;  %v4306_v31 = vld [vmem:[%s8358_s1 + $0x588] sm:$0xf0]  ;;  %v4709_v22 = vor.u32 %v5413_v17, %v4706_v51 }
  0xba   : > { %1844 = vmatpush.bf16.msrb.mxu3 %v4365_v60  ;;  %v4325_v60 = vor.u32 %v5317_v49, %v4322_v50  ;;  %v4309_v19 = vor.u32 %v5313_v12, %v4306_v31  ;;  %v4512_v50 = vld [vmem:[%s8360_s3 + $0x120] sm:$0xf]  ;;  %v5329_v17 = vld [vmem:[%s8360_s3 + $0x4] sm:$0xf] }
  0xbb   : > { %1806 = vmatpush.bf16.msrb.mxu0 %v4165_v2  ;;  %v4125_v2 = vor.u32 %v5267_v57, %v4122_v58 }
  0xbc   : > { %1819 = vmatpush.bf16.msrb.mxu1 %v4229_v3  ;;  %v5265_v3 = vld [vmem:[%s8358_s1 + $0x404] sm:$0xf] }
  0xbd   : > { %1832 = vmatpush.bf16.msrb.mxu2 %v4293_v4  ;;  %v4189_v4 = vor.u32 %v5283_v59, %v4186_v61  ;;  %v4117_v16 = vor.u32 %v5265_v3, %v4114_v6  ;;  %v4465_v3 = vor.u32 %v5359_v63, %v4464_v62  ;;  %v4416_v6 = vld [vmem:[%s8360_s3 + $0x60] sm:$0xf]  ;;  %v4472_v62 = vld [vmem:[%s8360_s3 + $0xc8] sm:$0xf]  ;;  %v5360_v63 = vld [vmem:[%s8360_s3 + $0xf4] sm:$0xf0] }
  0xbe   : > { %1845 = vmatpush.bf16.msrb.mxu3 %v4357_v8  ;;  %v4178_v8 = vld [vmem:[%s8358_s1 + $0x488] sm:$0xf0] }
  0xbf   : > { %1807 = vmatpush.bf16.msrb.mxu0 %v4157_v13  ;;  %v4704_v13 = vld [vmem:[%s8360_s3 + $0x2a0] sm:$0xf]  ;;  %v4181_v55 = vor.u32 %v5281_v7, %v4178_v8  ;;  %v5347_v7 = vld [vmem:[%s8360_s3 + $0x8c] sm:$0xf0] }
  0xc0   : > { %1820 = vmatpush.bf16.msrb.mxu1 %v4221_v14  ;;  %v5419_v14 = vld [vmem:[%s8360_s3 + $0x2cc] sm:$0xf0]  ;;  %v4417_v12 = vor.u32 %v5347_v7, %v4416_v6  ;;  %v4473_v6 = vor.u32 %v5360_v63, %v4472_v62  ;;  %v5385_v63 = vld [vmem:[%s8360_s3 + $0x1bc] sm:$0xf0] }
  0xc1   : > { %1833 = vmatpush.bf16.msrb.mxu2 %v4285_v15  ;;  %v1554_v15 = vpop.f32.mrf.mxu0  ;;  %v4705_v20 = vor.u32 %v5419_v14, %v4704_v13  ;;  %v4576_v62 = vld [vmem:[%s8360_s3 + $0x190] sm:$0xf] }
  0xc2   : > { %1846 = vmatpush.bf16.msrb.mxu3 %v4349_v54  ;;  %v1567_v54 = vpop.f32.mrf.mxu1 }
  0xc3   : > { %1808 = vmatpush.bf16.msrb.mxu0 %v4149_v23  ;;  %v4656_v23 = vld [vmem:[%s8360_s3 + $0x240] sm:$0xf] }
  0xc4   : > { %1821 = vmatpush.bf16.msrb.mxu1 %v4213_v24  ;;  %v5407_v24 = vld [vmem:[%s8360_s3 + $0x26c] sm:$0xf0] }
  0xc5   : > { %1834 = vmatpush.bf16.msrb.mxu2 %v4277_v27  ;;  %v1580_v27 = vpop.f32.mrf.mxu2  ;;  %v4657_v32 = vor.u32 %v5407_v24, %v4656_v23 }
  0xc6   : > { %1847 = vmatpush.bf16.msrb.mxu3 %v4341_v33  ;;  %v1593_v33 = vpop.f32.mrf.mxu3 }
  0xc7   : > { %1809 = vmatpush.bf16.msrb.mxu0 %v4141_v38  ;;  %v4610_v38 = vld [vmem:[%s8360_s3 + $0x210] sm:$0xf0] }
  0xc8   : > { %1822 = vmatpush.bf16.msrb.mxu1 %v4205_v41 }
  0xc9   : > { %1835 = vmatpush.bf16.msrb.mxu2 %v4269_v44  ;;  %v1556_v40 = vpop.f32.mrf.mxu0 }
  0xca   : > { %1848 = vmatpush.bf16.msrb.mxu3 %v4333_v43  ;;  %v1569_v41 = vpop.f32.mrf.mxu1  ;;  %v5377_v43 = vld [vmem:[%s8360_s3 + $0x184] sm:$0xf] }
  0xcb   : > { %1810 = vmatpush.bf16.msrb.mxu0 %v4133_v52  ;;  %v5371_v52 = vld [vmem:[%s8360_s3 + $0x14c] sm:$0xf0]  ;;  %v5396_v41 = vld [vmem:[%s8360_s3 + $0x214] sm:$0xf0] }
  0xcc   : > { %1823 = vmatpush.bf16.msrb.mxu1 %v4197_v53  ;;  %v5365_v53 = vld [vmem:[%s8360_s3 + $0x124] sm:$0xf]  ;;  %v4513_v58 = vor.u32 %v5371_v52, %v4512_v50 }
  0xcd   : > { %1836 = vmatpush.bf16.msrb.mxu2 %v4261_v56  ;;  %v1582_v42 = vpop.f32.mrf.mxu2  ;;  %v4514_v56 = vld [vmem:[%s8360_s3 + $0x150] sm:$0xf0] }
  0xce   : > { %1849 = vmatpush.bf16.msrb.mxu3 %v4325_v60  ;;  %v1595_v47 = vpop.f32.mrf.mxu3  ;;  %v4517_v61 = vor.u32 %v5365_v53, %v4514_v56  ;;  %v4568_v42 = vld [vmem:[%s8360_s3 + $0x188] sm:$0xf]  ;;  %v5372_v56 = vld [vmem:[%s8360_s3 + $0x154] sm:$0xf0] }
  0xcf   : > { %1811 = vmatpush.bf16.msrb.mxu0 %v4125_v2  ;;  %v4466_v2 = vld [vmem:[%s8360_s3 + $0xf0] sm:$0xf0]  ;;  %v4520_v53 = vld [vmem:[%s8360_s3 + $0x128] sm:$0xf] }
  0xd0   : > { %1824 = vmatpush.bf16.msrb.mxu1 %v4189_v4 }
  0xd1   : > { %1837 = vmatpush.bf16.msrb.mxu2 %v4253_v5  ;;  %v4469_v5 = vor.u32 %v5353_v1, %v4466_v2  ;;  %v5354_v1 = vld [vmem:[%s8360_s3 + $0xcc] sm:$0xf]  ;;  %v4474_v2 = vld [vmem:[%s8360_s3 + $0xf8] sm:$0xf0] }
  0xd2   : > { %1850 = vmatpush.bf16.msrb.mxu3 %v4317_v9  ;;  %v5341_v9 = vld [vmem:[%s8360_s3 + $0x64] sm:$0xf] }
  0xd3   : > { %1812 = vmatpush.bf16.msrb.mxu0 %v4117_v16  ;;  %v1606_v57 = vpop.f32.mrf.mxu0  ;;  %v4421_v14 = vor.u32 %v5341_v9, %v4418_v10  ;;  %v5335_v16 = vld [vmem:[%s8360_s3 + $0x2c] sm:$0xf0]  ;;  %v4424_v9 = vld [vmem:[%s8360_s3 + $0x68] sm:$0xf]  ;;  %v5348_v10 = vld [vmem:[%s8360_s3 + $0x94] sm:$0xf0] }
  0xd4   : > { %1825 = vmatpush.bf16.msrb.mxu1 %v4181_v55  ;;  %v1619_v59 = vpop.f32.mrf.mxu1  ;;  %v4712_v55 = vld [vmem:[%s8360_s3 + $0x2a8] sm:$0xf] }
  0xd5   : > { %1838 = vmatpush.bf16.msrb.mxu2 %v4245_v18  ;;  %v5420_v18 = vld [vmem:[%s8360_s3 + $0x2d4] sm:$0xf0] }
  0xd6   : > { %1851 = vmatpush.bf16.msrb.mxu3 %v4309_v19  ;;  %1813 = vmatmul.bf16.vlgmr.msrb.gmra.mxu0 %v6436_v21  ;;  %v5389_v21 = vld [vmem:[%s8360_s3 + $0x1e4] sm:$0xf]  ;;  %v5414_v19 = vld [vmem:[%s8360_s3 + $0x2ac] sm:$0xf] }
  0xd7   : > { %3041 = vmatpush.bf16.msra.mxu0 %v4705_v20  ;;  %1826 = vmatmul.bf16.vlgmr.msrb.gmra.mxu1 %v6449_v26  ;;  %v4609_v26 = vor.u32 %v5395_v36, %v4608_v35  ;;  %v4613_v44 = vor.u32 %v5389_v21, %v4610_v38  ;;  %v4714_v20 = vld [vmem:[%s8360_s3 + $0x2d8] sm:$0xf0]  ;;  %v4616_v38 = vld [vmem:[%s8360_s3 + $0x1e8] sm:$0xf] }
  0xd8   : > { %1839 = vmatmul.bf16.vlgmr.msrb.gmra.mxu2 %v6447_v25  ;;  %v539_v25 = vperm.slane %v7035_v37, 0  ;;  %v4717_v28 = vor.u32 %v5414_v19, %v4714_v20  ;;  %v4666_v35 = vld [vmem:[%s8360_s3 + $0x278] sm:$0xf0]  ;;  %v4617_v45 = vor.u32 %v5396_v41, %v4616_v38  ;;  %v5090_v41 = vld [vmem:[%s8360_s3 + $0x5d0] sm:$0xf0] }
  0xd9   : > { %3067 = vmatpush.bf16.msra.mxu2 %v4709_v22  ;;  %1852 = vmatmul.bf16.vlgmr.msrb.gmra.mxu3 %v6457_v29  ;;  %v4562_v29 = vld [vmem:[%s8360_s3 + $0x1b0] sm:$0xf0] }
  0xda   : > { %v1555_v48 = vadd.f32 %v1554_v15, %v539_v25  ;;  %v4565_v49 = vor.u32 %v5377_v43, %v4562_v29  ;;  %v4368_v15 = vld [vmem:[%s8360_s3] sm:$0xf]  ;;  %v4618_v25 = vld [vmem:[%s8360_s3 + $0x218] sm:$0xf0]  ;;  %v5384_v43 = vld [vmem:[%s8360_s3 + $0x1b4] sm:$0xf0] }
  0xdb   : > { %3042 = vmatpush.bf16.msra.mxu0 %v4657_v32  ;;  %v1632_v0 = vpop.f32.mrf.mxu2  ;;  %v1608_v11 = vpop.f32.mrf.mxu0  ;;  %v4369_v22 = vor.u32 %v5335_v16, %v4368_v15  ;;  %v5408_v32 = vld [vmem:[%s8360_s3 + $0x274] sm:$0xf0]  ;;  %v5378_v29 = vld [vmem:[%s8360_s3 + $0x18c] sm:$0xf]  ;;  %v4376_v16 = vld [vmem:[%s8360_s3 + $0x8] sm:$0xf] }
  0xdc   : > { %v1568_v60 = vadd.f32 %v1567_v54, %v1555_v48  ;;  %v1645_v8 = vpop.f32.mrf.mxu3  ;;  %v1621_v31 = vpop.f32.mrf.mxu1  ;;  %v4370_v54 = vld [vmem:[%s8360_s3 + $0x30] sm:$0xf0]  ;;  %v4665_v40 = vor.u32 %v5408_v32, %v4664_v30  ;;  %v5088_v32 = vld [vmem:[%s8360_s3 + $0x5a0] sm:$0xf] }
  0xdd   : > { %3068 = vmatpush.bf16.msra.mxu2 %v4661_v34  ;;  %v4373_v24 = vor.u32 %v5329_v17, %v4370_v54  ;;  %v5402_v34 = vld [vmem:[%s8360_s3 + $0x24c] sm:$0xf]  ;;  %v5336_v17 = vld [vmem:[%s8360_s3 + $0x34] sm:$0xf0]  ;;  %v4378_v54 = vld [vmem:[%s8360_s3 + $0x38] sm:$0xf0] }
  0xde   : > { %v1581_v4 = vadd.f32 %v1580_v27, %v1568_v60  ;;  %v4713_v27 = vor.u32 %v5420_v18, %v4712_v55  ;;  %v4669_v21 = vor.u32 %v5402_v34, %v4666_v35  ;;  %v4521_v60 = vor.u32 %v5372_v56, %v4520_v53  ;;  %v5342_v31 = vld [vmem:[%s8360_s3 + $0x6c] sm:$0xf]  ;;  %v4720_v55 = vld [vmem:[%s8360_s3 + $0x2b0] sm:$0xf]  ;;  %v5421_v18 = vld [vmem:[%s8360_s3 + $0x2dc] sm:$0xf0] }
  0xdf   : > { %3043 = vmatpush.bf16.msra.mxu0 %v4609_v26  ;;  %v5390_v26 = vld [vmem:[%s8360_s3 + $0x1ec] sm:$0xf]  ;;  %v4377_v20 = vor.u32 %v5336_v17, %v4376_v16  ;;  %v4721_v30 = vor.u32 %v5421_v18, %v4720_v55  ;;  %v5509_v34 = vld [vmem:[%s8360_s3 + $0x5a4] sm:$0xf]  ;;  %v4992_v56 = vld [vmem:[%s8360_s3 + $0x4e0] sm:$0xf] }
  0xe0   : > { %v1594_v13 = vadd.f32 %v1593_v33, %v1581_v4  ;;  %v4621_v39 = vor.u32 %v5390_v26, %v4618_v25  ;;  %v5403_v26 = vld [vmem:[%s8360_s3 + $0x254] sm:$0xf]  ;;  %v4674_v25 = vld [vmem:[%s8360_s3 + $0x280] sm:$0xf0]  ;;  %v4896_v17 = vld [vmem:[%s8360_s3 + $0x420] sm:$0xf] }
  0xe1   : > { %3069 = vmatpush.bf16.msra.mxu2 %v4613_v44  ;;  %v4898_v55 = vld [vmem:[%s8360_s3 + $0x450] sm:$0xf0] }
  0xe2   : > { %v1607_v23 = vadd.f32 %v1606_v57, %v1594_v13  ;;  %v4426_v13 = vld [vmem:[%s8360_s3 + $0x98] sm:$0xf0] }
  0xe3   : > { %3044 = vmatpush.bf16.msra.mxu0 %v4561_v46  ;;  %v1634_v51 = vpop.f32.mrf.mxu2  ;;  %v4570_v46 = vld [vmem:[%s8360_s3 + $0x1b8] sm:$0xf0]  ;;  %v4429_v15 = vor.u32 %v5342_v31, %v4426_v13 }
  0xe4   : > { %v1647_v33 = vpop.f32.mrf.mxu3  ;;  %v1620_v36 = vadd.f32 %v1619_v59, %v1607_v23  ;;  %v4573_v52 = vor.u32 %v5378_v29, %v4570_v46  ;;  %v4522_v59 = vld [vmem:[%s8360_s3 + $0x158] sm:$0xf0]  ;;  %v5330_v51 = vld [vmem:[%s8360_s3 + $0xc] sm:$0xf]  ;;  %v4722_v23 = vld [vmem:[%s8360_s3 + $0x2e0] sm:$0xf0]  ;;  %v4677_v29 = vor.u32 %v5403_v26, %v4674_v25 }
  0xe5   : > { %3070 = vmatpush.bf16.msra.mxu2 %v4565_v49  ;;  %v4569_v49 = vor.u32 %v5384_v43, %v4568_v42  ;;  %v5515_v33 = vld [vmem:[%s8360_s3 + $0x5cc] sm:$0xf0]  ;;  %v5497_v43 = vld [vmem:[%s8360_s3 + $0x544] sm:$0xf]  ;;  %v5349_v26 = vld [vmem:[%s8360_s3 + $0x9c] sm:$0xf0] }
  0xe6   : > { %v1633_v44 = vadd.f32 %v1632_v0, %v1620_v36  ;;  %v5089_v38 = vor.u32 %v5515_v33, %v5088_v32  ;;  %v5503_v42 = vld [vmem:[%s8360_s3 + $0x56c] sm:$0xf0]  ;;  %v4848_v32 = vld [vmem:[%s8360_s3 + $0x3c0] sm:$0xf]  ;;  %v5343_v25 = vld [vmem:[%s8360_s3 + $0x74] sm:$0xf] }
  0xe7   : > { %3045 = vmatpush.bf16.msra.mxu0 %v4513_v58  ;;  %v5366_v58 = vld [vmem:[%s8360_s3 + $0x12c] sm:$0xf]  ;;  %v4624_v46 = vld [vmem:[%s8360_s3 + $0x1f0] sm:$0xf] }
  0xe8   : > { %v1646_v47 = vadd.f32 %v1645_v8, %v1633_v44  ;;  %v4477_v8 = vor.u32 %v5354_v1, %v4474_v2  ;;  %v5093_v44 = vor.u32 %v5509_v34, %v5090_v41  ;;  %3054 = vmatpush.bf16.msra.mxu1 %v5089_v38  ;;  %v4578_v2 = vld [vmem:[%s8360_s3 + $0x1c0] sm:$0xf0]  ;;  %v5455_v33 = vld [vmem:[%s8360_s3 + $0x3ec] sm:$0xf0] }
  0xe9   : > { %3071 = vmatpush.bf16.msra.mxu2 %v4517_v61  ;;  %v4525_v61 = vor.u32 %v5366_v58, %v4522_v59  ;;  %v5485_v58 = vld [vmem:[%s8360_s3 + $0x4e4] sm:$0xf]  ;;  %v4994_v59 = vld [vmem:[%s8360_s3 + $0x510] sm:$0xf0]  ;;  %v4432_v41 = vld [vmem:[%s8360_s3 + $0x70] sm:$0xf] }
  0xea   : > { %3080 = vmatpush.bf16.msra.mxu3 %v5093_v44 }
  0xeb   : > { %3046 = vmatpush.bf16.msra.mxu0 %v4465_v3 }
  0xed   : > { %3072 = vmatpush.bf16.msra.mxu2 %v4469_v5 }
  0xef   : > { %3047 = vmatpush.bf16.msra.mxu0 %v4417_v12 }
  0xf1   : > { %3073 = vmatpush.bf16.msra.mxu2 %v4421_v14  ;;  %v4425_v14 = vor.u32 %v5348_v10, %v4424_v9  ;;  %v4528_v10 = vld [vmem:[%s8360_s3 + $0x130] sm:$0xf] }
  0xf3   : > { %3048 = vmatpush.bf16.msra.mxu0 %v4369_v22  ;;  %v1658_v48 = vpop.f32.mrf.mxu0  ;;  %v5415_v22 = vld [vmem:[%s8360_s3 + $0x2b4] sm:$0xf] }
  0xf4   : > { %v1671_v50 = vpop.f32.mrf.mxu1  ;;  %v1659_v57 = vadd.f32 %v1658_v48, %v1646_v47  ;;  %v4725_v36 = vor.u32 %v5415_v22, %v4722_v23  ;;  %v5397_v47 = vld [vmem:[%s8360_s3 + $0x21c] sm:$0xf0]  ;;  %v5355_v23 = vld [vmem:[%s8360_s3 + $0xd4] sm:$0xf] }
  0xf5   : > { %3074 = vmatpush.bf16.msra.mxu2 %v4373_v24  ;;  %v5361_v22 = vld [vmem:[%s8360_s3 + $0xfc] sm:$0xf0] }
  0xf6   : > { %v1672_v0 = vadd.f32 %v1671_v50, %v1659_v57  ;;  %v5391_v50 = vld [vmem:[%s8360_s3 + $0x1f4] sm:$0xf]  ;;  %v5491_v57 = vld [vmem:[%s8360_s3 + $0x50c] sm:$0xf0] }
  0xf7   : > { %3093 = vmatpush.bf16.msrb.mxu0 %v4713_v27  ;;  %v4381_v27 = vor.u32 %v5330_v51, %v4378_v54  ;;  %v4993_v1 = vor.u32 %v5491_v57, %v4992_v56  ;;  %v5467_v51 = vld [vmem:[%s8360_s3 + $0x44c] sm:$0xf0]  ;;  %v5461_v54 = vld [vmem:[%s8360_s3 + $0x424] sm:$0xf]  ;;  %v5331_v56 = vld [vmem:[%s8360_s3 + $0x14] sm:$0xf] }
  0xf8   : > { %v4386_v57 = vld [vmem:[%s8360_s3 + $0x40] sm:$0xf0] }
  0xf9   : > { %3119 = vmatpush.bf16.msrb.mxu2 %v4717_v28 }
  0xfb   : > { %3094 = vmatpush.bf16.msrb.mxu0 %v4665_v40  ;;  %v1684_v3 = vpop.f32.mrf.mxu2  ;;  %v1660_v7 = vpop.f32.mrf.mxu0  ;;  %v4672_v40 = vld [vmem:[%s8360_s3 + $0x250] sm:$0xf] }
  0xfc   : > { %v1685_v4 = vadd.f32 %v1684_v3, %v1672_v0  ;;  %v1697_v5 = vpop.f32.mrf.mxu3  ;;  %v1673_v11 = vpop.f32.mrf.mxu1  ;;  %v5379_v0 = vld [vmem:[%s8360_s3 + $0x194] sm:$0xf]  ;;  %v4997_v3 = vor.u32 %v5485_v58, %v4994_v59  ;;  %v4728_v59 = vld [vmem:[%s8360_s3 + $0x2b8] sm:$0xf] }
  0xfd   : > { %3120 = vmatpush.bf16.msrb.mxu2 %v4669_v21  ;;  %v5409_v21 = vld [vmem:[%s8360_s3 + $0x27c] sm:$0xf0]  ;;  %v4946_v7 = vld [vmem:[%s8360_s3 + $0x4b0] sm:$0xf0]  ;;  %v4581_v9 = vor.u32 %v5379_v0, %v4578_v2  ;;  %v4730_v0 = vld [vmem:[%s8360_s3 + $0x2e8] sm:$0xf0] }
  0xfe   : > { %v1698_v12 = vadd.f32 %v1697_v5, %v1685_v4  ;;  %v4944_v4 = vld [vmem:[%s8360_s3 + $0x480] sm:$0xf]  ;;  %v5479_v5 = vld [vmem:[%s8360_s3 + $0x4ac] sm:$0xf0] }
  0xff   : > { %3095 = vmatpush.bf16.msrb.mxu0 %v4617_v45  ;;  %v4673_v45 = vor.u32 %v5409_v21, %v4672_v40  ;;  %v5373_v11 = vld [vmem:[%s8360_s3 + $0x15c] sm:$0xf0]  ;;  %v4945_v13 = vor.u32 %v5479_v5, %v4944_v4  ;;  %v4850_v40 = vld [vmem:[%s8360_s3 + $0x3f0] sm:$0xf0]  ;;  %v5425_v5 = vld [vmem:[%s8360_s3 + $0x304] sm:$0xf] }
 0x100   : > { %5580 = vtanh.f32 %v1698_v12  ;;  %v5367_v12 = vld [vmem:[%s8360_s3 + $0x134] sm:$0xf]  ;;  %v4529_v18 = vor.u32 %v5373_v11, %v4528_v10  ;;  %v4752_v2 = vld [vmem:[%s8360_s3 + $0x300] sm:$0xf]  ;;  %v5096_v10 = vld [vmem:[%s8360_s3 + $0x5a8] sm:$0xf] }
 0x101   : > { %3121 = vmatpush.bf16.msrb.mxu2 %v4621_v39  ;;  %v5040_v39 = vld [vmem:[%s8360_s3 + $0x540] sm:$0xf]  ;;  %v5516_v11 = vld [vmem:[%s8360_s3 + $0x5d4] sm:$0xf0] }
 0x102   : > { %v5041_v48 = vor.u32 %v5503_v42, %v5040_v39  ;;  %v4434_v39 = vld [vmem:[%s8360_s3 + $0xa0] sm:$0xf0] }
 0x103   : > { %3096 = vmatpush.bf16.msrb.mxu0 %v4569_v49  ;;  %v1686_v19 = vpop.f32.mrf.mxu2  ;;  %v5042_v49 = vld [vmem:[%s8360_s3 + $0x570] sm:$0xf0] }
 0x104   : > { %v1699_v24 = vpop.f32.mrf.mxu3  ;;  %v5045_v53 = vor.u32 %v5497_v43, %v5042_v49  ;;  %3055 = vmatpush.bf16.msra.mxu1 %v5041_v48  ;;  %v4802_v48 = vld [vmem:[%s8360_s3 + $0x390] sm:$0xf0]  ;;  %v4433_v49 = vor.u32 %v5349_v26, %v4432_v41  ;;  %v4584_v41 = vld [vmem:[%s8360_s3 + $0x198] sm:$0xf] }
 0x105   : > { %3122 = vmatpush.bf16.msrb.mxu2 %v4573_v52  ;;  %v4626_v52 = vld [vmem:[%s8360_s3 + $0x220] sm:$0xf0]  ;;  %v4897_v24 = vor.u32 %v5467_v51, %v4896_v17  ;;  %v5098_v17 = vld [vmem:[%s8360_s3 + $0x5d8] sm:$0xf0] }
 0x106   : > { %v5581_v28 = vpop.eup %5580  ;;  %3081 = vmatpush.bf16.msra.mxu3 %v5045_v53  ;;  %v5337_v53 = vld [vmem:[%s8360_s3 + $0x3c] sm:$0xf0]  ;;  %v5404_v51 = vld [vmem:[%s8360_s3 + $0x25c] sm:$0xf] }
 0x107   : > { %3097 = vmatpush.bf16.msrb.mxu0 %v4521_v60  ;;  %v7222_v35 = vpack.c.bf16 %v5581_v28, %v5581_v28  ;;  %v4625_v60 = vor.u32 %v5397_v47, %v4624_v46  ;;  %v5443_v46 = vld [vmem:[%s8360_s3 + $0x38c] sm:$0xf0]  ;;  %v5437_v47 = vld [vmem:[%s8360_s3 + $0x364] sm:$0xf] }
 0x108   : > { %3056 = vmatpush.bf16.msra.mxu1 %v4993_v1 }
 0x109   : > { %3123 = vmatpush.bf16.msrb.mxu2 %v4525_v61  ;;  %3049 = vmatmul.bf16.vlgmr.msra.gmra.mxu0 %v7222_v35  ;;  %v4629_v61 = vor.u32 %v5391_v50, %v4626_v52  ;;  %v4384_v50 = vld [vmem:[%s8360_s3 + $0x10] sm:$0xf]  ;;  %v4437_v52 = vor.u32 %v5343_v25, %v4434_v39  ;;  %v5000_v25 = vld [vmem:[%s8360_s3 + $0x4e8] sm:$0xf] }
 0x10a   : > { %3075 = vmatmul.bf16.vlgmr.msra.gmra.mxu2 %v7222_v35  ;;  %3082 = vmatpush.bf16.msra.mxu3 %v4997_v3  ;;  %v5431_v3 = vld [vmem:[%s8360_s3 + $0x32c] sm:$0xf0]  ;;  %v4385_v4 = vor.u32 %v5337_v53, %v4384_v50  ;;  %v5386_v39 = vld [vmem:[%s8360_s3 + $0x1c4] sm:$0xf0]  ;;  %v4536_v50 = vld [vmem:[%s8360_s3 + $0x138] sm:$0xf] }
 0x10b   : > { %3098 = vmatpush.bf16.msrb.mxu0 %v4473_v6  ;;  %v5473_v6 = vld [vmem:[%s8360_s3 + $0x484] sm:$0xf]  ;;  %v5480_v53 = vld [vmem:[%s8360_s3 + $0x4b4] sm:$0xf0] }
 0x10c   : > { %v4949_v16 = vor.u32 %v5473_v6, %v4946_v7  ;;  %3057 = vmatpush.bf16.msra.mxu1 %v4945_v13  ;;  %v4754_v6 = vld [vmem:[%s8360_s3 + $0x330] sm:$0xf0]  ;;  %v4389_v7 = vor.u32 %v5331_v56, %v4386_v57  ;;  %v5410_v13 = vld [vmem:[%s8360_s3 + $0x284] sm:$0xf0] }
 0x10d   : > { %3124 = vmatpush.bf16.msrb.mxu2 %v4477_v8  ;;  %v4577_v8 = vor.u32 %v5385_v63, %v4576_v62  ;;  %v4805_v63 = vor.u32 %v5437_v47, %v4802_v48  ;;  %v4586_v47 = vld [vmem:[%s8360_s3 + $0x1c8] sm:$0xf0]  ;;  %v5374_v57 = vld [vmem:[%s8360_s3 + $0x164] sm:$0xf0] }
 0x10e   : > { %3083 = vmatpush.bf16.msra.mxu3 %v4949_v16  ;;  %v5510_v16 = vld [vmem:[%s8360_s3 + $0x5ac] sm:$0xf] }
 0x10f   : > { %3099 = vmatpush.bf16.msrb.mxu0 %v4425_v14  ;;  %v4530_v14 = vld [vmem:[%s8360_s3 + $0x160] sm:$0xf0] }
 0x110   : > { %v4533_v19 = vor.u32 %v5367_v12, %v4530_v14  ;;  %3058 = vmatpush.bf16.msra.mxu1 %v4897_v24  ;;  %v4753_v14 = vor.u32 %v5431_v3, %v4752_v2  ;;  %v5504_v24 = vld [vmem:[%s8360_s3 + $0x574] sm:$0xf0]  ;;  %v4537_v2 = vor.u32 %v5374_v57, %v4536_v50 }
 0x111   : > { %3125 = vmatpush.bf16.msrb.mxu2 %v4429_v15 }
 0x113   : > { %3100 = vmatpush.bf16.msrb.mxu0 %v4377_v20  ;;  %v7310_v31 = vpop.f32.mrf.mxu0  ;;  %v4480_v20 = vld [vmem:[%s8360_s3 + $0xd0] sm:$0xf] }
 0x114   : > { %v7315_v15 = vpop.f32.mrf.mxu1  ;;  %v4481_v21 = vor.u32 %v5361_v22, %v4480_v20  ;;  %v4632_v20 = vld [vmem:[%s8360_s3 + $0x1f8] sm:$0xf]  ;;  %v5101_v22 = vor.u32 %v5510_v16, %v5098_v17 }
 0x115   : > { %3126 = vmatpush.bf16.msrb.mxu2 %v4381_v27  ;;  %v4482_v27 = vld [vmem:[%s8360_s3 + $0x100] sm:$0xf0] }
 0x116   : > { %v4485_v38 = vor.u32 %v5355_v23, %v4482_v27  ;;  %v5048_v23 = vld [vmem:[%s8360_s3 + $0x548] sm:$0xf] }
 0x117   : > { %3145 = vmatpush.bf16.msra.mxu0 %v4721_v30  ;;  %v4901_v30 = vor.u32 %v5461_v54, %v4898_v55  ;;  %v4682_v54 = vld [vmem:[%s8360_s3 + $0x288] sm:$0xf0]  ;;  %v4757_v55 = vor.u32 %v5425_v5, %v4754_v6  ;;  %v5468_v5 = vld [vmem:[%s8360_s3 + $0x454] sm:$0xf0] }
 0x118   : > { %v4685_v27 = vor.u32 %v5404_v51, %v4682_v54  ;;  %v4856_v54 = vld [vmem:[%s8360_s3 + $0x3c8] sm:$0xf] }
 0x119   : > { %3171 = vmatpush.bf16.msra.mxu2 %v4725_v36  ;;  %3101 = vmatmul.bf16.vlgmr.msrb.gmra.mxu0 %v7222_v35  ;;  %v5449_v36 = vld [vmem:[%s8360_s3 + $0x3c4] sm:$0xf] }
 0x11a   : > { %3127 = vmatmul.bf16.vlgmr.msrb.gmra.mxu2 %v7222_v35  ;;  %3084 = vmatpush.bf16.msra.mxu3 %v4901_v30  ;;  %v4853_v43 = vor.u32 %v5449_v36, %v4850_v40  ;;  %v5398_v30 = vld [vmem:[%s8360_s3 + $0x224] sm:$0xf0]  ;;  %v5392_v36 = vld [vmem:[%s8360_s3 + $0x1fc] sm:$0xf]  ;;  %v4634_v40 = vld [vmem:[%s8360_s3 + $0x228] sm:$0xf0] }
 0x11b   : > { %3146 = vmatpush.bf16.msra.mxu0 %v4673_v45  ;;  %v7341_v28 = vpop.f32.mrf.mxu2  ;;  %v1712_v44 = vpop.f32.mrf.mxu0  ;;  %v4849_v45 = vor.u32 %v5455_v33, %v4848_v32  ;;  %v5498_v32 = vld [vmem:[%s8360_s3 + $0x54c] sm:$0xf]  ;;  %v5050_v33 = vld [vmem:[%s8360_s3 + $0x578] sm:$0xf0] }
 0x11c   : > { %v7350_v34 = vpop.f32.mrf.mxu3  ;;  %v1725_v42 = vpop.f32.mrf.mxu1  ;;  %v5053_v26 = vor.u32 %v5498_v32, %v5050_v33  ;;  %v5492_v44 = vld [vmem:[%s8360_s3 + $0x514] sm:$0xf0] }
 0x11d   : > { %3172 = vmatpush.bf16.msra.mxu2 %v4677_v29  ;;  %v4800_v29 = vld [vmem:[%s8360_s3 + $0x360] sm:$0xf]  ;;  %3059 = vmatpush.bf16.msra.mxu1 %v4849_v45  ;;  %v4637_v45 = vor.u32 %v5392_v36, %v4634_v40  ;;  %v5486_v42 = vld [vmem:[%s8360_s3 + $0x4ec] sm:$0xf]  ;;  %v5001_v48 = vor.u32 %v5492_v44, %v5000_v25  ;;  %v4392_v33 = vld [vmem:[%s8360_s3 + $0x18] sm:$0xf] }
 0x11e   : > { %v4801_v58 = vor.u32 %v5443_v46, %v4800_v29  ;;  %3085 = vmatpush.bf16.msra.mxu3 %v4853_v43  ;;  %v5002_v43 = vld [vmem:[%s8360_s3 + $0x518] sm:$0xf0]  ;;  %v540_v29 = vperm.slane %v7035_v37, 1  ;;  %v4952_v37 = vld [vmem:[%s8360_s3 + $0x488] sm:$0xf] }
 0x11f   : > { %3147 = vmatpush.bf16.msra.mxu0 %v4625_v60  ;;  %v5422_v60 = vld [vmem:[%s8360_s3 + $0x2e4] sm:$0xf0]  ;;  %v5380_v46 = vld [vmem:[%s8360_s3 + $0x19c] sm:$0xf]  ;;  %v5438_v44 = vld [vmem:[%s8360_s3 + $0x36c] sm:$0xf] }
 0x120   : > { %v4589_v56 = vor.u32 %v5380_v46, %v4586_v47  ;;  %v5332_v25 = vld [vmem:[%s8360_s3 + $0x1c] sm:$0xf]  ;;  %v5417_v47 = vld [vmem:[%s8360_s3 + $0x2c4] sm:$0xf] }
 0x121   : > { %3173 = vmatpush.bf16.msra.mxu2 %v4629_v61  ;;  %v5416_v61 = vld [vmem:[%s8360_s3 + $0x2bc] sm:$0xf]  ;;  %3060 = vmatpush.bf16.msra.mxu1 %v4801_v58  ;;  %v5474_v58 = vld [vmem:[%s8360_s3 + $0x48c] sm:$0xf] }
 0x122   : > { %v4733_v12 = vor.u32 %v5416_v61, %v4730_v0  ;;  %3086 = vmatpush.bf16.msra.mxu3 %v4805_v63  ;;  %v4538_v63 = vld [vmem:[%s8360_s3 + $0x168] sm:$0xf0] }
 0x123   : > { %3148 = vmatpush.bf16.msra.mxu0 %v4577_v8  ;;  %v1738_v62 = vpop.f32.mrf.mxu2  ;;  %v4729_v8 = vor.u32 %v5422_v60, %v4728_v59  ;;  %v4954_v59 = vld [vmem:[%s8360_s3 + $0x4b8] sm:$0xf0]  ;;  %v1711_v60 = vadd.f32 %v7310_v31, %v540_v29  ;;  %v4488_v31 = vld [vmem:[%s8360_s3 + $0xd8] sm:$0xf]  ;;  %v5423_v29 = vld [vmem:[%s8360_s3 + $0x2ec] sm:$0xf0] }
 0x124   : > { %v1751_v1 = vpop.f32.mrf.mxu3  ;;  %v5368_v62 = vld [vmem:[%s8360_s3 + $0x13c] sm:$0xf]  ;;  %v4957_v3 = vor.u32 %v5474_v58, %v4954_v59  ;;  %v5426_v58 = vld [vmem:[%s8360_s3 + $0x30c] sm:$0xf] }
 0x125   : > { %3174 = vmatpush.bf16.msra.mxu2 %v4581_v9  ;;  %v4680_v9 = vld [vmem:[%s8360_s3 + $0x258] sm:$0xf]  ;;  %3061 = vmatpush.bf16.msra.mxu1 %v4753_v14  ;;  %v4953_v1 = vor.u32 %v5480_v53, %v4952_v37  ;;  %v4541_v6 = vor.u32 %v5368_v62, %v4538_v63  ;;  %v4760_v37 = vld [vmem:[%s8360_s3 + $0x308] sm:$0xf]  ;;  %v4762_v59 = vld [vmem:[%s8360_s3 + $0x338] sm:$0xf0] }
 0x126   : > { %3087 = vmatpush.bf16.msra.mxu3 %v4757_v55  ;;  %v5456_v55 = vld [vmem:[%s8360_s3 + $0x3f4] sm:$0xf0]  ;;  %v4688_v63 = vld [vmem:[%s8360_s3 + $0x260] sm:$0xf] }
 0x127   : > { %3149 = vmatpush.bf16.msra.mxu0 %v4529_v18  ;;  %v5097_v18 = vor.u32 %v5516_v11, %v5096_v10  ;;  %v1724_v10 = vadd.f32 %v7315_v15, %v1711_v60  ;;  %v5356_v11 = vld [vmem:[%s8360_s3 + $0xdc] sm:$0xf]  ;;  %v4440_v15 = vld [vmem:[%s8360_s3 + $0x78] sm:$0xf]  ;;  %v4857_v36 = vor.u32 %v5456_v55, %v4856_v54 }
 0x128   : > { %v5432_v53 = vld [vmem:[%s8360_s3 + $0x334] sm:$0xf0] }
 0x129   : > { %3175 = vmatpush.bf16.msra.mxu2 %v4533_v19  ;;  %v4681_v19 = vor.u32 %v5410_v13, %v4680_v9  ;;  %3106 = vmatpush.bf16.msrb.mxu1 %v5097_v18  ;;  %v4906_v9 = vld [vmem:[%s8360_s3 + $0x458] sm:$0xf0] }
 0x12a   : > { %3132 = vmatpush.bf16.msrb.mxu3 %v5101_v22  ;;  %v4858_v22 = vld [vmem:[%s8360_s3 + $0x3f8] sm:$0xf0] }
 0x12b   : > { %3150 = vmatpush.bf16.msra.mxu0 %v4481_v21  ;;  %v5049_v21 = vor.u32 %v5504_v24, %v5048_v23  ;;  %v1737_v23 = vadd.f32 %v7341_v28, %v1724_v10  ;;  %v5338_v28 = vld [vmem:[%s8360_s3 + $0x44] sm:$0xf0] }
 0x12d   : > { %3176 = vmatpush.bf16.msra.mxu2 %v4485_v38  ;;  %v4633_v38 = vor.u32 %v5398_v30, %v4632_v20  ;;  %3107 = vmatpush.bf16.msrb.mxu1 %v5049_v21  ;;  %v5450_v20 = vld [vmem:[%s8360_s3 + $0x3cc] sm:$0xf] }
 0x12e   : > { %3133 = vmatpush.bf16.msrb.mxu3 %v5053_v26  ;;  %v4442_v30 = vld [vmem:[%s8360_s3 + $0xa8] sm:$0xf0]  ;;  %v4861_v21 = vor.u32 %v5450_v20, %v4858_v22  ;;  %v5375_v20 = vld [vmem:[%s8360_s3 + $0x16c] sm:$0xf0] }
 0x12f   : > { %3151 = vmatpush.bf16.msra.mxu0 %v4433_v49  ;;  %v4585_v49 = vor.u32 %v5386_v39, %v4584_v41  ;;  %v5444_v41 = vld [vmem:[%s8360_s3 + $0x394] sm:$0xf0]  ;;  %v1750_v39 = vadd.f32 %v7350_v34, %v1737_v23  ;;  %v4738_v34 = vld [vmem:[%s8360_s3 + $0x2f0] sm:$0xf0]  ;;  %v5369_v23 = vld [vmem:[%s8360_s3 + $0x144] sm:$0xf] }
 0x130   : > { %v4741_v62 = vor.u32 %v5417_v47, %v4738_v34 }
 0x131   : > { %3177 = vmatpush.bf16.msra.mxu2 %v4437_v52  ;;  %v5005_v52 = vor.u32 %v5486_v42, %v5002_v43  ;;  %3108 = vmatpush.bf16.msrb.mxu1 %v5001_v48  ;;  %v4394_v42 = vld [vmem:[%s8360_s3 + $0x48] sm:$0xf0]  ;;  %v4736_v43 = vld [vmem:[%s8360_s3 + $0x2c0] sm:$0xf] }
 0x132   : > { %v4737_v57 = vor.u32 %v5423_v29, %v4736_v43  ;;  %v5345_v43 = vld [vmem:[%s8360_s3 + $0x84] sm:$0xf]  ;;  %v4450_v29 = vld [vmem:[%s8360_s3 + $0xb0] sm:$0xf0] }
 0x133   : > { %3152 = vmatpush.bf16.msra.mxu0 %v4385_v4  ;;  %v7513_v61 = vpop.f32.mrf.mxu0  ;;  %3134 = vmatpush.bf16.msrb.mxu3 %v5005_v52  ;;  %v4904_v4 = vld [vmem:[%s8360_s3 + $0x428] sm:$0xf]  ;;  %v4453_v34 = vor.u32 %v5345_v43, %v4450_v29  ;;  %v4912_v29 = vld [vmem:[%s8360_s3 + $0x430] sm:$0xf] }
 0x134   : > { %v7521_v0 = vpop.f32.mrf.mxu1  ;;  %v4905_v14 = vor.u32 %v5468_v5, %v4904_v4  ;;  %v1763_v60 = vadd.f32 %v7513_v61, %v1750_v39  ;;  %v4765_v61 = vor.u32 %v5426_v58, %v4762_v59  ;;  %v5351_v39 = vld [vmem:[%s8360_s3 + $0xac] sm:$0xf0]  ;;  %v5517_v59 = vld [vmem:[%s8360_s3 + $0x5dc] sm:$0xf0] }
 0x135   : > { %3178 = vmatpush.bf16.msra.mxu2 %v4389_v7  ;;  %v5362_v7 = vld [vmem:[%s8360_s3 + $0x104] sm:$0xf0]  ;;  %3109 = vmatpush.bf16.msrb.mxu1 %v4953_v1  ;;  %v5411_v1 = vld [vmem:[%s8360_s3 + $0x28c] sm:$0xf0] }
 0x136   : > { %3153 = vmatmul.bf16.vlgmr.msra.gmra.mxu0 %v7222_v35  ;;  %v4489_v16 = vor.u32 %v5362_v7, %v4488_v31  ;;  %v4690_v31 = vld [vmem:[%s8360_s3 + $0x290] sm:$0xf0]  ;;  %v4689_v4 = vor.u32 %v5411_v1, %v4688_v63  ;;  %v1776_v5 = vadd.f32 %v7521_v0, %v1763_v60  ;;  %v4640_v7 = vld [vmem:[%s8360_s3 + $0x200] sm:$0xf] }
 0x137   : > { %3197 = vmatpush.bf16.msrb.mxu0 %v4729_v8  ;;  %v5462_v8 = vld [vmem:[%s8360_s3 + $0x42c] sm:$0xf]  ;;  %3135 = vmatpush.bf16.msrb.mxu3 %v4957_v3  ;;  %v4761_v3 = vor.u32 %v5432_v53, %v4760_v37  ;;  %v4642_v0 = vld [vmem:[%s8360_s3 + $0x230] sm:$0xf0]  ;;  %v4744_v37 = vld [vmem:[%s8360_s3 + $0x2c8] sm:$0xf] }
 0x138   : > { %3179 = vmatmul.bf16.vlgmr.msra.gmra.mxu2 %v7222_v35  ;;  %v4909_v51 = vor.u32 %v5462_v8, %v4906_v9  ;;  %v5399_v8 = vld [vmem:[%s8360_s3 + $0x22c] sm:$0xf0]  ;;  %v5393_v9 = vld [vmem:[%s8360_s3 + $0x204] sm:$0xf]  ;;  %v5424_v53 = vld [vmem:[%s8360_s3 + $0x2f4] sm:$0xf0] }
 0x139   : > { %3223 = vmatpush.bf16.msrb.mxu2 %v4733_v12  ;;  %v4490_v12 = vld [vmem:[%s8360_s3 + $0x108] sm:$0xf0]  ;;  %3110 = vmatpush.bf16.msrb.mxu1 %v4905_v14  ;;  %v4641_v10 = vor.u32 %v5399_v8, %v4640_v7  ;;  %v4592_v14 = vld [vmem:[%s8360_s3 + $0x1a0] sm:$0xf]  ;;  %v5511_v60 = vld [vmem:[%s8360_s3 + $0x5b4] sm:$0xf] }
 0x13a   : > { %v4493_v18 = vor.u32 %v5356_v11, %v4490_v12  ;;  %v4645_v12 = vor.u32 %v5393_v9, %v4642_v0  ;;  %v5056_v8 = vld [vmem:[%s8360_s3 + $0x550] sm:$0xf] }
 0x13b   : > { %3198 = vmatpush.bf16.msrb.mxu0 %v4681_v19  ;;  %v7548_v13 = vpop.f32.mrf.mxu2  ;;  %v5350_v19 = vld [vmem:[%s8360_s3 + $0xa4] sm:$0xf0]  ;;  %v1764_v24 = vpop.f32.mrf.mxu0  ;;  %3136 = vmatpush.bf16.msrb.mxu3 %v4909_v51  ;;  %v4594_v51 = vld [vmem:[%s8360_s3 + $0x1d0] sm:$0xf0] }
 0x13c   : > { %v7550_v17 = vpop.f32.mrf.mxu3  ;;  %v1777_v32 = vpop.f32.mrf.mxu1  ;;  %v4441_v40 = vor.u32 %v5350_v19, %v4440_v15  ;;  %v1789_v11 = vadd.f32 %v7548_v13, %v1776_v5  ;;  %v5381_v15 = vld [vmem:[%s8360_s3 + $0x1a4] sm:$0xf]  ;;  %v4544_v19 = vld [vmem:[%s8360_s3 + $0x140] sm:$0xf] }
 0x13d   : > { %3224 = vmatpush.bf16.msrb.mxu2 %v4685_v27  ;;  %v5344_v27 = vld [vmem:[%s8360_s3 + $0x7c] sm:$0xf]  ;;  %3111 = vmatpush.bf16.msrb.mxu1 %v4857_v36  ;;  %v4496_v32 = vld [vmem:[%s8360_s3 + $0xe0] sm:$0xf]  ;;  %v5357_v36 = vld [vmem:[%s8360_s3 + $0xe4] sm:$0xf] }
 0x13e   : > { %v4445_v26 = vor.u32 %v5344_v27, %v4442_v30  ;;  %v1802_v54 = vadd.f32 %v7550_v17, %v1789_v11  ;;  %v4546_v17 = vld [vmem:[%s8360_s3 + $0x170] sm:$0xf0]  ;;  %v4545_v27 = vor.u32 %v5375_v20, %v4544_v19  ;;  %v5493_v20 = vld [vmem:[%s8360_s3 + $0x51c] sm:$0xf0] }
 0x13f   : > { %3199 = vmatpush.bf16.msrb.mxu0 %v4633_v38  ;;  %v4808_v38 = vld [vmem:[%s8360_s3 + $0x368] sm:$0xf]  ;;  %3137 = vmatpush.bf16.msrb.mxu3 %v4861_v21  ;;  %v4549_v30 = vor.u32 %v5369_v23, %v4546_v17  ;;  %v5499_v11 = vld [vmem:[%s8360_s3 + $0x554] sm:$0xf]  ;;  %v5010_v23 = vld [vmem:[%s8360_s3 + $0x520] sm:$0xf0] }
 0x140   : > { %v4809_v48 = vor.u32 %v5444_v41, %v4808_v38 }
 0x141   : > { %3225 = vmatpush.bf16.msrb.mxu2 %v4637_v45  ;;  %v4810_v45 = vld [vmem:[%s8360_s3 + $0x398] sm:$0xf0] }
 0x142   : > { %v4813_v52 = vor.u32 %v5438_v44, %v4810_v45  ;;  %3112 = vmatpush.bf16.msrb.mxu1 %v4809_v48  ;;  %v4448_v45 = vld [vmem:[%s8360_s3 + $0x80] sm:$0xf] }
 0x143   : > { %3200 = vmatpush.bf16.msrb.mxu0 %v4585_v49  ;;  %v1790_v46 = vpop.f32.mrf.mxu2  ;;  %v4393_v49 = vor.u32 %v5338_v28, %v4392_v33  ;;  %v5363_v33 = vld [vmem:[%s8360_s3 + $0x10c] sm:$0xf0]  ;;  %v4449_v47 = vor.u32 %v5351_v39, %v4448_v45  ;;  %v4400_v48 = vld [vmem:[%s8360_s3 + $0x20] sm:$0xf]  ;;  %v4552_v45 = vld [vmem:[%s8360_s3 + $0x148] sm:$0xf] }
 0x144   : > { %v1803_v50 = vpop.f32.mrf.mxu3  ;;  %3138 = vmatpush.bf16.msrb.mxu3 %v4813_v52  ;;  %v4497_v38 = vor.u32 %v5363_v33, %v4496_v32  ;;  %v4402_v52 = vld [vmem:[%s8360_s3 + $0x50] sm:$0xf0]  ;;  %v5388_v32 = vld [vmem:[%s8360_s3 + $0x1d4] sm:$0xf0] }
 0x145   : > { %3226 = vmatpush.bf16.msrb.mxu2 %v4589_v56  ;;  %v4397_v56 = vor.u32 %v5332_v25, %v4394_v42  ;;  %v5333_v50 = vld [vmem:[%s8360_s3 + $0x24] sm:$0xf]  ;;  %v5376_v39 = vld [vmem:[%s8360_s3 + $0x174] sm:$0xf0] }
 0x146   : > { %3113 = vmatpush.bf16.msrb.mxu1 %v4761_v3  ;;  %v4405_v1 = vor.u32 %v5333_v50, %v4402_v52  ;;  %v4746_v3 = vld [vmem:[%s8360_s3 + $0x2f8] sm:$0xf0]  ;;  %v5370_v50 = vld [vmem:[%s8360_s3 + $0x14c] sm:$0xf] }
 0x147   : > { %3201 = vmatpush.bf16.msrb.mxu0 %v4537_v2  ;;  %v5405_v2 = vld [vmem:[%s8360_s3 + $0x264] sm:$0xf]  ;;  %v4554_v52 = vld [vmem:[%s8360_s3 + $0x178] sm:$0xf0] }
 0x148   : > { %3139 = vmatpush.bf16.msrb.mxu3 %v4765_v61  ;;  %v4696_v61 = vld [vmem:[%s8360_s3 + $0x268] sm:$0xf] }
 0x149   : > { %3227 = vmatpush.bf16.msrb.mxu2 %v4541_v6  ;;  %v4693_v6 = vor.u32 %v5405_v2, %v4690_v31  ;;  %v4745_v2 = vor.u32 %v5424_v53, %v4744_v37  ;;  %v5418_v31 = vld [vmem:[%s8360_s3 + $0x2cc] sm:$0xf]  ;;  %v4504_v37 = vld [vmem:[%s8360_s3 + $0xe8] sm:$0xf]  ;;  %v5364_v53 = vld [vmem:[%s8360_s3 + $0x114] sm:$0xf0] }
 0x14a   : > { %v4749_v0 = vor.u32 %v5418_v31, %v4746_v3  ;;  %v4506_v31 = vld [vmem:[%s8360_s3 + $0x118] sm:$0xf0]  ;;  %v4456_v3 = vld [vmem:[%s8360_s3 + $0x88] sm:$0xf] }
 0x14b   : > { %3202 = vmatpush.bf16.msrb.mxu0 %v4489_v16  ;;  %v5387_v16 = vld [vmem:[%s8360_s3 + $0x1cc] sm:$0xf0] }
 0x14c   : > { %v4593_v13 = vor.u32 %v5387_v16, %v4592_v14  ;;  %v5406_v16 = vld [vmem:[%s8360_s3 + $0x26c] sm:$0xf] }
 0x14d   : > { %3228 = vmatpush.bf16.msrb.mxu2 %v4493_v18  ;;  %v4597_v18 = vor.u32 %v5381_v15, %v4594_v51  ;;  %v4698_v15 = vld [vmem:[%s8360_s3 + $0x298] sm:$0xf0]  ;;  %v4648_v51 = vld [vmem:[%s8360_s3 + $0x208] sm:$0xf] }
 0x14e   : > { %v4701_v19 = vor.u32 %v5406_v16, %v4698_v15  ;;  %v4408_v16 = vld [vmem:[%s8360_s3 + $0x28] sm:$0xf]  ;;  %v5340_v15 = vld [vmem:[%s8360_s3 + $0x54] sm:$0xf0] }
 0x14f   : > { %3203 = vmatpush.bf16.msrb.mxu0 %v4441_v40  ;;  %v4498_v40 = vld [vmem:[%s8360_s3 + $0x110] sm:$0xf0] }
 0x150   : > { %v4501_v44 = vor.u32 %v5357_v36, %v4498_v40  ;;  %v4960_v40 = vld [vmem:[%s8360_s3 + $0x490] sm:$0xf] }
 0x151   : > { %3229 = vmatpush.bf16.msrb.mxu2 %v4445_v26 }
 0x153   : > { %3204 = vmatpush.bf16.msrb.mxu0 %v4393_v49  ;;  %v1814_v55 = vpop.f32.mrf.mxu0  ;;  %v5339_v49 = vld [vmem:[%s8360_s3 + $0x4c] sm:$0xf0] }
 0x154   : > { %v1827_v22 = vpop.f32.mrf.mxu1  ;;  %v1815_v24 = vadd.f32 %v1814_v55, %v1802_v54  ;;  %v4401_v58 = vor.u32 %v5339_v49, %v4400_v48  ;;  %v4914_v48 = vld [vmem:[%s8360_s3 + $0x460] sm:$0xf0]  ;;  %v4553_v49 = vor.u32 %v5376_v39, %v4552_v45  ;;  %v5016_v39 = vld [vmem:[%s8360_s3 + $0x4f8] sm:$0xf] }
 0x155   : > { %3230 = vmatpush.bf16.msrb.mxu2 %v4397_v56  ;;  %v5104_v56 = vld [vmem:[%s8360_s3 + $0x5b0] sm:$0xf] }
 0x156   : > { %3205 = vmatmul.bf16.vlgmr.msrb.gmra.mxu0 %v7222_v35  ;;  %v1828_v28 = vadd.f32 %v1827_v22, %v1815_v24  ;;  %v5487_v22 = vld [vmem:[%s8360_s3 + $0x4f4] sm:$0xf]  ;;  %v5394_v24 = vld [vmem:[%s8360_s3 + $0x20c] sm:$0xf] }
 0x157   : > { %3249 = vmatpush.bf16.msra.mxu0 %v4737_v57  ;;  %v5013_v36 = vor.u32 %v5487_v22, %v5010_v23  ;;  %v5334_v22 = vld [vmem:[%s8360_s3 + $0x2c] sm:$0xf]  ;;  %v4409_v23 = vor.u32 %v5340_v15, %v4408_v16  ;;  %v5428_v16 = vld [vmem:[%s8360_s3 + $0x31c] sm:$0xf] }
 0x158   : > { %3231 = vmatmul.bf16.vlgmr.msrb.gmra.mxu2 %v7222_v35 }
 0x159   : > { %3275 = vmatpush.bf16.msra.mxu2 %v4741_v62  ;;  %v5106_v62 = vld [vmem:[%s8360_s3 + $0x5e0] sm:$0xf0] }
 0x15a   : > { %v5109_v7 = vor.u32 %v5511_v60, %v5106_v62  ;;  %v5457_v60 = vld [vmem:[%s8360_s3 + $0x3fc] sm:$0xf0]  ;;  %v5451_v62 = vld [vmem:[%s8360_s3 + $0x3d4] sm:$0xf] }
 0x15b   : > { %3250 = vmatpush.bf16.msra.mxu0 %v4689_v4  ;;  %v1840_v21 = vpop.f32.mrf.mxu2  ;;  %v1816_v25 = vpop.f32.mrf.mxu0  ;;  %v5412_v4 = vld [vmem:[%s8360_s3 + $0x294] sm:$0xf0] }
 0x15c   : > { %v1841_v41 = vadd.f32 %v1840_v21, %v1828_v28  ;;  %v1853_v26 = vpop.f32.mrf.mxu3  ;;  %v1829_v42 = vpop.f32.mrf.mxu1  ;;  %v4697_v14 = vor.u32 %v5412_v4, %v4696_v61  ;;  %v5481_v21 = vld [vmem:[%s8360_s3 + $0x4bc] sm:$0xf0]  ;;  %v5382_v25 = vld [vmem:[%s8360_s3 + $0x1ac] sm:$0xf]  ;;  %v5352_v61 = vld [vmem:[%s8360_s3 + $0xb4] sm:$0xf0] }
 0x15d   : > { %3276 = vmatpush.bf16.msra.mxu2 %v4693_v6  ;;  %v5105_v6 = vor.u32 %v5517_v59, %v5104_v56  ;;  %v4961_v42 = vor.u32 %v5481_v21, %v4960_v40  ;;  %v4557_v59 = vor.u32 %v5370_v50, %v4554_v52  ;;  %v5476_v50 = vld [vmem:[%s8360_s3 + $0x49c] sm:$0xf] }
 0x15e   : > { %v1854_v46 = vadd.f32 %v1853_v26, %v1841_v41  ;;  %v4962_v41 = vld [vmem:[%s8360_s3 + $0x4c0] sm:$0xf0] }
 0x15f   : > { %3251 = vmatpush.bf16.msra.mxu0 %v4641_v10  ;;  %v5505_v10 = vld [vmem:[%s8360_s3 + $0x57c] sm:$0xf0] }
 0x160   : > { %5582 = vtanh.f32 %v1854_v46  ;;  %v5057_v54 = vor.u32 %v5505_v10, %v5056_v8  ;;  %v5445_v8 = vld [vmem:[%s8360_s3 + $0x39c] sm:$0xf0]  ;;  %v4818_v10 = vld [vmem:[%s8360_s3 + $0x3a0] sm:$0xf0] }
 0x161   : > { %3277 = vmatpush.bf16.msra.mxu2 %v4645_v12  ;;  %v5058_v12 = vld [vmem:[%s8360_s3 + $0x580] sm:$0xf0] }
 0x162   : > { %v5061_v55 = vor.u32 %v5499_v11, %v5058_v12  ;;  %v4457_v11 = vor.u32 %v5352_v61, %v4456_v3  ;;  %v5346_v12 = vld [vmem:[%s8360_s3 + $0x8c] sm:$0xf] }
 0x163   : > { %3252 = vmatpush.bf16.msra.mxu0 %v4593_v13  ;;  %v1842_v57 = vpop.f32.mrf.mxu2  ;;  %v5400_v13 = vld [vmem:[%s8360_s3 + $0x234] sm:$0xf0]  ;;  %v4874_v3 = vld [vmem:[%s8360_s3 + $0x408] sm:$0xf0] }
 0x164   : > { %v1855_v63 = vpop.f32.mrf.mxu3  ;;  %v4649_v17 = vor.u32 %v5400_v13, %v4648_v51 }
 0x165   : > { %3278 = vmatpush.bf16.msra.mxu2 %v4597_v18  ;;  %v5008_v18 = vld [vmem:[%s8360_s3 + $0x4f0] sm:$0xf]  ;;  %v4866_v63 = vld [vmem:[%s8360_s3 + $0x400] sm:$0xf0] }
 0x166   : > { %v5583_v5 = vpop.eup %5582  ;;  %v5009_v33 = vor.u32 %v5493_v20, %v5008_v18  ;;  %v4770_v20 = vld [vmem:[%s8360_s3 + $0x340] sm:$0xf0] }
 0x167   : > { %3253 = vmatpush.bf16.msra.mxu0 %v4545_v27  ;;  %v7749_v9 = vpack.c.bf16 %v5583_v5, %v5583_v5  ;;  %v4650_v27 = vld [vmem:[%s8360_s3 + $0x238] sm:$0xf0]  ;;  %v4869_v5 = vor.u32 %v5451_v62, %v4866_v63  ;;  %v4872_v63 = vld [vmem:[%s8360_s3 + $0x3d8] sm:$0xf] }
 0x168   : > { %v4653_v28 = vor.u32 %v5394_v24, %v4650_v27  ;;  %v5112_v24 = vld [vmem:[%s8360_s3 + $0x5b8] sm:$0xf]  ;;  %v5518_v27 = vld [vmem:[%s8360_s3 + $0x5e4] sm:$0xf0] }
 0x169   : > { %3279 = vmatpush.bf16.msra.mxu2 %v4549_v30  ;;  %3062 = vmatmul.bf16.vlgmr.msra.gmra.mxu1 %v7749_v9  ;;  %v4600_v30 = vld [vmem:[%s8360_s3 + $0x1a8] sm:$0xf] }
 0x16a   : > { %3088 = vmatmul.bf16.vlgmr.msra.gmra.mxu3 %v7749_v9  ;;  %3158 = vmatpush.bf16.msra.mxu1 %v5105_v6  ;;  %v4601_v26 = vor.u32 %v5388_v32, %v4600_v30  ;;  %v4816_v6 = vld [vmem:[%s8360_s3 + $0x370] sm:$0xf]  ;;  %v5512_v30 = vld [vmem:[%s8360_s3 + $0x5bc] sm:$0xf]  ;;  %v5114_v32 = vld [vmem:[%s8360_s3 + $0x5e8] sm:$0xf0] }
 0x16b   : > { %3254 = vmatpush.bf16.msra.mxu0 %v4497_v38  ;;  %3184 = vmatpush.bf16.msra.mxu3 %v5109_v7  ;;  %v5475_v38 = vld [vmem:[%s8360_s3 + $0x494] sm:$0xf]  ;;  %v4817_v51 = vor.u32 %v5445_v8, %v4816_v6  ;;  %v5117_v21 = vor.u32 %v5512_v30, %v5114_v32  ;;  %v5446_v6 = vld [vmem:[%s8360_s3 + $0x3a4] sm:$0xf0]  ;;  %v4826_v8 = vld [vmem:[%s8360_s3 + $0x3a8] sm:$0xf0] }
 0x16c   : > { %v4965_v43 = vor.u32 %v5475_v38, %v4962_v41  ;;  %v5064_v38 = vld [vmem:[%s8360_s3 + $0x558] sm:$0xf]  ;;  %v5506_v41 = vld [vmem:[%s8360_s3 + $0x584] sm:$0xf0]  ;;  %v5074_v30 = vld [vmem:[%s8360_s3 + $0x590] sm:$0xf0] }
 0x16d   : > { %3280 = vmatpush.bf16.msra.mxu2 %v4501_v44  ;;  %v4602_v44 = vld [vmem:[%s8360_s3 + $0x1d8] sm:$0xf0] }
 0x16e   : > { %3159 = vmatpush.bf16.msra.mxu1 %v5057_v54  ;;  %v4605_v46 = vor.u32 %v5382_v25, %v4602_v44  ;;  %v4768_v54 = vld [vmem:[%s8360_s3 + $0x310] sm:$0xf]  ;;  %v5066_v25 = vld [vmem:[%s8360_s3 + $0x588] sm:$0xf0]  ;;  %v5065_v44 = vor.u32 %v5506_v41, %v5064_v38  ;;  %v5489_v38 = vld [vmem:[%s8360_s3 + $0x504] sm:$0xf] }
 0x16f   : > { %3255 = vmatpush.bf16.msra.mxu0 %v4449_v47  ;;  %3185 = vmatpush.bf16.msra.mxu3 %v5061_v55  ;;  %v5469_v47 = vld [vmem:[%s8360_s3 + $0x45c] sm:$0xf0]  ;;  %v5026_v41 = vld [vmem:[%s8360_s3 + $0x530] sm:$0xf0] }
 0x170   : > { %v4913_v56 = vor.u32 %v5469_v47, %v4912_v29  ;;  %v5433_v55 = vld [vmem:[%s8360_s3 + $0x33c] sm:$0xf0]  ;;  %v5018_v29 = vld [vmem:[%s8360_s3 + $0x528] sm:$0xf0] }
 0x171   : > { %3281 = vmatpush.bf16.msra.mxu2 %v4453_v34  ;;  %v5463_v34 = vld [vmem:[%s8360_s3 + $0x434] sm:$0xf] }
 0x172   : > { %3160 = vmatpush.bf16.msra.mxu1 %v5009_v33  ;;  %v4917_v57 = vor.u32 %v5463_v34, %v4914_v48  ;;  %v4769_v33 = vor.u32 %v5433_v55, %v4768_v54  ;;  %v4968_v34 = vld [vmem:[%s8360_s3 + $0x498] sm:$0xf]  ;;  %v5482_v48 = vld [vmem:[%s8360_s3 + $0x4c4] sm:$0xf0]  ;;  %v5519_v54 = vld [vmem:[%s8360_s3 + $0x5ec] sm:$0xf0] }
 0x173   : > { %3256 = vmatpush.bf16.msra.mxu0 %v4401_v58  ;;  %3186 = vmatpush.bf16.msra.mxu3 %v5013_v36  ;;  %v4864_v58 = vld [vmem:[%s8360_s3 + $0x3d0] sm:$0xf]  ;;  %v4969_v52 = vor.u32 %v5482_v48, %v4968_v34  ;;  %v5513_v55 = vld [vmem:[%s8360_s3 + $0x5c4] sm:$0xf]  ;;  %v4928_v34 = vld [vmem:[%s8360_s3 + $0x440] sm:$0xf] }
 0x174   : > { %v4865_v4 = vor.u32 %v5457_v60, %v4864_v58  ;;  %v4922_v58 = vld [vmem:[%s8360_s3 + $0x468] sm:$0xf0]  ;;  %v5471_v48 = vld [vmem:[%s8360_s3 + $0x46c] sm:$0xf0] }
 0x175   : > { %3282 = vmatpush.bf16.msra.mxu2 %v4405_v1  ;;  %v4505_v1 = vor.u32 %v5364_v53, %v4504_v37  ;;  %v4920_v53 = vld [vmem:[%s8360_s3 + $0x438] sm:$0xf] }
 0x176   : > { %3257 = vmatmul.bf16.vlgmr.msra.gmra.mxu0 %v7222_v35  ;;  %3161 = vmatpush.bf16.msra.mxu1 %v4961_v42  ;;  %v5494_v42 = vld [vmem:[%s8360_s3 + $0x524] sm:$0xf0] }
 0x177   : > { %3301 = vmatpush.bf16.msrb.mxu0 %v4745_v2  ;;  %3187 = vmatpush.bf16.msra.mxu3 %v4965_v43  ;;  %v5358_v2 = vld [vmem:[%s8360_s3 + $0xec] sm:$0xf]  ;;  %v5488_v43 = vld [vmem:[%s8360_s3 + $0x4fc] sm:$0xf] }
 0x178   : > { %3283 = vmatmul.bf16.vlgmr.msra.gmra.mxu2 %v7222_v35  ;;  %v4509_v7 = vor.u32 %v5358_v2, %v4506_v31  ;;  %v5021_v47 = vor.u32 %v5488_v43, %v5018_v29  ;;  %v5452_v31 = vld [vmem:[%s8360_s3 + $0x3dc] sm:$0xf] }
 0x179   : > { %3327 = vmatpush.bf16.msrb.mxu2 %v4749_v0  ;;  %3114 = vmatmul.bf16.vlgmr.msrb.gmra.mxu1 %v7749_v9  ;;  %v5439_v0 = vld [vmem:[%s8360_s3 + $0x374] sm:$0xf] }
 0x17a   : > { %3140 = vmatmul.bf16.vlgmr.msrb.gmra.mxu3 %v7749_v9  ;;  %3162 = vmatpush.bf16.msra.mxu1 %v4913_v56  ;;  %v4821_v13 = vor.u32 %v5439_v0, %v4818_v10  ;;  %v5470_v56 = vld [vmem:[%s8360_s3 + $0x464] sm:$0xf0] }
 0x17b   : > { %3302 = vmatpush.bf16.msrb.mxu0 %v4697_v14  ;;  %3188 = vmatpush.bf16.msra.mxu3 %v4917_v57  ;;  %v4458_v14 = vld [vmem:[%s8360_s3 + $0xb8] sm:$0xf0] }
 0x17c   : > { %v4461_v18 = vor.u32 %v5346_v12, %v4458_v14  ;;  %v5464_v57 = vld [vmem:[%s8360_s3 + $0x43c] sm:$0xf]  ;;  %v4776_v12 = vld [vmem:[%s8360_s3 + $0x318] sm:$0xf]  ;;  %v5434_v14 = vld [vmem:[%s8360_s3 + $0x344] sm:$0xf0] }
 0x17d   : > { %3328 = vmatpush.bf16.msrb.mxu2 %v4701_v19  ;;  %v5427_v19 = vld [vmem:[%s8360_s3 + $0x314] sm:$0xf]  ;;  %v4925_v62 = vor.u32 %v5464_v57, %v4922_v58  ;;  %v5453_v57 = vld [vmem:[%s8360_s3 + $0x3e4] sm:$0xf] }
 0x17e   : > { %3163 = vmatpush.bf16.msra.mxu1 %v4865_v4  ;;  %v4773_v36 = vor.u32 %v5427_v19, %v4770_v20  ;;  %v4877_v4 = vor.u32 %v5452_v31, %v4874_v3  ;;  %v4777_v19 = vor.u32 %v5434_v14, %v4776_v12  ;;  %v4882_v58 = vld [vmem:[%s8360_s3 + $0x410] sm:$0xf0]  ;;  %v5447_v31 = vld [vmem:[%s8360_s3 + $0x3ac] sm:$0xf0]  ;;  %v5441_v3 = vld [vmem:[%s8360_s3 + $0x384] sm:$0xf] }
 0x17f   : > { %3303 = vmatpush.bf16.msrb.mxu0 %v4649_v17  ;;  %3189 = vmatpush.bf16.msra.mxu3 %v4869_v5  ;;  %v4410_v17 = vld [vmem:[%s8360_s3 + $0x58] sm:$0xf0]  ;;  %v4824_v5 = vld [vmem:[%s8360_s3 + $0x378] sm:$0xf]  ;;  %v5514_v12 = vld [vmem:[%s8360_s3 + $0x5cc] sm:$0xf] }
 0x180   : > { %v4413_v40 = vor.u32 %v5334_v22, %v4410_v17  ;;  %v4825_v0 = vor.u32 %v5446_v6, %v4824_v5  ;;  %v5072_v17 = vld [vmem:[%s8360_s3 + $0x560] sm:$0xf]  ;;  %v5130_v14 = vld [vmem:[%s8360_s3 + $0x5f8] sm:$0xf0] }
 0x181   : > { %3329 = vmatpush.bf16.msrb.mxu2 %v4653_v28  ;;  %v5113_v28 = vor.u32 %v5518_v27, %v5112_v24  ;;  %v5507_v24 = vld [vmem:[%s8360_s3 + $0x58c] sm:$0xf0]  ;;  %v5501_v27 = vld [vmem:[%s8360_s3 + $0x564] sm:$0xf]  ;;  %v4784_v6 = vld [vmem:[%s8360_s3 + $0x320] sm:$0xf] }
 0x182   : > { %3164 = vmatpush.bf16.msra.mxu1 %v4817_v51  ;;  %v4778_v51 = vld [vmem:[%s8360_s3 + $0x348] sm:$0xf0] }
 0x183   : > { %3304 = vmatpush.bf16.msrb.mxu0 %v4601_v26  ;;  %3190 = vmatpush.bf16.msra.mxu3 %v4821_v13  ;;  %v5500_v26 = vld [vmem:[%s8360_s3 + $0x55c] sm:$0xf]  ;;  %v5120_v13 = vld [vmem:[%s8360_s3 + $0x5c0] sm:$0xf]  ;;  %v4781_v20 = vor.u32 %v5428_v16, %v4778_v51 }
 0x184   : > { %v5069_v45 = vor.u32 %v5500_v26, %v5066_v25  ;;  %v5121_v22 = vor.u32 %v5519_v54, %v5120_v13  ;;  %v5029_v25 = vor.u32 %v5489_v38, %v5026_v41  ;;  %v5478_v38 = vld [vmem:[%s8360_s3 + $0x4ac] sm:$0xf]  ;;  %v4986_v41 = vld [vmem:[%s8360_s3 + $0x4d8] sm:$0xf0] }
 0x185   : > { %3330 = vmatpush.bf16.msrb.mxu2 %v4605_v46  ;;  %v5017_v46 = vor.u32 %v5494_v42, %v5016_v39  ;;  %v5477_v39 = vld [vmem:[%s8360_s3 + $0x4a4] sm:$0xf]  ;;  %v4978_v42 = vld [vmem:[%s8360_s3 + $0x4d0] sm:$0xf0] }
 0x186   : > { %3165 = vmatpush.bf16.msra.mxu1 %v4769_v33  ;;  %v5073_v33 = vor.u32 %v5507_v24, %v5072_v17  ;;  %v5032_v24 = vld [vmem:[%s8360_s3 + $0x508] sm:$0xf] }
 0x187   : > { %3305 = vmatpush.bf16.msrb.mxu0 %v4553_v49  ;;  %3191 = vmatpush.bf16.msra.mxu3 %v4773_v36  ;;  %v7962_v49 = vpop.f32.mrf.mxu0 }
 0x189   : > { %3331 = vmatpush.bf16.msrb.mxu2 %v4557_v59  ;;  %3166 = vmatmul.bf16.vlgmr.msra.gmra.mxu1 %v7749_v9  ;;  %v4921_v59 = vor.u32 %v5470_v56, %v4920_v53  ;;  %v4880_v53 = vld [vmem:[%s8360_s3 + $0x3e0] sm:$0xf]  ;;  %v5459_v56 = vld [vmem:[%s8360_s3 + $0x40c] sm:$0xf0] }
 0x18a   : > { %3210 = vmatpush.bf16.msrb.mxu1 %v5113_v28  ;;  %3192 = vmatmul.bf16.vlgmr.msra.gmra.mxu3 %v7749_v9  ;;  %v5024_v28 = vld [vmem:[%s8360_s3 + $0x500] sm:$0xf] }
 0x18b   : > { %3306 = vmatpush.bf16.msrb.mxu0 %v4505_v1  ;;  %3236 = vmatpush.bf16.msrb.mxu3 %v5117_v21  ;;  %v5458_v1 = vld [vmem:[%s8360_s3 + $0x404] sm:$0xf0]  ;;  %v5495_v21 = vld [vmem:[%s8360_s3 + $0x52c] sm:$0xf0] }
 0x18c   : > { %v4873_v61 = vor.u32 %v5458_v1, %v4872_v63  ;;  %v5025_v26 = vor.u32 %v5495_v21, %v5024_v28  ;;  %v4885_v1 = vor.u32 %v5453_v57, %v4882_v58  ;;  %v4984_v28 = vld [vmem:[%s8360_s3 + $0x4a8] sm:$0xf]  ;;  %v5484_v21 = vld [vmem:[%s8360_s3 + $0x4d4] sm:$0xf0] }
 0x18d   : > { %3332 = vmatpush.bf16.msrb.mxu2 %v4509_v7  ;;  %v7982_v60 = vpop.f32.mrf.mxu2  ;;  %v5440_v7 = vld [vmem:[%s8360_s3 + $0x37c] sm:$0xf]  ;;  %v4840_v57 = vld [vmem:[%s8360_s3 + $0x388] sm:$0xf]  ;;  %v5448_v58 = vld [vmem:[%s8360_s3 + $0x3b4] sm:$0xf0] }
 0x18e   : > { %3211 = vmatpush.bf16.msrb.mxu1 %v5065_v44  ;;  %v4976_v44 = vld [vmem:[%s8360_s3 + $0x4a0] sm:$0xf] }
 0x18f   : > { %3307 = vmatpush.bf16.msrb.mxu0 %v4457_v11  ;;  %3237 = vmatpush.bf16.msrb.mxu3 %v5069_v45  ;;  %v3052_v2 = vpop.f32.mrf.mxu0  ;;  %v4829_v11 = vor.u32 %v5440_v7, %v4826_v8  ;;  %v5483_v45 = vld [vmem:[%s8360_s3 + $0x4cc] sm:$0xf0]  ;;  %v5429_v8 = vld [vmem:[%s8360_s3 + $0x324] sm:$0xf] }
 0x190   : > { %v4977_v29 = vor.u32 %v5483_v45, %v4976_v44  ;;  %v4832_v2 = vld [vmem:[%s8360_s3 + $0x380] sm:$0xf]  ;;  %v5435_v7 = vld [vmem:[%s8360_s3 + $0x34c] sm:$0xf0]  ;;  %v4989_v44 = vor.u32 %v5478_v38, %v4986_v41  ;;  %v4936_v45 = vld [vmem:[%s8360_s3 + $0x448] sm:$0xf] }
 0x191   : > { %3333 = vmatpush.bf16.msrb.mxu2 %v4461_v18  ;;  %v5122_v18 = vld [vmem:[%s8360_s3 + $0x5f0] sm:$0xf0]  ;;  %v4785_v51 = vor.u32 %v5435_v7, %v4784_v6 }
 0x192   : > { %3212 = vmatpush.bf16.msrb.mxu1 %v5017_v46 }
 0x193   : > { %3308 = vmatpush.bf16.msrb.mxu0 %v4409_v23  ;;  %3238 = vmatpush.bf16.msrb.mxu3 %v5021_v47  ;;  %v5125_v23 = vor.u32 %v5513_v55, %v5122_v18  ;;  %v4981_v47 = vor.u32 %v5477_v39, %v4978_v42  ;;  %v5133_v55 = vor.u32 %v5514_v12, %v5130_v14  ;;  %v5080_v18 = vld [vmem:[%s8360_s3 + $0x568] sm:$0xf]  ;;  %v5472_v39 = vld [vmem:[%s8360_s3 + $0x474] sm:$0xf0]  ;;  %v5466_v42 = vld [vmem:[%s8360_s3 + $0x44c] sm:$0xf] }
 0x195   : > { %3334 = vmatpush.bf16.msrb.mxu2 %v4413_v40  ;;  %v3078_v10 = vpop.f32.mrf.mxu2  ;;  %v5077_v40 = vor.u32 %v5501_v27, %v5074_v30  ;;  %v5496_v27 = vld [vmem:[%s8360_s3 + $0x534] sm:$0xf0]  ;;  %v5490_v30 = vld [vmem:[%s8360_s3 + $0x50c] sm:$0xf] }
 0x196   : > { %3309 = vmatmul.bf16.vlgmr.msrb.gmra.mxu0 %v7222_v35  ;;  %3213 = vmatpush.bf16.msrb.mxu1 %v4969_v52  ;;  %v4929_v52 = vor.u32 %v5471_v48, %v4928_v34  ;;  %v5128_v10 = vld [vmem:[%s8360_s3 + $0x5c8] sm:$0xf]  ;;  %v5460_v48 = vld [vmem:[%s8360_s3 + $0x414] sm:$0xf0] }
 0x197   : > { %v8017_v15 = vpop.f32.mrf.mxu0  ;;  %v4888_v34 = vld [vmem:[%s8360_s3 + $0x3e8] sm:$0xf] }
 0x198   : > { %3335 = vmatmul.bf16.vlgmr.msrb.gmra.mxu2 %v7222_v35  ;;  %v4970_v35 = vld [vmem:[%s8360_s3 + $0x4c8] sm:$0xf0] }
 0x199   : > { %v4973_v37 = vor.u32 %v5476_v50, %v4970_v35  ;;  %v5465_v50 = vld [vmem:[%s8360_s3 + $0x444] sm:$0xf]  ;;  %v4930_v35 = vld [vmem:[%s8360_s3 + $0x470] sm:$0xf0] }
 0x19a   : > { %3214 = vmatpush.bf16.msrb.mxu1 %v4921_v59 }
 0x19b   : > { %3239 = vmatpush.bf16.msrb.mxu3 %v4973_v37  ;;  %v4933_v37 = vor.u32 %v5465_v50, %v4930_v35  ;;  %v5454_v50 = vld [vmem:[%s8360_s3 + $0x3ec] sm:$0xf]  ;;  %v4890_v35 = vld [vmem:[%s8360_s3 + $0x418] sm:$0xf0] }
 0x19d   : > { %v8046_v32 = vpop.f32.mrf.mxu2 }
 0x19e   : > { %3215 = vmatpush.bf16.msrb.mxu1 %v4873_v61  ;;  %v4834_v61 = vld [vmem:[%s8360_s3 + $0x3b0] sm:$0xf0] }
 0x19f   : > { %3240 = vmatpush.bf16.msrb.mxu3 %v4925_v62  ;;  %v3104_v36 = vpop.f32.mrf.mxu0  ;;  %v4881_v62 = vor.u32 %v5459_v56, %v4880_v53  ;;  %v4837_v5 = vor.u32 %v5441_v3, %v4834_v61  ;;  %v4893_v56 = vor.u32 %v5454_v50, %v4890_v35  ;;  %v5436_v3 = vld [vmem:[%s8360_s3 + $0x354] sm:$0xf0]  ;;  %v5430_v61 = vld [vmem:[%s8360_s3 + $0x32c] sm:$0xf] }
 0x1a0   : > { %v5033_v36 = vor.u32 %v5496_v27, %v5032_v24 }
 0x1a2   : > { %3216 = vmatpush.bf16.msrb.mxu1 %v4825_v0  ;;  %v4786_v0 = vld [vmem:[%s8360_s3 + $0x350] sm:$0xf0] }
 0x1a3   : > { %3241 = vmatpush.bf16.msrb.mxu3 %v4877_v4  ;;  %v4833_v4 = vor.u32 %v5447_v31, %v4832_v2  ;;  %v4789_v13 = vor.u32 %v5429_v8, %v4786_v0  ;;  %v4792_v31 = vld [vmem:[%s8360_s3 + $0x328] sm:$0xf]  ;;  %v8232_v8 = vld [vmem:[%s8361_s4] sm:$0xff] }
 0x1a4   : > { %v4793_v6 = vor.u32 %v5436_v3, %v4792_v31  ;;  %v2057_v0 = vperm.slane %v8232_v8, 0  ;;  %v2062_v3 = vperm.slane %v8232_v8, 5 }
 0x1a5   : > { %v3130_v43 = vpop.f32.mrf.mxu2 }
 0x1a6   : > { %3217 = vmatpush.bf16.msrb.mxu1 %v4777_v19  ;;  %v5508_v19 = vld [vmem:[%s8360_s3 + $0x594] sm:$0xf0]  ;;  %v4938_v43 = vld [vmem:[%s8360_s3 + $0x478] sm:$0xf0] }
 0x1a7   : > { %3242 = vmatpush.bf16.msrb.mxu3 %v4829_v11  ;;  %v5520_v11 = vld [vmem:[%s8360_s3 + $0x5f4] sm:$0xf0] }
 0x1a8   : > { %v5129_v54 = vor.u32 %v5520_v11, %v5128_v10  ;;  %v8243_v10 = vld [vmem:[%s8237_s16] sm:$0xff]  ;;  %v3051_v11 = vadd.f32 %v7962_v49, %v2057_v0 }
 0x1a9   : > { %3218 = vmatmul.bf16.vlgmr.msrb.gmra.mxu1 %v7749_v9  ;;  %v3357_v12 = vperm.slane %v8243_v10, 0  ;;  %v3358_v49 = vperm.slane %v8243_v10, 1 }
 0x1aa   : > { %3262 = vmatpush.bf16.msra.mxu1 %v5121_v22  ;;  %v5082_v22 = vld [vmem:[%s8360_s3 + $0x598] sm:$0xf0] }
 0x1ab   : > { %3243 = vmatpush.bf16.msrb.mxu3 %v4781_v20  ;;  %v5502_v20 = vld [vmem:[%s8360_s3 + $0x56c] sm:$0xf] }
 0x1ac   : > { %v5085_v17 = vor.u32 %v5502_v20, %v5082_v22 }
 0x1ae   : > { %3244 = vmatmul.bf16.vlgmr.msrb.gmra.mxu3 %v7749_v9  ;;  %3263 = vmatpush.bf16.msra.mxu1 %v5073_v33  ;;  %v5034_v33 = vld [vmem:[%s8360_s3 + $0x538] sm:$0xf0] }
 0x1af   : > { %3288 = vmatpush.bf16.msra.mxu3 %v5125_v23  ;;  %v5081_v23 = vor.u32 %v5508_v19, %v5080_v18  ;;  %v8259_v19 = vld [vmem:[%s8253_s19] sm:$0xff] }
 0x1b0   : > { %v3421_v24 = vperm.slane %v8259_v19, 0  ;;  %v3422_v38 = vperm.slane %v8259_v19, 1 }
 0x1b2   : > { %3264 = vmatpush.bf16.msra.mxu1 %v5025_v26  ;;  %v4985_v26 = vor.u32 %v5484_v21, %v4984_v28  ;;  %v3359_v21 = vperm.slane %v8243_v10, 2 }
 0x1b3   : > { %3289 = vmatpush.bf16.msra.mxu3 %v5077_v40  ;;  %v8074_v46 = vpop.f32.mrf.mxu0  ;;  %v5037_v40 = vor.u32 %v5490_v30, %v5034_v33 }
 0x1b6   : > { %3265 = vmatpush.bf16.msra.mxu1 %v4977_v29  ;;  %v4937_v29 = vor.u32 %v5472_v39, %v4936_v45 }
 0x1b7   : > { %3290 = vmatpush.bf16.msra.mxu3 %v5029_v25 }
 0x1ba   : > { %3266 = vmatpush.bf16.msra.mxu1 %v4929_v52 }
 0x1bb   : > { %3291 = vmatpush.bf16.msra.mxu3 %v4981_v47  ;;  %v8100_v59 = vpop.f32.mrf.mxu2  ;;  %v3156_v63 = vpop.f32.mrf.mxu0  ;;  %v4941_v47 = vor.u32 %v5466_v42, %v4938_v43 }
 0x1bc   : > { %v4842_v63 = vld [vmem:[%s8360_s3 + $0x3b8] sm:$0xf0] }
 0x1be   : > { %3267 = vmatpush.bf16.msra.mxu1 %v4881_v62  ;;  %v5442_v62 = vld [vmem:[%s8360_s3 + $0x38c] sm:$0xf] }
 0x1bf   : > { %3292 = vmatpush.bf16.msra.mxu3 %v4933_v37  ;;  %v4889_v37 = vor.u32 %v5460_v48, %v4888_v34  ;;  %v4845_v2 = vor.u32 %v5442_v62, %v4842_v63 }
 0x1c2   : > { %3268 = vmatpush.bf16.msra.mxu1 %v4833_v4  ;;  %v4794_v4 = vld [vmem:[%s8360_s3 + $0x358] sm:$0xf0] }
 0x1c3   : > { %3293 = vmatpush.bf16.msra.mxu3 %v4885_v1  ;;  %v3182_v16 = vpop.f32.mrf.mxu2  ;;  %v4841_v1 = vor.u32 %v5448_v58, %v4840_v57  ;;  %v4797_v7 = vor.u32 %v5430_v61, %v4794_v4 }
 0x1c4   : > { %v2058_v16 = vperm.slane %v8232_v8, 1 }
 0x1c6   : > { %3269 = vmatpush.bf16.msra.mxu1 %v4785_v51 }
 0x1c7   : > { %3294 = vmatpush.bf16.msra.mxu3 %v4837_v5 }
 0x1c9   : > { %3270 = vmatmul.bf16.vlgmr.msra.gmra.mxu1 %v7749_v9 }
 0x1ca   : > { %3314 = vmatpush.bf16.msrb.mxu1 %v5129_v54 }
 0x1cb   : > { %3295 = vmatpush.bf16.msra.mxu3 %v4789_v13 }
 0x1ce   : > { %3296 = vmatmul.bf16.vlgmr.msra.gmra.mxu3 %v7749_v9  ;;  %3315 = vmatpush.bf16.msrb.mxu1 %v5081_v23 }
 0x1cf   : > { %3340 = vmatpush.bf16.msrb.mxu3 %v5133_v55 }
 0x1d2   : > { %3316 = vmatpush.bf16.msrb.mxu1 %v5033_v36 }
 0x1d3   : > { %3341 = vmatpush.bf16.msrb.mxu3 %v5085_v17  ;;  %v8176_v25 = vpop.f32.mrf.mxu0 }
 0x1d6   : > { %3317 = vmatpush.bf16.msrb.mxu1 %v4985_v26  ;;  %v2060_v26 = vperm.slane %v8232_v8, 3 }
 0x1d7   : > { %3342 = vmatpush.bf16.msrb.mxu3 %v5037_v40 }
 0x1da   : > { %3318 = vmatpush.bf16.msrb.mxu1 %v4937_v29  ;;  %v3129_v29 = vadd.f32 %v8046_v32, %v2060_v26 }
 0x1db   : > { %3343 = vmatpush.bf16.msrb.mxu3 %v4989_v44  ;;  %v8202_v52 = vpop.f32.mrf.mxu2  ;;  %v3208_v53 = vpop.f32.mrf.mxu0 }
 0x1dc   : > { %v2061_v53 = vperm.slane %v8232_v8, 4 }
 0x1de   : > { %3319 = vmatpush.bf16.msrb.mxu1 %v4889_v37  ;;  %v3423_v37 = vperm.slane %v8259_v19, 2  ;;  %v3155_v62 = vadd.f32 %v8074_v46, %v2061_v53 }
 0x1df   : > { %3344 = vmatpush.bf16.msrb.mxu3 %v4941_v47  ;;  %v3360_v47 = vperm.slane %v8243_v10, 3 }
 0x1e2   : > { %3320 = vmatpush.bf16.msrb.mxu1 %v4841_v1  ;;  %v3361_v1 = vperm.slane %v8243_v10, 4 }
 0x1e3   : > { %3345 = vmatpush.bf16.msrb.mxu3 %v4893_v56  ;;  %v3234_v5 = vpop.f32.mrf.mxu2 }
 0x1e6   : > { %3321 = vmatpush.bf16.msrb.mxu1 %v4793_v6  ;;  %v3063_v14 = vpop.f32.mrf.mxu1 }
 0x1e7   : > { %3346 = vmatpush.bf16.msrb.mxu3 %v4845_v2  ;;  %v3064_v51 = vadd.f32 %v3063_v14, %v3051_v11  ;;  %v3424_v2 = vperm.slane %v8259_v19, 3  ;;  %v3362_v11 = vperm.slane %v8243_v10, 5 }
 0x1e9   : > { %3322 = vmatmul.bf16.vlgmr.msrb.gmra.mxu1 %v7749_v9  ;;  %v3381_v54 = vsub.f32 %v3064_v51, %v3357_v12 }
 0x1eb   : > { %3347 = vmatpush.bf16.msrb.mxu3 %v4797_v7  ;;  %v3393_v55 = vmul.f32 1.442695, %v3381_v54  ;;  %v3181_v7 = vadd.f32 %v8100_v59, %v2062_v3 }
 0x1ed   : > { %v3089_v18 = vpop.f32.mrf.mxu3  ;;  %5584 = vpow2.f32 %v3393_v55 }
 0x1ee   : > { %3348 = vmatmul.bf16.vlgmr.msrb.gmra.mxu3 %v7749_v9  ;;  %v3077_v9 = vadd.f32 %v7982_v60, %v2058_v16  ;;  %v3065_v22 = vpop.f32.mrf.mxu1  ;;  %v2059_v60 = vperm.slane %v8232_v8, 2 }
 0x1ef   : > { %v3426_v22 = vperm.slane %v8259_v19, 5 }
 0x1f0   : > { %v3090_v20 = vadd.f32 %v3089_v18, %v3077_v9  ;;  %v3103_v28 = vadd.f32 %v8017_v15, %v2059_v60  ;;  %v3425_v9 = vperm.slane %v8259_v19, 4 }
 0x1f2   : > { %v3382_v23 = vsub.f32 %v3090_v20, %v3358_v49 }
 0x1f3   : > { %v8248_v13 = vpop.f32.mrf.mxu0  ;;  %v5585_v33 = vpop.eup %5584 }
 0x1f4   : > { %v3395_v30 = vmul.f32 1.442695, %v3382_v23  ;;  %v3445_v36 = vmul.f32 %v5585_v33, %v3421_v24 }
 0x1f5   : > { %v3091_v40 = vpop.f32.mrf.mxu3 }
 0x1f6   : > { %5586 = vpow2.f32 %v3395_v30  ;;  %3457 = vst [vmem:[%s8269_s17] sm:$0xff] %v3445_v36  ;;  %v3115_v41 = vpop.f32.mrf.mxu1  ;;  %v3363_v30 = vperm.slane %v8243_v10, 6  ;;  %v2064_v40 = vperm.slane %v8232_v8, 7 }
 0x1f7   : > { %v3116_v44 = vadd.f32 %v3115_v41, %v3103_v28  ;;  %v3364_v41 = vperm.slane %v8243_v10, 7  ;;  %v2054_v10 = vld [vmem:[%s8361_s4 + $0x8] sm:$0xf] }
 0x1f9   : > { %v3383_v42 = vsub.f32 %v3116_v44, %v3359_v21 }
 0x1fb   : > { %v8263_v17 = vpop.f32.mrf.mxu2  ;;  %v3260_v27 = vpop.f32.mrf.mxu0  ;;  %v3397_v15 = vmul.f32 1.442695, %v3383_v42 }
 0x1fc   : > { %v5587_v39 = vpop.eup %5586  ;;  %v2063_v27 = vperm.slane %v8232_v8, 6 }
 0x1fd   : > { %v3446_v43 = vmul.f32 %v5587_v39, %v3422_v38  ;;  %v3141_v34 = vpop.f32.mrf.mxu3  ;;  %5588 = vpow2.f32 %v3397_v15  ;;  %v3233_v38 = vadd.f32 %v8202_v52, %v2064_v40  ;;  %v3428_v15 = vperm.slane %v8259_v19, 7 }
 0x1fe   : > { %v3142_v48 = vadd.f32 %v3141_v34, %v3129_v29  ;;  %v3117_v50 = vpop.f32.mrf.mxu1  ;;  %v3207_v60 = vadd.f32 %v8176_v25, %v2063_v27  ;;  %v3427_v25 = vperm.slane %v8259_v19, 6  ;;  %v2065_v34 = vperm.slane %v2054_v10, 0 }
 0x1ff   : > { %3458 = vst [vmem:[%s8269_s17 + $0x8] sm:$0xff] %v3446_v43 }
 0x200   : > { %v3384_v35 = vsub.f32 %v3142_v48, %v3360_v47  ;;  %v3354_v48 = vld [vmem:[%s8237_s16 + $0x8] sm:$0xf]  ;;  %v3259_v50 = vadd.f32 %v8248_v13, %v2065_v34  ;;  %s3486_s16 = sshll.u32 %s8269_s17, 4  ;;  %s3487_s16 = int_to_ptr.vmem [resolvable:$true] %s3486_s16 }
 0x202   : > { %v3399_v56 = vmul.f32 1.442695, %v3384_v35  ;;  %v3365_v35 = vperm.slane %v3354_v48, 0 }
 0x203   : > { %v3286_v45 = vpop.f32.mrf.mxu2  ;;  %v5589_v57 = vpop.eup %5588 }
 0x204   : > { %5590 = vpow2.f32 %v3399_v56  ;;  %v3447_v58 = vmul.f32 %v5589_v57, %v3423_v37  ;;  %v2066_v56 = vperm.slane %v2054_v10, 1 }
 0x205   : > { %v3143_v32 = vpop.f32.mrf.mxu3 }
 0x206   : > { %3459 = vst [vmem:[%s8269_s17 + $0x10] sm:$0xff] %v3447_v58  ;;  %v3167_v31 = vpop.f32.mrf.mxu1  ;;  %v3285_v19 = vadd.f32 %v8263_v17, %v2066_v56  ;;  %v3366_v32 = vperm.slane %v3354_v48, 1  ;;  %v2067_v17 = vperm.slane %v2054_v10, 2 }
 0x207   : > { %v3168_v61 = vadd.f32 %v3167_v31, %v3155_v62  ;;  %v3418_v62 = vld [vmem:[%s8253_s19 + $0x8] sm:$0xf]  ;;  %s5624_s19 = scalar_lea.hbm %s5623_s18, 96 }
 0x208   : > { %v3429_v3 = vperm.slane %v3418_v62, 0  ;;  %p5625_p12 = scmp.ne.s32.totalorder %s5623_s18, %s5624_s19  ;;  %p5630_p2 = scmp.lt.s32.totalorder %s5628_s30, %s5624_s19 }
 0x209   : > { %v3385_v5 = vsub.f32 %v3168_v61, %v3361_v1 }
 0x20a   : > { %v5591_v4 = vpop.eup %5590  ;;  %p5626_p13 = pnand %p5625_p12, %p5768_p4  ;;  %p5631_p3 = por %p5630_p2, %p5629_p1 }
 0x20b   : > { %v3448_v6 = vmul.f32 %v5591_v4, %v3424_v2  ;;  %v3401_v0 = vmul.f32 1.442695, %v3385_v5 }
 0x20c   : > { %p5627_p0 = pneg %p5626_p13 }
 0x20d   : > { %3460 = vst [vmem:[%s8269_s17 + $0x18] sm:$0xff] %v3448_v6  ;;  %v3193_v46 = vpop.f32.mrf.mxu3  ;;  %5592 = vpow2.f32 %v3401_v0 }
 0x20e   : > { %v3194_v14 = vadd.f32 %v3193_v46, %v3181_v7  ;;  %v3169_v51 = vpop.f32.mrf.mxu1  ;;  %v3430_v7 = vperm.slane %v3418_v62, 1  ;;  %p5632_p5 = pnand %p5631_p3, %p5627_p0 }
 0x210   : > { %v3386_v54 = vsub.f32 %v3194_v14, %v3362_v11  ;;  %v3367_v14 = vperm.slane %v3354_v48, 2 }
 0x212   : > { %v3403_v55 = vmul.f32 1.442695, %v3386_v54  ;;  %v2068_v54 = vperm.slane %v2054_v10, 3 }
 0x213   : > { %v8280_v63 = vpop.f32.mrf.mxu0  ;;  %v5593_v49 = vpop.eup %5592 }
 0x214   : > { %5594 = vpow2.f32 %v3403_v55  ;;  %v3449_v59 = vmul.f32 %v5593_v49, %v3425_v9  ;;  %v3311_v46 = vadd.f32 %v8280_v63, %v2067_v17 }
 0x215   : > { %v3195_v18 = vpop.f32.mrf.mxu3 }
 0x216   : > { %3461 = vst [vmem:[%s8269_s17 + $0x20] sm:$0xff] %v3449_v59  ;;  %v3368_v59 = vperm.slane %v3354_v48, 3 }
 0x21a   : > { %v5595_v23 = vpop.eup %5594 }
 0x21b   : > { %v8289_v12 = vpop.f32.mrf.mxu2  ;;  %v3312_v16 = vpop.f32.mrf.mxu0  ;;  %v3450_v24 = vmul.f32 %v5595_v23, %v3426_v22  ;;  %v3431_v23 = vperm.slane %v3418_v62, 2 }
 0x21c   : > { %v3337_v49 = vadd.f32 %v8289_v12, %v2068_v54  ;;  %v3432_v12 = vperm.slane %v3418_v62, 3 }
 0x21d   : > { %3462 = vst [vmem:[%s8269_s17 + $0x28] sm:$0xff] %v3450_v24 }
 0x223   : > { %v3338_v20 = vpop.f32.mrf.mxu2 }
 0x226   : > { %v3219_v33 = vpop.f32.mrf.mxu1 }
 0x227   : > { %v3220_v36 = vadd.f32 %v3219_v33, %v3207_v60 }
 0x229   : > { %v3387_v28 = vsub.f32 %v3220_v36, %v3363_v30 }
 0x22b   : > { %v3405_v21 = vmul.f32 1.442695, %v3387_v28 }
 0x22d   : > { %5596 = vpow2.f32 %v3405_v21 }
 0x22e   : > { %v3221_v45 = vpop.f32.mrf.mxu1 }
 0x231   : > { %v3245_v26 = vpop.f32.mrf.mxu3 }
 0x232   : > { %v3246_v44 = vadd.f32 %v3245_v26, %v3233_v38 }
 0x233   : > { %v5597_v43 = vpop.eup %5596 }
 0x234   : > { %v3388_v39 = vsub.f32 %v3246_v44, %v3364_v41  ;;  %v3451_v29 = vmul.f32 %v5597_v43, %v3427_v25 }
 0x236   : > { %v3407_v42 = vmul.f32 1.442695, %v3388_v39  ;;  %3463 = vst [vmem:[%s8269_s17 + $0x30] sm:$0xff] %v3451_v29 }
 0x238   : > { %5598 = vpow2.f32 %v3407_v42 }
 0x239   : > { %v3247_v8 = vpop.f32.mrf.mxu3 }
 0x23e   : > { %v5599_v52 = vpop.eup %5598 }
 0x23f   : > { %v3452_v47 = vmul.f32 %v5599_v52, %v3428_v15 }
 0x241   : > { %3464 = vst [vmem:[%s8269_s17 + $0x38] sm:$0xff] %v3452_v47 }
 0x246   : > { %v3271_v37 = vpop.f32.mrf.mxu1 }
 0x247   : > { %v3272_v53 = vadd.f32 %v3271_v37, %v3259_v50 }
 0x249   : > { %v3389_v57 = vsub.f32 %v3272_v53, %v3365_v35 }
 0x24b   : > { %v3409_v58 = vmul.f32 1.442695, %v3389_v57 }
 0x24d   : > { %5600 = vpow2.f32 %v3409_v58 }
 0x24e   : > { %v3273_v31 = vpop.f32.mrf.mxu1 }
 0x251   : > { %v3297_v1 = vpop.f32.mrf.mxu3 }
 0x252   : > { %v3298_v2 = vadd.f32 %v3297_v1, %v3285_v19 }
 0x253   : > { %v5601_v13 = vpop.eup %5600 }
 0x254   : > { %v3390_v61 = vsub.f32 %v3298_v2, %v3366_v32  ;;  %v3453_v5 = vmul.f32 %v5601_v13, %v3429_v3 }
 0x256   : > { %v3411_v4 = vmul.f32 1.442695, %v3390_v61  ;;  %3465 = vst [vmem:[%s8269_s17 + $0x40] sm:$0xff] %v3453_v5 }
 0x258   : > { %5602 = vpow2.f32 %v3411_v4 }
 0x259   : > { %v3299_v6 = vpop.f32.mrf.mxu3 }
 0x25e   : > { %v5603_v0 = vpop.eup %5602 }
 0x25f   : > { %v3454_v11 = vmul.f32 %v5603_v0, %v3430_v7 }
 0x261   : > { %3466 = vst [vmem:[%s8269_s17 + $0x48] sm:$0xff] %v3454_v11 }
 0x266   : > { %v3323_v16 = vpop.f32.mrf.mxu1 }
 0x267   : > { %v3324_v51 = vadd.f32 %v3323_v16, %v3311_v46 }
 0x269   : > { %v3391_v9 = vsub.f32 %v3324_v51, %v3367_v14 }
 0x26b   : > { %v3413_v55 = vmul.f32 1.442695, %v3391_v9 }
 0x26d   : > { %5604 = vpow2.f32 %v3413_v55 }
 0x26e   : > { %v3325_v22 = vpop.f32.mrf.mxu1 }
 0x271   : > { %v3349_v18 = vpop.f32.mrf.mxu3 }
 0x272   : > { %v3350_v20 = vadd.f32 %v3349_v18, %v3337_v49 }
 0x273   : > { %v5605_v27 = vpop.eup %5604 }
 0x274   : > { %v3392_v24 = vsub.f32 %v3350_v20, %v3368_v59  ;;  %v3455_v60 = vmul.f32 %v5605_v27, %v3431_v23 }
 0x276   : > { %v3415_v63 = vmul.f32 1.442695, %v3392_v24  ;;  %3467 = vst [vmem:[%s8269_s17 + $0x50] sm:$0xff] %v3455_v60 }
 0x278   : > { %5606 = vpow2.f32 %v3415_v63 }
 0x279   : > { %v3351_v30 = vpop.f32.mrf.mxu3 }
 0x27e   : > { %v5607_v33 = vpop.eup %5606 }
 0x27f   : > { %v3456_v36 = vmul.f32 %v5607_v33, %v3432_v12 }
 0x281   : > { %3469 = vst.msk [vmem:[%s8269_s17 + $0x58] sm:$0xff] %vm3468_vm0, %v3456_v36 }
 0x282   : > { %5635 = shalt.err (!%p5632_p5)
}
 0x283   : > { %5525 = dma.vmem_to_hbm [thread:$0]  (%p5768_p4), %s3487_s16, 1536, %s3489_s21, %s3471_s27  }
 0x284 PF: > { %p5531_p6 = scmp.ge.s32.totalorder %s5686_s29, 2  ;;  %s3500_s20 = sand.u32 1, %s5666_s24  }
 0x285   : > { %s3501_s17 = scalar_lea.sflag [#allocation3], %s3500_s20 }
 0x286   : > { %p5528_p7 = pnand %p5531_p6, %p5775_p8 }
 0x288   : > { %p5529_p9 = pneg %p5528_p7 }
 0x28a   : > { %5661 = dma.done.wait (%p5529_p9), %s3501_s17, 1536  }
 0x28b   : > { %5663 = vsyncadd (%p5529_p9), %s3501_s17, 4294965760  ;;  %s20_s29 = sadd.s32 1, %s5686_s29   ;;  %s8367_s24 = smov %s5670_s25 }
 0x28c   : > { %p17_p10 = scmp.ge.s32.totalorder %s20_s29, 4   ;;  %s8368_s25 = smov %s5674_s26 }
 0x28d   : > { %s8369_s26 = smov %s5781_s14  ;;  %s8370_s27 = smov %s5682_s28 }
 0x28e   : > { %s8371_s28 = smov %s8373_s9  ;;  %19 = sbr.rel (!%p17_p10) target bundleno = 4 (0x4), region = 89 }
 0x293   :  { %3507 = vsyncpa [#allocation3], 1 }
 0x294   :  { %3509 = vsyncpa [#allocation3 + $0x1], 1 }

</bundles_post_ra>
